<compile_context>
chip_gen: v7x
topology: tpu7x:2x2x1
jax: 0.10.0
libtpu: 0.0.40
codegen_flags: <defaults>
</compile_context>

<pallas_src>
import functools

import jax
import jax.numpy as jnp
from jax import lax
from jax.experimental import pallas as pl
from jax.experimental.pallas import tpu as pltpu

_LANE = 128
_VMEM_LIMIT = 32 * 1024 * 1024


def _round_up(n, m):
    return (n + m - 1) // m * m


def _cdiv(a, b):
    return (a + b - 1) // b


# ---------------------------------------------------------------------------
# Kernel 1: fused conv1 -> ReLU -> 2x2 pool -> conv2 -> ReLU -> 2x2 pool
# (NB samples per grid step; everything stays in VMEM between the two convs).
# ---------------------------------------------------------------------------
def _conv_block_kernel(x_ref, w1_ref, b1_ref, w2_ref, b2_ref, o_ref, *, K):
    NB, H, W = x_ref.shape
    Ho, Wo = H - K + 1, W - K + 1            # 24, 24
    Hp, Wp = Ho // 2, Wo // 2                # 12, 12
    C1P = w1_ref.shape[1] // (2 * Wp)        # 128
    C2P = w2_ref.shape[1]                    # 128
    Ho2, Wo2 = Hp - K + 1, Wp - K + 1        # 8, 8
    Hq, Wq = Ho2 // 2, Wo2 // 2              # 4, 4

    # ----- conv1 as ONE banded MXU matmul: K = 5 * 28 = 140 ------------------
    # LHS row (b, ho) = [x[b, ho+0, :], x[b, ho+1, :], ..., x[b, ho+4, :]]
    x = x_ref[...].astype(jnp.bfloat16)                                   # (NB, 28, 28)
    lhs = jnp.concatenate([x[:, kh:kh + Ho, :] for kh in range(K)],
                          axis=-1)                                        # (NB, 24, K*W)
    lhs = lhs.reshape(NB * Ho, K * W)
    y1 = jnp.dot(lhs, w1_ref[...], preferred_element_type=jnp.float32)    # (NB*24, 2*Wp*C1P)

    # W-pool is free: weight columns are ordered (w-parity, wp, c) so even/odd
    # output columns are lane-tile-aligned halves.
    half = Wp * C1P
    y1 = jnp.maximum(y1[:, :half], y1[:, half:]).astype(jnp.bfloat16)     # (NB*24, Wp*C1P)
    y1 = y1.reshape(NB, Ho, Wp, C1P)
    # H-pool: major-dim split (free) + VPU max.
    y1 = y1.reshape(NB, Hp, 2, Wp, C1P)
    y1 = jnp.maximum(y1[:, :, 0], y1[:, :, 1])                            # (NB, 12, 12, C1P)
    # Bias + ReLU commute with max-pool; do them on the 4x smaller tensor.
    p1 = jnp.maximum(y1 + b1_ref[...].astype(jnp.bfloat16), 0.0)          # bf16

    # ----- conv2 as ONE big-K GEMM over an in-kernel bf16 im2col -------------
    # chunk (kh, kw) occupies lanes [(kh*K+kw)*C1P : +C1P]  (128-aligned concat).
    chunks = []
    for kh in range(K):
        for kw in range(K):
            chunks.append(
                p1[:, kh:kh + Ho2, kw:kw + Wo2, :].reshape(NB * Ho2 * Wo2, C1P))
    i2c = jnp.concatenate(chunks, axis=-1)                                # (NB*64, 25*C1P)
    y2 = jnp.dot(i2c, w2_ref[...], preferred_element_type=jnp.float32)    # (NB*64, C2P)

    # bias + ReLU + 2x2 pool (pool first: commutes), emit flattened (h, w, c).
    y2 = y2.reshape(NB, Ho2, Wo2, C2P)
    y2 = y2.reshape(NB, Hq, 2, Wo2, C2P)
    y2 = jnp.maximum(y2[:, :, 0], y2[:, :, 1])                            # (NB, 4, 8, C2P)
    y2 = y2.reshape(NB, Hq, Wq, 2, C2P)
    y2 = jnp.maximum(y2[:, :, :, 0], y2[:, :, :, 1])                      # (NB, 4, 4, C2P)
    y2 = jnp.maximum(y2 + b2_ref[...], 0.0)
    o_ref[...] = y2.reshape(NB, Hq * Wq, C2P).astype(o_ref.dtype)


def conv_block(x_bhw, w1g, b1, w2g, b2, *, K=5, nb_max=8):
    """x_bhw: (B, 28, 28) f32 -> (B, 16, C2P) bf16 pooled conv2 features."""
    B, H, W = x_bhw.shape
    NB = min(nb_max, max(1, _cdiv(B, 2)))          # >=2 grid steps when possible
    Bp = _round_up(B, NB)
    if Bp != B:
        x_bhw = jnp.pad(x_bhw, ((0, Bp - B), (0, 0), (0, 0)))
    Hq = Wq = (((H - K + 1) // 2) - K + 1) // 2    # 4
    C2P = w2g.shape[1]
    out = pl.pallas_call(
        functools.partial(_conv_block_kernel, K=K),
        out_shape=jax.ShapeDtypeStruct((Bp, Hq * Wq, C2P), jnp.bfloat16),
        grid=(Bp // NB,),
        in_specs=[
            pl.BlockSpec((NB, H, W), lambda i: (i, 0, 0)),
            pl.BlockSpec(w1g.shape, lambda i: (0, 0)),
            pl.BlockSpec(b1.shape, lambda i: (0, 0)),
            pl.BlockSpec(w2g.shape, lambda i: (0, 0)),
            pl.BlockSpec(b2.shape, lambda i: (0, 0)),
        ],
        out_specs=pl.BlockSpec((NB, Hq * Wq, C2P), lambda i: (i, 0, 0)),
        compiler_params=pltpu.CompilerParams(
            dimension_semantics=("parallel",),
            vmem_limit_bytes=_VMEM_LIMIT),
    )(x_bhw.astype(jnp.float32), w1g, b1, w2g, b2)
    return out[:B]


# ---------------------------------------------------------------------------
# Kernel 2: fused fc1(+ReLU) -> fc2(+ReLU) -> fc3, intermediates stay in VMEM.
# ---------------------------------------------------------------------------
def _fc_stack_kernel(x_ref, w1_ref, b1_ref, w2_ref, b2_ref, w3_ref, b3_ref, o_ref):
    h = jnp.dot(x_ref[...], w1_ref[...], preferred_element_type=jnp.float32)
    h = jnp.maximum(h + b1_ref[...], 0.0).astype(jnp.bfloat16)
    h = jnp.dot(h, w2_ref[...], preferred_element_type=jnp.float32)
    h = jnp.maximum(h + b2_ref[...], 0.0).astype(jnp.bfloat16)
    h = jnp.dot(h, w3_ref[...], preferred_element_type=jnp.float32)
    o_ref[...] = (h + b3_ref[...]).astype(o_ref.dtype)


def fc_stack(x, w1, b1, w2, b2, w3, b3, *, block_m=256):
    B, Kin = x.shape
    # >= 2 grid steps when possible so "parallel" can shard across v7x's 2 TCs.
    tm = min(block_m, max(8, _round_up(_cdiv(B, 2), 8)))
    Bp = _round_up(B, tm)
    if Bp != B:
        x = jnp.pad(x, ((0, Bp - B), (0, 0)))
    N1, N2, N3 = w1.shape[1], w2.shape[1], w3.shape[1]
    out = pl.pallas_call(
        _fc_stack_kernel,
        out_shape=jax.ShapeDtypeStruct((Bp, N3), jnp.float32),
        grid=(Bp // tm,),
        in_specs=[
            pl.BlockSpec((tm, Kin), lambda i: (i, 0)),
            pl.BlockSpec((Kin, N1), lambda i: (0, 0)),
            pl.BlockSpec((1, N1), lambda i: (0, 0)),
            pl.BlockSpec((N1, N2), lambda i: (0, 0)),
            pl.BlockSpec((1, N2), lambda i: (0, 0)),
            pl.BlockSpec((N2, N3), lambda i: (0, 0)),
            pl.BlockSpec((1, N3), lambda i: (0, 0)),
        ],
        out_specs=pl.BlockSpec((tm, N3), lambda i: (i, 0)),
        compiler_params=pltpu.CompilerParams(
            dimension_semantics=("parallel",),
            vmem_limit_bytes=_VMEM_LIMIT),
    )(x, w1, b1, w2, b2, w3, b3)
    return out[:B]


# ---------------------------------------------------------------------------
# Parameter setup (PyTorch layouts) + one-time conversion to TPU GEMM layouts.
# ---------------------------------------------------------------------------
def init_params(key, num_classes=10, over_factor=5):
    c1 = int(6 * over_factor)
    c2 = int(16 * over_factor)
    f1_in = int(4 * 4 * 16 * over_factor)
    f1_out = int(120 * over_factor)
    f2_out = int(84 * over_factor)

    def uinit(k, shape, fan_in):
        bound = 1.0 / jnp.sqrt(jnp.float32(fan_in))
        return jax.random.uniform(k, shape, jnp.float32, -bound, bound)

    ks = jax.random.split(key, 10)
    return {
        "W1": uinit(ks[0], (c1, 1, 5, 5), 1 * 5 * 5),
        "b1": uinit(ks[1], (c1,), 1 * 5 * 5),
        "W2": uinit(ks[2], (c2, c1, 5, 5), c1 * 5 * 5),
        "b2": uinit(ks[3], (c2,), c1 * 5 * 5),
        "Wf1": uinit(ks[4], (f1_out, f1_in), f1_in),
        "bf1": uinit(ks[5], (f1_out,), f1_in),
        "Wf2": uinit(ks[6], (f2_out, f1_out), f1_out),
        "bf2": uinit(ks[7], (f2_out,), f1_out),
        "Wf3": uinit(ks[8], (num_classes, f2_out), f2_out),
        "bf3": uinit(ks[9], (num_classes,), f2_out),
    }


def prepare_params(p, *, num_classes=10, H=28, W=28):
    """Convert PyTorch-layout weights to padded GEMM-ready TPU weights (done once)."""
    c1 = p["W1"].shape[0]
    c2 = p["W2"].shape[0]
    K = p["W1"].shape[2]
    C1P = _round_up(c1, _LANE)
    C2P = _round_up(c2, _LANE)
    Ho, Wo = H - K + 1, W - K + 1              # 24, 24
    Wp = Wo // 2                               # 12

    # conv1: banded GEMM weight (K*W, 2*Wp*C1P).
    #   rows   = (kh, input column i)
    #   cols   = (w-parity sw, wp, c)  with wo = 2*wp + sw
    #   value  = w1[kh, i - wo, c] when 0 <= i - wo < K, else 0.
    w1k = jnp.transpose(p["W1"][:, 0, :, :], (1, 2, 0))                  # (K, K, c1)
    w1k = jnp.pad(w1k, ((0, 0), (0, 0), (0, C1P - c1)))                  # (K, K, C1P)
    i_idx = jnp.arange(W)[:, None]
    wo_idx = jnp.arange(Wo)[None, :]
    kw_idx = i_idx - wo_idx                                              # (W, Wo)
    valid = ((kw_idx >= 0) & (kw_idx < K)).astype(jnp.float32)
    kw_c = jnp.clip(kw_idx, 0, K - 1)
    band = w1k[:, kw_c, :] * valid[None, :, :, None]                     # (K, W, Wo, C1P)
    wo_order = (2 * jnp.arange(Wp)[None, :] + jnp.arange(2)[:, None]).reshape(-1)
    band = band[:, :, wo_order, :]                                       # cols -> (sw, wp, c)
    w1g = band.reshape(K * W, 2 * Wp * C1P).astype(jnp.bfloat16)         # (140, 3072)
    b1 = jnp.pad(p["b1"], (0, C1P - c1)).reshape(1, C1P).astype(jnp.float32)

    # conv2: (c2, c1, 5, 5) -> (25*C1P, C2P), row order (kh, kw, ci).
    w2 = jnp.transpose(p["W2"], (2, 3, 1, 0))                            # (K, K, c1, c2)
    w2 = jnp.pad(w2, ((0, 0), (0, 0), (0, C1P - c1), (0, C2P - c2)))
    w2g = w2.reshape(K * K * C1P, C2P).astype(jnp.bfloat16)
    b2 = jnp.pad(p["b2"], (0, C2P - c2)).reshape(1, C2P).astype(jnp.float32)

    # fc1: PyTorch flatten is NCHW (c, h, w); our features are (h, w, c_padded).
    f1_out, f1_in = p["Wf1"].shape
    hw = 4
    assert f1_in == c2 * hw * hw
    wf1 = p["Wf1"].reshape(f1_out, c2, hw, hw)
    wf1 = jnp.transpose(wf1, (0, 2, 3, 1))                               # (f1_out, h, w, c2)
    wf1 = jnp.pad(wf1, ((0, 0), (0, 0), (0, 0), (0, C2P - c2)))
    wf1 = wf1.reshape(f1_out, hw * hw * C2P).T                           # (hw*hw*C2P, f1_out)
    F1P = _round_up(f1_out, _LANE)
    wf1 = jnp.pad(wf1, ((0, 0), (0, F1P - f1_out))).astype(jnp.bfloat16)
    bf1 = jnp.pad(p["bf1"], (0, F1P - f1_out)).reshape(1, F1P).astype(jnp.float32)

    f2_out = p["Wf2"].shape[0]
    F2P = _round_up(f2_out, _LANE)
    wf2 = jnp.pad(p["Wf2"].T, ((0, F1P - f1_out), (0, F2P - f2_out))).astype(jnp.bfloat16)
    bf2 = jnp.pad(p["bf2"], (0, F2P - f2_out)).reshape(1, F2P).astype(jnp.float32)

    NCP = _round_up(num_classes, _LANE)
    wf3 = jnp.pad(p["Wf3"].T, ((0, F2P - f2_out), (0, NCP - num_classes))).astype(jnp.bfloat16)
    bf3 = jnp.pad(p["bf3"], (0, NCP - num_classes)).reshape(1, NCP).astype(jnp.float32)

    return {"w1": w1g, "b1": b1, "w2": w2g, "b2": b2,
            "wf1": wf1, "bf1": bf1, "wf2": wf2, "bf2": bf2,
            "wf3": wf3, "bf3": bf3}


# ---------------------------------------------------------------------------
# Forward pass (matches OverLeNet5.forward semantics)
# ---------------------------------------------------------------------------
def over_lenet5_forward(params, x_nchw, *, num_classes=10):
    B = x_nchw.shape[0]
    x = x_nchw[:, 0, :, :].astype(jnp.float32)                           # (B, 28, 28)
    feat = conv_block(x, params["w1"], params["b1"],
                      params["w2"], params["b2"])                        # (B, 16, C2P) bf16
    feat = feat.reshape(B, -1)                                           # free bitcast reshape
    logits = fc_stack(feat, params["wf1"], params["bf1"],
                      params["wf2"], params["bf2"],
                      params["wf3"], params["bf3"])                      # (B, NCP) f32
    return logits[:, :num_classes]


# ---------------------------------------------------------------------------
# Pure-XLA reference (PyTorch-exact layouts) used only for the correctness check.
# ---------------------------------------------------------------------------
def _reference_forward(p, x_nchw):
    y = lax.conv_general_dilated(x_nchw, p["W1"], (1, 1), "VALID",
                                 dimension_numbers=("NCHW", "OIHW", "NCHW"))
    y = jax.nn.relu(y + p["b1"][None, :, None, None])
    y = lax.reduce_window(y, -jnp.inf, lax.max, (1, 1, 2, 2), (1, 1, 2, 2), "VALID")
    y = lax.conv_general_dilated(y, p["W2"], (1, 1), "VALID",
                                 dimension_numbers=("NCHW", "OIHW", "NCHW"))
    y = jax.nn.relu(y + p["b2"][None, :, None, None])
    y = lax.reduce_window(y, -jnp.inf, lax.max, (1, 1, 2, 2), (1, 1, 2, 2), "VALID")
    y = y.reshape(y.shape[0], -1)
    y = jax.nn.relu(y @ p["Wf1"].T + p["bf1"])
    y = jax.nn.relu(y @ p["Wf2"].T + p["bf2"])
    return y @ p["Wf3"].T + p["bf3"]


# ---------------------------------------------------------------------------
if __name__ == "__main__":
    key = jax.random.PRNGKey(0)
    kp, kx = jax.random.split(key)

    raw = init_params(kp, num_classes=10, over_factor=5)
    params = prepare_params(raw, num_classes=10)
    # MNIST-shaped input (the 4*4*16*of flatten in fc1 pins spatial size to 28x28).
    x = jax.random.normal(kx, (2, 1, 28, 28), dtype=jnp.float32)

    fwd = jax.jit(functools.partial(over_lenet5_forward, num_classes=10))
    out = jax.block_until_ready(fwd(params, x))

    assert out.shape == (2, 10), out.shape
    assert out.dtype == jnp.float32, out.dtype

    # Loose tolerance: kernel uses bf16 weights/activations with f32 accumulation.
    ref = _reference_forward(raw, x)
    max_err = float(jnp.max(jnp.abs(out - ref)))
    assert bool(jnp.allclose(out, ref, rtol=0.12, atol=0.08)), max_err

    print("KERNEL_OK")
</pallas_src>

<mosaic_0001>
module attributes {stable_mosaic.version = 11 : i64} {
  func.func @_conv_block_kernel(%arg0: i32, %arg1: memref<1x28x28xf32, #tpu.memory_space<vmem>>, %arg2: memref<140x3072xbf16, #tpu.memory_space<vmem>>, %arg3: memref<1x128xf32, #tpu.memory_space<vmem>>, %arg4: memref<3200x128xbf16, #tpu.memory_space<vmem>>, %arg5: memref<1x128xf32, #tpu.memory_space<vmem>>, %arg6: memref<1x16x128xbf16, #tpu.memory_space<vmem>>) attributes {dimension_semantics = [#tpu.dimension_semantics<parallel>], iteration_bounds = array<i64: 2>, scalar_prefetch = 0 : i64, scratch_operands = 0 : i64, tpu.core_type = #tpu.core_type<tc>, window_params = [{transform_indices = @transform_0, window_bounds = array<i64: 1, 28, 28>}, {pipeline_mode = #tpu.pipeline_mode<synchronous>, transform_indices = @transform_1, window_bounds = array<i64: 140, 3072>}, {pipeline_mode = #tpu.pipeline_mode<synchronous>, transform_indices = @transform_2, window_bounds = array<i64: 1, 128>}, {pipeline_mode = #tpu.pipeline_mode<synchronous>, transform_indices = @transform_3, window_bounds = array<i64: 3200, 128>}, {pipeline_mode = #tpu.pipeline_mode<synchronous>, transform_indices = @transform_4, window_bounds = array<i64: 1, 128>}, {transform_indices = @transform_5, window_bounds = array<i64: 1, 16, 128>}]} {
    %c0 = arith.constant 0 : index
    %c0_0 = arith.constant 0 : index
    %c0_1 = arith.constant 0 : index
    %0 = vector.load %arg1[%c0, %c0_0, %c0_1] : memref<1x28x28xf32, #tpu.memory_space<vmem>>, vector<1x28x28xf32>
    %1 = arith.truncf %0 : vector<1x28x28xf32> to vector<1x28x28xbf16>
    %2 = vector.extract_strided_slice %1 {offsets = [0, 0, 0], sizes = [1, 24, 28], strides = [1, 1, 1]} : vector<1x28x28xbf16> to vector<1x24x28xbf16>
    %3 = vector.extract_strided_slice %1 {offsets = [0, 1, 0], sizes = [1, 24, 28], strides = [1, 1, 1]} : vector<1x28x28xbf16> to vector<1x24x28xbf16>
    %4 = vector.extract_strided_slice %1 {offsets = [0, 2, 0], sizes = [1, 24, 28], strides = [1, 1, 1]} : vector<1x28x28xbf16> to vector<1x24x28xbf16>
    %5 = vector.extract_strided_slice %1 {offsets = [0, 3, 0], sizes = [1, 24, 28], strides = [1, 1, 1]} : vector<1x28x28xbf16> to vector<1x24x28xbf16>
    %6 = vector.extract_strided_slice %1 {offsets = [0, 4, 0], sizes = [1, 24, 28], strides = [1, 1, 1]} : vector<1x28x28xbf16> to vector<1x24x28xbf16>
    %7 = tpu.concatenate %2, %3, %4, %5, %6 in 2 : vector<1x24x28xbf16>, vector<1x24x28xbf16>, vector<1x24x28xbf16>, vector<1x24x28xbf16>, vector<1x24x28xbf16> -> vector<1x24x140xbf16>
    %8 = vector.shape_cast %7 : vector<1x24x140xbf16> to vector<24x140xbf16>
    %c0_2 = arith.constant 0 : index
    %c0_3 = arith.constant 0 : index
    %9 = vector.load %arg2[%c0_2, %c0_3] : memref<140x3072xbf16, #tpu.memory_space<vmem>>, vector<140x3072xbf16>
    %cst = arith.constant dense<0.000000e+00> : vector<24x3072xf32>
    %10 = tpu.matmul %8, %9, %cst {dimension_numbers = #tpu.dot_dimension_numbers<[1], [0], [0], [1], [0, 0, 1, 1], [], []>} : vector<24x140xbf16>, vector<140x3072xbf16>, vector<24x3072xf32> -> vector<24x3072xf32>
    %11 = vector.extract_strided_slice %10 {offsets = [0, 0], sizes = [24, 1536], strides = [1, 1]} : vector<24x3072xf32> to vector<24x1536xf32>
    %12 = vector.extract_strided_slice %10 {offsets = [0, 1536], sizes = [24, 1536], strides = [1, 1]} : vector<24x3072xf32> to vector<24x1536xf32>
    %13 = arith.maximumf %11, %12 : vector<24x1536xf32>
    %14 = arith.truncf %13 : vector<24x1536xf32> to vector<24x1536xbf16>
    %15 = vector.shape_cast %14 : vector<24x1536xbf16> to vector<1x24x12x128xbf16>
    %16 = vector.shape_cast %15 : vector<1x24x12x128xbf16> to vector<1x12x2x12x128xbf16>
    %17 = vector.extract_strided_slice %16 {offsets = [0, 0, 0, 0, 0], sizes = [1, 12, 1, 12, 128], strides = [1, 1, 1, 1, 1]} : vector<1x12x2x12x128xbf16> to vector<1x12x1x12x128xbf16>
    %18 = vector.shape_cast %17 : vector<1x12x1x12x128xbf16> to vector<1x12x12x128xbf16>
    %19 = vector.extract_strided_slice %16 {offsets = [0, 0, 1, 0, 0], sizes = [1, 12, 1, 12, 128], strides = [1, 1, 1, 1, 1]} : vector<1x12x2x12x128xbf16> to vector<1x12x1x12x128xbf16>
    %20 = vector.shape_cast %19 : vector<1x12x1x12x128xbf16> to vector<1x12x12x128xbf16>
    %21 = arith.maximumf %18, %20 : vector<1x12x12x128xbf16>
    %c0_4 = arith.constant 0 : index
    %c0_5 = arith.constant 0 : index
    %22 = vector.load %arg3[%c0_4, %c0_5] : memref<1x128xf32, #tpu.memory_space<vmem>>, vector<1x128xf32>
    %23 = arith.truncf %22 : vector<1x128xf32> to vector<1x128xbf16>
    %24 = vector.shape_cast %23 : vector<1x128xbf16> to vector<1x1x1x128xbf16>
    %25 = vector.broadcast %24 : vector<1x1x1x128xbf16> to vector<1x12x12x128xbf16>
    %26 = arith.addf %21, %25 : vector<1x12x12x128xbf16>
    %cst_6 = arith.constant 0.000000e+00 : bf16
    %27 = vector.broadcast %cst_6 : bf16 to vector<1x12x12x128xbf16>
    %28 = arith.maximumf %26, %27 : vector<1x12x12x128xbf16>
    %29 = vector.extract_strided_slice %28 {offsets = [0, 0, 0, 0], sizes = [1, 8, 8, 128], strides = [1, 1, 1, 1]} : vector<1x12x12x128xbf16> to vector<1x8x8x128xbf16>
    %30 = vector.shape_cast %29 : vector<1x8x8x128xbf16> to vector<64x128xbf16>
    %31 = vector.extract_strided_slice %28 {offsets = [0, 0, 1, 0], sizes = [1, 8, 8, 128], strides = [1, 1, 1, 1]} : vector<1x12x12x128xbf16> to vector<1x8x8x128xbf16>
    %32 = vector.shape_cast %31 : vector<1x8x8x128xbf16> to vector<64x128xbf16>
    %33 = vector.extract_strided_slice %28 {offsets = [0, 0, 2, 0], sizes = [1, 8, 8, 128], strides = [1, 1, 1, 1]} : vector<1x12x12x128xbf16> to vector<1x8x8x128xbf16>
    %34 = vector.shape_cast %33 : vector<1x8x8x128xbf16> to vector<64x128xbf16>
    %35 = vector.extract_strided_slice %28 {offsets = [0, 0, 3, 0], sizes = [1, 8, 8, 128], strides = [1, 1, 1, 1]} : vector<1x12x12x128xbf16> to vector<1x8x8x128xbf16>
    %36 = vector.shape_cast %35 : vector<1x8x8x128xbf16> to vector<64x128xbf16>
    %37 = vector.extract_strided_slice %28 {offsets = [0, 0, 4, 0], sizes = [1, 8, 8, 128], strides = [1, 1, 1, 1]} : vector<1x12x12x128xbf16> to vector<1x8x8x128xbf16>
    %38 = vector.shape_cast %37 : vector<1x8x8x128xbf16> to vector<64x128xbf16>
    %39 = vector.extract_strided_slice %28 {offsets = [0, 1, 0, 0], sizes = [1, 8, 8, 128], strides = [1, 1, 1, 1]} : vector<1x12x12x128xbf16> to vector<1x8x8x128xbf16>
    %40 = vector.shape_cast %39 : vector<1x8x8x128xbf16> to vector<64x128xbf16>
    %41 = vector.extract_strided_slice %28 {offsets = [0, 1, 1, 0], sizes = [1, 8, 8, 128], strides = [1, 1, 1, 1]} : vector<1x12x12x128xbf16> to vector<1x8x8x128xbf16>
    %42 = vector.shape_cast %41 : vector<1x8x8x128xbf16> to vector<64x128xbf16>
    %43 = vector.extract_strided_slice %28 {offsets = [0, 1, 2, 0], sizes = [1, 8, 8, 128], strides = [1, 1, 1, 1]} : vector<1x12x12x128xbf16> to vector<1x8x8x128xbf16>
    %44 = vector.shape_cast %43 : vector<1x8x8x128xbf16> to vector<64x128xbf16>
    %45 = vector.extract_strided_slice %28 {offsets = [0, 1, 3, 0], sizes = [1, 8, 8, 128], strides = [1, 1, 1, 1]} : vector<1x12x12x128xbf16> to vector<1x8x8x128xbf16>
    %46 = vector.shape_cast %45 : vector<1x8x8x128xbf16> to vector<64x128xbf16>
    %47 = vector.extract_strided_slice %28 {offsets = [0, 1, 4, 0], sizes = [1, 8, 8, 128], strides = [1, 1, 1, 1]} : vector<1x12x12x128xbf16> to vector<1x8x8x128xbf16>
    %48 = vector.shape_cast %47 : vector<1x8x8x128xbf16> to vector<64x128xbf16>
    %49 = vector.extract_strided_slice %28 {offsets = [0, 2, 0, 0], sizes = [1, 8, 8, 128], strides = [1, 1, 1, 1]} : vector<1x12x12x128xbf16> to vector<1x8x8x128xbf16>
    %50 = vector.shape_cast %49 : vector<1x8x8x128xbf16> to vector<64x128xbf16>
    %51 = vector.extract_strided_slice %28 {offsets = [0, 2, 1, 0], sizes = [1, 8, 8, 128], strides = [1, 1, 1, 1]} : vector<1x12x12x128xbf16> to vector<1x8x8x128xbf16>
    %52 = vector.shape_cast %51 : vector<1x8x8x128xbf16> to vector<64x128xbf16>
    %53 = vector.extract_strided_slice %28 {offsets = [0, 2, 2, 0], sizes = [1, 8, 8, 128], strides = [1, 1, 1, 1]} : vector<1x12x12x128xbf16> to vector<1x8x8x128xbf16>
    %54 = vector.shape_cast %53 : vector<1x8x8x128xbf16> to vector<64x128xbf16>
    %55 = vector.extract_strided_slice %28 {offsets = [0, 2, 3, 0], sizes = [1, 8, 8, 128], strides = [1, 1, 1, 1]} : vector<1x12x12x128xbf16> to vector<1x8x8x128xbf16>
    %56 = vector.shape_cast %55 : vector<1x8x8x128xbf16> to vector<64x128xbf16>
    %57 = vector.extract_strided_slice %28 {offsets = [0, 2, 4, 0], sizes = [1, 8, 8, 128], strides = [1, 1, 1, 1]} : vector<1x12x12x128xbf16> to vector<1x8x8x128xbf16>
    %58 = vector.shape_cast %57 : vector<1x8x8x128xbf16> to vector<64x128xbf16>
    %59 = vector.extract_strided_slice %28 {offsets = [0, 3, 0, 0], sizes = [1, 8, 8, 128], strides = [1, 1, 1, 1]} : vector<1x12x12x128xbf16> to vector<1x8x8x128xbf16>
    %60 = vector.shape_cast %59 : vector<1x8x8x128xbf16> to vector<64x128xbf16>
    %61 = vector.extract_strided_slice %28 {offsets = [0, 3, 1, 0], sizes = [1, 8, 8, 128], strides = [1, 1, 1, 1]} : vector<1x12x12x128xbf16> to vector<1x8x8x128xbf16>
    %62 = vector.shape_cast %61 : vector<1x8x8x128xbf16> to vector<64x128xbf16>
    %63 = vector.extract_strided_slice %28 {offsets = [0, 3, 2, 0], sizes = [1, 8, 8, 128], strides = [1, 1, 1, 1]} : vector<1x12x12x128xbf16> to vector<1x8x8x128xbf16>
    %64 = vector.shape_cast %63 : vector<1x8x8x128xbf16> to vector<64x128xbf16>
    %65 = vector.extract_strided_slice %28 {offsets = [0, 3, 3, 0], sizes = [1, 8, 8, 128], strides = [1, 1, 1, 1]} : vector<1x12x12x128xbf16> to vector<1x8x8x128xbf16>
    %66 = vector.shape_cast %65 : vector<1x8x8x128xbf16> to vector<64x128xbf16>
    %67 = vector.extract_strided_slice %28 {offsets = [0, 3, 4, 0], sizes = [1, 8, 8, 128], strides = [1, 1, 1, 1]} : vector<1x12x12x128xbf16> to vector<1x8x8x128xbf16>
    %68 = vector.shape_cast %67 : vector<1x8x8x128xbf16> to vector<64x128xbf16>
    %69 = vector.extract_strided_slice %28 {offsets = [0, 4, 0, 0], sizes = [1, 8, 8, 128], strides = [1, 1, 1, 1]} : vector<1x12x12x128xbf16> to vector<1x8x8x128xbf16>
    %70 = vector.shape_cast %69 : vector<1x8x8x128xbf16> to vector<64x128xbf16>
    %71 = vector.extract_strided_slice %28 {offsets = [0, 4, 1, 0], sizes = [1, 8, 8, 128], strides = [1, 1, 1, 1]} : vector<1x12x12x128xbf16> to vector<1x8x8x128xbf16>
    %72 = vector.shape_cast %71 : vector<1x8x8x128xbf16> to vector<64x128xbf16>
    %73 = vector.extract_strided_slice %28 {offsets = [0, 4, 2, 0], sizes = [1, 8, 8, 128], strides = [1, 1, 1, 1]} : vector<1x12x12x128xbf16> to vector<1x8x8x128xbf16>
    %74 = vector.shape_cast %73 : vector<1x8x8x128xbf16> to vector<64x128xbf16>
    %75 = vector.extract_strided_slice %28 {offsets = [0, 4, 3, 0], sizes = [1, 8, 8, 128], strides = [1, 1, 1, 1]} : vector<1x12x12x128xbf16> to vector<1x8x8x128xbf16>
    %76 = vector.shape_cast %75 : vector<1x8x8x128xbf16> to vector<64x128xbf16>
    %77 = vector.extract_strided_slice %28 {offsets = [0, 4, 4, 0], sizes = [1, 8, 8, 128], strides = [1, 1, 1, 1]} : vector<1x12x12x128xbf16> to vector<1x8x8x128xbf16>
    %78 = vector.shape_cast %77 : vector<1x8x8x128xbf16> to vector<64x128xbf16>
    %79 = tpu.concatenate %30, %32, %34, %36, %38, %40, %42, %44, %46, %48, %50, %52, %54, %56, %58, %60 in 1 : vector<64x128xbf16>, vector<64x128xbf16>, vector<64x128xbf16>, vector<64x128xbf16>, vector<64x128xbf16>, vector<64x128xbf16>, vector<64x128xbf16>, vector<64x128xbf16>, vector<64x128xbf16>, vector<64x128xbf16>, vector<64x128xbf16>, vector<64x128xbf16>, vector<64x128xbf16>, vector<64x128xbf16>, vector<64x128xbf16>, vector<64x128xbf16> -> vector<64x2048xbf16>
    %80 = tpu.concatenate %62, %64, %66, %68, %70, %72, %74, %76, %78 in 1 : vector<64x128xbf16>, vector<64x128xbf16>, vector<64x128xbf16>, vector<64x128xbf16>, vector<64x128xbf16>, vector<64x128xbf16>, vector<64x128xbf16>, vector<64x128xbf16>, vector<64x128xbf16> -> vector<64x1152xbf16>
    %81 = tpu.concatenate %79, %80 in 1 : vector<64x2048xbf16>, vector<64x1152xbf16> -> vector<64x3200xbf16>
    %c0_7 = arith.constant 0 : index
    %c0_8 = arith.constant 0 : index
    %82 = vector.load %arg4[%c0_7, %c0_8] : memref<3200x128xbf16, #tpu.memory_space<vmem>>, vector<3200x128xbf16>
    %cst_9 = arith.constant dense<0.000000e+00> : vector<64x128xf32>
    %83 = tpu.matmul %81, %82, %cst_9 {dimension_numbers = #tpu.dot_dimension_numbers<[1], [0], [0], [1], [0, 0, 1, 1], [], []>} : vector<64x3200xbf16>, vector<3200x128xbf16>, vector<64x128xf32> -> vector<64x128xf32>
    %84 = vector.shape_cast %83 : vector<64x128xf32> to vector<1x8x8x128xf32>
    %85 = vector.shape_cast %84 : vector<1x8x8x128xf32> to vector<1x4x2x8x128xf32>
    %86 = vector.extract_strided_slice %85 {offsets = [0, 0, 0, 0, 0], sizes = [1, 4, 1, 8, 128], strides = [1, 1, 1, 1, 1]} : vector<1x4x2x8x128xf32> to vector<1x4x1x8x128xf32>
    %87 = vector.shape_cast %86 : vector<1x4x1x8x128xf32> to vector<1x4x8x128xf32>
    %88 = vector.extract_strided_slice %85 {offsets = [0, 0, 1, 0, 0], sizes = [1, 4, 1, 8, 128], strides = [1, 1, 1, 1, 1]} : vector<1x4x2x8x128xf32> to vector<1x4x1x8x128xf32>
    %89 = vector.shape_cast %88 : vector<1x4x1x8x128xf32> to vector<1x4x8x128xf32>
    %90 = arith.maximumf %87, %89 : vector<1x4x8x128xf32>
    %91 = vector.shape_cast %90 : vector<1x4x8x128xf32> to vector<1x4x4x2x128xf32>
    %92 = vector.extract_strided_slice %91 {offsets = [0, 0, 0, 0, 0], sizes = [1, 4, 4, 1, 128], strides = [1, 1, 1, 1, 1]} : vector<1x4x4x2x128xf32> to vector<1x4x4x1x128xf32>
    %93 = vector.shape_cast %92 : vector<1x4x4x1x128xf32> to vector<1x4x4x128xf32>
    %94 = vector.extract_strided_slice %91 {offsets = [0, 0, 0, 1, 0], sizes = [1, 4, 4, 1, 128], strides = [1, 1, 1, 1, 1]} : vector<1x4x4x2x128xf32> to vector<1x4x4x1x128xf32>
    %95 = vector.shape_cast %94 : vector<1x4x4x1x128xf32> to vector<1x4x4x128xf32>
    %96 = arith.maximumf %93, %95 : vector<1x4x4x128xf32>
    %c0_10 = arith.constant 0 : index
    %c0_11 = arith.constant 0 : index
    %97 = vector.load %arg5[%c0_10, %c0_11] : memref<1x128xf32, #tpu.memory_space<vmem>>, vector<1x128xf32>
    %98 = vector.shape_cast %97 : vector<1x128xf32> to vector<1x1x1x128xf32>
    %99 = vector.broadcast %98 : vector<1x1x1x128xf32> to vector<1x4x4x128xf32>
    %100 = arith.addf %96, %99 : vector<1x4x4x128xf32>
    %cst_12 = arith.constant 0.000000e+00 : f32
    %101 = vector.broadcast %cst_12 : f32 to vector<1x4x4x128xf32>
    %102 = arith.maximumf %100, %101 : vector<1x4x4x128xf32>
    %103 = vector.shape_cast %102 : vector<1x4x4x128xf32> to vector<1x16x128xf32>
    %104 = arith.truncf %103 : vector<1x16x128xf32> to vector<1x16x128xbf16>
    %c0_13 = arith.constant 0 : index
    %c0_14 = arith.constant 0 : index
    %c0_15 = arith.constant 0 : index
    %105 = vector.load %arg6[%c0_13, %c0_14, %c0_15] : memref<1x16x128xbf16, #tpu.memory_space<vmem>>, vector<1x16x128xbf16>
    tpu.vector_store %arg6[%c0_13, %c0_14, %c0_15], %104 {strides = array<i32>} : memref<1x16x128xbf16, #tpu.memory_space<vmem>>, vector<1x16x128xbf16>,
    return
  }
  func.func @transform_0(%arg0: i32) -> (i32, i32, i32) {
    %c0_i32 = arith.constant 0 : i32
    %c0_i32_0 = arith.constant 0 : i32
    %c0_i32_1 = arith.constant 0 : i32
    return %arg0, %c0_i32, %c0_i32_0 : i32, i32, i32
  }
  func.func @transform_1(%arg0: i32) -> (i32, i32) {
    %c0_i32 = arith.constant 0 : i32
    %c0_i32_0 = arith.constant 0 : i32
    %c0_i32_1 = arith.constant 0 : i32
    return %c0_i32, %c0_i32_0 : i32, i32
  }
  func.func @transform_2(%arg0: i32) -> (i32, i32) {
    %c0_i32 = arith.constant 0 : i32
    %c0_i32_0 = arith.constant 0 : i32
    %c0_i32_1 = arith.constant 0 : i32
    return %c0_i32, %c0_i32_0 : i32, i32
  }
  func.func @transform_3(%arg0: i32) -> (i32, i32) {
    %c0_i32 = arith.constant 0 : i32
    %c0_i32_0 = arith.constant 0 : i32
    %c0_i32_1 = arith.constant 0 : i32
    return %c0_i32, %c0_i32_0 : i32, i32
  }
  func.func @transform_4(%arg0: i32) -> (i32, i32) {
    %c0_i32 = arith.constant 0 : i32
    %c0_i32_0 = arith.constant 0 : i32
    %c0_i32_1 = arith.constant 0 : i32
    return %c0_i32, %c0_i32_0 : i32, i32
  }
  func.func @transform_5(%arg0: i32) -> (i32, i32, i32) {
    %c0_i32 = arith.constant 0 : i32
    %c0_i32_0 = arith.constant 0 : i32
    %c0_i32_1 = arith.constant 0 : i32
    return %arg0, %c0_i32, %c0_i32_0 : i32, i32, i32
  }
}

module attributes {stable_mosaic.version = 11 : i64} {
  func.func @_fc_stack_kernel(%arg0: i32, %arg1: memref<8x2048xbf16, #tpu.memory_space<vmem>>, %arg2: memref<2048x640xbf16, #tpu.memory_space<vmem>>, %arg3: memref<1x640xf32, #tpu.memory_space<vmem>>, %arg4: memref<640x512xbf16, #tpu.memory_space<vmem>>, %arg5: memref<1x512xf32, #tpu.memory_space<vmem>>, %arg6: memref<512x128xbf16, #tpu.memory_space<vmem>>, %arg7: memref<1x128xf32, #tpu.memory_space<vmem>>, %arg8: memref<8x128xf32, #tpu.memory_space<vmem>>) attributes {dimension_semantics = [#tpu.dimension_semantics<parallel>], iteration_bounds = array<i64: 1>, scalar_prefetch = 0 : i64, scratch_operands = 0 : i64, tpu.core_type = #tpu.core_type<tc>, window_params = [{transform_indices = @transform_0, window_bounds = array<i64: 8, 2048>}, {pipeline_mode = #tpu.pipeline_mode<synchronous>, transform_indices = @transform_1, window_bounds = array<i64: 2048, 640>}, {pipeline_mode = #tpu.pipeline_mode<synchronous>, transform_indices = @transform_2, window_bounds = array<i64: 1, 640>}, {pipeline_mode = #tpu.pipeline_mode<synchronous>, transform_indices = @transform_3, window_bounds = array<i64: 640, 512>}, {pipeline_mode = #tpu.pipeline_mode<synchronous>, transform_indices = @transform_4, window_bounds = array<i64: 1, 512>}, {pipeline_mode = #tpu.pipeline_mode<synchronous>, transform_indices = @transform_5, window_bounds = array<i64: 512, 128>}, {pipeline_mode = #tpu.pipeline_mode<synchronous>, transform_indices = @transform_6, window_bounds = array<i64: 1, 128>}, {transform_indices = @transform_7, window_bounds = array<i64: 8, 128>}]} {
    %c0 = arith.constant 0 : index
    %c0_0 = arith.constant 0 : index
    %0 = vector.load %arg1[%c0, %c0_0] : memref<8x2048xbf16, #tpu.memory_space<vmem>>, vector<8x2048xbf16>
    %c0_1 = arith.constant 0 : index
    %c0_2 = arith.constant 0 : index
    %1 = vector.load %arg2[%c0_1, %c0_2] : memref<2048x640xbf16, #tpu.memory_space<vmem>>, vector<2048x640xbf16>
    %cst = arith.constant dense<0.000000e+00> : vector<8x640xf32>
    %2 = tpu.matmul %0, %1, %cst {dimension_numbers = #tpu.dot_dimension_numbers<[1], [0], [0], [1], [0, 0, 1, 1], [], []>} : vector<8x2048xbf16>, vector<2048x640xbf16>, vector<8x640xf32> -> vector<8x640xf32>
    %c0_3 = arith.constant 0 : index
    %c0_4 = arith.constant 0 : index
    %3 = vector.load %arg3[%c0_3, %c0_4] : memref<1x640xf32, #tpu.memory_space<vmem>>, vector<1x640xf32>
    %4 = vector.broadcast %3 : vector<1x640xf32> to vector<8x640xf32>
    %5 = arith.addf %2, %4 : vector<8x640xf32>
    %cst_5 = arith.constant 0.000000e+00 : f32
    %6 = vector.broadcast %cst_5 : f32 to vector<8x640xf32>
    %7 = arith.maximumf %5, %6 : vector<8x640xf32>
    %8 = arith.truncf %7 : vector<8x640xf32> to vector<8x640xbf16>
    %c0_6 = arith.constant 0 : index
    %c0_7 = arith.constant 0 : index
    %9 = vector.load %arg4[%c0_6, %c0_7] : memref<640x512xbf16, #tpu.memory_space<vmem>>, vector<640x512xbf16>
    %cst_8 = arith.constant dense<0.000000e+00> : vector<8x512xf32>
    %10 = tpu.matmul %8, %9, %cst_8 {dimension_numbers = #tpu.dot_dimension_numbers<[1], [0], [0], [1], [0, 0, 1, 1], [], []>} : vector<8x640xbf16>, vector<640x512xbf16>, vector<8x512xf32> -> vector<8x512xf32>
    %c0_9 = arith.constant 0 : index
    %c0_10 = arith.constant 0 : index
    %11 = vector.load %arg5[%c0_9, %c0_10] : memref<1x512xf32, #tpu.memory_space<vmem>>, vector<1x512xf32>
    %12 = vector.broadcast %11 : vector<1x512xf32> to vector<8x512xf32>
    %13 = arith.addf %10, %12 : vector<8x512xf32>
    %cst_11 = arith.constant 0.000000e+00 : f32
    %14 = vector.broadcast %cst_11 : f32 to vector<8x512xf32>
    %15 = arith.maximumf %13, %14 : vector<8x512xf32>
    %16 = arith.truncf %15 : vector<8x512xf32> to vector<8x512xbf16>
    %c0_12 = arith.constant 0 : index
    %c0_13 = arith.constant 0 : index
    %17 = vector.load %arg6[%c0_12, %c0_13] : memref<512x128xbf16, #tpu.memory_space<vmem>>, vector<512x128xbf16>
    %cst_14 = arith.constant dense<0.000000e+00> : vector<8x128xf32>
    %18 = tpu.matmul %16, %17, %cst_14 {dimension_numbers = #tpu.dot_dimension_numbers<[1], [0], [0], [1], [0, 0, 1, 1], [], []>} : vector<8x512xbf16>, vector<512x128xbf16>, vector<8x128xf32> -> vector<8x128xf32>
    %c0_15 = arith.constant 0 : index
    %c0_16 = arith.constant 0 : index
    %19 = vector.load %arg7[%c0_15, %c0_16] : memref<1x128xf32, #tpu.memory_space<vmem>>, vector<1x128xf32>
    %20 = vector.broadcast %19 : vector<1x128xf32> to vector<8x128xf32>
    %21 = arith.addf %18, %20 : vector<8x128xf32>
    %c0_17 = arith.constant 0 : index
    %c0_18 = arith.constant 0 : index
    %22 = vector.load %arg8[%c0_17, %c0_18] : memref<8x128xf32, #tpu.memory_space<vmem>>, vector<8x128xf32>
    tpu.vector_store %arg8[%c0_17, %c0_18], %21 {strides = array<i32>} : memref<8x128xf32, #tpu.memory_space<vmem>>, vector<8x128xf32>,
    return
  }
  func.func @transform_0(%arg0: i32) -> (i32, i32) {
    %c0_i32 = arith.constant 0 : i32
    %c0_i32_0 = arith.constant 0 : i32
    return %arg0, %c0_i32 : i32, i32
  }
  func.func @transform_1(%arg0: i32) -> (i32, i32) {
    %c0_i32 = arith.constant 0 : i32
    %c0_i32_0 = arith.constant 0 : i32
    %c0_i32_1 = arith.constant 0 : i32
    return %c0_i32, %c0_i32_0 : i32, i32
  }
  func.func @transform_2(%arg0: i32) -> (i32, i32) {
    %c0_i32 = arith.constant 0 : i32
    %c0_i32_0 = arith.constant 0 : i32
    %c0_i32_1 = arith.constant 0 : i32
    return %c0_i32, %c0_i32_0 : i32, i32
  }
  func.func @transform_3(%arg0: i32) -> (i32, i32) {
    %c0_i32 = arith.constant 0 : i32
    %c0_i32_0 = arith.constant 0 : i32
    %c0_i32_1 = arith.constant 0 : i32
    return %c0_i32, %c0_i32_0 : i32, i32
  }
  func.func @transform_4(%arg0: i32) -> (i32, i32) {
    %c0_i32 = arith.constant 0 : i32
    %c0_i32_0 = arith.constant 0 : i32
    %c0_i32_1 = arith.constant 0 : i32
    return %c0_i32, %c0_i32_0 : i32, i32
  }
  func.func @transform_5(%arg0: i32) -> (i32, i32) {
    %c0_i32 = arith.constant 0 : i32
    %c0_i32_0 = arith.constant 0 : i32
    %c0_i32_1 = arith.constant 0 : i32
    return %c0_i32, %c0_i32_0 : i32, i32
  }
  func.func @transform_6(%arg0: i32) -> (i32, i32) {
    %c0_i32 = arith.constant 0 : i32
    %c0_i32_0 = arith.constant 0 : i32
    %c0_i32_1 = arith.constant 0 : i32
    return %c0_i32, %c0_i32_0 : i32, i32
  }
  func.func @transform_7(%arg0: i32) -> (i32, i32) {
    %c0_i32 = arith.constant 0 : i32
    %c0_i32_0 = arith.constant 0 : i32
    return %arg0, %c0_i32 : i32, i32
  }
}

</mosaic_0001>

<bundles_post_ra>
// kernel: over_lenet5_forward.2
= control target key start
LH: loop header
LB: loop body
LE: loop exit
PB: predicated region body
PF: predicated region fallthrough
CT: control target
= control target key end

     0   :  { %10 = vsyncpa [#allocation3], 0  ;;  %s9349_s0 = inlined_call_operand.vmem [shape: f32[2,28,28], index: 0, kind: input, shape index: {}]   ;;  %s9350_s1 = inlined_call_operand.hbm [shape: bf16[140,3072], index: 1, kind: input, shape index: {}]   ;;  %s9351_s2 = inlined_call_operand.hbm [shape: f32[1,128], index: 2, kind: input, shape index: {}]   ;;  %s9352_s3 = inlined_call_operand.hbm [shape: bf16[3200,128], index: 3, kind: input, shape index: {}]   ;;  %s9353_s4 = inlined_call_operand.hbm [shape: f32[1,128], index: 4, kind: input, shape index: {}]   ;;  %s9354_s5 = inlined_call_operand.vmem [shape: bf16[2,16,128], index: 5, kind: output, shape index: {}]  }
   0x1   :  { %11 = vsyncpa [#allocation5], 0 }
   0x2   :  { %12 = vsyncpa [#allocation8], 0  ;;  %s8012_s18 = smov 0  }
   0x3 LB: > { %s7967_s19 = smov [#allocation4]   ;;  %s8018_s21 = sadd.s32 4294967295, %s7965_s18   ;;  %s7965_s18 = sphi %s8012_s18, %s18_s18  }
   0x4   : > { %s185_s20 = sshll.u32 %s7967_s19, 4  ;;  %p6408_p0 = scmp.ge.s32.totalorder %s7965_s18, 1  ;;  %s186_s20 = int_to_ptr.vmem [resolvable:$true] %s185_s20 }
   0x5   : > { %p159_p1 = scmp.lt.s32.totalorder %s7965_s18, 3  ;;  %p9355_p2 = scmp.eq.s32.totalorder %s8018_s21, 0 }
   0x6   : > { %s7968_s23 = smov [#allocation2]   ;;  %s7969_s26 = smov [#allocation6]  }
   0x7   : > { %p8023_p3 = pnand %p6408_p0, %p159_p1  ;;  %s171_s24 = sshll.u32 %s7968_s23, 4  ;;  %s8029_s24 = int_to_ptr.vmem [resolvable:$true] %s171_s24 }
   0x8   : > { %s195_s27 = sshll.u32 %s7969_s26, 4  ;;  %s7835_s30 = scalar_lea.hbm %s9351_s2, 16  ;;  %s8037_s27 = int_to_ptr.vmem [resolvable:$true] %s195_s27 }
   0x9   : > { %s9389_s22 = scalar_select %p8023_p3, 1, 0 }
   0xa   : > { %p7591_p4 = pneg %p8023_p3  ;;  %p7836_p6 = scmp.ne.s32.totalorder %s9351_s2, %s7835_s30 }
   0xb   : > { %p7842_p10 = scmp.lt.u32.totalorder %s7835_s30, %s9351_s2 }
   0xc   : > { %p8033_p5 = pnand %p9355_p2, %p7591_p4 }
   0xe   : > { %p8047_p7 = pneg %p8033_p5 }
  0x10   : > { %p7838_p8 = pnand %p8047_p7, %p7836_p6 }
  0x12   : > { %p7839_p9 = pneg %p7838_p8 }
  0x14   : > { %p7844_p11 = pnand %p7842_p10, %p7839_p9 }
  0x16   : > { %7847 = shalt.err (!%p7844_p11)
}
  0x17   : > { %s7848_s11 = scalar_lea.vmem %s186_s20, 16  ;;  %s7855_s12 = scalar_lea.vmem %s186_s20, 32 }
  0x18   : > { %p7849_p12 = scmp.ne.s32.totalorder %s186_s20, %s7848_s11  ;;  %p7856_p1 = scmp.lt.s32.totalorder %s186_s20, %s186_s20 }
  0x19   : > { %p7857_p4 = scmp.lt.s32.totalorder %s7855_s12, %s7848_s11 }
  0x1a   : > { %p7851_p13 = pnand %p7849_p12, %p8047_p7 }
  0x1b   : > { %p7858_p2 = por %p7857_p4, %p7856_p1 }
  0x1c   : > { %p7852_p0 = pneg %p7851_p13 }
  0x1e   : > { %p7859_p3 = pnand %p7858_p2, %p7852_p0 }
  0x20   : > { %7862 = shalt.err (!%p7859_p3)
}
  0x21   : > { %7597 = dma.hbm_to_vmem [thread:$0]  (!%p8033_p5), %s9351_s2, 16, %s186_s20, [#allocation5]  }
  0x22   : > { %s7863_s17 = scalar_lea.hbm %s9350_s1, 27648 }
  0x23   : > { %p7864_p6 = scmp.ne.s32.totalorder %s9350_s1, %s7863_s17  ;;  %p7870_p2 = scmp.lt.u32.totalorder %s7863_s17, %s9350_s1 }
  0x25   : > { %p7866_p8 = pnand %p7864_p6, %p8047_p7 }
  0x27   : > { %p7867_p9 = pneg %p7866_p8 }
  0x29   : > { %p7872_p3 = pnand %p7870_p2, %p7867_p9 }
  0x2b   : > { %7875 = shalt.err (!%p7872_p3)
}
  0x2c   : > { %s7876_s20 = scalar_lea.vmem %s8029_s24, 27648  ;;  %p7884_p13 = scmp.lt.s32.totalorder %s8029_s24, %s8029_s24 }
  0x2d   : > { %p7877_p10 = scmp.ne.s32.totalorder %s8029_s24, %s7876_s20  ;;  %p7885_p0 = scmp.lt.s32.totalorder %s7876_s20, %s7876_s20 }
  0x2f   : > { %p7879_p11 = pnand %p7877_p10, %p8047_p7  ;;  %p7886_p1 = por %p7885_p0, %p7884_p13 }
  0x31   : > { %p7880_p12 = pneg %p7879_p11 }
  0x33   : > { %p7887_p4 = pnand %p7886_p1, %p7880_p12 }
  0x35   : > { %7890 = shalt.err (!%p7887_p4)
}
  0x36   : > { %s7970_s29 = smov 1536   ;;  %s7971_s30 = smov 96  }
  0x37   : > { %7594 = dma.hbm_to_vmem [thread:$0]  (!%p8033_p5), %s9350_s1, 27648, %s8029_s24, [#allocation3], %s7970_s29, %s7970_s29, %s7971_s30  }
  0x38   : > { %s7891_s11 = scalar_lea.hbm %s9352_s3, 25600 }
  0x39   : > { %p7892_p6 = scmp.ne.s32.totalorder %s9352_s3, %s7891_s11  ;;  %p7898_p2 = scmp.lt.u32.totalorder %s7891_s11, %s9352_s3 }
  0x3b   : > { %p7894_p8 = pnand %p7892_p6, %p8047_p7 }
  0x3d   : > { %p7895_p9 = pneg %p7894_p8 }
  0x3f   : > { %p7900_p3 = pnand %p7898_p2, %p7895_p9 }
  0x41   : > { %7903 = shalt.err (!%p7900_p3)
}
  0x42   : > { %s7904_s24 = scalar_lea.vmem %s8037_s27, 25600  ;;  %p7912_p13 = scmp.lt.s32.totalorder %s8037_s27, %s8037_s27 }
  0x43   : > { %p7905_p10 = scmp.ne.s32.totalorder %s8037_s27, %s7904_s24  ;;  %p7913_p0 = scmp.lt.s32.totalorder %s7904_s24, %s7904_s24 }
  0x45   : > { %p7907_p11 = pnand %p7905_p10, %p8047_p7  ;;  %p7914_p1 = por %p7913_p0, %p7912_p13 }
  0x47   : > { %p7908_p12 = pneg %p7907_p11 }
  0x49   : > { %p7915_p4 = pnand %p7914_p1, %p7908_p12 }
  0x4b   : > { %7918 = shalt.err (!%p7915_p4)
}
  0x4c   : > { %s7972_s16 = smov 64   ;;  %s7973_s17 = smov 4  }
  0x4d   : > { %7600 = dma.hbm_to_vmem [thread:$0]  (!%p8033_p5), %s9352_s3, 25600, %s8037_s27, [#allocation5], %s7972_s16, %s7972_s16, %s7973_s17  }
  0x4e   : > { %s7974_s26 = smov [#allocation7]   ;;  %s7919_s30 = scalar_lea.hbm %s9353_s4, 16 }
  0x4f   : > { %s209_s28 = sshll.u32 %s7974_s26, 4  ;;  %p7920_p6 = scmp.ne.s32.totalorder %s9353_s4, %s7919_s30  ;;  %s210_s28 = int_to_ptr.vmem [resolvable:$true] %s209_s28 }
  0x50   : > { %p7926_p2 = scmp.lt.u32.totalorder %s7919_s30, %s9353_s4 }
  0x51   : > { %p7922_p8 = pnand %p7920_p6, %p8047_p7 }
  0x53   : > { %p7923_p9 = pneg %p7922_p8 }
  0x55   : > { %p7928_p3 = pnand %p7926_p2, %p7923_p9 }
  0x57   : > { %7931 = shalt.err (!%p7928_p3)
}
  0x58   : > { %s7932_s27 = scalar_lea.vmem %s210_s28, 16  ;;  %s7939_s11 = scalar_lea.vmem %s210_s28, 32 }
  0x59   : > { %p7933_p10 = scmp.ne.s32.totalorder %s210_s28, %s7932_s27  ;;  %p7940_p13 = scmp.lt.s32.totalorder %s210_s28, %s210_s28 }
  0x5a   : > { %p7941_p0 = scmp.lt.s32.totalorder %s7939_s11, %s7932_s27 }
  0x5b   : > { %p7935_p11 = pnand %p7933_p10, %p8047_p7 }
  0x5c   : > { %p7942_p1 = por %p7941_p0, %p7940_p13 }
  0x5d   : > { %p7936_p12 = pneg %p7935_p11 }
  0x5f   : > { %p7943_p4 = pnand %p7942_p1, %p7936_p12 }
  0x61   : > { %7946 = shalt.err (!%p7943_p4)
}
  0x62   : > { %7603 = dma.hbm_to_vmem [thread:$0]  (!%p8033_p5), %s9353_s4, 16, %s210_s28, [#allocation8]  }
  0x63   : > { %p9392_p6 = scmp.ne.s32.totalorder %s9389_s22, 0 }
  0x65   : > { %230 = sbr.rel (%p9392_p6) target bundleno = 1180 (0x49c), region = 40 }
  0x6c   : > { %p9393_p8 = scmp.eq.s32.totalorder %s8018_s21, 0 }
  0x6e   : > { %7952 = dma.done.wait (%p9393_p8), [#allocation3], 27648   ;;  %p9394_p7 = pmov %p9393_p8 }
  0x70   : > { %7954 = vsyncadd (%p9394_p7), [#allocation3], 4294939648  ;;  %p9395_p9 = pmov %p9394_p7 }
  0x71   : > { %p9396_p2 = pmov %p9394_p7 }
  0x72   : > { %7956 = dma.done.wait (%p9395_p9), [#allocation5], 25616  }
  0x73   : > { %7958 = vsyncadd (%p9396_p2), [#allocation5], 4294941680  ;;  %p9397_p3 = pmov %p9396_p2 }
  0x74   : > { %p9398_p5 = pmov %p9396_p2 }
  0x75   : > { %7960 = dma.done.wait (%p9397_p3), [#allocation8], 16  }
  0x76   : > { %7962 = vsyncadd (%p9398_p5), [#allocation8], 4294967280  ;;  %p270_p10 = scmp.lt.s32.totalorder %s8018_s21, 1  ;;  %v359_v5 = vld [vmem:[#allocation2] sm:$0xff]  ;;  %vm287_vm0 = vsmask.f32 7424 }
  0x77   : > { %v371_v6 = vld [vmem:[#allocation2 + $0x60] sm:$0xff]  ;;  %v360_v9 = vld [vmem:[#allocation2 + $0x8] sm:$0xff]  ;;  %vm317_vm1 = vsmask.f32 6400  ;;  %vm309_vm2 = vcmask 1046528   ;;  %vm329_vm3 = vcmask 1045504  }
  0x78   : > { %s9471_s21 = smov (!%p270_p10, %s8018_s21), 1  ;;  %v6424_v8 = vcombine.high %v359_v5, %v371_v6  ;;  %v372_v10 = vld [vmem:[#allocation2 + $0x68] sm:$0xff]  ;;  %v6423_v11 = vcombine.low %v359_v5, %v371_v6  ;;  %v383_v17 = vld [vmem:[#allocation2 + $0xc0] sm:$0xff]  ;;  %s7975_s15 = smov 28   ;;  %v8173_v62 = vld [vmem:[#allocation2 + $0x10] sm:$0xff]  ;;  %vm337_vm4 = vcmask 228352  }
  0x79   : > { %s7025_s22 = sshll.u32 %s9471_s21, 5  ;;  %v6426_v21 = vcombine.high %v360_v9, %v372_v10  ;;  %v395_v22 = vld [vmem:[#allocation2 + $0x120] sm:$0xff]  ;;  %v384_v23 = vld [vmem:[#allocation2 + $0xc8] sm:$0xff]  ;;  %v6425_v34 = vcombine.low %v360_v9, %v372_v10  ;;  %s7976_s24 = smov 84   ;;  %v8175_v63 = vld [vmem:[#allocation2 + $0x70] sm:$0xff]  ;;  %vm342_vm5 = vcmask 457728  }
  0x7a   : > { %s274_s14 = scalar_lea.vmem %s9349_s0, %s7025_s22  ;;  %1709 = vmatprep.subr.bf16.mxu0 %v6424_v8  ;;  %v396_v24 = vld [vmem:[#allocation2 + $0x128] sm:$0xff]  ;;  %v407_v29 = vld [vmem:[#allocation2 + $0x180] sm:$0xff]  ;;  %v6448_v39 = vcombine.high %v383_v17, %v395_v22  ;;  %v6447_v42 = vcombine.low %v383_v17, %v395_v22  ;;  %s7977_s16 = smov 56   ;;  %v6427_v10 = vcombine.low %v8173_v62, %v8175_v63  ;;  %vm347_vm6 = vcmask 687104  }
  0x7b   : > { %v281_v0 = vld [vmem:[%s274_s14] sm:$0xff]  ;;  %v282_v1 = vld [vmem:[%s274_s14 + $0x8] sm:$0xff]  ;;  %v283_v2 = vld [vmem:[%s274_s14 + $0x10] sm:$0xff]  ;;  %1710 = vmatpush1.bf16.msra.mxu0 %v6423_v11  ;;  %1760 = vmatprep.subr.bf16.mxu1 %v6426_v21  ;;  %v6450_v40 = vcombine.high %v384_v23, %v396_v24  ;;  %v6449_v43 = vcombine.low %v384_v23, %v396_v24  ;;  %s7978_s17 = smov 112   ;;  %vm1631_vm7 = vcmask 97280   ;;  %vm352_vm8 = vcmask 916480  }
  0x7c   : > { %v284_v3 = vld [vmem:[%s274_s14 + $0x18] sm:$0xf]  ;;  %v8149_v4 = vpack.c.bf16 %v282_v1, %v281_v0  ;;  %v419_v30 = vld [vmem:[#allocation2 + $0x1e0] sm:$0xff]  ;;  %v408_v35 = vld [vmem:[#allocation2 + $0x188] sm:$0xff]  ;;  %1761 = vmatpush1.bf16.msra.mxu1 %v6425_v34  ;;  %1711 = vmatprep.subr.bf16.mxu0 %v6448_v39  ;;  %vm2962_vm9 = vsmask.f32 3328 }
  0x7d   : > { %v8151_v7 = vpack.c.bf16 %v284_v3, %v283_v2  ;;  %v420_v36 = vld [vmem:[#allocation2 + $0x1e8] sm:$0xff]  ;;  %v6472_v44 = vcombine.high %v407_v29, %v419_v30  ;;  %v431_v47 = vld [vmem:[#allocation2 + $0x240] sm:$0xff]  ;;  %1762 = vmatprep.subr.bf16.mxu1 %v6450_v40  ;;  %v6471_v53 = vcombine.low %v407_v29, %v419_v30  ;;  %v8177_v1 = vld [vmem:[#allocation2 + $0x18] sm:$0xff]  ;;  %vm2963_vm10 = vsmask.f32 7440  ;;  %s7026_s19 = sshll.u32 %s9471_s21, 3 }
  0x7e   : > { %v289_v12 = vshrl.u32 %v8149_v4, 16  ;;  %v291_v13 = vshll.u32 %v8149_v4, 16  ;;  %v310_v16 = vrot.slane %v8149_v4, 1  ;;  %v330_v28 = vrot.slane %v8149_v4, 2  ;;  %v443_v48 = vld [vmem:[#allocation2 + $0x2a0] sm:$0xff]  ;;  %v432_v50 = vld [vmem:[#allocation2 + $0x248] sm:$0xff]  ;;  %vm8634_vm15 = vmor %vm2962_vm9, %vm2963_vm10  ;;  %s279_s21 = scalar_lea.vmem %s9354_s5, %s7026_s19 }
  0x7f   : > { %v296_v14 = vshll.u32 %v8151_v7, 16  ;;  %v300_v15 = vshrl.u32 %v8151_v7, 16  ;;  %v311_v33 = vrot.slane %v8151_v7, 1  ;;  %v331_v38 = vrot.slane %v8151_v7, 2  ;;  %v444_v51 = vld [vmem:[#allocation2 + $0x2a8] sm:$0xff]  ;;  %1712 = vmatpush1.bf16.msra.mxu0 %v6447_v42  ;;  %v455_v58 = vld [vmem:[#allocation2 + $0x300] sm:$0xff] }
  0x80   : > { %v293_v18 = vrot.slane %v291_v13, 1  ;;  %v318_v19 = vrot.slane %v289_v12, 1  ;;  %v319_v20 = vrot.slane %v291_v13, 2  ;;  %v6474_v46 = vcombine.high %v408_v35, %v420_v36  ;;  %1763 = vmatpush1.bf16.msra.mxu1 %v6449_v43  ;;  %1713 = vmatprep.subr.bf16.mxu0 %v6472_v44  ;;  %v467_v59 = vld [vmem:[#allocation2 + $0x360] sm:$0xff]  ;;  %v456_v60 = vld [vmem:[#allocation2 + $0x308] sm:$0xff]  ;;  %v8179_v2 = vld [vmem:[#allocation2 + $0x78] sm:$0xff] }
  0x81   : > { %v298_v25 = vrot.slane %v296_v14, 1  ;;  %v321_v26 = vrot.slane %v300_v15, 1  ;;  %v322_v27 = vrot.slane %v296_v14, 2  ;;  %v312_v49 = vsel %vm309_vm2, %v310_v16, %v311_v33  ;;  %v468_v61 = vld [vmem:[#allocation2 + $0x368] sm:$0xff]  ;;  %v479_v8 = vld [vmem:[#allocation2 + $0x3c0] sm:$0xff] }
  0x82   : > { %v294_v31 = vor.u32 %v293_v18, %v289_v12  ;;  %v320_v32 = vor.u32 %v319_v20, %v318_v19  ;;  %v332_v52 = vsel %vm329_vm3, %v330_v28, %v331_v38  ;;  %v6473_v54 = vcombine.low %v408_v35, %v420_v36  ;;  %1764 = vmatprep.subr.bf16.mxu1 %v6474_v46  ;;  %v491_v9 = vld [vmem:[#allocation2 + $0x420] sm:$0xff]  ;;  %v480_v11 = vld [vmem:[#allocation2 + $0x3c8] sm:$0xff] }
  0x83   : > { %v8160_v37 = vor.u32 %v322_v27, %v321_v26  ;;  %v6496_v55 = vcombine.high %v431_v47, %v443_v48  ;;  %v302_v56 = vor.u32 %v300_v15, %v298_v25  ;;  %v6498_v57 = vcombine.high %v432_v50, %v444_v51  ;;  %1714 = vmatpush1.bf16.msra.mxu0 %v6471_v53  ;;  %v492_v12 = vld [vmem:[#allocation2 + $0x428] sm:$0xff]  ;;  %v503_v17 = vld [vmem:[#allocation2 + $0x480] sm:$0xff]  ;;  %v398_v53 = vld [vmem:[#allocation2 + $0x138] sm:$0xff] }
  0x84   : > { %v299_v41 = vsel %vm287_vm0, %v294_v31, %v298_v25  ;;  %v6495_v0 = vcombine.low %v431_v47, %v443_v48  ;;  %1765 = vmatpush1.bf16.msra.mxu1 %v6473_v54  ;;  %v6497_v3 = vcombine.low %v432_v50, %v444_v51  ;;  %v6520_v5 = vcombine.high %v455_v58, %v467_v59  ;;  %v515_v18 = vld [vmem:[#allocation2 + $0x4e0] sm:$0xff]  ;;  %v504_v19 = vld [vmem:[#allocation2 + $0x488] sm:$0xff]  ;;  %v385_v50 = vld [vmem:[#allocation2 + $0xd0] sm:$0xff] }
  0x85   : > { %303 = vrot.lane.b32.xlu0 %v299_v41, %s7975_s15  ;;  %v324_v45 = vsel %vm317_vm1, %v320_v32, %v8160_v37  ;;  %1715 = vmatprep.subr.bf16.mxu0 %v6496_v55  ;;  %v6522_v6 = vcombine.high %v456_v60, %v468_v61  ;;  %v6429_v13 = vcombine.low %v8177_v1, %v8179_v2  ;;  %v516_v21 = vld [vmem:[#allocation2 + $0x4e8] sm:$0xff]  ;;  %v527_v25 = vld [vmem:[#allocation2 + $0x540] sm:$0xff]  ;;  %v397_v51 = vld [vmem:[#allocation2 + $0x130] sm:$0xff]  ;;  %vm3112_vm11 = vsmask.f32 2304 }
  0x86   : > { %325 = vrot.lane.b32.xlu1 %v324_v45, %s7976_s24  ;;  %1766 = vmatprep.subr.bf16.mxu1 %v6498_v57  ;;  %v6519_v14 = vcombine.low %v455_v58, %v467_v59  ;;  %v6521_v15 = vcombine.low %v456_v60, %v468_v61  ;;  %v6544_v16 = vcombine.high %v479_v8, %v491_v9  ;;  %v539_v26 = vld [vmem:[#allocation2 + $0x5a0] sm:$0xff]  ;;  %v528_v27 = vld [vmem:[#allocation2 + $0x548] sm:$0xff]  ;;  %v409_v61 = vld [vmem:[#allocation2 + $0x190] sm:$0xff]  ;;  %vm3113_vm12 = vsmask.f32 6416 }
  0x87   : > { %1716 = vmatpush1.bf16.msra.mxu0 %v6495_v0  ;;  %v6546_v20 = vcombine.high %v480_v11, %v492_v12  ;;  %v6543_v22 = vcombine.low %v479_v8, %v491_v9  ;;  %v6545_v23 = vcombine.low %v480_v11, %v492_v12  ;;  %v6568_v24 = vcombine.high %v503_v17, %v515_v18  ;;  %v540_v29 = vld [vmem:[#allocation2 + $0x5a8] sm:$0xff]  ;;  %v563_v34 = vld [vmem:[#allocation2 + $0x660] sm:$0x33]  ;;  %vm8657_vm0 = vmor %vm3112_vm11, %vm3113_vm12 }
  0x88   : > { %1767 = vmatpush1.bf16.msra.mxu1 %v6497_v3  ;;  %1717 = vmatprep.subr.bf16.mxu0 %v6520_v5  ;;  %v6570_v28 = vcombine.high %v504_v19, %v516_v21  ;;  %v6567_v30 = vcombine.low %v503_v17, %v515_v18  ;;  %v6569_v31 = vcombine.low %v504_v19, %v516_v21  ;;  %v552_v35 = vld [vmem:[#allocation2 + $0x608] sm:$0xff]  ;;  %v421_v3 = vld [vmem:[#allocation2 + $0x1f0] sm:$0xff]  ;;  %v410_v5 = vld [vmem:[#allocation2 + $0x198] sm:$0xff]  ;;  %vm3077_vm13 = vcmask 1042432  }
  0x89   : > { %313 = vrot.lane.b32.xlu0 %v312_v49, %s7977_s16  ;;  %1768 = vmatprep.subr.bf16.mxu1 %v6522_v6  ;;  %v6592_v32 = vcombine.high %v527_v25, %v539_v26  ;;  %v6594_v36 = vcombine.high %v528_v27, %v540_v29  ;;  %v6593_v39 = vcombine.low %v528_v27, %v540_v29  ;;  %v422_v6 = vld [vmem:[#allocation2 + $0x1f8] sm:$0xff]  ;;  %v457_v19 = vld [vmem:[#allocation2 + $0x310] sm:$0xff]  ;;  %vm3078_vm14 = vcmask 1046532  }
  0x8a   : > { %333 = vrot.lane.b32.xlu1 %v332_v52, %s7978_s17  ;;  %v6428_v45 = vcombine.high %v8173_v62, %v8175_v63  ;;  %v6430_v47 = vcombine.high %v8177_v1, %v8179_v2  ;;  %v386_v52 = vld [vmem:[#allocation2 + $0xd8] sm:$0xff]  ;;  %v6452_v59 = vcombine.high %v385_v50, %v397_v51  ;;  %v6451_v11 = vcombine.low %v385_v50, %v397_v51  ;;  %v445_v62 = vld [vmem:[#allocation2 + $0x2b0] sm:$0xff]  ;;  %vm8668_vm1 = vmor %vm3077_vm13, %vm3078_vm14 }
  0x8b   : > { %1718 = vmatpush1.bf16.msra.mxu0 %v6519_v14  ;;  %v6454_v60 = vcombine.high %v386_v52, %v398_v53  ;;  %v6453_v12 = vcombine.low %v386_v52, %v398_v53  ;;  %v6478_v17 = vcombine.high %v410_v5, %v422_v6  ;;  %v434_v63 = vld [vmem:[#allocation2 + $0x258] sm:$0xff]  ;;  %v493_v29 = vld [vmem:[#allocation2 + $0x430] sm:$0xff]  ;;  %vm3195_vm2 = vcmask 1041408  }
  0x8c   : > { %1769 = vmatpush1.bf16.msra.mxu1 %v6521_v15  ;;  %1719 = vmatprep.subr.bf16.mxu0 %v6544_v16  ;;  %v433_v15 = vld [vmem:[#allocation2 + $0x250] sm:$0xff]  ;;  %v6476_v16 = vcombine.high %v409_v61, %v421_v3  ;;  %v458_v21 = vld [vmem:[#allocation2 + $0x318] sm:$0xff]  ;;  %vm6282_vm9 = vcmask 1045509   ;;  %vm6285_vm10 = vcmask 1046534   ;;  %vm6288_vm11 = vcmask 1047559  }
  0x8d   : > { %305 = vrot.lane.b32.xlu0 %v302_v56, %s7975_s15  ;;  %1770 = vmatprep.subr.bf16.mxu1 %v6546_v20  ;;  %v469_v20 = vld [vmem:[#allocation2 + $0x370] sm:$0xff] }
  0x8e   : > { %315 = vrot.lane.b32.xlu1 %v311_v33, %s7977_s16  ;;  %v551_v33 = vld [vmem:[#allocation2 + $0x600] sm:$0xff]  ;;  %v553_v52 = vld [vmem:[#allocation2 + $0x610] sm:$0xff] }
  0x8f   : > { %1720 = vmatpush1.bf16.msra.mxu0 %v6543_v22  ;;  %v6616_v40 = vcombine.high %v551_v33, %v563_v34  ;;  %v6615_v41 = vcombine.low %v551_v33, %v563_v34  ;;  %v470_v22 = vld [vmem:[#allocation2 + $0x378] sm:$0xff]  ;;  %v6523_v34 = vcombine.low %v457_v19, %v469_v20  ;;  %v565_v53 = vld [vmem:[#allocation2 + $0x670] sm:$0x33] }
  0x90   : > { %1771 = vmatpush1.bf16.msra.mxu1 %v6545_v23  ;;  %1721 = vmatprep.subr.bf16.mxu0 %v6568_v24  ;;  %v6500_v24 = vcombine.high %v433_v15, %v445_v62  ;;  %v6526_v33 = vcombine.high %v458_v21, %v470_v22 }
  0x91   : > { %327 = vrot.lane.b32.xlu0 %v8160_v37, %s7976_s24  ;;  %1772 = vmatprep.subr.bf16.mxu1 %v6570_v28  ;;  %v564_v37 = vld [vmem:[#allocation2 + $0x668] sm:$0x33]  ;;  %v1638_v44 = vsel %vm329_vm3, %v6615_v41, 0  ;;  %v481_v28 = vld [vmem:[#allocation2 + $0x3d0] sm:$0xff]  ;;  %v518_v41 = vld [vmem:[#allocation2 + $0x4f8] sm:$0xff] }
  0x92   : > { %335 = vrot.lane.b32.xlu1 %v331_v38, %s7978_s17  ;;  %v6591_v38 = vcombine.low %v527_v25, %v539_v26  ;;  %v6618_v42 = vcombine.high %v552_v35, %v564_v37  ;;  %v6617_v43 = vcombine.low %v552_v35, %v564_v37  ;;  %v6499_v26 = vcombine.low %v433_v15, %v445_v62  ;;  %v517_v37 = vld [vmem:[#allocation2 + $0x4f0] sm:$0xff]  ;;  %v388_v62 = vld [vmem:[#allocation2 + $0xe8] sm:$0xff] }
  0x93   : > { %1722 = vmatpush1.bf16.msra.mxu0 %v6567_v30  ;;  %v482_v30 = vld [vmem:[#allocation2 + $0x3d8] sm:$0xff]  ;;  %v6525_v35 = vcombine.low %v458_v21, %v470_v22 }
  0x94   : > { %1773 = vmatpush1.bf16.msra.mxu1 %v6569_v31  ;;  %1723 = vmatprep.subr.bf16.mxu0 %v6592_v32  ;;  %v1644_v46 = vsel %vm329_vm3, %v6617_v43, 0  ;;  %v494_v31 = vld [vmem:[#allocation2 + $0x438] sm:$0xff]  ;;  %v6524_v32 = vcombine.high %v457_v19, %v469_v20  ;;  %v412_v19 = vld [vmem:[#allocation2 + $0x1a8] sm:$0xff] }
  0x95   : > { %1774 = vmatprep.subr.bf16.mxu1 %v6594_v36  ;;  %v505_v36 = vld [vmem:[#allocation2 + $0x490] sm:$0xff]  ;;  %v6549_v43 = vcombine.low %v482_v30, %v494_v31  ;;  %v424_v20 = vld [vmem:[#allocation2 + $0x208] sm:$0xff] }
  0x96   : > { %v6571_v50 = vcombine.low %v505_v36, %v517_v37 }
  0x97   : > { %1724 = vmatpush1.bf16.msra.mxu0 %v6591_v38  ;;  %v506_v38 = vld [vmem:[#allocation2 + $0x498] sm:$0xff] }
  0x98   : > { %1775 = vmatpush1.bf16.msra.mxu1 %v6593_v39  ;;  %6639 = vmatprep.subr.msk.bf16.mxu0 %vm329_vm3, %v6616_v40  ;;  %v6548_v39 = vcombine.high %v481_v28, %v493_v29  ;;  %v6550_v40 = vcombine.high %v482_v30, %v494_v31  ;;  %v6573_v51 = vcombine.low %v506_v38, %v518_v41 }
  0x99   : > { %6642 = vmatprep.subr.msk.bf16.mxu1 %vm329_vm3, %v6618_v42  ;;  %v6547_v42 = vcombine.low %v481_v28, %v493_v29  ;;  %v436_v28 = vld [vmem:[#allocation2 + $0x268] sm:$0xff]  ;;  %v6482_v31 = vcombine.high %v412_v19, %v424_v20 }
  0x9a   : > { %v448_v29 = vld [vmem:[#allocation2 + $0x2c8] sm:$0xff] }
  0x9b   : > { %1726 = vmatpush1.bf16.msra.mxu0 %v1638_v44  ;;  %v529_v44 = vld [vmem:[#allocation2 + $0x550] sm:$0xff] }
  0x9c   : > { %1777 = vmatpush1.bf16.msra.mxu1 %v1644_v46  ;;  %1811 = vmatprep.subr.bf16.mxu0 %v6428_v45  ;;  %v541_v45 = vld [vmem:[#allocation2 + $0x5b0] sm:$0xff]  ;;  %v530_v46 = vld [vmem:[#allocation2 + $0x558] sm:$0xff] }
  0x9d   : > { %1862 = vmatprep.subr.bf16.mxu1 %v6430_v47  ;;  %v542_v47 = vld [vmem:[#allocation2 + $0x5b8] sm:$0xff] }
  0xf7   : > { %v304_v48 = vpop.permute.xlu0 %303 }
  0xf8   : > { %v326_v49 = vpop.permute.xlu1 %325  ;;  %v339_v54 = vsel %vm337_vm4, %v8149_v4, %v304_v48  ;;  %v6572_v48 = vcombine.high %v505_v36, %v517_v37  ;;  %v460_v36 = vld [vmem:[#allocation2 + $0x328] sm:$0xff] }
  0xf9   : > { %v472_v37 = vld [vmem:[#allocation2 + $0x388] sm:$0xff] }
  0xfb   : > { %v314_v55 = vpop.permute.xlu0 %313 }
  0xfc   : > { %v344_v56 = vsel %vm342_vm5, %v339_v54, %v314_v55  ;;  %v8202_v57 = vpop.permute.xlu1 %333  ;;  %v554_v54 = vld [vmem:[#allocation2 + $0x618] sm:$0xff]  ;;  %v6596_v55 = vcombine.high %v529_v44, %v541_v45 }
  0xfd   : > { %v349_v58 = vsel %vm347_vm6, %v344_v56, %v326_v49  ;;  %6640 = vmatprep.mubr.msk.bf16.mxu0 %vm1631_vm7, %v8202_v57  ;;  %6643 = vmatprep.mubr.msk.bf16.mxu1 %vm1631_vm7, %v8202_v57  ;;  %v6574_v49 = vcombine.high %v506_v38, %v518_v41  ;;  %v6598_v56 = vcombine.high %v530_v46, %v542_v47  ;;  %v8259_v41 = vld [vmem:[#allocation2 + $0x680] sm:$0x33] }
  0xfe   : > { %v8211_v4 = vsel %vm352_vm8, %v349_v58, %v8202_v57  ;;  %v566_v58 = vld [vmem:[#allocation2 + $0x678] sm:$0x33] }
  0xff   : > { %1742 = vmatmul.mubr.bf16.vlgmr.msra.gmra.mrb[0].mxu0 %v8211_v4  ;;  %1793 = vmatmul.mubr.bf16.vlgmr.msra.gmra.mrb[0].mxu1 %v8211_v4  ;;  %v306_v0 = vpop.permute.xlu0 %305 }
 0x100   : > { %1812 = vmatpush1.bf16.msra.mxu0 %v6427_v10  ;;  %1863 = vmatpush1.bf16.msra.mxu1 %v6429_v13  ;;  %v341_v8 = vsel %vm337_vm4, %v8151_v7, %v306_v0  ;;  %v316_v9 = vpop.permute.xlu1 %315  ;;  %v446_v10 = vld [vmem:[#allocation2 + $0x2b8] sm:$0xff]  ;;  %v6475_v7 = vcombine.low %v409_v61, %v421_v3  ;;  %v6477_v13 = vcombine.low %v410_v5, %v422_v6  ;;  %v363_v0 = vld [vmem:[#allocation2 + $0x20] sm:$0xff]  ;;  %v364_v5 = vld [vmem:[#allocation2 + $0x28] sm:$0xff] }
 0x101   : > { %v346_v14 = vsel %vm342_vm5, %v341_v8, %v316_v9  ;;  %1813 = vmatprep.subr.bf16.mxu0 %v6452_v59  ;;  %1864 = vmatprep.subr.bf16.mxu1 %v6454_v60  ;;  %v6502_v25 = vcombine.high %v434_v63, %v446_v10  ;;  %v6501_v27 = vcombine.low %v434_v63, %v446_v10  ;;  %v375_v3 = vld [vmem:[#allocation2 + $0x80] sm:$0xff]  ;;  %v400_v63 = vld [vmem:[#allocation2 + $0x148] sm:$0xff]  ;;  %vm6270_vm5 = vcmask 1041409  }
 0x102   : > { %v6595_v59 = vcombine.low %v529_v44, %v541_v45  ;;  %v6597_v60 = vcombine.low %v530_v46, %v542_v47  ;;  %v6619_v61 = vcombine.low %v553_v52, %v565_v53  ;;  %v6620_v6 = vcombine.high %v553_v52, %v565_v53  ;;  %v483_v45 = vld [vmem:[#allocation2 + $0x3e0] sm:$0xff]  ;;  %v484_v47 = vld [vmem:[#allocation2 + $0x3e8] sm:$0xff] }
 0x103   : > { %v328_v18 = vpop.permute.xlu0 %327  ;;  %v6622_v8 = vcombine.high %v554_v54, %v566_v58  ;;  %v6621_v9 = vcombine.low %v554_v54, %v566_v58  ;;  %v6432_v15 = vcombine.high %v363_v0, %v375_v3  ;;  %v6431_v10 = vcombine.low %v363_v0, %v375_v3  ;;  %v495_v46 = vld [vmem:[#allocation2 + $0x440] sm:$0xff]  ;;  %v520_v0 = vld [vmem:[#allocation2 + $0x508] sm:$0xff] }
 0x104   : > { %1814 = vmatpush1.bf16.msra.mxu0 %v6451_v11  ;;  %1865 = vmatpush1.bf16.msra.mxu1 %v6453_v12  ;;  %v351_v1 = vsel %vm347_vm6, %v346_v14, %v328_v18  ;;  %v8225_v2 = vpop.permute.xlu1 %335  ;;  %v376_v11 = vld [vmem:[#allocation2 + $0x88] sm:$0xff]  ;;  %v1650_v12 = vsel %vm329_vm3, %v6619_v61, 0  ;;  %v399_v18 = vld [vmem:[#allocation2 + $0x140] sm:$0xff]  ;;  %v6458_v22 = vcombine.high %v388_v62, %v400_v63  ;;  %v6505_v44 = vcombine.low %v436_v28, %v448_v29 }
 0x105   : > { %6641 = vmatprep.mubr.msk.bf16.mxu0 %vm1631_vm7, %v8225_v2  ;;  %6644 = vmatprep.mubr.msk.bf16.mxu1 %vm1631_vm7, %v8225_v2  ;;  %v8233_v23 = vsel %vm352_vm8, %v351_v1, %v8225_v2  ;;  %v1656_v14 = vsel %vm329_vm3, %v6621_v9, 0  ;;  %v6433_v1 = vcombine.low %v364_v5, %v376_v11  ;;  %v519_v58 = vld [vmem:[#allocation2 + $0x500] sm:$0xff]  ;;  %vm6273_vm6 = vcmask 1042434  }
 0x106   : > { %1815 = vmatprep.subr.bf16.mxu0 %v6476_v16  ;;  %1866 = vmatprep.subr.bf16.mxu1 %v6478_v17  ;;  %v6434_v16 = vcombine.high %v364_v5, %v376_v11  ;;  %v387_v17 = vld [vmem:[#allocation2 + $0xe0] sm:$0xff]  ;;  %vm6279_vm8 = vcmask 1044484  }
 0x107   : > { %1752 = vmatmul.mubr.bf16.gmra.mrb[4].mxu0 %v8233_v23  ;;  %1803 = vmatmul.mubr.bf16.gmra.mrb[4].mxu1 %v8233_v23  ;;  %v6456_v21 = vcombine.high %v387_v17, %v399_v18  ;;  %v531_v9 = vld [vmem:[#allocation2 + $0x560] sm:$0xff] }
 0x108   : > { %1816 = vmatpush1.bf16.msra.mxu0 %v6475_v7  ;;  %1867 = vmatpush1.bf16.msra.mxu1 %v6477_v13  ;;  %v411_v7 = vld [vmem:[#allocation2 + $0x1a0] sm:$0xff] }
 0x109   : > { %6646 = vmatprep.mubr.msk.bf16.mxu0 %vm1631_vm7, %v8202_v57  ;;  %6649 = vmatprep.mubr.msk.bf16.mxu1 %vm1631_vm7, %v8202_v57  ;;  %v423_v13 = vld [vmem:[#allocation2 + $0x200] sm:$0xff] }
 0x10a   : > { %1817 = vmatprep.subr.bf16.mxu0 %v6500_v24  ;;  %1868 = vmatprep.subr.bf16.mxu1 %v6502_v25  ;;  %v6455_v24 = vcombine.low %v387_v17, %v399_v18  ;;  %v6457_v25 = vcombine.low %v388_v62, %v400_v63  ;;  %v6480_v30 = vcombine.high %v411_v7, %v423_v13  ;;  %v543_v11 = vld [vmem:[#allocation2 + $0x5c0] sm:$0xff] }
 0x10b   : > { %v6600_v62 = vcombine.high %v531_v9, %v543_v11 }
 0x10c   : > { %1818 = vmatpush1.bf16.msra.mxu0 %v6499_v26  ;;  %1869 = vmatpush1.bf16.msra.mxu1 %v6501_v27  ;;  %v435_v26 = vld [vmem:[#allocation2 + $0x260] sm:$0xff] }
 0x10d   : > { %1819 = vmatprep.subr.bf16.mxu0 %v6524_v32  ;;  %1870 = vmatprep.subr.bf16.mxu1 %v6526_v33  ;;  %v447_v27 = vld [vmem:[#allocation2 + $0x2c0] sm:$0xff]  ;;  %v6479_v32 = vcombine.low %v411_v7, %v423_v13  ;;  %v6481_v33 = vcombine.low %v412_v19, %v424_v20  ;;  %v365_v7 = vld [vmem:[#allocation2 + $0x30] sm:$0xff]  ;;  %v366_v19 = vld [vmem:[#allocation2 + $0x38] sm:$0xff] }
 0x10e   : > { %v6504_v38 = vcombine.high %v435_v26, %v447_v27  ;;  %v377_v13 = vld [vmem:[#allocation2 + $0x90] sm:$0xff]  ;;  %v378_v20 = vld [vmem:[#allocation2 + $0x98] sm:$0xff] }
 0x110   : > { %1820 = vmatpush1.bf16.msra.mxu0 %v6523_v34  ;;  %1871 = vmatpush1.bf16.msra.mxu1 %v6525_v35  ;;  %v459_v34 = vld [vmem:[#allocation2 + $0x320] sm:$0xff] }
 0x111   : > { %1821 = vmatprep.subr.bf16.mxu0 %v6548_v39  ;;  %1872 = vmatprep.subr.bf16.mxu1 %v6550_v40  ;;  %v471_v35 = vld [vmem:[#allocation2 + $0x380] sm:$0xff]  ;;  %v6506_v39 = vcombine.high %v436_v28, %v448_v29  ;;  %v390_v28 = vld [vmem:[#allocation2 + $0xf8] sm:$0xff] }
 0x112   : > { %v8257_v40 = vld [vmem:[#allocation2 + $0x620] sm:$0xff]  ;;  %v6527_v54 = vcombine.low %v459_v34, %v471_v35  ;;  %v402_v29 = vld [vmem:[#allocation2 + $0x158] sm:$0xff] }
 0x113   : > { %v6623_v52 = vcombine.low %v8257_v40, %v8259_v41 }
 0x114   : > { %1822 = vmatpush1.bf16.msra.mxu0 %v6547_v42  ;;  %1873 = vmatpush1.bf16.msra.mxu1 %v6549_v43  ;;  %v8261_v42 = vld [vmem:[#allocation2 + $0x628] sm:$0xff]  ;;  %v6503_v43 = vcombine.low %v435_v26, %v447_v27  ;;  %v389_v26 = vld [vmem:[#allocation2 + $0xf0] sm:$0xff] }
 0x115   : > { %1823 = vmatprep.subr.bf16.mxu0 %v6572_v48  ;;  %1874 = vmatprep.subr.bf16.mxu1 %v6574_v49  ;;  %v496_v48 = vld [vmem:[#allocation2 + $0x448] sm:$0xff]  ;;  %v1662_v3 = vsel %vm329_vm3, %v6623_v52, 0  ;;  %v401_v27 = vld [vmem:[#allocation2 + $0x150] sm:$0xff]  ;;  %v462_v52 = vld [vmem:[#allocation2 + $0x338] sm:$0xff] }
 0x116   : > { %v568_v49 = vld [vmem:[#allocation2 + $0x688] sm:$0x33]  ;;  %v6554_v61 = vcombine.high %v484_v47, %v496_v48 }
 0x117   : > { %v6625_v53 = vcombine.low %v8261_v42, %v568_v49 }
 0x118   : > { %1824 = vmatpush1.bf16.msra.mxu0 %v6571_v50  ;;  %1875 = vmatpush1.bf16.msra.mxu1 %v6573_v51  ;;  %v6528_v50 = vcombine.high %v459_v34, %v471_v35  ;;  %v6530_v51 = vcombine.high %v460_v36, %v472_v37  ;;  %v414_v34 = vld [vmem:[#allocation2 + $0x1b8] sm:$0xff] }
 0x119   : > { %1825 = vmatprep.subr.bf16.mxu0 %v6596_v55  ;;  %1876 = vmatprep.subr.bf16.mxu1 %v6598_v56  ;;  %v6529_v55 = vcombine.low %v460_v36, %v472_v37  ;;  %v507_v56 = vld [vmem:[#allocation2 + $0x4a0] sm:$0xff]  ;;  %v1668_v5 = vsel %vm329_vm3, %v6625_v53, 0  ;;  %v426_v35 = vld [vmem:[#allocation2 + $0x218] sm:$0xff]  ;;  %v6460_v36 = vcombine.high %v389_v26, %v401_v27  ;;  %v6462_v37 = vcombine.high %v390_v28, %v402_v29 }
 0x11a   : > { %v6575_v17 = vcombine.low %v507_v56, %v519_v58  ;;  %v474_v53 = vld [vmem:[#allocation2 + $0x398] sm:$0xff] }
 0x11c   : > { %1826 = vmatpush1.bf16.msra.mxu0 %v6595_v59  ;;  %1877 = vmatpush1.bf16.msra.mxu1 %v6597_v60  ;;  %v508_v59 = vld [vmem:[#allocation2 + $0x4a8] sm:$0xff]  ;;  %v6552_v60 = vcombine.high %v483_v45, %v495_v46 }
 0x11d   : > { %6645 = vmatprep.subr.msk.bf16.mxu0 %vm329_vm3, %v6620_v6  ;;  %6648 = vmatprep.subr.msk.bf16.mxu1 %vm329_vm3, %v6622_v8  ;;  %v6551_v6 = vcombine.low %v483_v45, %v495_v46  ;;  %v6553_v8 = vcombine.low %v484_v47, %v496_v48  ;;  %v6577_v18 = vcombine.low %v508_v59, %v520_v0  ;;  %v450_v45 = vld [vmem:[#allocation2 + $0x2d8] sm:$0xff] }
 0x11e   : > { %v6485_v47 = vcombine.low %v414_v34, %v426_v35 }
 0x120   : > { %1828 = vmatpush1.bf16.msra.mxu0 %v1650_v12  ;;  %1879 = vmatpush1.bf16.msra.mxu1 %v1656_v14  ;;  %v532_v12 = vld [vmem:[#allocation2 + $0x568] sm:$0xff] }
 0x121   : > { %1913 = vmatprep.subr.bf16.mxu0 %v6432_v15  ;;  %1964 = vmatprep.subr.bf16.mxu1 %v6434_v16  ;;  %v544_v14 = vld [vmem:[#allocation2 + $0x5c8] sm:$0xff]  ;;  %v6576_v15 = vcombine.high %v507_v56, %v519_v58  ;;  %v6578_v16 = vcombine.high %v508_v59, %v520_v0  ;;  %v6534_v58 = vcombine.high %v462_v52, %v474_v53  ;;  %v485_v59 = vld [vmem:[#allocation2 + $0x3f0] sm:$0xff]  ;;  %v498_v0 = vld [vmem:[#allocation2 + $0x458] sm:$0xff] }
 0x122   : > { %v6602_v63 = vcombine.high %v532_v12, %v544_v14 }
 0x123   : > { %1844 = vmatmul.mubr.bf16.vlgmr.msra.gmra.mrb[8].mxu0 %v8211_v4  ;;  %1895 = vmatmul.mubr.bf16.vlgmr.msra.gmra.mrb[8].mxu1 %v8211_v4 }
 0x124   : > { %6647 = vmatprep.mubr.msk.bf16.mxu0 %vm1631_vm7, %v8225_v2  ;;  %6650 = vmatprep.mubr.msk.bf16.mxu1 %vm1631_vm7, %v8225_v2 }
 0x125   : > { %1914 = vmatpush1.bf16.msra.mxu0 %v6431_v10  ;;  %1965 = vmatpush1.bf16.msra.mxu1 %v6433_v1  ;;  %v6599_v10 = vcombine.low %v531_v9, %v543_v11  ;;  %v6601_v1 = vcombine.low %v532_v12, %v544_v14  ;;  %v509_v9 = vld [vmem:[#allocation2 + $0x4b0] sm:$0xff]  ;;  %v510_v12 = vld [vmem:[#allocation2 + $0x4b8] sm:$0xff] }
 0x126   : > { %1915 = vmatprep.subr.bf16.mxu0 %v6456_v21  ;;  %1966 = vmatprep.subr.bf16.mxu1 %v6458_v22  ;;  %v6624_v21 = vcombine.high %v8257_v40, %v8259_v41  ;;  %v6626_v22 = vcombine.high %v8261_v42, %v568_v49  ;;  %v437_v40 = vld [vmem:[#allocation2 + $0x270] sm:$0xff]  ;;  %v522_v14 = vld [vmem:[#allocation2 + $0x518] sm:$0xff] }
 0x127   : > { %v449_v41 = vld [vmem:[#allocation2 + $0x2d0] sm:$0xff] }
 0x128   : > { %v6508_v48 = vcombine.high %v437_v40, %v449_v41  ;;  %v521_v11 = vld [vmem:[#allocation2 + $0x510] sm:$0xff] }
 0x129   : > { %1916 = vmatpush1.bf16.msra.mxu0 %v6455_v24  ;;  %1967 = vmatpush1.bf16.msra.mxu1 %v6457_v25  ;;  %v6436_v24 = vcombine.high %v365_v7, %v377_v13  ;;  %v6438_v25 = vcombine.high %v366_v19, %v378_v20 }
 0x12a   : > { %1917 = vmatprep.subr.bf16.mxu0 %v6480_v30  ;;  %1968 = vmatprep.subr.bf16.mxu1 %v6482_v31  ;;  %v6435_v30 = vcombine.low %v365_v7, %v377_v13  ;;  %v6437_v31 = vcombine.low %v366_v19, %v378_v20  ;;  %v6579_v7 = vcombine.low %v509_v9, %v521_v11 }
 0x12b   : > { %1854 = vmatmul.mubr.bf16.gmra.mrb[12].mxu0 %v8233_v23  ;;  %1905 = vmatmul.mubr.bf16.gmra.mrb[12].mxu1 %v8233_v23  ;;  %v6581_v13 = vcombine.low %v510_v12, %v522_v14 }
 0x12c   : > { %6652 = vmatprep.mubr.msk.bf16.mxu0 %vm1631_vm7, %v8202_v57  ;;  %6655 = vmatprep.mubr.msk.bf16.mxu1 %vm1631_vm7, %v8202_v57 }
 0x12d   : > { %1918 = vmatpush1.bf16.msra.mxu0 %v6479_v32  ;;  %1969 = vmatpush1.bf16.msra.mxu1 %v6481_v33  ;;  %v413_v32 = vld [vmem:[#allocation2 + $0x1b0] sm:$0xff] }
 0x12e   : > { %1919 = vmatprep.subr.bf16.mxu0 %v6504_v38  ;;  %1970 = vmatprep.subr.bf16.mxu1 %v6506_v39  ;;  %v425_v33 = vld [vmem:[#allocation2 + $0x210] sm:$0xff]  ;;  %v6459_v38 = vcombine.low %v389_v26, %v401_v27  ;;  %v6461_v39 = vcombine.low %v390_v28, %v402_v29 }
 0x12f   : > { %v6484_v42 = vcombine.high %v413_v32, %v425_v33  ;;  %v6483_v46 = vcombine.low %v413_v32, %v425_v33  ;;  %v367_v32 = vld [vmem:[#allocation2 + $0x40] sm:$0xff] }
 0x130   : > { %v379_v33 = vld [vmem:[#allocation2 + $0xa0] sm:$0xff] }
 0x131   : > { %1920 = vmatpush1.bf16.msra.mxu0 %v6503_v43  ;;  %1971 = vmatpush1.bf16.msra.mxu1 %v6505_v44  ;;  %v6486_v43 = vcombine.high %v414_v34, %v426_v35  ;;  %v438_v44 = vld [vmem:[#allocation2 + $0x278] sm:$0xff]  ;;  %v368_v34 = vld [vmem:[#allocation2 + $0x48] sm:$0xff] }
 0x132   : > { %1921 = vmatprep.subr.bf16.mxu0 %v6528_v50  ;;  %1972 = vmatprep.subr.bf16.mxu1 %v6530_v51  ;;  %v6510_v49 = vcombine.high %v438_v44, %v450_v45  ;;  %v461_v50 = vld [vmem:[#allocation2 + $0x330] sm:$0xff]  ;;  %v380_v35 = vld [vmem:[#allocation2 + $0xa8] sm:$0xff] }
 0x133   : > { %v473_v51 = vld [vmem:[#allocation2 + $0x390] sm:$0xff] }
 0x134   : > { %v6532_v56 = vcombine.high %v461_v50, %v473_v51 }
 0x135   : > { %1922 = vmatpush1.bf16.msra.mxu0 %v6527_v54  ;;  %1973 = vmatpush1.bf16.msra.mxu1 %v6529_v55  ;;  %v6507_v54 = vcombine.low %v437_v40, %v449_v41  ;;  %v6509_v55 = vcombine.low %v438_v44, %v450_v45  ;;  %v391_v40 = vld [vmem:[#allocation2 + $0x100] sm:$0xff]  ;;  %v6439_v44 = vcombine.low %v367_v32, %v379_v33 }
 0x136   : > { %1923 = vmatprep.subr.bf16.mxu0 %v6552_v60  ;;  %1974 = vmatprep.subr.bf16.mxu1 %v6554_v61  ;;  %v497_v60 = vld [vmem:[#allocation2 + $0x450] sm:$0xff]  ;;  %v486_v61 = vld [vmem:[#allocation2 + $0x3f8] sm:$0xff]  ;;  %v403_v41 = vld [vmem:[#allocation2 + $0x160] sm:$0xff]  ;;  %v6441_v45 = vcombine.low %v368_v34, %v380_v35 }
 0x139   : > { %1924 = vmatpush1.bf16.msra.mxu0 %v6551_v6  ;;  %1975 = vmatpush1.bf16.msra.mxu1 %v6553_v8  ;;  %v6556_v6 = vcombine.high %v485_v59, %v497_v60  ;;  %v6558_v8 = vcombine.high %v486_v61, %v498_v0 }
 0x13a   : > { %1925 = vmatprep.subr.bf16.mxu0 %v6576_v15  ;;  %1976 = vmatprep.subr.bf16.mxu1 %v6578_v16  ;;  %v6555_v15 = vcombine.low %v485_v59, %v497_v60  ;;  %v6557_v16 = vcombine.low %v486_v61, %v498_v0  ;;  %v440_v59 = vld [vmem:[#allocation2 + $0x288] sm:$0xff] }
 0x13b   : > { %v452_v60 = vld [vmem:[#allocation2 + $0x2e8] sm:$0xff] }
 0x13d   : > { %1926 = vmatpush1.bf16.msra.mxu0 %v6575_v17  ;;  %1977 = vmatpush1.bf16.msra.mxu1 %v6577_v18  ;;  %v6580_v17 = vcombine.high %v509_v9, %v521_v11  ;;  %v6582_v18 = vcombine.high %v510_v12, %v522_v14  ;;  %v464_v9 = vld [vmem:[#allocation2 + $0x348] sm:$0xff]  ;;  %v6513_v14 = vcombine.low %v440_v59, %v452_v60 }
 0x13e   : > { %1927 = vmatprep.subr.bf16.mxu0 %v6600_v62  ;;  %1978 = vmatprep.subr.bf16.mxu1 %v6602_v63  ;;  %v533_v62 = vld [vmem:[#allocation2 + $0x570] sm:$0xff]  ;;  %v476_v11 = vld [vmem:[#allocation2 + $0x3a8] sm:$0xff] }
 0x13f   : > { %v545_v63 = vld [vmem:[#allocation2 + $0x5d0] sm:$0xff] }
 0x140   : > { %v6604_v19 = vcombine.high %v533_v62, %v545_v63  ;;  %v6603_v26 = vcombine.low %v533_v62, %v545_v63  ;;  %v488_v62 = vld [vmem:[#allocation2 + $0x408] sm:$0xff] }
 0x141   : > { %1928 = vmatpush1.bf16.msra.mxu0 %v6599_v10  ;;  %1979 = vmatpush1.bf16.msra.mxu1 %v6601_v1  ;;  %v534_v10 = vld [vmem:[#allocation2 + $0x578] sm:$0xff]  ;;  %v500_v63 = vld [vmem:[#allocation2 + $0x468] sm:$0xff] }
 0x142   : > { %6651 = vmatprep.subr.msk.bf16.mxu0 %vm329_vm3, %v6624_v21  ;;  %6654 = vmatprep.subr.msk.bf16.mxu1 %vm329_vm3, %v6626_v22  ;;  %v546_v1 = vld [vmem:[#allocation2 + $0x5d8] sm:$0xff]  ;;  %v557_v21 = vld [vmem:[#allocation2 + $0x630] sm:$0xff] }
 0x143   : > { %v6606_v20 = vcombine.high %v534_v10, %v546_v1  ;;  %v569_v22 = vld [vmem:[#allocation2 + $0x690] sm:$0x33]  ;;  %v6605_v27 = vcombine.low %v534_v10, %v546_v1  ;;  %v6537_v1 = vcombine.low %v464_v9, %v476_v11 }
 0x144   : > { %v6628_v28 = vcombine.high %v557_v21, %v569_v22 }
 0x145   : > { %1930 = vmatpush1.bf16.msra.mxu0 %v1662_v3  ;;  %1981 = vmatpush1.bf16.msra.mxu1 %v1668_v5  ;;  %v6531_v3 = vcombine.low %v461_v50, %v473_v51  ;;  %v6533_v5 = vcombine.low %v462_v52, %v474_v53  ;;  %v416_v50 = vld [vmem:[#allocation2 + $0x1c8] sm:$0xff]  ;;  %v6463_v52 = vcombine.low %v391_v40, %v403_v41 }
 0x146   : > { %2015 = vmatprep.subr.bf16.mxu0 %v6436_v24  ;;  %2066 = vmatprep.subr.bf16.mxu1 %v6438_v25  ;;  %v558_v24 = vld [vmem:[#allocation2 + $0x638] sm:$0xff]  ;;  %v428_v51 = vld [vmem:[#allocation2 + $0x228] sm:$0xff] }
 0x147   : > { %v570_v25 = vld [vmem:[#allocation2 + $0x698] sm:$0x33]  ;;  %v6489_v0 = vcombine.low %v416_v50, %v428_v51 }
 0x148   : > { %1946 = vmatmul.mubr.bf16.vlgmr.msra.gmra.mrb[16].mxu0 %v8211_v4  ;;  %1997 = vmatmul.mubr.bf16.vlgmr.msra.gmra.mrb[16].mxu1 %v8211_v4  ;;  %v6630_v29 = vcombine.high %v558_v24, %v570_v25 }
 0x149   : > { %6653 = vmatprep.mubr.msk.bf16.mxu0 %vm1631_vm7, %v8225_v2  ;;  %6656 = vmatprep.mubr.msk.bf16.mxu1 %vm1631_vm7, %v8225_v2 }
 0x14a   : > { %2016 = vmatpush1.bf16.msra.mxu0 %v6435_v30  ;;  %2067 = vmatpush1.bf16.msra.mxu1 %v6437_v31  ;;  %v6627_v30 = vcombine.low %v557_v21, %v569_v22  ;;  %v6629_v31 = vcombine.low %v558_v24, %v570_v25  ;;  %v512_v21 = vld [vmem:[#allocation2 + $0x4c8] sm:$0xff]  ;;  %v6561_v25 = vcombine.low %v488_v62, %v500_v63 }
 0x14b   : > { %2017 = vmatprep.subr.bf16.mxu0 %v6460_v36  ;;  %2068 = vmatprep.subr.bf16.mxu1 %v6462_v37  ;;  %v524_v22 = vld [vmem:[#allocation2 + $0x528] sm:$0xff] }
 0x14c   : > { %v1674_v36 = vsel %vm329_vm3, %v6627_v30, 0  ;;  %v1680_v37 = vsel %vm329_vm3, %v6629_v31, 0  ;;  %v536_v30 = vld [vmem:[#allocation2 + $0x588] sm:$0xff] }
 0x14d   : > { %v548_v31 = vld [vmem:[#allocation2 + $0x5e8] sm:$0xff] }
 0x14e   : > { %2018 = vmatpush1.bf16.msra.mxu0 %v6459_v38  ;;  %2069 = vmatpush1.bf16.msra.mxu1 %v6461_v39  ;;  %v6440_v38 = vcombine.high %v367_v32, %v379_v33  ;;  %v6442_v39 = vcombine.high %v368_v34, %v380_v35  ;;  %v6585_v33 = vcombine.low %v512_v21, %v524_v22 }
 0x14f   : > { %2019 = vmatprep.subr.bf16.mxu0 %v6484_v42  ;;  %2070 = vmatprep.subr.bf16.mxu1 %v6486_v43  ;;  %v392_v42 = vld [vmem:[#allocation2 + $0x108] sm:$0xff]  ;;  %v6610_v35 = vcombine.high %v536_v30, %v548_v31 }
 0x150   : > { %1956 = vmatmul.mubr.bf16.gmra.mrb[20].mxu0 %v8233_v23  ;;  %2007 = vmatmul.mubr.bf16.gmra.mrb[20].mxu1 %v8233_v23  ;;  %v404_v43 = vld [vmem:[#allocation2 + $0x168] sm:$0xff] }
 0x151   : > { %6658 = vmatprep.mubr.msk.bf16.mxu0 %vm1631_vm7, %v8202_v57  ;;  %6661 = vmatprep.mubr.msk.bf16.mxu1 %vm1631_vm7, %v8202_v57  ;;  %v6465_v53 = vcombine.low %v392_v42, %v404_v43 }
 0x152   : > { %2020 = vmatpush1.bf16.msra.mxu0 %v6483_v46  ;;  %2071 = vmatpush1.bf16.msra.mxu1 %v6485_v47  ;;  %v6464_v46 = vcombine.high %v391_v40, %v403_v41  ;;  %v6466_v47 = vcombine.high %v392_v42, %v404_v43  ;;  %v6609_v41 = vcombine.low %v536_v30, %v548_v31 }
 0x153   : > { %2021 = vmatprep.subr.bf16.mxu0 %v6508_v48  ;;  %2072 = vmatprep.subr.bf16.mxu1 %v6510_v49  ;;  %v415_v48 = vld [vmem:[#allocation2 + $0x1c0] sm:$0xff] }
 0x154   : > { %v427_v49 = vld [vmem:[#allocation2 + $0x220] sm:$0xff] }
 0x155   : > { %v6487_v61 = vcombine.low %v415_v48, %v427_v49 }
 0x156   : > { %2022 = vmatpush1.bf16.msra.mxu0 %v6507_v54  ;;  %2073 = vmatpush1.bf16.msra.mxu1 %v6509_v55  ;;  %v6488_v54 = vcombine.high %v415_v48, %v427_v49  ;;  %v6490_v55 = vcombine.high %v416_v50, %v428_v51  ;;  %v370_v48 = vld [vmem:[#allocation2 + $0x58] sm:$0xff] }
 0x157   : > { %2023 = vmatprep.subr.bf16.mxu0 %v6532_v56  ;;  %2074 = vmatprep.subr.bf16.mxu1 %v6534_v58  ;;  %v439_v56 = vld [vmem:[#allocation2 + $0x280] sm:$0xff]  ;;  %v382_v49 = vld [vmem:[#allocation2 + $0xb8] sm:$0xff] }
 0x158   : > { %v451_v58 = vld [vmem:[#allocation2 + $0x2e0] sm:$0xff] }
 0x159   : > { %v6511_v12 = vcombine.low %v439_v56, %v451_v58 }
 0x15a   : > { %2024 = vmatpush1.bf16.msra.mxu0 %v6531_v3  ;;  %2075 = vmatpush1.bf16.msra.mxu1 %v6533_v5  ;;  %v6512_v3 = vcombine.high %v439_v56, %v451_v58  ;;  %v6514_v5 = vcombine.high %v440_v59, %v452_v60  ;;  %v394_v56 = vld [vmem:[#allocation2 + $0x118] sm:$0xff]  ;;  %v6445_v60 = vcombine.low %v370_v48, %v382_v49 }
 0x15b   : > { %2025 = vmatprep.subr.bf16.mxu0 %v6556_v6  ;;  %2076 = vmatprep.subr.bf16.mxu1 %v6558_v8  ;;  %v463_v6 = vld [vmem:[#allocation2 + $0x340] sm:$0xff]  ;;  %v406_v58 = vld [vmem:[#allocation2 + $0x178] sm:$0xff] }
 0x15c   : > { %v475_v8 = vld [vmem:[#allocation2 + $0x3a0] sm:$0xff] }
 0x15d   : > { %v6535_v10 = vcombine.low %v463_v6, %v475_v8 }
 0x15e   : > { %2026 = vmatpush1.bf16.msra.mxu0 %v6555_v15  ;;  %2077 = vmatpush1.bf16.msra.mxu1 %v6557_v16  ;;  %v6536_v15 = vcombine.high %v463_v6, %v475_v8  ;;  %v6538_v16 = vcombine.high %v464_v9, %v476_v11  ;;  %v418_v6 = vld [vmem:[#allocation2 + $0x1d8] sm:$0xff]  ;;  %v6469_v11 = vcombine.low %v394_v56, %v406_v58 }
 0x15f   : > { %2027 = vmatprep.subr.bf16.mxu0 %v6580_v17  ;;  %2078 = vmatprep.subr.bf16.mxu1 %v6582_v18  ;;  %v487_v17 = vld [vmem:[#allocation2 + $0x400] sm:$0xff]  ;;  %v430_v8 = vld [vmem:[#allocation2 + $0x238] sm:$0xff] }
 0x160   : > { %v499_v18 = vld [vmem:[#allocation2 + $0x460] sm:$0xff] }
 0x161   : > { %v6559_v24 = vcombine.low %v487_v17, %v499_v18 }
 0x162   : > { %2028 = vmatpush1.bf16.msra.mxu0 %v6579_v7  ;;  %2079 = vmatpush1.bf16.msra.mxu1 %v6581_v13  ;;  %v6560_v7 = vcombine.high %v487_v17, %v499_v18  ;;  %v6562_v13 = vcombine.high %v488_v62, %v500_v63  ;;  %v442_v17 = vld [vmem:[#allocation2 + $0x298] sm:$0xff]  ;;  %v6493_v63 = vcombine.low %v418_v6, %v430_v8 }
 0x163   : > { %2029 = vmatprep.subr.bf16.mxu0 %v6604_v19  ;;  %2080 = vmatprep.subr.bf16.mxu1 %v6606_v20  ;;  %v511_v19 = vld [vmem:[#allocation2 + $0x4c0] sm:$0xff]  ;;  %v454_v18 = vld [vmem:[#allocation2 + $0x2f8] sm:$0xff] }
 0x164   : > { %v523_v20 = vld [vmem:[#allocation2 + $0x520] sm:$0xff] }
 0x165   : > { %v6583_v32 = vcombine.low %v511_v19, %v523_v20 }
 0x166   : > { %2030 = vmatpush1.bf16.msra.mxu0 %v6603_v26  ;;  %2081 = vmatpush1.bf16.msra.mxu1 %v6605_v27  ;;  %v6584_v26 = vcombine.high %v511_v19, %v523_v20  ;;  %v6586_v27 = vcombine.high %v512_v21, %v524_v22  ;;  %v466_v19 = vld [vmem:[#allocation2 + $0x358] sm:$0xff]  ;;  %v6517_v22 = vcombine.low %v442_v17, %v454_v18 }
 0x167   : > { %6657 = vmatprep.subr.msk.bf16.mxu0 %vm329_vm3, %v6628_v28  ;;  %6660 = vmatprep.subr.msk.bf16.mxu1 %vm329_vm3, %v6630_v29  ;;  %v535_v28 = vld [vmem:[#allocation2 + $0x580] sm:$0xff]  ;;  %v478_v20 = vld [vmem:[#allocation2 + $0x3b8] sm:$0xff] }
 0x168   : > { %v547_v29 = vld [vmem:[#allocation2 + $0x5e0] sm:$0xff]  ;;  %v6541_v31 = vcombine.low %v466_v19, %v478_v20 }
 0x169   : > { %v6608_v34 = vcombine.high %v535_v28, %v547_v29  ;;  %v6607_v40 = vcombine.low %v535_v28, %v547_v29  ;;  %v490_v28 = vld [vmem:[#allocation2 + $0x418] sm:$0xff] }
 0x16a   : > { %2032 = vmatpush1.bf16.msra.mxu0 %v1674_v36  ;;  %2083 = vmatpush1.bf16.msra.mxu1 %v1680_v37  ;;  %v559_v36 = vld [vmem:[#allocation2 + $0x640] sm:$0xff]  ;;  %v502_v29 = vld [vmem:[#allocation2 + $0x478] sm:$0xff] }
 0x16b   : > { %2117 = vmatprep.subr.bf16.mxu0 %v6440_v38  ;;  %2168 = vmatprep.subr.bf16.mxu1 %v6442_v39  ;;  %v571_v37 = vld [vmem:[#allocation2 + $0x6a0] sm:$0x33]  ;;  %v560_v38 = vld [vmem:[#allocation2 + $0x648] sm:$0xff] }
 0x16c   : > { %v572_v39 = vld [vmem:[#allocation2 + $0x6a8] sm:$0x33]  ;;  %v6632_v42 = vcombine.high %v559_v36, %v571_v37 }
 0x16d   : > { %2048 = vmatmul.mubr.bf16.vlgmr.msra.gmra.mrb[24].mxu0 %v8211_v4  ;;  %2099 = vmatmul.mubr.bf16.vlgmr.msra.gmra.mrb[24].mxu1 %v8211_v4  ;;  %v6634_v43 = vcombine.high %v560_v38, %v572_v39 }
 0x16e   : > { %6659 = vmatprep.mubr.msk.bf16.mxu0 %vm1631_vm7, %v8225_v2  ;;  %6662 = vmatprep.mubr.msk.bf16.mxu1 %vm1631_vm7, %v8225_v2 }
 0x16f   : > { %2118 = vmatpush1.bf16.msra.mxu0 %v6439_v44  ;;  %2169 = vmatpush1.bf16.msra.mxu1 %v6441_v45  ;;  %v6631_v44 = vcombine.low %v559_v36, %v571_v37  ;;  %v6633_v45 = vcombine.low %v560_v38, %v572_v39  ;;  %v526_v36 = vld [vmem:[#allocation2 + $0x538] sm:$0xff]  ;;  %v6565_v38 = vcombine.low %v490_v28, %v502_v29 }
 0x170   : > { %2119 = vmatprep.subr.bf16.mxu0 %v6464_v46  ;;  %2170 = vmatprep.subr.bf16.mxu1 %v6466_v47  ;;  %v369_v46 = vld [vmem:[#allocation2 + $0x50] sm:$0xff] }
 0x171   : > { %v381_v47 = vld [vmem:[#allocation2 + $0xb0] sm:$0xff]  ;;  %v1686_v50 = vsel %vm329_vm3, %v6631_v44, 0  ;;  %v1692_v51 = vsel %vm329_vm3, %v6633_v45, 0  ;;  %v550_v44 = vld [vmem:[#allocation2 + $0x5f8] sm:$0xff] }
 0x172   : > { %v6443_v59 = vcombine.low %v369_v46, %v381_v47 }
 0x173   : > { %2120 = vmatpush1.bf16.msra.mxu0 %v6463_v52  ;;  %2171 = vmatpush1.bf16.msra.mxu1 %v6465_v53  ;;  %v6444_v52 = vcombine.high %v369_v46, %v381_v47  ;;  %v6446_v53 = vcombine.high %v370_v48, %v382_v49  ;;  %v561_v49 = vld [vmem:[#allocation2 + $0x650] sm:$0xff] }
 0x174   : > { %2121 = vmatprep.subr.bf16.mxu0 %v6488_v54  ;;  %2172 = vmatprep.subr.bf16.mxu1 %v6490_v55  ;;  %v393_v54 = vld [vmem:[#allocation2 + $0x110] sm:$0xff] }
 0x175   : > { %2058 = vmatmul.mubr.bf16.gmra.mrb[28].mxu0 %v8233_v23  ;;  %2109 = vmatmul.mubr.bf16.gmra.mrb[28].mxu1 %v8233_v23  ;;  %v405_v55 = vld [vmem:[#allocation2 + $0x170] sm:$0xff] }
 0x176   : > { %6664 = vmatprep.mubr.msk.bf16.mxu0 %vm1631_vm7, %v8202_v57  ;;  %6667 = vmatprep.mubr.msk.bf16.mxu1 %vm1631_vm7, %v8202_v57  ;;  %v6467_v9 = vcombine.low %v393_v54, %v405_v55 }
 0x177   : > { %2122 = vmatpush1.bf16.msra.mxu0 %v6487_v61  ;;  %2173 = vmatpush1.bf16.msra.mxu1 %v6489_v0  ;;  %v6468_v61 = vcombine.high %v393_v54, %v405_v55  ;;  %v6470_v0 = vcombine.high %v394_v56, %v406_v58 }
 0x178   : > { %2123 = vmatprep.subr.bf16.mxu0 %v6512_v3  ;;  %2174 = vmatprep.subr.bf16.mxu1 %v6514_v5  ;;  %v417_v3 = vld [vmem:[#allocation2 + $0x1d0] sm:$0xff] }
 0x179   : > { %v429_v5 = vld [vmem:[#allocation2 + $0x230] sm:$0xff] }
 0x17a   : > { %v6491_v62 = vcombine.low %v417_v3, %v429_v5 }
 0x17b   : > { %2124 = vmatpush1.bf16.msra.mxu0 %v6511_v12  ;;  %2175 = vmatpush1.bf16.msra.mxu1 %v6513_v14  ;;  %v6492_v12 = vcombine.high %v417_v3, %v429_v5  ;;  %v6494_v14 = vcombine.high %v418_v6, %v430_v8 }
 0x17c   : > { %2125 = vmatprep.subr.bf16.mxu0 %v6536_v15  ;;  %2176 = vmatprep.subr.bf16.mxu1 %v6538_v16  ;;  %v441_v15 = vld [vmem:[#allocation2 + $0x290] sm:$0xff] }
 0x17d   : > { %v453_v16 = vld [vmem:[#allocation2 + $0x2f0] sm:$0xff] }
 0x17e   : > { %v6515_v21 = vcombine.low %v441_v15, %v453_v16 }
 0x17f   : > { %2126 = vmatpush1.bf16.msra.mxu0 %v6535_v10  ;;  %2177 = vmatpush1.bf16.msra.mxu1 %v6537_v1  ;;  %v6516_v10 = vcombine.high %v441_v15, %v453_v16  ;;  %v6518_v1 = vcombine.high %v442_v17, %v454_v18 }
 0x180   : > { %2127 = vmatprep.subr.bf16.mxu0 %v6560_v7  ;;  %2178 = vmatprep.subr.bf16.mxu1 %v6562_v13  ;;  %v465_v7 = vld [vmem:[#allocation2 + $0x350] sm:$0xff] }
 0x181   : > { %v477_v13 = vld [vmem:[#allocation2 + $0x3b0] sm:$0xff] }
 0x182   : > { %v6539_v30 = vcombine.low %v465_v7, %v477_v13 }
 0x183   : > { %2128 = vmatpush1.bf16.msra.mxu0 %v6559_v24  ;;  %2179 = vmatpush1.bf16.msra.mxu1 %v6561_v25  ;;  %v6540_v24 = vcombine.high %v465_v7, %v477_v13  ;;  %v6542_v25 = vcombine.high %v466_v19, %v478_v20 }
 0x184   : > { %2129 = vmatprep.subr.bf16.mxu0 %v6584_v26  ;;  %2180 = vmatprep.subr.bf16.mxu1 %v6586_v27  ;;  %v489_v26 = vld [vmem:[#allocation2 + $0x410] sm:$0xff] }
 0x185   : > { %v501_v27 = vld [vmem:[#allocation2 + $0x470] sm:$0xff] }
 0x186   : > { %v6563_v37 = vcombine.low %v489_v26, %v501_v27 }
 0x187   : > { %2130 = vmatpush1.bf16.msra.mxu0 %v6583_v32  ;;  %2181 = vmatpush1.bf16.msra.mxu1 %v6585_v33  ;;  %v6564_v32 = vcombine.high %v489_v26, %v501_v27  ;;  %v513_v33 = vld [vmem:[#allocation2 + $0x4d0] sm:$0xff] }
 0x188   : > { %2131 = vmatprep.subr.bf16.mxu0 %v6608_v34  ;;  %2182 = vmatprep.subr.bf16.mxu1 %v6610_v35  ;;  %v525_v34 = vld [vmem:[#allocation2 + $0x530] sm:$0xff]  ;;  %v514_v35 = vld [vmem:[#allocation2 + $0x4d8] sm:$0xff] }
 0x189   : > { %v6588_v39 = vcombine.high %v513_v33, %v525_v34  ;;  %v6587_v45 = vcombine.low %v513_v33, %v525_v34  ;;  %v6589_v46 = vcombine.low %v514_v35, %v526_v36 }
 0x18b   : > { %2132 = vmatpush1.bf16.msra.mxu0 %v6607_v40  ;;  %2183 = vmatpush1.bf16.msra.mxu1 %v6609_v41  ;;  %v6590_v40 = vcombine.high %v514_v35, %v526_v36  ;;  %v537_v41 = vld [vmem:[#allocation2 + $0x590] sm:$0xff] }
 0x18c   : > { %6663 = vmatprep.subr.msk.bf16.mxu0 %vm329_vm3, %v6632_v42  ;;  %6666 = vmatprep.subr.msk.bf16.mxu1 %vm329_vm3, %v6634_v43  ;;  %v549_v42 = vld [vmem:[#allocation2 + $0x5f0] sm:$0xff]  ;;  %v538_v43 = vld [vmem:[#allocation2 + $0x598] sm:$0xff] }
 0x18d   : > { %v6612_v47 = vcombine.high %v537_v41, %v549_v42  ;;  %v6614_v48 = vcombine.high %v538_v43, %v550_v44  ;;  %v6613_v54 = vcombine.low %v538_v43, %v550_v44 }
 0x18f   : > { %2134 = vmatpush1.bf16.msra.mxu0 %v1686_v50  ;;  %2185 = vmatpush1.bf16.msra.mxu1 %v1692_v51  ;;  %v573_v50 = vld [vmem:[#allocation2 + $0x6b0] sm:$0x33]  ;;  %v562_v51 = vld [vmem:[#allocation2 + $0x658] sm:$0xff] }
 0x190   : > { %2219 = vmatprep.subr.bf16.mxu0 %v6444_v52  ;;  %2270 = vmatprep.subr.bf16.mxu1 %v6446_v53  ;;  %v574_v52 = vld [vmem:[#allocation2 + $0x6b8] sm:$0x33]  ;;  %v6611_v53 = vcombine.low %v537_v41, %v549_v42  ;;  %v6636_v55 = vcombine.high %v561_v49, %v573_v50  ;;  %v6635_v58 = vcombine.low %v561_v49, %v573_v50  ;;  %v7639_v49 = vld [vmem:[#allocation6 + $0x48] sm:$0xff]  }
 0x191   : > { %v6638_v56 = vcombine.high %v562_v51, %v574_v52  ;;  %v7640_v50 = vld [vmem:[#allocation6 + $0xc8] sm:$0xff]  }
 0x192   : > { %2150 = vmatmul.mubr.bf16.vlgmr.msra.gmra.mrb[32].mxu0 %v8211_v4  ;;  %2201 = vmatmul.mubr.bf16.vlgmr.msra.gmra.mrb[32].mxu1 %v8211_v4 }
 0x193   : > { %6665 = vmatprep.mubr.msk.bf16.mxu0 %vm1631_vm7, %v8225_v2  ;;  %6668 = vmatprep.mubr.msk.bf16.mxu1 %vm1631_vm7, %v8225_v2 }
 0x194   : > { %2220 = vmatpush1.bf16.msra.mxu0 %v6443_v59  ;;  %2271 = vmatpush1.bf16.msra.mxu1 %v6445_v60  ;;  %v6637_v59 = vcombine.low %v562_v51, %v574_v52  ;;  %v1698_v60 = vsel %vm329_vm3, %v6635_v58, 0  ;;  %v7641_v51 = vld [vmem:[#allocation6 + $0x8] sm:$0xff]   ;;  %v7647_v58 = vld [vmem:[#allocation6 + $0x58] sm:$0xff]  }
 0x195   : > { %2221 = vmatprep.subr.bf16.mxu0 %v6468_v61  ;;  %2272 = vmatprep.subr.bf16.mxu1 %v6470_v0  ;;  %v7642_v52 = vld [vmem:[#allocation6 + $0x88] sm:$0xff]  }
 0x196   : > { %v1704_v61 = vsel %vm329_vm3, %v6637_v59, 0  ;;  %v7648_v59 = vld [vmem:[#allocation6 + $0xd8] sm:$0xff]  }
 0x198   : > { %2222 = vmatpush1.bf16.msra.mxu0 %v6467_v9  ;;  %2273 = vmatpush1.bf16.msra.mxu1 %v6469_v11 }
 0x199   : > { %2223 = vmatprep.subr.bf16.mxu0 %v6492_v12  ;;  %2274 = vmatprep.subr.bf16.mxu1 %v6494_v14 }
 0x19a   : > { %2160 = vmatmul.mubr.bf16.gmra.mrb[36].mxu0 %v8233_v23  ;;  %2211 = vmatmul.mubr.bf16.gmra.mrb[36].mxu1 %v8233_v23 }
 0x19b   : > { %6670 = vmatprep.mubr.msk.bf16.mxu0 %vm1631_vm7, %v8202_v57  ;;  %6673 = vmatprep.mubr.msk.bf16.mxu1 %vm1631_vm7, %v8202_v57  ;;  %v6566_v57 = vcombine.high %v490_v28, %v502_v29 }
 0x19c   : > { %2224 = vmatpush1.bf16.msra.mxu0 %v6491_v62  ;;  %2275 = vmatpush1.bf16.msra.mxu1 %v6493_v63 }
 0x19d   : > { %2225 = vmatprep.subr.bf16.mxu0 %v6516_v10  ;;  %2276 = vmatprep.subr.bf16.mxu1 %v6518_v1 }
 0x1a0   : > { %2226 = vmatpush1.bf16.msra.mxu0 %v6515_v21  ;;  %2277 = vmatpush1.bf16.msra.mxu1 %v6517_v22 }
 0x1a1   : > { %2227 = vmatprep.subr.bf16.mxu0 %v6540_v24  ;;  %2278 = vmatprep.subr.bf16.mxu1 %v6542_v25 }
 0x1a4   : > { %2228 = vmatpush1.bf16.msra.mxu0 %v6539_v30  ;;  %2279 = vmatpush1.bf16.msra.mxu1 %v6541_v31  ;;  %v7635_v30 = vld [vmem:[#allocation6 + $0x40] sm:$0xff]  }
 0x1a5   : > { %2229 = vmatprep.subr.bf16.mxu0 %v6564_v32  ;;  %2280 = vmatprep.subr.bf16.mxu1 %v6566_v57  ;;  %v7636_v31 = vld [vmem:[#allocation6 + $0xc0] sm:$0xff]  }
 0x1a8   : > { %2230 = vmatpush1.bf16.msra.mxu0 %v6563_v37  ;;  %2281 = vmatpush1.bf16.msra.mxu1 %v6565_v38 }
 0x1a9   : > { %2231 = vmatprep.subr.bf16.mxu0 %v6588_v39  ;;  %2282 = vmatprep.subr.bf16.mxu1 %v6590_v40 }
 0x1ac   : > { %2232 = vmatpush1.bf16.msra.mxu0 %v6587_v45  ;;  %2283 = vmatpush1.bf16.msra.mxu1 %v6589_v46 }
 0x1ad   : > { %2233 = vmatprep.subr.bf16.mxu0 %v6612_v47  ;;  %2284 = vmatprep.subr.bf16.mxu1 %v6614_v48  ;;  %v7637_v47 = vld [vmem:[#allocation6] sm:$0xff]  }
 0x1ae   : > { %v7638_v48 = vld [vmem:[#allocation6 + $0x80] sm:$0xff]  }
 0x1b0   : > { %2234 = vmatpush1.bf16.msra.mxu0 %v6611_v53  ;;  %2285 = vmatpush1.bf16.msra.mxu1 %v6613_v54  ;;  %v7643_v53 = vld [vmem:[#allocation6 + $0x50] sm:$0xff]  }
 0x1b1   : > { %6669 = vmatprep.subr.msk.bf16.mxu0 %vm329_vm3, %v6636_v55  ;;  %6672 = vmatprep.subr.msk.bf16.mxu1 %vm329_vm3, %v6638_v56  ;;  %v7644_v54 = vld [vmem:[#allocation6 + $0xd0] sm:$0xff]   ;;  %vm3196_vm3 = vcmask 1045508  }
 0x1b2   : > { %v7645_v55 = vld [vmem:[#allocation6 + $0x10] sm:$0xff]   ;;  %vm8876_vm4 = vmor %vm3195_vm2, %vm3196_vm3 }
 0x1b3   : > { %v7646_v56 = vld [vmem:[#allocation6 + $0x90] sm:$0xff]  }
 0x1b4   : > { %2236 = vmatpush1.bf16.msra.mxu0 %v1698_v60  ;;  %2287 = vmatpush1.bf16.msra.mxu1 %v1704_v61  ;;  %v7649_v60 = vld [vmem:[#allocation6 + $0x18] sm:$0xff]  }
 0x1b5   : > { %7043 = vmatprep.subr.bf16.mxu0 %v7635_v30  ;;  %7083 = vmatprep.subr.bf16.mxu1 %v7636_v31  ;;  %v7650_v61 = vld [vmem:[#allocation6 + $0x98] sm:$0xff]   ;;  %v7659_v30 = vld [vmem:[#allocation6 + $0x70] sm:$0xff]  }
 0x1b6   : > { %v7660_v31 = vld [vmem:[#allocation6 + $0xf0] sm:$0xff]  }
 0x1b7   : > { %2252 = vmatmul.mubr.bf16.vlgmr.msra.gmra.mrb[40].mxu0 %v8211_v4  ;;  %2303 = vmatmul.mubr.bf16.vlgmr.msra.gmra.mrb[40].mxu1 %v8211_v4 }
 0x1b8   : > { %6671 = vmatprep.mubr.msk.bf16.mxu0 %vm1631_vm7, %v8225_v2  ;;  %6674 = vmatprep.mubr.msk.bf16.mxu1 %vm1631_vm7, %v8225_v2  ;;  %vm6276_vm7 = vcmask 1043459  }
 0x1b9   : > { %7044 = vmatpush3.bf16.msra.mxu0 %v7637_v47  ;;  %7084 = vmatpush3.bf16.msra.mxu1 %v7638_v48  ;;  %v7663_v47 = vld [vmem:[#allocation6 + $0x78] sm:$0xff]  }
 0x1ba   : > { %7045 = vmatprep.subr.bf16.mxu0 %v7639_v49  ;;  %7085 = vmatprep.subr.bf16.mxu1 %v7640_v50  ;;  %v7664_v48 = vld [vmem:[#allocation6 + $0xf8] sm:$0xff]  }
 0x1bd   : > { %7046 = vmatpush3.bf16.msra.mxu0 %v7641_v51  ;;  %7086 = vmatpush3.bf16.msra.mxu1 %v7642_v52 }
 0x1be   : > { %7047 = vmatprep.subr.bf16.mxu0 %v7643_v53  ;;  %7087 = vmatprep.subr.bf16.mxu1 %v7644_v54 }
 0x1bf   : > { %2262 = vmatmul.mubr.bf16.gmra.mrb[44].mxu0 %v8233_v23  ;;  %2313 = vmatmul.mubr.bf16.gmra.mrb[44].mxu1 %v8233_v23 }
 0x1c1   : > { %7048 = vmatpush3.bf16.msra.mxu0 %v7645_v55  ;;  %7088 = vmatpush3.bf16.msra.mxu1 %v7646_v56 }
 0x1c2   : > { %7049 = vmatprep.subr.bf16.mxu0 %v7647_v58  ;;  %7089 = vmatprep.subr.bf16.mxu1 %v7648_v59  ;;  %v7665_v58 = vld [vmem:[#allocation6 + $0x38] sm:$0xff]  }
 0x1c3   : > { %v7666_v59 = vld [vmem:[#allocation6 + $0xb8] sm:$0xff]  }
 0x1c5   : > { %7050 = vmatpush3.bf16.msra.mxu0 %v7649_v60  ;;  %7090 = vmatpush3.bf16.msra.mxu1 %v7650_v61 }
 0x1d2   : > { %v8329_v0 = vpop.f32.mrb[0].mxu0  ;;  %v8331_v3 = vpop.f32.mrb[0].mxu1 }
 0x1d3   : > { %v8333_v5 = vpop.f32.mrb[1].mxu0  ;;  %v8335_v6 = vpop.f32.mrb[1].mxu1 }
 0x1d4   : > { %v8337_v8 = vpop.f32.mrb[2].mxu0  ;;  %v8339_v4 = vpop.f32.mrb[2].mxu1 }
 0x1d5   : > { %v8341_v9 = vpop.f32.mrb[3].mxu0  ;;  %v8343_v11 = vpop.f32.mrb[3].mxu1 }
 0x1da   : > { %v8345_v2 = vpop.f32.mrb[4].mxu0  ;;  %v8347_v12 = vpop.f32.mrb[4].mxu1 }
 0x1db   : > { %v8349_v23 = vpop.f32.mrb[5].mxu0  ;;  %v8351_v14 = vpop.f32.mrb[5].mxu1 }
 0x1dc   : > { %v1757_v15 = vpop.f32.mrb[6].mxu0  ;;  %v1808_v16 = vpop.f32.mrb[6].mxu1 }
 0x1dd   : > { %v1758_v17 = vpop.f32.mrb[7].mxu0  ;;  %v1809_v18 = vpop.f32.mrb[7].mxu1  ;;  %v7651_v15 = vld [vmem:[#allocation6 + $0x60] sm:$0xff]  }
 0x1de   : > { %v7652_v16 = vld [vmem:[#allocation6 + $0xe0] sm:$0xff]   ;;  %7051 = vmatprep.subr.bf16.mxu0 %v7651_v15 }
 0x1df   : > { %v7653_v17 = vld [vmem:[#allocation6 + $0x20] sm:$0xff]   ;;  %7091 = vmatprep.subr.bf16.mxu1 %v7652_v16 }
 0x1e0   : > { %v7654_v18 = vld [vmem:[#allocation6 + $0xa0] sm:$0xff]   ;;  %7052 = vmatpush3.bf16.msra.mxu0 %v7653_v17 }
 0x1e1   : > { %7092 = vmatpush3.bf16.msra.mxu1 %v7654_v18  ;;  %v7668_v16 = vld [vmem:[#allocation6 + $0x1c0] sm:$0xff]  }
 0x1f6   : > { %v8353_v62 = vpop.f32.mrb[8].mxu0  ;;  %v8355_v63 = vpop.f32.mrb[8].mxu1 }
 0x1f7   : > { %v8357_v10 = vpop.f32.mrb[9].mxu0  ;;  %v8359_v1 = vpop.f32.mrb[9].mxu1 }
 0x1f8   : > { %v8361_v7 = vpop.f32.mrb[10].mxu0  ;;  %v8363_v13 = vpop.f32.mrb[10].mxu1 }
 0x1f9   : > { %v8365_v19 = vpop.f32.mrb[11].mxu0  ;;  %v8367_v20 = vpop.f32.mrb[11].mxu1 }
 0x1fe   : > { %v8369_v21 = vpop.f32.mrb[12].mxu0  ;;  %v8371_v22 = vpop.f32.mrb[12].mxu1 }
 0x1ff   : > { %v8373_v24 = vpop.f32.mrb[13].mxu0  ;;  %v8375_v25 = vpop.f32.mrb[13].mxu1 }
 0x200   : > { %v1859_v26 = vpop.f32.mrb[14].mxu0  ;;  %v1910_v27 = vpop.f32.mrb[14].mxu1 }
 0x201   : > { %v1860_v28 = vpop.f32.mrb[15].mxu0  ;;  %v1911_v29 = vpop.f32.mrb[15].mxu1  ;;  %v7655_v26 = vld [vmem:[#allocation6 + $0x68] sm:$0xff]  }
 0x202   : > { %v7656_v27 = vld [vmem:[#allocation6 + $0xe8] sm:$0xff]   ;;  %7053 = vmatprep.subr.bf16.mxu0 %v7655_v26 }
 0x203   : > { %v7657_v28 = vld [vmem:[#allocation6 + $0x28] sm:$0xff]   ;;  %7093 = vmatprep.subr.bf16.mxu1 %v7656_v27 }
 0x204   : > { %v7658_v29 = vld [vmem:[#allocation6 + $0xa8] sm:$0xff]   ;;  %7054 = vmatpush3.bf16.msra.mxu0 %v7657_v28 }
 0x205   : > { %7094 = vmatpush3.bf16.msra.mxu1 %v7658_v29  ;;  %7055 = vmatprep.subr.bf16.mxu0 %v7659_v30 }
 0x206   : > { %7095 = vmatprep.subr.bf16.mxu1 %v7660_v31 }
 0x21b   : > { %v8377_v32 = vpop.f32.mrb[16].mxu0  ;;  %v8379_v57 = vpop.f32.mrb[16].mxu1 }
 0x21c   : > { %v8381_v33 = vpop.f32.mrb[17].mxu0  ;;  %v8383_v34 = vpop.f32.mrb[17].mxu1 }
 0x21d   : > { %v8385_v35 = vpop.f32.mrb[18].mxu0  ;;  %v8387_v36 = vpop.f32.mrb[18].mxu1 }
 0x21e   : > { %v8389_v37 = vpop.f32.mrb[19].mxu0  ;;  %v8391_v38 = vpop.f32.mrb[19].mxu1 }
 0x223   : > { %v8393_v39 = vpop.f32.mrb[20].mxu0  ;;  %v8395_v40 = vpop.f32.mrb[20].mxu1 }
 0x224   : > { %v8397_v41 = vpop.f32.mrb[21].mxu0  ;;  %v8399_v42 = vpop.f32.mrb[21].mxu1 }
 0x225   : > { %v1961_v43 = vpop.f32.mrb[22].mxu0  ;;  %v2012_v44 = vpop.f32.mrb[22].mxu1 }
 0x226   : > { %v1962_v45 = vpop.f32.mrb[23].mxu0  ;;  %v2013_v46 = vpop.f32.mrb[23].mxu1  ;;  %v7661_v43 = vld [vmem:[#allocation6 + $0x30] sm:$0xff]  }
 0x227   : > { %v7662_v46 = vld [vmem:[#allocation6 + $0xb0] sm:$0xff]   ;;  %7056 = vmatpush3.bf16.msra.mxu0 %v7661_v43  ;;  %v7979_v43 = vmov 1983009808  }
 0x228   : > { %7096 = vmatpush3.bf16.msra.mxu1 %v7662_v46  ;;  %7057 = vmatprep.subr.bf16.mxu0 %v7663_v47 }
 0x229   : > { %7097 = vmatprep.subr.bf16.mxu1 %v7664_v48 }
 0x22b   : > { %7058 = vmatpush3.bf16.msra.mxu0 %v7665_v58 }
 0x22c   : > { %7098 = vmatpush3.bf16.msra.mxu1 %v7666_v59 }
 0x22d   : > { %7163 = vmatprep.subr.bf16.mxu1 %v7668_v16 }
 0x240   : > { %v2049_v44 = vpop.f32.mrb[24].mxu0  ;;  %v2100_v45 = vpop.f32.mrb[24].mxu1 }
 0x241   : > { %v2321_v49 = vmax.f32 %v8329_v0, %v2049_v44  ;;  %v2323_v50 = vmax.f32 %v8331_v3, %v2100_v45  ;;  %v2051_v51 = vpop.f32.mrb[25].mxu0  ;;  %v2102_v52 = vpop.f32.mrb[25].mxu1  ;;  %v2380_v44 = vunpack.c.l.s4 %v7979_v43  ;;  %v2382_v45 = vlaneseq }
 0x242   : > { %v2322_v53 = vmax.f32 %v8333_v5, %v2051_v51  ;;  %v2324_v54 = vmax.f32 %v8335_v6, %v2102_v52  ;;  %v2053_v55 = vpop.f32.mrb[26].mxu0  ;;  %v2104_v56 = vpop.f32.mrb[26].mxu1  ;;  %v7667_v6 = vld [vmem:[#allocation6 + $0x140] sm:$0xff]  }
 0x243   : > { %v2333_v60 = vmax.f32 %v8337_v8, %v2053_v55  ;;  %v2335_v0 = vmax.f32 %v8339_v4, %v2104_v56  ;;  %v2055_v61 = vpop.f32.mrb[27].mxu0  ;;  %v2106_v3 = vpop.f32.mrb[27].mxu1  ;;  %7123 = vmatprep.subr.bf16.mxu0 %v7667_v6  ;;  %v2381_v46 = vunpack.c.0.s8 %v2380_v44  ;;  %v8425_v47 = vshrl.u32 %v2382_v45, 7 }
 0x244   : > { %v2334_v15 = vmax.f32 %v8341_v9, %v2055_v61  ;;  %v2336_v5 = vmax.f32 %v8343_v11, %v2106_v3 }
 0x245   : > { %v8429_v55 = vsub.s32 %v2381_v46, %v8425_v47 }
 0x247   : > { %9399 = vst [vmem:[#allocation12_spill] sm:$0xff] %v8429_v55 }
 0x248   : > { %v8409_v17 = vpop.f32.mrb[28].mxu0  ;;  %v8411_v18 = vpop.f32.mrb[28].mxu1 }
 0x249   : > { %v2345_v8 = vmax.f32 %v8345_v2, %v8409_v17  ;;  %v2347_v4 = vmax.f32 %v8347_v12, %v8411_v18  ;;  %v8417_v26 = vpop.f32.mrb[29].mxu0  ;;  %v8419_v27 = vpop.f32.mrb[29].mxu1 }
 0x24a   : > { %v2346_v9 = vmax.f32 %v8349_v23, %v8417_v26  ;;  %v2348_v11 = vmax.f32 %v8351_v14, %v8419_v27  ;;  %v2063_v28 = vpop.f32.mrb[30].mxu0  ;;  %v2114_v29 = vpop.f32.mrb[30].mxu1  ;;  %v2889_v23 = vld [vmem:[#allocation4] sm:$0x1]  ;;  %v2896_v14 = vsub.s32 0, %v8425_v47 }
 0x24b   : > { %v2064_v30 = vpop.f32.mrb[31].mxu0  ;;  %v2115_v31 = vpop.f32.mrb[31].mxu1  ;;  %v2890_v26 = vpack.c.bf16 %v2889_v23, %v2889_v23 }
 0x265   : > { %v2151_v48 = vpop.f32.mrb[32].mxu0  ;;  %v2202_v51 = vpop.f32.mrb[32].mxu1 }
 0x266   : > { %v2325_v52 = vmax.f32 %v8353_v62, %v2151_v48  ;;  %v2327_v56 = vmax.f32 %v8355_v63, %v2202_v51  ;;  %v2153_v58 = vpop.f32.mrb[33].mxu0  ;;  %v2204_v59 = vpop.f32.mrb[33].mxu1 }
 0x267   : > { %v2326_v61 = vmax.f32 %v8357_v10, %v2153_v58  ;;  %v2328_v3 = vmax.f32 %v8359_v1, %v2204_v59  ;;  %v2155_v6 = vpop.f32.mrb[34].mxu0  ;;  %v2206_v16 = vpop.f32.mrb[34].mxu1 }
 0x268   : > { %v6675_v28 = vpack.c.bf16 %v2325_v52, %v2321_v49  ;;  %v6677_v29 = vpack.c.bf16 %v2327_v56, %v2323_v50  ;;  %v2337_v30 = vmax.f32 %v8361_v7, %v2155_v6  ;;  %v2339_v31 = vmax.f32 %v8363_v13, %v2206_v16  ;;  %v2157_v62 = vpop.f32.mrb[35].mxu0  ;;  %v2208_v43 = vpop.f32.mrb[35].mxu1 }
 0x269   : > { %v6679_v44 = vpack.c.bf16 %v2326_v61, %v2322_v53  ;;  %v6681_v45 = vpack.c.bf16 %v2328_v3, %v2324_v54  ;;  %v2338_v63 = vmax.f32 %v8365_v19, %v2157_v62  ;;  %v2340_v46 = vmax.f32 %v8367_v20, %v2208_v43 }
 0x26a   : > { %v2385_v10 = vrot.slane %v6675_v28, %v8429_v55  ;;  %v2401_v1 = vrot.slane %v6677_v29, %v8429_v55  ;;  %v6676_v48 = vpack.c.bf16 %v2337_v30, %v2333_v60  ;;  %v6678_v51 = vpack.c.bf16 %v2339_v31, %v2335_v0 }
 0x26b   : > { %v2519_v49 = vrot.slane %v6679_v44, %v8429_v55  ;;  %v2535_v7 = vrot.slane %v6681_v45, %v8429_v55  ;;  %v6680_v50 = vpack.c.bf16 %v2338_v63, %v2334_v15  ;;  %v6682_v13 = vpack.c.bf16 %v2340_v46, %v2336_v5 }
 0x26c   : > { %v2439_v52 = vcombine.low %v2385_v10, %v2401_v1  ;;  %v2440_v56 = vcombine.high %v2385_v10, %v2401_v1  ;;  %v2392_v53 = vrot.slane %v6676_v48, %v8429_v55  ;;  %v2408_v19 = vrot.slane %v6678_v51, %v8429_v55 }
 0x26d   : > { %v2573_v54 = vcombine.low %v2519_v49, %v2535_v7  ;;  %v2574_v20 = vcombine.high %v2519_v49, %v2535_v7  ;;  %v2526_v58 = vrot.slane %v6680_v50, %v8429_v55  ;;  %v2542_v59 = vrot.slane %v6682_v13, %v8429_v55  ;;  %v2161_v60 = vpop.f32.mrb[36].mxu0  ;;  %v2212_v0 = vpop.f32.mrb[36].mxu1 }
 0x26e   : > { %v2455_v61 = vcombine.low %v2392_v53, %v2408_v19  ;;  %v2456_v3 = vcombine.high %v2392_v53, %v2408_v19  ;;  %v2163_v6 = vpop.f32.mrb[37].mxu0  ;;  %v2214_v16 = vpop.f32.mrb[37].mxu1  ;;  %v2349_v30 = vmax.f32 %v8369_v21, %v2161_v60  ;;  %v2351_v31 = vmax.f32 %v8371_v22, %v2212_v0 }
 0x26f   : > { %v2589_v15 = vcombine.low %v2526_v58, %v2542_v59  ;;  %v2590_v5 = vcombine.high %v2526_v58, %v2542_v59  ;;  %v2165_v28 = vpop.f32.mrb[38].mxu0  ;;  %v2216_v29 = vpop.f32.mrb[38].mxu1  ;;  %v2350_v44 = vmax.f32 %v8373_v24, %v2163_v6  ;;  %v2352_v45 = vmax.f32 %v8375_v25, %v2214_v16 }
 0x270   : > { %v2166_v62 = vpop.f32.mrb[39].mxu0  ;;  %v2217_v43 = vpop.f32.mrb[39].mxu1  ;;  %v6683_v63 = vpack.c.bf16 %v2349_v30, %v2345_v8  ;;  %v6684_v46 = vpack.c.bf16 %v2351_v31, %v2347_v4  ;;  %v7980_v4 = vmov 1934713408   ;;  %v2892_v48 = vpack.i.b16 %v2890_v26, %v2890_v26 }
 0x271   : > { %v6685_v21 = vpack.c.bf16 %v2350_v44, %v2346_v9  ;;  %v6686_v22 = vpack.c.bf16 %v2352_v45, %v2348_v11  ;;  %v2442_v1 = vunpack.c.l.s4 %v7980_v4  ;;  %v9357_v62 = vmov 0  }
 0x272   : > { %v2652_v24 = vrot.slane %v6683_v63, %v8429_v55  ;;  %v2660_v25 = vrot.slane %v6684_v46, %v8429_v55  ;;  %v8470_v49 = vrot.slane %v2892_v48, %v2896_v14 }
 0x273   : > { %v2720_v10 = vrot.slane %v6685_v21, %v8429_v55  ;;  %v2728_v2 = vrot.slane %v6686_v22, %v8429_v55  ;;  %v2443_v9 = vunpack.c.0.s8 %v2442_v1 }
 0x274   : > { %v2677_v17 = vcombine.low %v2652_v24, %v2660_v25  ;;  %v2678_v8 = vcombine.high %v2652_v24, %v2660_v25  ;;  %9400 = vst [vmem:[#allocation13_spill] sm:$0xff] %v8470_v49 }
 0x275   : > { %v2745_v12 = vcombine.low %v2720_v10, %v2728_v2  ;;  %v2746_v18 = vcombine.high %v2720_v10, %v2728_v2  ;;  %v8468_v27 = vsub.s32 %v2443_v9, %v8425_v47 }
 0x277   : > { %v8473_v7 = vrot.slane %v2439_v52, %v8468_v27  ;;  %v8476_v50 = vrot.slane %v2440_v56, %v8468_v27  ;;  %v8481_v59 = vrot.slane %v2573_v54, %v8468_v27  ;;  %v8484_v47 = vrot.slane %v2574_v20, %v8468_v27 }
 0x278   : > { %v2463_v56 = vrot.slane %v2455_v61, %v8468_v27  ;;  %v8493_v29 = vrot.slane %v2589_v15, %v8468_v27  ;;  %v8496_v20 = vrot.slane %v2590_v5, %v8468_v27  ;;  %v8501_v61 = vrot.slane %v2677_v17, %v8468_v27 }
 0x279   : > { %v8507_v30 = vrot.slane %v2745_v12, %v8468_v27  ;;  %v8510_v15 = vrot.slane %v2746_v18, %v8468_v27 }
 0x28a   : > { %v2253_v11 = vpop.f32.mrb[40].mxu0  ;;  %v2304_v51 = vpop.f32.mrb[40].mxu1 }
 0x28b   : > { %v2329_v13 = vmax.f32 %v8377_v32, %v2253_v11  ;;  %v2331_v53 = vmax.f32 %v8379_v57, %v2304_v51  ;;  %v2255_v19 = vpop.f32.mrb[41].mxu0  ;;  %v2306_v58 = vpop.f32.mrb[41].mxu1  ;;  %v2470_v32 = vrot.slane %v2456_v3, %v8468_v27  ;;  %v8504_v3 = vrot.slane %v2678_v8, %v8468_v27 }
 0x28c   : > { %v2330_v60 = vmax.f32 %v8381_v33, %v2255_v19  ;;  %v2332_v52 = vmax.f32 %v8383_v34, %v2306_v58  ;;  %v2257_v0 = vpop.f32.mrb[42].mxu0  ;;  %v2308_v6 = vpop.f32.mrb[42].mxu1 }
 0x28d   : > { %v2341_v57 = vmax.f32 %v8385_v35, %v2257_v0  ;;  %v2343_v16 = vmax.f32 %v8387_v36, %v2308_v6  ;;  %v2259_v28 = vpop.f32.mrb[43].mxu0  ;;  %v2310_v54 = vpop.f32.mrb[43].mxu1 }
 0x28e   : > { %v2342_v33 = vmax.f32 %v8389_v37, %v2259_v28  ;;  %v2344_v34 = vmax.f32 %v8391_v38, %v2310_v54 }
 0x28f   : > { %v2365_v35 = vpack.c.bf16 %v2341_v57, %v2329_v13  ;;  %v2367_v36 = vpack.c.bf16 %v2343_v16, %v2331_v53 }
 0x290   : > { %v2366_v5 = vpack.c.bf16 %v2342_v33, %v2330_v60  ;;  %v2368_v31 = vpack.c.bf16 %v2344_v34, %v2332_v52 }
 0x291   : > { %v2409_v37 = vcombine.high %v2365_v35, %v9357_v62  ;;  %v2416_v38 = vrot.slane %v2365_v35, %v8429_v55  ;;  %v2424_v43 = vcombine.high %v2367_v36, %v9357_v62  ;;  %v2431_v44 = vrot.slane %v2367_v36, %v8429_v55 }
 0x292   : > { %v2543_v45 = vcombine.high %v2366_v5, %v9357_v62  ;;  %v2550_v63 = vrot.slane %v2366_v5, %v8429_v55  ;;  %v2558_v46 = vcombine.high %v2368_v31, %v9357_v62  ;;  %v2565_v21 = vrot.slane %v2368_v31, %v8429_v55  ;;  %v8520_v22 = vpop.f32.mrb[44].mxu0  ;;  %v8522_v24 = vpop.f32.mrb[44].mxu1 }
 0x293   : > { %v2423_v25 = vrot.slane %v2409_v37, %v8429_v55  ;;  %v2438_v10 = vrot.slane %v2424_v43, %v8429_v55  ;;  %v2471_v2 = vcombine.low %v2416_v38, %v2431_v44  ;;  %v2472_v17 = vcombine.high %v2416_v38, %v2431_v44  ;;  %v8526_v8 = vpop.f32.mrb[45].mxu0  ;;  %v8528_v12 = vpop.f32.mrb[45].mxu1 }
 0x294   : > { %v2557_v18 = vrot.slane %v2543_v45, %v8429_v55  ;;  %v2572_v4 = vrot.slane %v2558_v46, %v8429_v55  ;;  %v2605_v1 = vcombine.low %v2550_v63, %v2565_v21  ;;  %v2606_v23 = vcombine.high %v2550_v63, %v2565_v21  ;;  %v2267_v26 = vpop.f32.mrb[46].mxu0  ;;  %v2318_v9 = vpop.f32.mrb[46].mxu1 }
 0x295   : > { %v2479_v48 = vrot.slane %v2471_v2, %v8468_v27  ;;  %v2486_v14 = vrot.slane %v2472_v17, %v8468_v27  ;;  %v2487_v11 = vcombine.low %v2423_v25, %v2438_v10  ;;  %v2488_v51 = vcombine.high %v2423_v25, %v2438_v10  ;;  %v2268_v13 = vpop.f32.mrb[47].mxu0  ;;  %v2319_v53 = vpop.f32.mrb[47].mxu1 }
 0x296   : > { %v2613_v19 = vrot.slane %v2605_v1, %v8468_v27  ;;  %v2620_v58 = vrot.slane %v2606_v23, %v8468_v27  ;;  %v2621_v60 = vcombine.low %v2557_v18, %v2572_v4  ;;  %v2622_v52 = vcombine.high %v2557_v18, %v2572_v4 }
 0x297   : > { %v2495_v0 = vrot.slane %v2487_v11, %v8468_v27  ;;  %v2502_v6 = vrot.slane %v2488_v51, %v8468_v27  ;;  %v2503_v57 = vcombine.low %v8473_v7, %v2479_v48  ;;  %v2504_v16 = vcombine.high %v8473_v7, %v2479_v48 }
 0x298   : > { %v2505_v28 = vcombine.low %v8476_v50, %v2486_v14  ;;  %v2506_v54 = vcombine.high %v8476_v50, %v2486_v14  ;;  %v2629_v33 = vrot.slane %v2621_v60, %v8468_v27  ;;  %v2636_v34 = vrot.slane %v2622_v52, %v8468_v27 }
 0x299   : > { %v2507_v35 = vcombine.low %v2463_v56, %v2495_v0  ;;  %v2508_v36 = vcombine.high %v2463_v56, %v2495_v0  ;;  %v2509_v5 = vcombine.low %v2470_v32, %v2502_v6  ;;  %v2510_v31 = vcombine.high %v2470_v32, %v2502_v6 }
 0x29a   : > { %v2785_v37 = vshrl.u32 %v2503_v57, 16  ;;  %v2793_v38 = vshrl.u32 %v2504_v16, 16  ;;  %v2801_v43 = vshrl.u32 %v2505_v28, 16  ;;  %v2809_v44 = vshrl.u32 %v2506_v54, 16 }
 0x29b   : > { %v2817_v45 = vshrl.u32 %v2507_v35, 16  ;;  %v2825_v63 = vshrl.u32 %v2508_v36, 16  ;;  %v2833_v46 = vshrl.u32 %v2509_v5, 16  ;;  %v2841_v7 = vshrl.u32 %v2510_v31, 16 }
 0x29c   : > { %v2637_v21 = vcombine.low %v8481_v59, %v2613_v19  ;;  %v2638_v50 = vcombine.high %v8481_v59, %v2613_v19  ;;  %v2639_v25 = vcombine.low %v8484_v47, %v2620_v58  ;;  %v2640_v10 = vcombine.high %v8484_v47, %v2620_v58 }
 0x29d   : > { %v2641_v56 = vcombine.low %v8493_v29, %v2629_v33  ;;  %v2642_v32 = vcombine.high %v8493_v29, %v2629_v33  ;;  %v2643_v2 = vcombine.low %v8496_v20, %v2636_v34  ;;  %v2644_v17 = vcombine.high %v8496_v20, %v2636_v34 }
 0x29e   : > { %v2783_v18 = vpack.i.b16 %v2637_v21, %v2503_v57  ;;  %v2786_v4 = vshrl.u32 %v2637_v21, 16  ;;  %v2791_v1 = vpack.i.b16 %v2638_v50, %v2504_v16  ;;  %v2794_v23 = vshrl.u32 %v2638_v50, 16 }
 0x29f   : > { %v2799_v26 = vpack.i.b16 %v2639_v25, %v2505_v28  ;;  %v2802_v9 = vshrl.u32 %v2639_v25, 16  ;;  %v2807_v48 = vpack.i.b16 %v2640_v10, %v2506_v54  ;;  %v2810_v59 = vshrl.u32 %v2640_v10, 16 }
 0x2a0   : > { %v2787_v14 = vpack.i.b16 %v2786_v4, %v2785_v37  ;;  %v2795_v11 = vpack.i.b16 %v2794_v23, %v2793_v38  ;;  %v2815_v51 = vpack.i.b16 %v2641_v56, %v2507_v35  ;;  %v2818_v47 = vshrl.u32 %v2641_v56, 16 }
 0x2a1   : > { %v2803_v13 = vpack.i.b16 %v2802_v9, %v2801_v43  ;;  %v2811_v53 = vpack.i.b16 %v2810_v59, %v2809_v44  ;;  %v2823_v19 = vpack.i.b16 %v2642_v32, %v2508_v36  ;;  %v2826_v29 = vshrl.u32 %v2642_v32, 16 }
 0x2a2   : > { %v2819_v58 = vpack.i.b16 %v2818_v47, %v2817_v45  ;;  %v2831_v60 = vpack.i.b16 %v2643_v2, %v2509_v5  ;;  %v2834_v52 = vshrl.u32 %v2643_v2, 16  ;;  %v2839_v20 = vpack.i.b16 %v2644_v17, %v2510_v31 }
 0x2a3   : > { %v2827_v0 = vpack.i.b16 %v2826_v29, %v2825_v63  ;;  %v2842_v6 = vshrl.u32 %v2644_v17, 16  ;;  %v2877_v57 = vmax.bf16 %v2787_v14, %v2783_v18  ;;  %v2878_v16 = vmax.bf16 %v2795_v11, %v2791_v1 }
 0x2a4   : > { %v2835_v28 = vpack.i.b16 %v2834_v52, %v2833_v46  ;;  %v2879_v33 = vmax.bf16 %v2803_v13, %v2799_v26  ;;  %v2880_v54 = vmax.bf16 %v2811_v53, %v2807_v48  ;;  %v2881_v34 = vmax.bf16 %v2819_v58, %v2815_v51 }
 0x2a5   : > { %v2843_v37 = vpack.i.b16 %v2842_v6, %v2841_v7  ;;  %v2882_v38 = vmax.bf16 %v2827_v0, %v2823_v19  ;;  %v2898_v35 = vadd.bf16 %v8470_v49, %v2877_v57  ;;  %v2899_v43 = vadd.bf16 %v8470_v49, %v2878_v16 }
 0x2a6   : > { %v2883_v36 = vmax.bf16 %v2835_v28, %v2831_v60  ;;  %v2900_v44 = vadd.bf16 %v8470_v49, %v2879_v33  ;;  %v2901_v5 = vadd.bf16 %v8470_v49, %v2880_v54  ;;  %v2902_v31 = vadd.bf16 %v8470_v49, %v2881_v34 }
 0x2a7   : > { %v2884_v45 = vmax.bf16 %v2843_v37, %v2839_v20  ;;  %v2903_v63 = vadd.bf16 %v8470_v49, %v2882_v38  ;;  %v8559_v46 = vmax.bf16 %v9357_v62, %v2898_v35  ;;  %v8562_v7 = vmax.bf16 %v9357_v62, %v2899_v43 }
 0x2a8   : > { %v2904_v21 = vadd.bf16 %v8470_v49, %v2883_v36  ;;  %v8566_v50 = vmax.bf16 %v9357_v62, %v2900_v44  ;;  %v8569_v25 = vmax.bf16 %v9357_v62, %v2901_v5  ;;  %v8572_v10 = vmax.bf16 %v9357_v62, %v2902_v31 }
 0x2a9   : > { %v2905_v56 = vadd.bf16 %v8470_v49, %v2884_v45  ;;  %v8576_v32 = vmax.bf16 %v9357_v62, %v2903_v63  ;;  %v2353_v2 = vmax.f32 %v8393_v39, %v8520_v22  ;;  %v2355_v17 = vmax.f32 %v8395_v40, %v8522_v24 }
 0x2aa   : > { %v8583_v18 = vmax.bf16 %v9357_v62, %v2904_v21  ;;  %v2354_v4 = vmax.f32 %v8397_v41, %v8526_v8  ;;  %v2356_v1 = vmax.f32 %v8399_v42, %v8528_v12  ;;  %v8591_v23 = vcombine.low %v8559_v46, %v8559_v46 }
 0x2ab   : > { %v8594_v26 = vmax.bf16 %v9357_v62, %v2905_v56  ;;  %v2661_v39 = vpack.c.bf16 %v2353_v2, %v2353_v2  ;;  %v2669_v22 = vpack.c.bf16 %v2355_v17, %v2355_v17  ;;  %v8598_v40 = vcombine.high %v8559_v46, %v8559_v46 }
 0x2ac   : > { %v2729_v24 = vpack.c.bf16 %v2354_v4, %v2354_v4  ;;  %v2737_v9 = vpack.c.bf16 %v2356_v1, %v2356_v1  ;;  %v8602_v41 = vcombine.low %v8562_v7, %v8562_v7  ;;  %v8606_v42 = vcombine.high %v8562_v7, %v8562_v7 }
 0x2ad   : > { %v2668_v8 = vrot.slane %v2661_v39, %v8429_v55  ;;  %v2676_v12 = vrot.slane %v2669_v22, %v8429_v55  ;;  %v2966_v48 = vshrl.u32 %v8591_v23, 16  ;;  %v2969_v59 = vshll.u32 %v8591_v23, 16 }
 0x2ae   : > { %v2736_v14 = vrot.slane %v2729_v24, %v8429_v55  ;;  %v2744_v11 = vrot.slane %v2737_v9, %v8429_v55  ;;  %v2975_v51 = vshll.u32 %v8598_v40, 16  ;;  %v2980_v47 = vshrl.u32 %v8602_v41, 16  ;;  %v7686_v55 = vld [vmem:[#allocation6 + $0x1a0] sm:$0xff]  }
 0x2af   : > { %v2693_v13 = vcombine.low %v2668_v8, %v2676_v12  ;;  %v2694_v53 = vcombine.high %v2668_v8, %v2676_v12  ;;  %v2968_v19 = vrot.slane %v2966_v48, 4  ;;  %v2971_v29 = vrot.slane %v2969_v59, 5 }
 0x2b0   : > { %v2761_v58 = vcombine.low %v2736_v14, %v2744_v11  ;;  %v2762_v60 = vcombine.high %v2736_v14, %v2744_v11  ;;  %v8616_v52 = vrot.slane %v2975_v51, 5  ;;  %v2982_v20 = vrot.slane %v2980_v47, 4 }
 0x2b1   : > { %v2701_v0 = vrot.slane %v2693_v13, %v8468_v27  ;;  %v2708_v6 = vrot.slane %v2694_v53, %v8468_v27  ;;  %v2972_v57 = vor.u32 %v2971_v29, %v2968_v19  ;;  %v2983_v16 = vshll.u32 %v8602_v41, 16 }
 0x2b2   : > { %v2769_v28 = vrot.slane %v2761_v58, %v8468_v27  ;;  %v2776_v33 = vrot.slane %v2762_v60, %v8468_v27  ;;  %v2989_v54 = vshll.u32 %v8606_v42, 16  ;;  %v3115_v34 = vrot.slane %v2966_v48, 5 }
 0x2b3   : > { %v2709_v37 = vcombine.low %v8501_v61, %v2701_v0  ;;  %v2710_v38 = vcombine.high %v8501_v61, %v2701_v0  ;;  %v2711_v35 = vcombine.low %v8504_v3, %v2708_v6  ;;  %v2712_v43 = vcombine.high %v8504_v3, %v2708_v6 }
 0x2b4   : > { %v2777_v36 = vcombine.low %v8507_v30, %v2769_v28  ;;  %v2778_v44 = vcombine.high %v8507_v30, %v2769_v28  ;;  %v2779_v5 = vcombine.low %v8510_v15, %v2776_v33  ;;  %v2780_v27 = vcombine.high %v8510_v15, %v2776_v33  ;;  %v7740_v30 = vld [vmem:[#allocation6 + $0x3d0] sm:$0xff]  }
 0x2b5   : > { %v2849_v31 = vshrl.u32 %v2709_v37, 16  ;;  %v2857_v45 = vshrl.u32 %v2710_v38, 16  ;;  %v2865_v63 = vshrl.u32 %v2711_v35, 16  ;;  %v2873_v61 = vshrl.u32 %v2712_v43, 16 }
 0x2b6   : > { %v2847_v21 = vpack.i.b16 %v2777_v36, %v2709_v37  ;;  %v2850_v56 = vshrl.u32 %v2777_v36, 16  ;;  %v2855_v2 = vpack.i.b16 %v2778_v44, %v2710_v38  ;;  %v2858_v3 = vshrl.u32 %v2778_v44, 16 }
 0x2b7   : > { %v2863_v17 = vpack.i.b16 %v2779_v5, %v2711_v35  ;;  %v2866_v4 = vshrl.u32 %v2779_v5, 16  ;;  %v2871_v1 = vpack.i.b16 %v2780_v27, %v2712_v43  ;;  %v2874_v39 = vshrl.u32 %v2780_v27, 16  ;;  %v7669_v27 = vld [vmem:[#allocation6 + $0x100] sm:$0xff]   ;;  %v7738_v5 = vld [vmem:[#allocation6 + $0x388] sm:$0xff]  }
 0x2b8   : > { %v2851_v15 = vpack.i.b16 %v2850_v56, %v2849_v31  ;;  %v2859_v22 = vpack.i.b16 %v2858_v3, %v2857_v45  ;;  %v2973_v24 = vrot.slane %v2972_v57, 4  ;;  %v2985_v9 = vrot.slane %v2983_v16, 5 }
 0x2b9   : > { %v2867_v8 = vpack.i.b16 %v2866_v4, %v2865_v63  ;;  %v2875_v12 = vpack.i.b16 %v2874_v39, %v2873_v61  ;;  %v2991_v48 = vrot.slane %v2989_v54, 5  ;;  %v3116_v14 = vrot.slane %v2969_v59, 6  ;;  %v7671_v61 = vld [vmem:[#allocation6 + $0x148] sm:$0xff]  }
 0x2ba   : > { %v8638_v11 = vmax.bf16 %v2851_v15, %v2847_v21  ;;  %v2886_v13 = vmax.bf16 %v2859_v22, %v2855_v2  ;;  %v2978_v53 = vsel %vm8634_vm15, %v2973_v24, %v8616_v52  ;;  %v2986_v19 = vor.u32 %v2985_v9, %v2982_v20  ;;  %v7673_v24 = vld [vmem:[#allocation6 + $0x108] sm:$0xff]   ;;  %v7743_v20 = vld [vmem:[#allocation6 + $0x358] sm:$0xff]  }
 0x2bb   : > { %v8643_v29 = vmax.bf16 %v2867_v8, %v2863_v17  ;;  %v2888_v58 = vmax.bf16 %v2875_v12, %v2871_v1  ;;  %v3117_v60 = vor.u32 %v3116_v14, %v3115_v34  ;;  %v3119_v0 = vshrl.u32 %v8598_v40, 16 }
 0x2bc   : > { %9403 = vst [vmem:[#allocation14_spill] sm:$0xff] %v8638_v11  ;;  %v2907_v6 = vadd.bf16 %v8470_v49, %v2886_v13  ;;  %v2987_v57 = vrot.slane %v2986_v19, 4  ;;  %v3122_v28 = vrot.slane %v2975_v51, 6  ;;  %v3125_v33 = vrot.slane %v2980_v47, 5  ;;  %v7675_v13 = vld [vmem:[#allocation6 + $0x150] sm:$0xff]   ;;  %v7670_v19 = vld [vmem:[#allocation6 + $0x180] sm:$0xff]  }
 0x2bd   : > { %9404 = vst [vmem:[#allocation15_spill] sm:$0xff] %v8643_v29  ;;  %v2909_v59 = vadd.bf16 %v8470_v49, %v2888_v58  ;;  %v3118_v37 = vrot.slane %v3117_v60, 4  ;;  %v3121_v38 = vrot.slane %v3119_v0, 5  ;;  %v3126_v35 = vrot.slane %v2983_v16, 6 }
 0x2be   : > { %v8649_v43 = vmax.bf16 %v9357_v62, %v2907_v6  ;;  %v8653_v52 = vsel %vm8634_vm15, %v2987_v57, %v2991_v48  ;;  %v3129_v51 = vshrl.u32 %v8606_v42, 16  ;;  %v3132_v47 = vrot.slane %v2989_v54, 6 }
 0x2bf   : > { %9406 = vst [vmem:[#allocation17_spill] sm:$0xff] %v8653_v52  ;;  %v8663_v34 = vmax.bf16 %v9357_v62, %v2909_v59  ;;  %v6739_v16 = vcombine.low %v2978_v53, %v8653_v52  ;;  %v3123_v36 = vor.u32 %v3122_v28, %v3121_v38  ;;  %v3127_v44 = vor.u32 %v3126_v35, %v3125_v33  ;;  %v7672_v59 = vld [vmem:[#allocation6 + $0x1c8] sm:$0xff]  }
 0x2c0   : > { %9405 = vst [vmem:[#allocation16_spill] sm:$0xff] %v8649_v43  ;;  %v3131_v31 = vrot.slane %v3129_v51, 5  ;;  %v6735_v45 = vcombine.low %v8559_v46, %v8562_v7  ;;  %v6703_v54 = vrot.slane %v8591_v23, 9  ;;  %v3082_v63 = vrot.slane %v8598_v40, 5 }
 0x2c1   : > { %9409 = vst [vmem:[#allocation18_spill] sm:$0xff] %v8663_v34  ;;  %5168 = vmatprep.mubr.bf16.mxu0 %v6739_v16  ;;  %v3124_v21 = vsel %vm8657_vm0, %v3118_v37, %v3123_v36  ;;  %v3128_v56 = vrot.slane %v3127_v44, 4  ;;  %v6704_v2 = vrot.slane %v8602_v41, 9  ;;  %v3086_v3 = vrot.slane %v8606_v42, 5 }
 0x2c2   : > { %v3133_v17 = vor.u32 %v3132_v47, %v3131_v31  ;;  %5169 = vmatmul.mubr.bf16.vlgmr.msra.gmra.mrb[48].mxu0 %v6735_v45  ;;  %v3083_v4 = vsel %vm8668_vm1, %v6703_v54, %v3082_v63  ;;  %v8684_v46 = vcombine.low %v8566_v50, %v8566_v50  ;;  %v8688_v1 = vcombine.high %v8566_v50, %v8566_v50  ;;  %v7677_v47 = vld [vmem:[#allocation6 + $0x110] sm:$0xff]   ;;  %v7679_v31 = vld [vmem:[#allocation6 + $0x158] sm:$0xff]  }
 0x2c3   : > { %v8692_v39 = vsel %vm8668_vm1, %v6704_v2, %v3086_v3  ;;  %7124 = vmatpush3.bf16.msra.mxu0 %v7669_v27  ;;  %v8696_v15 = vcombine.low %v8569_v25, %v8569_v25  ;;  %v8700_v22 = vcombine.high %v8569_v25, %v8569_v25  ;;  %v8704_v9 = vcombine.low %v8566_v50, %v8569_v25 }
 0x2c4   : > { %v8708_v8 = vsel %vm8657_vm0, %v3128_v56, %v3133_v17  ;;  %v6743_v12 = vcombine.low %v3083_v4, %v8692_v39  ;;  %v2994_v48 = vshrl.u32 %v8684_v46, 16  ;;  %v2997_v14 = vshll.u32 %v8684_v46, 16  ;;  %7125 = vmatprep.subr.bf16.mxu0 %v7671_v61  ;;  %v7676_v4 = vld [vmem:[#allocation6 + $0x1d0] sm:$0xff]  }
 0x2c5   : > { %9412 = vst [vmem:[#allocation19_spill] sm:$0xff] %v8704_v9  ;;  %9413 = vst [vmem:[#allocation20_spill] sm:$0xff] %v8708_v8  ;;  %v6747_v53 = vcombine.low %v3124_v21, %v8708_v8  ;;  %v3003_v58 = vshll.u32 %v8688_v1, 16  ;;  %v3008_v60 = vshrl.u32 %v8696_v15, 16  ;;  %v3011_v0 = vshll.u32 %v8696_v15, 16  ;;  %v7674_v21 = vld [vmem:[#allocation6 + $0x188] sm:$0xff]  }
 0x2c6   : > { %v2996_v6 = vrot.slane %v2994_v48, 4  ;;  %v2999_v57 = vrot.slane %v2997_v14, 5  ;;  %v3017_v28 = vshll.u32 %v8700_v22, 16  ;;  %v3135_v33 = vrot.slane %v2994_v48, 5 }
 0x2c7   : > { %5233 = vmatprep.mubr.bf16.mxu1 %v6747_v53  ;;  %v3005_v37 = vrot.slane %v3003_v58, 5  ;;  %v3010_v38 = vrot.slane %v3008_v60, 4  ;;  %v3013_v35 = vrot.slane %v3011_v0, 5  ;;  %v3136_v51 = vrot.slane %v2997_v14, 6  ;;  %7126 = vmatpush3.bf16.msra.mxu0 %v7673_v24 }
 0x2c8   : > { %5234 = vmatmul.mubr.bf16.vlgmr.msra.gmra.mrb[48].mxu1 %v6743_v12  ;;  %v3000_v16 = vor.u32 %v2999_v57, %v2996_v6  ;;  %v3019_v36 = vrot.slane %v3017_v28, 5  ;;  %v3139_v44 = vshrl.u32 %v8688_v1, 16  ;;  %v3142_v27 = vrot.slane %v3003_v58, 6  ;;  %7127 = vmatprep.subr.bf16.mxu0 %v7675_v13  ;;  %v7681_v13 = vld [vmem:[#allocation6 + $0x118] sm:$0xff]  }
 0x2c9   : > { %7164 = vmatpush3.bf16.msra.mxu1 %v7670_v19  ;;  %v3014_v45 = vor.u32 %v3013_v35, %v3010_v38  ;;  %v3137_v54 = vor.u32 %v3136_v51, %v3135_v33  ;;  %v3145_v63 = vrot.slane %v3008_v60, 5  ;;  %v3146_v61 = vrot.slane %v3011_v0, 6  ;;  %v7683_v0 = vld [vmem:[#allocation6 + $0x160] sm:$0xff]  }
 0x2ca   : > { %v3001_v56 = vrot.slane %v3000_v16, 4  ;;  %v3141_v2 = vrot.slane %v3139_v44, 5  ;;  %v3149_v3 = vshrl.u32 %v8700_v22, 16  ;;  %v3152_v17 = vrot.slane %v3017_v28, 6  ;;  %7165 = vmatprep.subr.bf16.mxu1 %v7672_v59  ;;  %v7678_v59 = vld [vmem:[#allocation6 + $0x190] sm:$0xff]  }
 0x2cb   : > { %v3015_v24 = vrot.slane %v3014_v45, 4  ;;  %v3138_v12 = vrot.slane %v3137_v54, 4  ;;  %v3147_v48 = vor.u32 %v3146_v61, %v3145_v63  ;;  %v6705_v14 = vrot.slane %v8684_v46, 9  ;;  %7128 = vmatpush3.bf16.msra.mxu0 %v7677_v47  ;;  %v7680_v47 = vld [vmem:[#allocation6 + $0x1d8] sm:$0xff]   ;;  %v7687_v61 = vld [vmem:[#allocation6 + $0x168] sm:$0xff]   ;;  %v7691_v16 = vld [vmem:[#allocation6 + $0x170] sm:$0xff]  }
 0x2cc   : > { %v8723_v53 = vsel %vm8634_vm15, %v3001_v56, %v3005_v37  ;;  %v3143_v19 = vor.u32 %v3142_v27, %v3141_v2  ;;  %v3151_v58 = vrot.slane %v3149_v3, 5  ;;  %v3090_v60 = vrot.slane %v8688_v1, 5  ;;  %7129 = vmatprep.subr.bf16.mxu0 %v7679_v31  ;;  %v7685_v31 = vld [vmem:[#allocation6 + $0x120] sm:$0xff]  }
 0x2cd   : > { %9414 = vst [vmem:[#allocation21_spill] sm:$0xff] %v8723_v53  ;;  %v8728_v6 = vsel %vm8634_vm15, %v3015_v24, %v3019_v36  ;;  %v3148_v28 = vrot.slane %v3147_v48, 4  ;;  %7166 = vmatpush3.bf16.msra.mxu1 %v7674_v21  ;;  %v6706_v33 = vrot.slane %v8696_v15, 9  ;;  %v3094_v36 = vrot.slane %v8700_v22, 5 }
 0x2ce   : > { %v8735_v37 = vcombine.low %v8723_v53, %v8728_v6  ;;  %v8739_v38 = vsel %vm8657_vm0, %v3138_v12, %v3143_v19  ;;  %v3153_v35 = vor.u32 %v3152_v17, %v3151_v58  ;;  %7167 = vmatprep.subr.bf16.mxu1 %v7676_v4  ;;  %v8743_v51 = vsel %vm8668_vm1, %v6705_v14, %v3090_v60  ;;  %v7682_v4 = vld [vmem:[#allocation6 + $0x198] sm:$0xff]  }
 0x2cf   : > { %9416 = vst [vmem:[#allocation23_spill] sm:$0xff] %v8739_v38  ;;  %v8750_v44 = vcombine.low %v8572_v10, %v8572_v10  ;;  %v8754_v27 = vcombine.high %v8572_v10, %v8572_v10  ;;  %7130 = vmatpush3.bf16.msra.mxu0 %v7681_v13  ;;  %v8763_v54 = vcombine.low %v8576_v32, %v8576_v32  ;;  %v7684_v13 = vld [vmem:[#allocation6 + $0x1e0] sm:$0xff]  }
 0x2d0   : > { %9415 = vst [vmem:[#allocation22_spill] sm:$0xff] %v8735_v37  ;;  %5176 = vmatprep.mubr.bf16.mxu0 %v8735_v37  ;;  %v8759_v45 = vsel %vm8657_vm0, %v3148_v28, %v3153_v35  ;;  %v8767_v63 = vcombine.high %v8576_v32, %v8576_v32  ;;  %7131 = vmatprep.subr.bf16.mxu0 %v7683_v0  ;;  %v7689_v28 = vld [vmem:[#allocation6 + $0x128] sm:$0xff]  }
 0x2d1   : > { %9417 = vst [vmem:[#allocation24_spill] sm:$0xff] %v8759_v45  ;;  %v8772_v56 = vcombine.low %v8739_v38, %v8759_v45  ;;  %5177 = vmatmul.mubr.bf16.gmra.mrb[52].mxu0 %v8704_v9  ;;  %v8777_v2 = vsel %vm8668_vm1, %v6706_v33, %v3094_v36  ;;  %7168 = vmatpush3.bf16.msra.mxu1 %v7678_v59  ;;  %v3022_v3 = vshrl.u32 %v8750_v44, 16  ;;  %v3025_v17 = vshll.u32 %v8750_v44, 16  ;;  %v7688_v38 = vld [vmem:[#allocation6 + $0x1e8] sm:$0xff]  }
 0x2d2   : > { %v8783_v24 = vcombine.low %v8743_v51, %v8777_v2  ;;  %v3031_v12 = vshll.u32 %v8754_v27, 16  ;;  %v3036_v48 = vshrl.u32 %v8763_v54, 16  ;;  %v3039_v14 = vshll.u32 %v8763_v54, 16  ;;  %7169 = vmatprep.subr.bf16.mxu1 %v7680_v47 }
 0x2d3   : > { %9418 = vst [vmem:[#allocation25_spill] sm:$0xff] %v8772_v56  ;;  %5241 = vmatprep.mubr.bf16.mxu1 %v8772_v56  ;;  %v3024_v19 = vrot.slane %v3022_v3, 4  ;;  %v3027_v58 = vrot.slane %v3025_v17, 5  ;;  %v3045_v60 = vshll.u32 %v8767_v63, 16  ;;  %v3155_v0 = vrot.slane %v3022_v3, 5  ;;  %7132 = vmatpush3.bf16.msra.mxu0 %v7685_v31 }
 0x2d4   : > { %9419 = vst [vmem:[#allocation26_spill] sm:$0xff] %v8783_v24  ;;  %5242 = vmatmul.mubr.bf16.gmra.mrb[52].mxu1 %v8783_v24  ;;  %v3033_v33 = vrot.slane %v3031_v12, 5  ;;  %v3038_v59 = vrot.slane %v3036_v48, 4  ;;  %v3041_v35 = vrot.slane %v3039_v14, 5  ;;  %v3156_v36 = vrot.slane %v3025_v17, 6  ;;  %7133 = vmatprep.subr.bf16.mxu0 %v7687_v61  ;;  %v7693_v61 = vld [vmem:[#allocation6 + $0x130] sm:$0xff]  }
 0x2d5   : > { %v3028_v57 = vor.u32 %v3027_v58, %v3024_v19  ;;  %v3047_v47 = vrot.slane %v3045_v60, 5  ;;  %v3159_v62 = vshrl.u32 %v8754_v27, 16  ;;  %v3162_v21 = vrot.slane %v3031_v12, 6  ;;  %7170 = vmatpush3.bf16.msra.mxu1 %v7682_v4  ;;  %v7695_v12 = vld [vmem:[#allocation6 + $0x178] sm:$0xff]  }
 0x2d6   : > { %v3042_v56 = vor.u32 %v3041_v35, %v3038_v59  ;;  %v3157_v9 = vor.u32 %v3156_v36, %v3155_v0  ;;  %v3165_v3 = vrot.slane %v3036_v48, 5  ;;  %v3166_v31 = vrot.slane %v3039_v14, 6  ;;  %7171 = vmatprep.subr.bf16.mxu1 %v7684_v13  ;;  %v7690_v13 = vld [vmem:[#allocation6 + $0x1a8] sm:$0xff]   ;;  %v7692_v0 = vld [vmem:[#allocation6 + $0x1f0] sm:$0xff]   ;;  %v7699_v59 = vld [vmem:[#allocation6 + $0x240] sm:$0xff]  }
 0x2d7   : > { %v3029_v24 = vrot.slane %v3028_v57, 4  ;;  %v3161_v8 = vrot.slane %v3159_v62, 5  ;;  %v3169_v37 = vshrl.u32 %v8767_v63, 16  ;;  %v3172_v17 = vrot.slane %v3045_v60, 6  ;;  %7134 = vmatpush3.bf16.msra.mxu0 %v7689_v28 }
 0x2d8   : > { %v3043_v19 = vrot.slane %v3042_v56, 4  ;;  %v3158_v58 = vrot.slane %v3157_v9, 4  ;;  %v3167_v34 = vor.u32 %v3166_v31, %v3165_v3  ;;  %v8795_v4 = vcombine.low %v8572_v10, %v8576_v32  ;;  %7135 = vmatprep.subr.bf16.mxu0 %v7691_v16 }
 0x2d9   : > { %v8799_v48 = vsel %vm8634_vm15, %v3029_v24, %v3033_v33  ;;  %v3163_v57 = vor.u32 %v3162_v21, %v3161_v8  ;;  %v3171_v62 = vrot.slane %v3169_v37, 5  ;;  %v6707_v14 = vrot.slane %v8750_v44, 9  ;;  %7172 = vmatpush3.bf16.msra.mxu1 %v7686_v55  ;;  %v7697_v21 = vld [vmem:[#allocation6 + $0x138] sm:$0xff]  }
 0x2da   : > { %9420 = vst [vmem:[#allocation27_spill] sm:$0xff] %v8795_v4  ;;  %v8804_v9 = vsel %vm8634_vm15, %v3043_v19, %v3047_v47  ;;  %v3168_v56 = vrot.slane %v3167_v34, 4  ;;  %v3098_v60 = vrot.slane %v8754_v27, 5  ;;  %v6708_v16 = vrot.slane %v8763_v54, 9  ;;  %7173 = vmatprep.subr.bf16.mxu1 %v7688_v38 }
 0x2db   : > { %v8810_v24 = vcombine.low %v8799_v48, %v8804_v9  ;;  %v8814_v8 = vsel %vm8657_vm0, %v3158_v58, %v3163_v57  ;;  %v3173_v55 = vor.u32 %v3172_v17, %v3171_v62  ;;  %v3102_v37 = vrot.slane %v8767_v63, 5  ;;  %7136 = vmatpush3.bf16.msra.mxu0 %v7693_v61  ;;  %v7694_v58 = vld [vmem:[#allocation6 + $0x1b0] sm:$0xff]  }
 0x2dc   : > { %9422 = vst [vmem:[#allocation29_spill] sm:$0xff] %v8814_v8  ;;  %v8819_v34 = vsel %vm8668_vm1, %v6707_v14, %v3098_v60  ;;  %v8823_v38 = vcombine.low %v8583_v18, %v8583_v18  ;;  %v8827_v28 = vcombine.high %v8583_v18, %v8583_v18  ;;  %v8831_v33 = vcombine.low %v8594_v26, %v8594_v26 }
 0x2dd   : > { %9421 = vst [vmem:[#allocation28_spill] sm:$0xff] %v8810_v24  ;;  %7137 = vmatprep.subr.bf16.mxu0 %v7695_v12  ;;  %5184 = vmatprep.mubr.bf16.mxu0 %v8810_v24  ;;  %v8836_v35 = vsel %vm8657_vm0, %v3168_v56, %v3173_v55  ;;  %v8840_v36 = vsel %vm8668_vm1, %v6708_v16, %v3102_v37 }
 0x2de   : > { %9423 = vst [vmem:[#allocation30_spill] sm:$0xff] %v8836_v35  ;;  %v8844_v47 = vcombine.high %v8594_v26, %v8594_v26  ;;  %7174 = vmatpush3.bf16.msra.mxu1 %v7690_v13  ;;  %v8849_v31 = vcombine.low %v8814_v8, %v8836_v35  ;;  %5185 = vmatmul.mubr.bf16.gmra.mrb[56].mxu0 %v8795_v4  ;;  %v3050_v61 = vshrl.u32 %v8823_v38, 16  ;;  %v3053_v19 = vshll.u32 %v8823_v38, 16  ;;  %v7696_v13 = vld [vmem:[#allocation6 + $0x1f8] sm:$0xff]  }
 0x2df   : > { %v8854_v17 = vcombine.low %v8819_v34, %v8840_v36  ;;  %7175 = vmatprep.subr.bf16.mxu1 %v7692_v0  ;;  %v3059_v12 = vshll.u32 %v8827_v28, 16  ;;  %v3064_v57 = vshrl.u32 %v8831_v33, 16  ;;  %v3067_v62 = vshll.u32 %v8831_v33, 16  ;;  %7138 = vmatpush3.bf16.msra.mxu0 %v7697_v21  ;;  %v7698_v21 = vld [vmem:[#allocation6 + $0x1b8] sm:$0xff]  }
 0x2e0   : > { %9424 = vst [vmem:[#allocation31_spill] sm:$0xff] %v8849_v31  ;;  %v3073_v14 = vshll.u32 %v8844_v47, 16  ;;  %5249 = vmatprep.mubr.bf16.mxu1 %v8849_v31  ;;  %v3052_v56 = vrot.slane %v3050_v61, 4  ;;  %v3055_v60 = vrot.slane %v3053_v19, 5  ;;  %v3175_v16 = vrot.slane %v3050_v61, 5  ;;  %7203 = vmatprep.subr.bf16.mxu0 %v7699_v59  ;;  %v7700_v59 = vld [vmem:[#allocation6 + $0x2c0] sm:$0xff]  }
 0x2e1   : > { %9425 = vst [vmem:[#allocation32_spill] sm:$0xff] %v8854_v17  ;;  %v3176_v55 = vrot.slane %v3053_v19, 6  ;;  %5250 = vmatmul.mubr.bf16.gmra.mrb[56].mxu1 %v8854_v17  ;;  %v3061_v0 = vrot.slane %v3059_v12, 5  ;;  %v3066_v37 = vrot.slane %v3064_v57, 4  ;;  %v3069_v3 = vrot.slane %v3067_v62, 5 }
 0x2e2   : > { %v3075_v4 = vrot.slane %v3073_v14, 5  ;;  %v3056_v24 = vor.u32 %v3055_v60, %v3052_v56  ;;  %v3179_v43 = vshrl.u32 %v8827_v28, 16  ;;  %v3182_v53 = vrot.slane %v3059_v12, 6  ;;  %7176 = vmatpush3.bf16.msra.mxu1 %v7694_v58 }
 0x2e3   : > { %v3177_v29 = vor.u32 %v3176_v55, %v3175_v16  ;;  %v3070_v52 = vor.u32 %v3069_v3, %v3066_v37  ;;  %v3185_v31 = vrot.slane %v3064_v57, 5  ;;  %v3186_v35 = vrot.slane %v3067_v62, 6  ;;  %7177 = vmatprep.subr.bf16.mxu1 %v7696_v13 }
 0x2e4   : > { %v3189_v61 = vshrl.u32 %v8844_v47, 16  ;;  %v3057_v19 = vrot.slane %v3056_v24, 4  ;;  %v3181_v45 = vrot.slane %v3179_v43, 5  ;;  %v3192_v8 = vrot.slane %v3073_v14, 6 }
 0x2e5   : > { %v3178_v17 = vrot.slane %v3177_v29, 4  ;;  %v3071_v49 = vrot.slane %v3070_v52, 4  ;;  %v3187_v11 = vor.u32 %v3186_v35, %v3185_v31  ;;  %v8868_v60 = vcombine.low %v8583_v18, %v8594_v26 }
 0x2e6   : > { %v3191_v56 = vrot.slane %v3189_v61, 5  ;;  %v3062_v3 = vsel %vm8634_vm15, %v3057_v19, %v3061_v0  ;;  %v3183_v58 = vor.u32 %v3182_v53, %v3181_v45  ;;  %v6709_v12 = vrot.slane %v8823_v38, 9  ;;  %7178 = vmatpush3.bf16.msra.mxu1 %v7698_v21  ;;  %v7701_v0 = vld [vmem:[#allocation6 + $0x200] sm:$0xff]   ;;  %v9432_v21 = vld [vmem:[#allocation14_spill] sm:$0xff]  ;;  %v9433_v61 = vld [vmem:[#allocation13_spill] sm:$0xff] }
 0x2e7   : > { %v3106_v57 = vrot.slane %v8827_v28, 5  ;;  %v8882_v43 = vsel %vm8634_vm15, %v3071_v49, %v3075_v4  ;;  %v3188_v52 = vrot.slane %v3187_v11, 4  ;;  %v6710_v35 = vrot.slane %v8831_v33, 9  ;;  %7243 = vmatprep.subr.bf16.mxu1 %v7700_v59  ;;  %v7703_v19 = vld [vmem:[#allocation6 + $0x248] sm:$0xff]  }
 0x2e8   : > { %v3193_v24 = vor.u32 %v3192_v8, %v3191_v56  ;;  %v8886_v53 = vcombine.low %v3062_v3, %v8882_v43  ;;  %v3184_v45 = vsel %vm8657_vm0, %v3178_v17, %v3183_v58  ;;  %v3110_v62 = vrot.slane %v8844_v47, 5 }
 0x2e9   : > { %v3107_v31 = vsel %vm8668_vm1, %v6709_v12, %v3106_v57  ;;  %v6755_v11 = vcombine.low %v8562_v7, %v8566_v50  ;;  %v6763_v4 = vcombine.low %v8692_v39, %v8743_v51  ;;  %v9428_v8 = vrot.slane %v8598_v40, 6 }
 0x2ea   : > { %v8895_v49 = vsel %vm8657_vm0, %v3188_v52, %v3193_v24  ;;  %v9429_v14 = vrot.slane %v8591_v23, 10  ;;  %5192 = vmatprep.mubr.bf16.mxu0 %v8886_v53  ;;  %v8913_v16 = vsel %vm8668_vm1, %v6710_v35, %v3110_v62  ;;  %v6712_v7 = vrot.slane %v8602_v41, 10  ;;  %v7704_v52 = vld [vmem:[#allocation6 + $0x2c8] sm:$0xff]   ;;  %v9437_v62 = vld [vmem:[#allocation30_spill] sm:$0xff] }
 0x2eb   : > { %v8909_v13 = vcombine.low %v3184_v45, %v8895_v49  ;;  %v3204_v50 = vrot.slane %v8606_v42, 6  ;;  %5193 = vmatmul.mubr.bf16.gmra.mrb[60].mxu0 %v8868_v60  ;;  %v8919_v23 = vcombine.low %v3107_v31, %v8913_v16  ;;  %v8923_v40 = vcombine.low %v8569_v25, %v8572_v10  ;;  %v9436_v24 = vld [vmem:[#allocation24_spill] sm:$0xff] }
 0x2ec   : > { %v3201_v17 = vsel %vm8876_vm4, %v9429_v14, %v9428_v8  ;;  %v8927_v39 = vcombine.low %v8777_v2, %v8819_v34  ;;  %v6713_v51 = vrot.slane %v8684_v46, 10  ;;  %5298 = vmatprep.mubr.bf16.mxu0 %v6755_v11  ;;  %v3208_v42 = vrot.slane %v8688_v1, 6 }
 0x2ed   : > { %5257 = vmatprep.mubr.bf16.mxu1 %v8909_v13  ;;  %v8933_v41 = vsel %vm8876_vm4, %v6712_v7, %v3204_v50  ;;  %v6714_v55 = vrot.slane %v8696_v15, 10  ;;  %v3212_v25 = vrot.slane %v8700_v22, 6  ;;  %v8942_v46 = vcombine.low %v8728_v6, %v8799_v48  ;;  %v9438_v7 = vld [vmem:[#allocation17_spill] sm:$0xff] }
 0x2ee   : > { %5258 = vmatmul.mubr.bf16.gmra.mrb[60].mxu1 %v8919_v23  ;;  %v6751_v10 = vcombine.low %v3201_v17, %v8933_v41  ;;  %v8946_v2 = vcombine.low %v8576_v32, %v8583_v18  ;;  %v8949_v34 = vcombine.low %v8840_v36, %v3107_v31  ;;  %v8953_v1 = vsel %vm8876_vm4, %v6713_v51, %v3208_v42  ;;  %v9439_v50 = vld [vmem:[#allocation21_spill] sm:$0xff] }
 0x2ef   : > { %5363 = vmatprep.mubr.bf16.mxu1 %v6763_v4  ;;  %v3213_v15 = vsel %vm8876_vm4, %v6714_v55, %v3212_v25  ;;  %v6715_v22 = vrot.slane %v8750_v44, 10  ;;  %v3216_v6 = vrot.slane %v8754_v27, 6  ;;  %v6716_v32 = vrot.slane %v8763_v54, 10  ;;  %v7705_v4 = vld [vmem:[#allocation6 + $0x208] sm:$0xff]  }
 0x2f0   : > { %9430 = vst [vmem:[#allocation33_spill] sm:$0xff] %v8949_v34  ;;  %v8960_v48 = vcombine.low %v8953_v1, %v3213_v15  ;;  %v3220_v18 = vrot.slane %v8767_v63, 6  ;;  %v8965_v36 = vcombine.low %v8804_v9, %v3062_v3  ;;  %v2906_v59 = vadd.bf16 %v9433_v61, %v9432_v21  ;;  %v7702_v3 = vld [vmem:[#allocation6 + $0x280] sm:$0xff]  }
 0x2f1   : > { %v3217_v37 = vsel %vm8876_vm4, %v6715_v22, %v3216_v6  ;;  %v6717_v44 = vrot.slane %v8823_v38, 10  ;;  %v3224_v27 = vrot.slane %v8827_v28, 6  ;;  %v6718_v63 = vrot.slane %v8831_v33, 10  ;;  %v9441_v55 = vld [vmem:[#allocation16_spill] sm:$0xff] }
 0x2f2   : > { %9431 = vst [vmem:[#allocation34_spill] sm:$0xff] %v8965_v36  ;;  %v3221_v54 = vsel %vm8876_vm4, %v6716_v32, %v3220_v18  ;;  %v3228_v9 = vrot.slane %v8844_v47, 6  ;;  %v9434_v12 = vmov 0   ;;  %v8986_v28 = vcombine.low %v3213_v15, %v3217_v37  ;;  %v9435_v47 = vld [vmem:[#allocation29_spill] sm:$0xff] }
 0x2f3   : > { %v8979_v58 = vcombine.low %v3217_v37, %v3221_v54  ;;  %v8982_v57 = vmax.bf16 %v9434_v12, %v2906_v59  ;;  %v3225_v38 = vsel %vm8876_vm4, %v6717_v44, %v3224_v27  ;;  %5299 = vmatmul.mubr.bf16.vlgmr.msra.gmra.mrb[64].mxu0 %v6751_v10  ;;  %v8992_v35 = vcombine.low %v9436_v24, %v9435_v47  ;;  %v7706_v10 = vld [vmem:[#allocation6 + $0x288] sm:$0xff]   ;;  %v7708_v18 = vld [vmem:[#allocation6 + $0x2d0] sm:$0xff]  }
 0x2f4   : > { %v3229_v33 = vsel %vm8876_vm4, %v6718_v63, %v3228_v9  ;;  %v8994_v31 = vcombine.low %v3221_v54, %v3225_v38  ;;  %v8997_v11 = vcombine.low %v9437_v62, %v3184_v45  ;;  %7204 = vmatpush3.bf16.msra.mxu0 %v7701_v0  ;;  %5306 = vmatprep.mubr.bf16.mxu0 %v8923_v40  ;;  %v7707_v45 = vld [vmem:[#allocation6 + $0x250] sm:$0xff]   ;;  %v7711_v9 = vld [vmem:[#allocation6 + $0x258] sm:$0xff]  }
 0x2f5   : > { %v9002_v8 = vcombine.low %v8594_v26, %v8982_v57  ;;  %v6719_v14 = vcombine.low %v8982_v57, %v8982_v57  ;;  %v6720_v17 = vcombine.high %v8982_v57, %v8982_v57  ;;  %v9440_v51 = vcombine.low %v9438_v7, %v9439_v50  ;;  %7205 = vmatprep.subr.bf16.mxu0 %v7703_v19  ;;  %v7709_v44 = vld [vmem:[#allocation6 + $0x210] sm:$0xff]  }
 0x2f6   : > { %v9011_v42 = vcombine.low %v3225_v38, %v3229_v33  ;;  %v9015_v25 = vcombine.low %v9441_v55, %v9441_v55  ;;  %v9019_v26 = vcombine.high %v9441_v55, %v9441_v55  ;;  %v7710_v24 = vld [vmem:[#allocation6 + $0x290] sm:$0xff]   ;;  %v9446_v29 = vcombine.low %v8933_v41, %v8953_v1  ;;  %v7730_v41 = vld [vmem:[#allocation6 + $0x2b8] sm:$0xff]  }
 0x2f7   : > { %5364 = vmatmul.mubr.bf16.vlgmr.msra.gmra.mrb[64].mxu1 %v9440_v51  ;;  %v6721_v15 = vrot.slane %v6719_v14, 9  ;;  %v3251_v22 = vrot.slane %v6720_v17, 5  ;;  %v3236_v6 = vshrl.u32 %v6719_v14, 16  ;;  %v3239_v32 = vshll.u32 %v6719_v14, 16 }
 0x2f8   : > { %7244 = vmatpush3.bf16.msra.mxu1 %v7702_v3  ;;  %5371 = vmatprep.mubr.bf16.mxu1 %v8927_v39  ;;  %v3245_v0 = vshll.u32 %v6720_v17, 16  ;;  %v6722_v37 = vrot.slane %v6719_v14, 10  ;;  %v3265_v21 = vrot.slane %v6720_v17, 6  ;;  %v3273_v59 = vshrl.u32 %v9015_v25, 16 }
 0x2f9   : > { %7245 = vmatprep.subr.bf16.mxu1 %v7704_v52  ;;  %7206 = vmatpush3.bf16.msra.mxu0 %v7705_v4  ;;  %v9025_v27 = vsel %vm8668_vm1, %v6721_v15, %v3251_v22  ;;  %v3238_v19 = vrot.slane %v3236_v6, 4  ;;  %v3241_v54 = vrot.slane %v3239_v32, 5  ;;  %v3276_v63 = vshll.u32 %v9015_v25, 16 }
 0x2fa   : > { %7207 = vmatprep.subr.bf16.mxu0 %v7707_v45  ;;  %v9030_v3 = vcombine.low %v8913_v16, %v9025_v27  ;;  %v3247_v38 = vrot.slane %v3245_v0, 5  ;;  %v9034_v52 = vsel %vm8876_vm4, %v6722_v37, %v3265_v21  ;;  %v3275_v47 = vrot.slane %v3273_v59, 4  ;;  %v7712_v16 = vld [vmem:[#allocation6 + $0x2d8] sm:$0xff]  }
 0x2fb   : > { %v3242_v62 = vor.u32 %v3241_v54, %v3238_v19  ;;  %v9037_v4 = vcombine.low %v3229_v33, %v9034_v52  ;;  %v3278_v14 = vrot.slane %v3276_v63, 5  ;;  %v3282_v7 = vshll.u32 %v9019_v26, 16  ;;  %5307 = vmatmul.mubr.bf16.gmra.mrb[68].mxu0 %v8960_v48 }
 0x2fc   : > { %9442 = vst [vmem:[#allocation14_spill] sm:$0xff] %v9030_v3  ;;  %7246 = vmatpush3.bf16.msra.mxu1 %v7706_v10  ;;  %v3253_v50 = vrot.slane %v3236_v6, 5  ;;  %v3254_v51 = vrot.slane %v3239_v32, 6  ;;  %v3257_v45 = vshrl.u32 %v6720_v17, 16  ;;  %v3260_v15 = vrot.slane %v3245_v0, 6  ;;  %5314 = vmatprep.mubr.bf16.mxu0 %v8946_v2  ;;  %v7713_v10 = vld [vmem:[#allocation6 + $0x218] sm:$0xff]  }
 0x2fd   : > { %7247 = vmatprep.subr.bf16.mxu1 %v7708_v18  ;;  %7208 = vmatpush3.bf16.msra.mxu0 %v7709_v44  ;;  %v3243_v22 = vrot.slane %v3242_v62, 4  ;;  %v3279_v37 = vor.u32 %v3278_v14, %v3275_v47  ;;  %v3284_v21 = vrot.slane %v3282_v7, 5  ;;  %v9044_v33 = vcombine.low %v8982_v57, %v9441_v55  ;;  %v7715_v18 = vld [vmem:[#allocation6 + $0x260] sm:$0xff]   ;;  %v7714_v0 = vld [vmem:[#allocation6 + $0x298] sm:$0xff]  }
 0x2fe   : > { %7209 = vmatprep.subr.bf16.mxu0 %v7711_v9  ;;  %v3255_v19 = vor.u32 %v3254_v51, %v3253_v50  ;;  %v3259_v6 = vrot.slane %v3257_v45, 5  ;;  %v3290_v32 = vrot.slane %v3273_v59, 5  ;;  %v3291_v17 = vrot.slane %v3276_v63, 6  ;;  %v7716_v62 = vld [vmem:[#allocation6 + $0x2e0] sm:$0xff]  }
 0x2ff   : > { %5372 = vmatmul.mubr.bf16.gmra.mrb[68].mxu1 %v8942_v46  ;;  %v3248_v44 = vsel %vm8634_vm15, %v3243_v22, %v3247_v38  ;;  %v3280_v54 = vrot.slane %v3279_v37, 4  ;;  %v3294_v47 = vshrl.u32 %v9019_v26, 16  ;;  %v3297_v57 = vrot.slane %v3282_v7, 6  ;;  %v7717_v63 = vld [vmem:[#allocation6 + $0x220] sm:$0xff]  }
 0x300   : > { %7248 = vmatpush3.bf16.msra.mxu1 %v7710_v24  ;;  %5379 = vmatprep.mubr.bf16.mxu1 %v8949_v34  ;;  %v9052_v9 = vcombine.low %v8882_v43, %v3248_v44  ;;  %v3256_v14 = vrot.slane %v3255_v19, 4  ;;  %v3261_v50 = vor.u32 %v3260_v15, %v3259_v6  ;;  %v3292_v59 = vor.u32 %v3291_v17, %v3290_v32  ;;  %v9443_v38 = vld [vmem:[#allocation15_spill] sm:$0xff]  ;;  %v7720_v6 = vld [vmem:[#allocation6 + $0x2e8] sm:$0xff]  }
 0x301   : > { %7249 = vmatprep.subr.bf16.mxu1 %v7712_v16  ;;  %7210 = vmatpush3.bf16.msra.mxu0 %v7713_v10  ;;  %v9056_v24 = vsel %vm8634_vm15, %v3280_v54, %v3284_v21  ;;  %v3296_v51 = vrot.slane %v3294_v47, 5  ;;  %v2908_v45 = vadd.bf16 %v9433_v61, %v9443_v38  ;;  %v6725_v7 = vrot.slane %v9015_v25, 9  ;;  %v7719_v16 = vld [vmem:[#allocation6 + $0x268] sm:$0xff]   ;;  %v7718_v37 = vld [vmem:[#allocation6 + $0x2a0] sm:$0xff]   ;;  %v7723_v47 = vld [vmem:[#allocation6 + $0x270] sm:$0xff]  }
 0x302   : > { %7211 = vmatprep.subr.bf16.mxu0 %v7715_v18  ;;  %v9062_v43 = vcombine.low %v3248_v44, %v9056_v24  ;;  %v3262_v15 = vsel %vm8657_vm0, %v3256_v14, %v3261_v50  ;;  %v3293_v10 = vrot.slane %v3292_v59, 4  ;;  %v3288_v22 = vrot.slane %v9019_v26, 5 }
 0x303   : > { %v9068_v21 = vcombine.low %v8895_v49, %v3262_v15  ;;  %v3298_v19 = vor.u32 %v3297_v57, %v3296_v51  ;;  %v9071_v61 = vmax.bf16 %v9434_v12, %v2908_v45  ;;  %v6726_v18 = vrot.slane %v9015_v25, 10  ;;  %5315 = vmatmul.mubr.bf16.gmra.mrb[72].mxu0 %v8979_v58  ;;  %v7721_v25 = vld [vmem:[#allocation6 + $0x228] sm:$0xff]   ;;  %v7724_v45 = vld [vmem:[#allocation6 + $0x2f0] sm:$0xff]  }
 0x304   : > { %7250 = vmatpush3.bf16.msra.mxu1 %v7714_v0  ;;  %v9077_v32 = vsel %vm8668_vm1, %v6725_v7, %v3288_v22  ;;  %v3302_v17 = vrot.slane %v9019_v26, 6  ;;  %v9444_v0 = vld [vmem:[#allocation18_spill] sm:$0xff]  ;;  %5322 = vmatprep.mubr.bf16.mxu0 %v9002_v8 }
 0x305   : > { %7251 = vmatprep.subr.bf16.mxu1 %v7716_v62  ;;  %v9082_v49 = vcombine.low %v9444_v0, %v9444_v0  ;;  %v9086_v12 = vcombine.high %v9444_v0, %v9444_v0  ;;  %7212 = vmatpush3.bf16.msra.mxu0 %v7717_v63  ;;  %v9091_v44 = vsel %vm8657_vm0, %v3293_v10, %v3298_v19  ;;  %v7725_v22 = vld [vmem:[#allocation6 + $0x230] sm:$0xff]  }
 0x306   : > { %v9097_v26 = vcombine.low %v9025_v27, %v9077_v32  ;;  %7213 = vmatprep.subr.bf16.mxu0 %v7719_v16  ;;  %v9101_v57 = vcombine.low %v3262_v15, %v9091_v44  ;;  %v9105_v62 = vsel %vm8876_vm4, %v6726_v18, %v3302_v17  ;;  %v6727_v14 = vcombine.low %v9071_v61, %v9071_v61  ;;  %v7722_v27 = vld [vmem:[#allocation6 + $0x2a8] sm:$0xff]   ;;  %v7727_v17 = vld [vmem:[#allocation6 + $0x278] sm:$0xff]  }
 0x307   : > { %5380 = vmatmul.mubr.bf16.gmra.mrb[72].mxu1 %v8965_v36  ;;  %v6734_v50 = vrot.slane %v9082_v49, 10  ;;  %v9113_v59 = vcombine.low %v9034_v52, %v9105_v62  ;;  %v6728_v63 = vcombine.high %v9071_v61, %v9071_v61  ;;  %v3376_v51 = vrot.slane %v9086_v12, 6  ;;  %v7726_v36 = vld [vmem:[#allocation6 + $0x2b0] sm:$0xff]  }
 0x308   : > { %7252 = vmatpush3.bf16.msra.mxu1 %v7718_v37  ;;  %5387 = vmatprep.mubr.bf16.mxu1 %v9030_v3  ;;  %v3347_v38 = vshrl.u32 %v9082_v49, 16  ;;  %v6729_v7 = vrot.slane %v6727_v14, 9  ;;  %v6730_v16 = vrot.slane %v6727_v14, 10  ;;  %v3310_v15 = vshrl.u32 %v6727_v14, 16 }
 0x309   : > { %7253 = vmatprep.subr.bf16.mxu1 %v7720_v6  ;;  %v3313_v10 = vshll.u32 %v6727_v14, 16  ;;  %7214 = vmatpush3.bf16.msra.mxu0 %v7721_v25  ;;  %v3325_v37 = vrot.slane %v6728_v63, 5  ;;  %v3339_v19 = vrot.slane %v6728_v63, 6  ;;  %v9121_v52 = vsel %vm8876_vm4, %v6734_v50, %v3376_v51 }
 0x30a   : > { %9445 = vst [vmem:[#allocation13_spill] sm:$0xff] %v9121_v52  ;;  %v3319_v18 = vshll.u32 %v6728_v63, 16  ;;  %7215 = vmatprep.subr.bf16.mxu0 %v7723_v47  ;;  %v3312_v54 = vrot.slane %v3310_v15, 4  ;;  %v3327_v3 = vrot.slane %v3310_v15, 5  ;;  %v3331_v50 = vshrl.u32 %v6728_v63, 16  ;;  %v7728_v47 = vld [vmem:[#allocation6 + $0x2f8] sm:$0xff]  }
 0x30b   : > { %v3315_v56 = vrot.slane %v3313_v10, 5  ;;  %v3328_v6 = vrot.slane %v3313_v10, 6  ;;  %v9125_v14 = vsel %vm8668_vm1, %v6729_v7, %v3325_v37  ;;  %v9129_v25 = vsel %vm8876_vm4, %v6730_v16, %v3339_v19  ;;  %5323 = vmatmul.mubr.bf16.gmra.mrb[76].mxu0 %v9011_v42  ;;  %v7729_v63 = vld [vmem:[#allocation6 + $0x238] sm:$0xff]   ;;  %v7731_v19 = vld [vmem:[#allocation6 + $0x340] sm:$0xff]  }
 0x30c   : > { %7254 = vmatpush3.bf16.msra.mxu1 %v7722_v27  ;;  %v3321_v34 = vrot.slane %v3319_v18, 5  ;;  %v3334_v15 = vrot.slane %v3319_v18, 6  ;;  %5428 = vmatprep.mubr.bf16.mxu0 %v9446_v29  ;;  %v3333_v10 = vrot.slane %v3331_v50, 5  ;;  %v3349_v37 = vrot.slane %v3347_v38, 4  ;;  %v9447_v18 = vld [vmem:[#allocation22_spill] sm:$0xff]  ;;  %v7733_v52 = vld [vmem:[#allocation6 + $0x300] sm:$0xff]  }
 0x30d   : > { %7255 = vmatprep.subr.bf16.mxu1 %v7724_v45  ;;  %7216 = vmatpush3.bf16.msra.mxu0 %v7725_v22  ;;  %v3316_v45 = vor.u32 %v3315_v56, %v3312_v54  ;;  %v3329_v16 = vor.u32 %v3328_v6, %v3327_v3  ;;  %v3350_v27 = vshll.u32 %v9082_v49, 16  ;;  %v3356_v51 = vshll.u32 %v9086_v12, 16 }
 0x30e   : > { %7217 = vmatprep.subr.bf16.mxu0 %v7727_v17  ;;  %v3364_v7 = vrot.slane %v3347_v38, 5  ;;  %v3368_v22 = vshrl.u32 %v9086_v12, 16  ;;  %v3335_v3 = vor.u32 %v3334_v15, %v3333_v10  ;;  %v7732_v17 = vld [vmem:[#allocation6 + $0x3c0] sm:$0xff]   ;;  %v6733_v15 = vrot.slane %v9082_v49, 9  ;;  %v7736_v49 = vld [vmem:[#allocation6 + $0x3c8] sm:$0xff]  }
 0x30f   : > { %5388 = vmatmul.mubr.bf16.gmra.mrb[76].mxu1 %v9052_v9  ;;  %v3317_v1 = vrot.slane %v3316_v45, 4  ;;  %v3330_v56 = vrot.slane %v3329_v16, 4  ;;  %v3352_v6 = vrot.slane %v3350_v27, 5  ;;  %v3365_v50 = vrot.slane %v3350_v27, 6  ;;  %v7735_v16 = vld [vmem:[#allocation6 + $0x348] sm:$0xff]  }
 0x310   : > { %7256 = vmatpush3.bf16.msra.mxu1 %v7726_v36  ;;  %5493 = vmatprep.mubr.bf16.mxu1 %v9447_v18  ;;  %v3370_v29 = vrot.slane %v3368_v22, 5  ;;  %v3371_v45 = vrot.slane %v3356_v51, 6  ;;  %v3362_v22 = vrot.slane %v9086_v12, 5  ;;  %v9448_v18 = vld [vmem:[#allocation20_spill] sm:$0xff]  ;;  %v7739_v12 = vld [vmem:[#allocation6 + $0x350] sm:$0xff]  }
 0x311   : > { %7257 = vmatprep.subr.bf16.mxu1 %v7728_v47  ;;  %7218 = vmatpush3.bf16.msra.mxu0 %v7729_v63  ;;  %v9150_v38 = vsel %vm8634_vm15, %v3317_v1, %v3321_v34  ;;  %v9154_v36 = vsel %vm8657_vm0, %v3330_v56, %v3335_v3  ;;  %v3353_v63 = vor.u32 %v3352_v6, %v3349_v37  ;;  %v7734_v34 = vld [vmem:[#allocation6 + $0x380] sm:$0xff]   ;;  %v3358_v3 = vrot.slane %v3356_v51, 5  ;;  %v7737_v27 = vld [vmem:[#allocation6 + $0x308] sm:$0xff]  }
 0x312   : > { %7283 = vmatprep.subr.bf16.mxu0 %v7731_v19  ;;  %v6781_v47 = vcombine.low %v9056_v24, %v9150_v38  ;;  %v3366_v10 = vor.u32 %v3365_v50, %v3364_v7  ;;  %v9449_v1 = vld [vmem:[#allocation23_spill] sm:$0xff]  ;;  %v3372_v0 = vor.u32 %v3371_v45, %v3370_v29  ;;  %v9168_v7 = vsel %vm8668_vm1, %v6733_v15, %v3362_v22  ;;  %v7741_v29 = vld [vmem:[#allocation6 + $0x310] sm:$0xff]   ;;  %v7828_v24 = vld [vmem:[#allocation6 + $0x608] sm:$0xff]  }
 0x313   : > { %v9450_v56 = vcombine.low %v9448_v18, %v9449_v1  ;;  %v3354_v19 = vrot.slane %v3353_v63, 4  ;;  %v9451_v37 = vld [vmem:[#allocation19_spill] sm:$0xff]  ;;  %v7752_v18 = vld [vmem:[#allocation6 + $0x3e8] sm:$0xff]  }
 0x314   : > { %7258 = vmatpush3.bf16.msra.mxu1 %v7730_v41  ;;  %v3367_v54 = vrot.slane %v3366_v10, 4  ;;  %v7745_v45 = vld [vmem:[#allocation6 + $0x318] sm:$0xff]   ;;  %v7748_v63 = vld [vmem:[#allocation6 + $0x3e0] sm:$0xff]   ;;  %v7753_v1 = vld [vmem:[#allocation6 + $0x328] sm:$0xff]  }
 0x315   : > { %7323 = vmatprep.subr.bf16.mxu1 %v7732_v17  ;;  %5429 = vmatmul.mubr.bf16.vlgmr.msra.gmra.mrb[80].mxu0 %v9450_v56  ;;  %v3359_v41 = vsel %vm8634_vm15, %v3354_v19, %v3358_v3  ;;  %v9452_v17 = vld [vmem:[#allocation28_spill] sm:$0xff]  ;;  %v9453_v15 = vld [vmem:[#allocation27_spill] sm:$0xff]  ;;  %v7755_v56 = vld [vmem:[#allocation6 + $0x370] sm:$0xff]  }
 0x316   : > { %7284 = vmatpush3.bf16.msra.mxu0 %v7733_v52  ;;  %5436 = vmatprep.mubr.bf16.mxu0 %v8986_v28  ;;  %v9175_v51 = vsel %vm8657_vm0, %v3367_v54, %v3372_v0  ;;  %v6787_v52 = vcombine.low %v9125_v14, %v9168_v7  ;;  %v9181_v6 = vcombine.low %v9150_v38, %v3359_v41  ;;  %v7742_v0 = vld [vmem:[#allocation6 + $0x390] sm:$0xff]   ;;  %v7744_v54 = vld [vmem:[#allocation6 + $0x3d8] sm:$0xff]   ;;  %v7749_v10 = vld [vmem:[#allocation6 + $0x320] sm:$0xff]  }
 0x317   : > { %5494 = vmatmul.mubr.bf16.vlgmr.msra.gmra.mrb[80].mxu1 %v9451_v37  ;;  %7285 = vmatprep.subr.bf16.mxu0 %v7735_v16  ;;  %v6788_v50 = vcombine.low %v9154_v36, %v9175_v51  ;;  %v7747_v16 = vld [vmem:[#allocation6 + $0x360] sm:$0xff]   ;;  %v7756_v19 = vld [vmem:[#allocation6 + $0x3f0] sm:$0xff]   ;;  %v7759_v37 = vld [vmem:[#allocation6 + $0x378] sm:$0xff]  }
 0x318   : > { %7324 = vmatpush3.bf16.msra.mxu1 %v7734_v34  ;;  %5501 = vmatprep.mubr.bf16.mxu1 %v9452_v17  ;;  %v7751_v34 = vld [vmem:[#allocation6 + $0x368] sm:$0xff]   ;;  %v7750_v22 = vld [vmem:[#allocation6 + $0x3a0] sm:$0xff]   ;;  %v7757_v3 = vld [vmem:[#allocation6 + $0x330] sm:$0xff]  }
 0x319   : > { %7325 = vmatprep.subr.bf16.mxu1 %v7736_v49  ;;  %v7754_v49 = vld [vmem:[#allocation6 + $0x3a8] sm:$0xff]   ;;  %v7760_v41 = vld [vmem:[#allocation6 + $0x3f8] sm:$0xff]  }
 0x31a   : > { %7286 = vmatpush3.bf16.msra.mxu0 %v7737_v27  ;;  %v7746_v27 = vld [vmem:[#allocation6 + $0x398] sm:$0xff]  }
 0x31b   : > { %7287 = vmatprep.subr.bf16.mxu0 %v7739_v12  ;;  %v7758_v12 = vld [vmem:[#allocation6 + $0x3b0] sm:$0xff]   ;;  %v7830_v38 = vld [vmem:[#allocation6 + $0x618] sm:$0xff]  }
 0x31c   : > { %7326 = vmatpush3.bf16.msra.mxu1 %v7738_v5  ;;  %v9454_v5 = vld [vmem:[#allocation25_spill] sm:$0xff] }
 0x31d   : > { %7327 = vmatprep.subr.bf16.mxu1 %v7740_v30  ;;  %5437 = vmatmul.mubr.bf16.gmra.mrb[84].mxu0 %v8992_v35  ;;  %v7761_v30 = vld [vmem:[#allocation6 + $0x338] sm:$0xff]  }
 0x31e   : > { %7288 = vmatpush3.bf16.msra.mxu0 %v7741_v29  ;;  %5444 = vmatprep.mubr.bf16.mxu0 %v8994_v31  ;;  %v7763_v29 = vld [vmem:[#allocation6 + $0x440] sm:$0xff]  }
 0x31f   : > { %5502 = vmatmul.mubr.bf16.gmra.mrb[84].mxu1 %v9453_v15  ;;  %7289 = vmatprep.subr.bf16.mxu0 %v7743_v20  ;;  %v7762_v20 = vld [vmem:[#allocation6 + $0x3b8] sm:$0xff]  }
 0x320   : > { %7328 = vmatpush3.bf16.msra.mxu1 %v7742_v0  ;;  %5509 = vmatprep.mubr.bf16.mxu1 %v8886_v53  ;;  %v7764_v0 = vld [vmem:[#allocation6 + $0x4c0] sm:$0xff]  }
 0x321   : > { %7329 = vmatprep.subr.bf16.mxu1 %v7744_v54  ;;  %v7765_v54 = vld [vmem:[#allocation6 + $0x400] sm:$0xff]  }
 0x322   : > { %7290 = vmatpush3.bf16.msra.mxu0 %v7745_v45  ;;  %v7767_v45 = vld [vmem:[#allocation6 + $0x448] sm:$0xff]  }
 0x323   : > { %7291 = vmatprep.subr.bf16.mxu0 %v7747_v16  ;;  %v7766_v16 = vld [vmem:[#allocation6 + $0x480] sm:$0xff]  }
 0x324   : > { %7330 = vmatpush3.bf16.msra.mxu1 %v7746_v27  ;;  %v9455_v27 = vld [vmem:[#allocation26_spill] sm:$0xff] }
 0x325   : > { %7331 = vmatprep.subr.bf16.mxu1 %v7748_v63  ;;  %5445 = vmatmul.mubr.bf16.gmra.mrb[88].mxu0 %v8997_v11  ;;  %v7768_v63 = vld [vmem:[#allocation6 + $0x4c8] sm:$0xff]  }
 0x326   : > { %7292 = vmatpush3.bf16.msra.mxu0 %v7749_v10  ;;  %5452 = vmatprep.mubr.bf16.mxu0 %v9037_v4  ;;  %v9456_v10 = vld [vmem:[#allocation31_spill] sm:$0xff] }
 0x327   : > { %5510 = vmatmul.mubr.bf16.gmra.mrb[88].mxu1 %v8868_v60  ;;  %7293 = vmatprep.subr.bf16.mxu0 %v7751_v34  ;;  %v7769_v34 = vld [vmem:[#allocation6 + $0x408] sm:$0xff]  }
 0x328   : > { %7332 = vmatpush3.bf16.msra.mxu1 %v7750_v22  ;;  %5517 = vmatprep.mubr.bf16.mxu1 %v9062_v43  ;;  %v7770_v22 = vld [vmem:[#allocation6 + $0x488] sm:$0xff]  }
 0x329   : > { %7333 = vmatprep.subr.bf16.mxu1 %v7752_v18  ;;  %v7772_v18 = vld [vmem:[#allocation6 + $0x4d0] sm:$0xff]  }
 0x32a   : > { %7294 = vmatpush3.bf16.msra.mxu0 %v7753_v1  ;;  %v7773_v1 = vld [vmem:[#allocation6 + $0x410] sm:$0xff]  }
 0x32b   : > { %7295 = vmatprep.subr.bf16.mxu0 %v7755_v56  ;;  %v7775_v56 = vld [vmem:[#allocation6 + $0x458] sm:$0xff]  }
 0x32c   : > { %7334 = vmatpush3.bf16.msra.mxu1 %v7754_v49  ;;  %v7774_v49 = vld [vmem:[#allocation6 + $0x490] sm:$0xff]  }
 0x32d   : > { %7335 = vmatprep.subr.bf16.mxu1 %v7756_v19  ;;  %5453 = vmatmul.mubr.bf16.gmra.mrb[92].mxu0 %v9068_v21  ;;  %v9457_v19 = vld [vmem:[#allocation32_spill] sm:$0xff] }
 0x32e   : > { %7296 = vmatpush3.bf16.msra.mxu0 %v7757_v3  ;;  %5558 = vmatprep.mubr.bf16.mxu0 %v9454_v5  ;;  %v7776_v3 = vld [vmem:[#allocation6 + $0x4d8] sm:$0xff]   ;;  %v7783_v5 = vld [vmem:[#allocation6 + $0x468] sm:$0xff]  }
 0x32f   : > { %5518 = vmatmul.mubr.bf16.gmra.mrb[92].mxu1 %v9044_v33  ;;  %7297 = vmatprep.subr.bf16.mxu0 %v7759_v37  ;;  %v7778_v37 = vld [vmem:[#allocation6 + $0x498] sm:$0xff]  }
 0x330   : > { %7336 = vmatpush3.bf16.msra.mxu1 %v7758_v12  ;;  %5623 = vmatprep.mubr.bf16.mxu1 %v8923_v40  ;;  %v7771_v40 = vld [vmem:[#allocation6 + $0x450] sm:$0xff]   ;;  %v7780_v12 = vld [vmem:[#allocation6 + $0x4e0] sm:$0xff]  }
 0x331   : > { %7337 = vmatprep.subr.bf16.mxu1 %v7760_v41  ;;  %v7781_v41 = vld [vmem:[#allocation6 + $0x420] sm:$0xff]  }
 0x332   : > { %7298 = vmatpush3.bf16.msra.mxu0 %v7761_v30  ;;  %v7782_v30 = vld [vmem:[#allocation6 + $0x4a0] sm:$0xff]  }
 0x333   : > { %7363 = vmatprep.subr.bf16.mxu0 %v7763_v29  ;;  %v7784_v29 = vld [vmem:[#allocation6 + $0x4e8] sm:$0xff]  }
 0x334   : > { %7338 = vmatpush3.bf16.msra.mxu1 %v7762_v20  ;;  %v7785_v20 = vld [vmem:[#allocation6 + $0x428] sm:$0xff]  }
 0x335   : > { %7403 = vmatprep.subr.bf16.mxu1 %v7764_v0  ;;  %5559 = vmatmul.mubr.bf16.vlgmr.msra.gmra.mrb[96].mxu0 %v9455_v27  ;;  %v9458_v0 = vcombine.low %v9441_v55, %v9071_v61  ;;  %v7791_v27 = vld [vmem:[#allocation6 + $0x478] sm:$0xff]   ;;  %v7795_v55 = vld [vmem:[#allocation6 + $0x540] sm:$0xff]  }
 0x336   : > { %7364 = vmatpush3.bf16.msra.mxu0 %v7765_v54  ;;  %5566 = vmatprep.mubr.bf16.mxu0 %v9456_v10  ;;  %v7786_v54 = vld [vmem:[#allocation6 + $0x4a8] sm:$0xff]  }
 0x337   : > { %5624 = vmatmul.mubr.bf16.vlgmr.msra.gmra.mrb[96].mxu1 %v8960_v48  ;;  %7365 = vmatprep.subr.bf16.mxu0 %v7767_v45  ;;  %v7777_v48 = vld [vmem:[#allocation6 + $0x418] sm:$0xff]   ;;  %v7788_v45 = vld [vmem:[#allocation6 + $0x4f0] sm:$0xff]  }
 0x338   : > { %7404 = vmatpush3.bf16.msra.mxu1 %v7766_v16  ;;  %5631 = vmatprep.mubr.bf16.mxu1 %v8946_v2  ;;  %v7779_v2 = vld [vmem:[#allocation6 + $0x460] sm:$0xff]   ;;  %v7789_v16 = vld [vmem:[#allocation6 + $0x430] sm:$0xff]  }
 0x339   : > { %7405 = vmatprep.subr.bf16.mxu1 %v7768_v63  ;;  %v7790_v63 = vld [vmem:[#allocation6 + $0x4b0] sm:$0xff]  }
 0x33a   : > { %7366 = vmatpush3.bf16.msra.mxu0 %v7769_v34  ;;  %v7792_v34 = vld [vmem:[#allocation6 + $0x4f8] sm:$0xff]  }
 0x33b   : > { %7367 = vmatprep.subr.bf16.mxu0 %v7771_v40  ;;  %v7793_v40 = vld [vmem:[#allocation6 + $0x438] sm:$0xff]  }
 0x33c   : > { %7406 = vmatpush3.bf16.msra.mxu1 %v7770_v22  ;;  %v7794_v22 = vld [vmem:[#allocation6 + $0x4b8] sm:$0xff]  }
 0x33d   : > { %7407 = vmatprep.subr.bf16.mxu1 %v7772_v18  ;;  %5567 = vmatmul.mubr.bf16.gmra.mrb[100].mxu0 %v9457_v19  ;;  %v7796_v18 = vld [vmem:[#allocation6 + $0x5c0] sm:$0xff]  }
 0x33e   : > { %7368 = vmatpush3.bf16.msra.mxu0 %v7773_v1  ;;  %5574 = vmatprep.mubr.bf16.mxu0 %v8909_v13  ;;  %v7797_v1 = vld [vmem:[#allocation6 + $0x500] sm:$0xff]  }
 0x33f   : > { %5632 = vmatmul.mubr.bf16.gmra.mrb[100].mxu1 %v8979_v58  ;;  %7369 = vmatprep.subr.bf16.mxu0 %v7775_v56  ;;  %v7799_v56 = vld [vmem:[#allocation6 + $0x548] sm:$0xff]  }
 0x340   : > { %7408 = vmatpush3.bf16.msra.mxu1 %v7774_v49  ;;  %5639 = vmatprep.mubr.bf16.mxu1 %v9002_v8  ;;  %v7787_v8 = vld [vmem:[#allocation6 + $0x470] sm:$0xff]   ;;  %v7798_v49 = vld [vmem:[#allocation6 + $0x580] sm:$0xff]  }
 0x341   : > { %7409 = vmatprep.subr.bf16.mxu1 %v7776_v3  ;;  %v9459_v3 = vld [vmem:[#allocation33_spill] sm:$0xff] }
 0x342   : > { %7370 = vmatpush3.bf16.msra.mxu0 %v7777_v48  ;;  %v7801_v48 = vld [vmem:[#allocation6 + $0x508] sm:$0xff]  }
 0x343   : > { %7371 = vmatprep.subr.bf16.mxu0 %v7779_v2  ;;  %v7802_v2 = vld [vmem:[#allocation6 + $0x588] sm:$0xff]  }
 0x344   : > { %7410 = vmatpush3.bf16.msra.mxu1 %v7778_v37  ;;  %v7804_v37 = vld [vmem:[#allocation6 + $0x5d0] sm:$0xff]  }
 0x345   : > { %7411 = vmatprep.subr.bf16.mxu1 %v7780_v12  ;;  %5575 = vmatmul.mubr.bf16.gmra.mrb[104].mxu0 %v8919_v23  ;;  %v7805_v12 = vld [vmem:[#allocation6 + $0x510] sm:$0xff]  }
 0x346   : > { %7372 = vmatpush3.bf16.msra.mxu0 %v7781_v41  ;;  %5582 = vmatprep.mubr.bf16.mxu0 %v9101_v57  ;;  %v7807_v41 = vld [vmem:[#allocation6 + $0x558] sm:$0xff]  }
 0x347   : > { %5640 = vmatmul.mubr.bf16.gmra.mrb[104].mxu1 %v9011_v42  ;;  %7373 = vmatprep.subr.bf16.mxu0 %v7783_v5  ;;  %v9460_v5 = vld [vmem:[#allocation34_spill] sm:$0xff] }
 0x348   : > { %7412 = vmatpush3.bf16.msra.mxu1 %v7782_v30  ;;  %5647 = vmatprep.mubr.bf16.mxu1 %v9458_v0  ;;  %v7808_v30 = vld [vmem:[#allocation6 + $0x5d8] sm:$0xff]   ;;  %v7813_v0 = vld [vmem:[#allocation6 + $0x520] sm:$0xff]  }
 0x349   : > { %7413 = vmatprep.subr.bf16.mxu1 %v7784_v29  ;;  %v7809_v29 = vld [vmem:[#allocation6 + $0x518] sm:$0xff]  }
 0x34a   : > { %7374 = vmatpush3.bf16.msra.mxu0 %v7785_v20  ;;  %v7810_v20 = vld [vmem:[#allocation6 + $0x598] sm:$0xff]  }
 0x34b   : > { %7375 = vmatprep.subr.bf16.mxu0 %v7787_v8  ;;  %v7812_v8 = vld [vmem:[#allocation6 + $0x5e0] sm:$0xff]  }
 0x34c   : > { %7414 = vmatpush3.bf16.msra.mxu1 %v7786_v54  ;;  %v7815_v54 = vld [vmem:[#allocation6 + $0x568] sm:$0xff]  }
 0x34d   : > { %7415 = vmatprep.subr.bf16.mxu1 %v7788_v45  ;;  %5583 = vmatmul.mubr.bf16.gmra.mrb[108].mxu0 %v9097_v26  ;;  %v7814_v45 = vld [vmem:[#allocation6 + $0x5a0] sm:$0xff]  }
 0x34e   : > { %7376 = vmatpush3.bf16.msra.mxu0 %v7789_v16  ;;  %5688 = vmatprep.mubr.bf16.mxu0 %v8927_v39  ;;  %v7800_v39 = vld [vmem:[#allocation6 + $0x5c8] sm:$0xff]  }
 0x34f   : > { %5648 = vmatmul.mubr.bf16.gmra.mrb[108].mxu1 %v9113_v59  ;;  %7377 = vmatprep.subr.bf16.mxu0 %v7791_v27  ;;  %v7816_v16 = vld [vmem:[#allocation6 + $0x5e8] sm:$0xff]  }
 0x350   : > { %7416 = vmatpush3.bf16.msra.mxu1 %v7790_v63  ;;  %5753 = vmatprep.mubr.bf16.mxu1 %v8986_v28  ;;  %v7803_v28 = vld [vmem:[#allocation6 + $0x550] sm:$0xff]   ;;  %v7817_v27 = vld [vmem:[#allocation6 + $0x528] sm:$0xff]   ;;  %v9463_v63 = vcombine.low %v9105_v62, %v9129_v25  ;;  %v7825_v62 = vld [vmem:[#allocation6 + $0x538] sm:$0xff]  }
 0x351   : > { %7417 = vmatprep.subr.bf16.mxu1 %v7792_v34  ;;  %v7818_v34 = vld [vmem:[#allocation6 + $0x5a8] sm:$0xff]  }
 0x352   : > { %7378 = vmatpush3.bf16.msra.mxu0 %v7793_v40  ;;  %v7820_v40 = vld [vmem:[#allocation6 + $0x5f0] sm:$0xff]  }
 0x353   : > { %7443 = vmatprep.subr.bf16.mxu0 %v7795_v55  ;;  %v7823_v55 = vld [vmem:[#allocation6 + $0x578] sm:$0xff]  }
 0x354   : > { %7418 = vmatpush3.bf16.msra.mxu1 %v7794_v22  ;;  %v9464_v22 = vcombine.low %v9091_v44, %v9154_v36  ;;  %v7829_v44 = vld [vmem:[#allocation6 + $0x610] sm:$0xff]  }
 0x355   : > { %7483 = vmatprep.subr.bf16.mxu1 %v7796_v18  ;;  %5689 = vmatmul.mubr.bf16.vlgmr.msra.gmra.mrb[112].mxu0 %v8942_v46  ;;  %v7806_v46 = vld [vmem:[#allocation6 + $0x590] sm:$0xff]   ;;  %v7827_v18 = vld [vmem:[#allocation6 + $0x600] sm:$0xff]  }
 0x356   : > { %7444 = vmatpush3.bf16.msra.mxu0 %v7797_v1  ;;  %5696 = vmatprep.mubr.bf16.mxu0 %v9459_v3  ;;  %v7826_v1 = vld [vmem:[#allocation6 + $0x5b8] sm:$0xff]  }
 0x357   : > { %5754 = vmatmul.mubr.bf16.vlgmr.msra.gmra.mrb[112].mxu1 %v8992_v35  ;;  %7445 = vmatprep.subr.bf16.mxu0 %v7799_v56  ;;  %v9461_v35 = vld [vmem:[#allocation14_spill] sm:$0xff] }
 0x358   : > { %7484 = vmatpush3.bf16.msra.mxu1 %v7798_v49  ;;  %5761 = vmatprep.mubr.bf16.mxu1 %v8994_v31  ;;  %v7811_v31 = vld [vmem:[#allocation6 + $0x560] sm:$0xff]  }
 0x359   : > { %7485 = vmatprep.subr.bf16.mxu1 %v7800_v39 }
 0x35a   : > { %7446 = vmatpush3.bf16.msra.mxu0 %v7801_v48 }
 0x35b   : > { %7447 = vmatprep.subr.bf16.mxu0 %v7803_v28 }
 0x35c   : > { %7486 = vmatpush3.bf16.msra.mxu1 %v7802_v2 }
 0x35d   : > { %7487 = vmatprep.subr.bf16.mxu1 %v7804_v37  ;;  %5697 = vmatmul.mubr.bf16.gmra.mrb[116].mxu0 %v9460_v5 }
 0x35e   : > { %7448 = vmatpush3.bf16.msra.mxu0 %v7805_v12  ;;  %5704 = vmatprep.mubr.bf16.mxu0 %v9461_v35 }
 0x35f   : > { %5762 = vmatmul.mubr.bf16.gmra.mrb[116].mxu1 %v8997_v11  ;;  %7449 = vmatprep.subr.bf16.mxu0 %v7807_v41  ;;  %v9462_v11 = vcombine.low %v9077_v32, %v9125_v14  ;;  %v7822_v32 = vld [vmem:[#allocation6 + $0x5b0] sm:$0xff]  }
 0x360   : > { %7488 = vmatpush3.bf16.msra.mxu1 %v7806_v46  ;;  %5769 = vmatprep.mubr.bf16.mxu1 %v9037_v4  ;;  %v7819_v4 = vld [vmem:[#allocation6 + $0x570] sm:$0xff]  }
 0x361   : > { %7489 = vmatprep.subr.bf16.mxu1 %v7808_v30 }
 0x362   : > { %7450 = vmatpush3.bf16.msra.mxu0 %v7809_v29 }
 0x363   : > { %7451 = vmatprep.subr.bf16.mxu0 %v7811_v31 }
 0x364   : > { %7490 = vmatpush3.bf16.msra.mxu1 %v7810_v20 }
 0x365   : > { %7491 = vmatprep.subr.bf16.mxu1 %v7812_v8  ;;  %5705 = vmatmul.mubr.bf16.gmra.mrb[120].mxu0 %v9052_v9  ;;  %v7821_v9 = vld [vmem:[#allocation6 + $0x530] sm:$0xff]  }
 0x366   : > { %7452 = vmatpush3.bf16.msra.mxu0 %v7813_v0  ;;  %5712 = vmatprep.mubr.bf16.mxu0 %v9462_v11 }
 0x367   : > { %5770 = vmatmul.mubr.bf16.gmra.mrb[120].mxu1 %v9068_v21  ;;  %7453 = vmatprep.subr.bf16.mxu0 %v7815_v54  ;;  %v7824_v21 = vld [vmem:[#allocation6 + $0x5f8] sm:$0xff]  }
 0x368   : > { %7492 = vmatpush3.bf16.msra.mxu1 %v7814_v45  ;;  %5777 = vmatprep.mubr.bf16.mxu1 %v9463_v63 }
 0x369   : > { %7493 = vmatprep.subr.bf16.mxu1 %v7816_v16 }
 0x36a   : > { %7454 = vmatpush3.bf16.msra.mxu0 %v7817_v27 }
 0x36b   : > { %7455 = vmatprep.subr.bf16.mxu0 %v7819_v4 }
 0x36c   : > { %7494 = vmatpush3.bf16.msra.mxu1 %v7818_v34 }
 0x36d   : > { %7495 = vmatprep.subr.bf16.mxu1 %v7820_v40  ;;  %5713 = vmatmul.mubr.bf16.gmra.mrb[124].mxu0 %v6781_v47 }
 0x36e   : > { %7456 = vmatpush3.bf16.msra.mxu0 %v7821_v9  ;;  %5818 = vmatprep.mubr.bf16.mxu0 %v9452_v17 }
 0x36f   : > { %5778 = vmatmul.mubr.bf16.gmra.mrb[124].mxu1 %v9464_v22  ;;  %7457 = vmatprep.subr.bf16.mxu0 %v7823_v55 }
 0x370   : > { %7496 = vmatpush3.bf16.msra.mxu1 %v7822_v32  ;;  %5883 = vmatprep.mubr.bf16.mxu1 %v9456_v10 }
 0x371   : > { %7497 = vmatprep.subr.bf16.mxu1 %v7824_v21 }
 0x372   : > { %7458 = vmatpush3.bf16.msra.mxu0 %v7825_v62 }
 0x373   : > { %7535 = vmatprep.subr.bf16.mxu0 %v7827_v18 }
 0x374   : > { %7498 = vmatpush3.bf16.msra.mxu1 %v7826_v1 }
 0x375   : > { %7559 = vmatprep.subr.bf16.mxu1 %v7827_v18  ;;  %5819 = vmatmul.mubr.bf16.vlgmr.msra.gmra.mrb[128].mxu0 %v9453_v15 }
 0x376   : > { %7536 = vmatpush3.bf16.msra.mxu0 %v7827_v18  ;;  %5826 = vmatprep.mubr.bf16.mxu0 %v8886_v53  ;;  %v7831_v53 = vld [vmem:[#allocation6 + $0x620] sm:$0xff]  }
 0x377   : > { %5884 = vmatmul.mubr.bf16.vlgmr.msra.gmra.mrb[128].mxu1 %v9457_v19  ;;  %7537 = vmatprep.subr.bf16.mxu0 %v7828_v24 }
 0x378   : > { %7567 = vmatpush3.bf16.msra.mxu1 %v7827_v18  ;;  %5891 = vmatprep.mubr.bf16.mxu1 %v8909_v13  ;;  %v7832_v13 = vld [vmem:[#allocation6 + $0x628] sm:$0xff]  }
 0x379   : > { %7560 = vmatprep.subr.bf16.mxu1 %v7828_v24 }
 0x37a   : > { %7538 = vmatpush3.bf16.msra.mxu0 %v7828_v24 }
 0x37b   : > { %7539 = vmatprep.subr.bf16.mxu0 %v7829_v44 }
 0x37c   : > { %7568 = vmatpush3.bf16.msra.mxu1 %v7828_v24 }
 0x37d   : > { %7561 = vmatprep.subr.bf16.mxu1 %v7829_v44  ;;  %5827 = vmatmul.mubr.bf16.gmra.mrb[132].mxu0 %v8868_v60  ;;  %v7833_v60 = vld [vmem:[#allocation6 + $0x630] sm:$0xff]  }
 0x37e   : > { %7540 = vmatpush3.bf16.msra.mxu0 %v7829_v44  ;;  %5834 = vmatprep.mubr.bf16.mxu0 %v9062_v43 }
 0x37f   : > { %5892 = vmatmul.mubr.bf16.gmra.mrb[132].mxu1 %v8919_v23  ;;  %7541 = vmatprep.subr.bf16.mxu0 %v7830_v38  ;;  %v7834_v23 = vld [vmem:[#allocation6 + $0x638] sm:$0xff]  }
 0x380   : > { %7569 = vmatpush3.bf16.msra.mxu1 %v7829_v44  ;;  %5899 = vmatprep.mubr.bf16.mxu1 %v9101_v57 }
 0x381   : > { %7562 = vmatprep.subr.bf16.mxu1 %v7830_v38 }
 0x382   : > { %7542 = vmatpush3.bf16.msra.mxu0 %v7830_v38 }
 0x383   : > { %7543 = vmatprep.subr.bf16.mxu0 %v7831_v53 }
 0x384   : > { %7570 = vmatpush3.bf16.msra.mxu1 %v7830_v38 }
 0x385   : > { %7563 = vmatprep.subr.bf16.mxu1 %v7831_v53  ;;  %5835 = vmatmul.mubr.bf16.gmra.mrb[136].mxu0 %v9044_v33  ;;  %v9465_v33 = vld [vmem:[#allocation18_spill] sm:$0xff] }
 0x386   : > { %7544 = vmatpush3.bf16.msra.mxu0 %v7831_v53  ;;  %5842 = vmatprep.mubr.bf16.mxu0 %v9181_v6  ;;  %v9466_v43 = vcombine.low %v9071_v61, %v9465_v33 }
 0x387   : > { %5900 = vmatmul.mubr.bf16.gmra.mrb[136].mxu1 %v9097_v26  ;;  %7545 = vmatprep.subr.bf16.mxu0 %v7832_v13  ;;  %v9467_v26 = vld [vmem:[#allocation13_spill] sm:$0xff] }
 0x388   : > { %7571 = vmatpush3.bf16.msra.mxu1 %v7831_v53  ;;  %5907 = vmatprep.mubr.bf16.mxu1 %v6788_v50  ;;  %v9468_v61 = vcombine.low %v9129_v25, %v9467_v26 }
 0x389   : > { %7564 = vmatprep.subr.bf16.mxu1 %v7832_v13 }
 0x38a   : > { %7546 = vmatpush3.bf16.msra.mxu0 %v7832_v13 }
 0x38b   : > { %7547 = vmatprep.subr.bf16.mxu0 %v7833_v60 }
 0x38c   : > { %7572 = vmatpush3.bf16.msra.mxu1 %v7832_v13 }
 0x38d   : > { %7565 = vmatprep.subr.bf16.mxu1 %v7833_v60  ;;  %5843 = vmatmul.mubr.bf16.gmra.mrb[140].mxu0 %v9466_v43 }
 0x38e   : > { %7548 = vmatpush3.bf16.msra.mxu0 %v7833_v60  ;;  %7551 = vmatprep.mubr.bf16.mxu0 %v8979_v58 }
 0x38f   : > { %5908 = vmatmul.mubr.bf16.gmra.mrb[140].mxu1 %v6787_v52  ;;  %7549 = vmatprep.subr.bf16.mxu0 %v7834_v23 }
 0x390   : > { %7573 = vmatpush3.bf16.msra.mxu1 %v7833_v60  ;;  %7555 = vmatprep.mubr.bf16.mxu1 %v9113_v59 }
 0x391   : > { %7566 = vmatprep.subr.bf16.mxu1 %v7834_v23 }
 0x392   : > { %7550 = vmatpush3.bf16.msra.mxu0 %v7834_v23 }
 0x394   : > { %7574 = vmatpush3.bf16.msra.mxu1 %v7834_v23 }
 0x395   : > { %7552 = vmatmul.mubr.bf16.vlgmr.msra.gmra.mrb[144].mxu0 %v9011_v42  ;;  %v7059_v57 = vpop.f32.mrb[48].mxu0 }
 0x396   : > { %v7060_v36 = vpop.f32.mrb[49].mxu0 }
 0x397   : > { %7556 = vmatmul.mubr.bf16.vlgmr.msra.gmra.mrb[144].mxu1 %v9468_v61  ;;  %v7061_v58 = vadd.f32 %v7060_v36, %v7059_v57  ;;  %v7062_v47 = vpop.f32.mrb[50].mxu0 }
 0x398   : > { %v7063_v51 = vpop.f32.mrb[51].mxu0 }
 0x399   : > { %v7064_v14 = vadd.f32 %v7063_v51, %v7062_v47 }
 0x39b   : > { %v7099_v7 = vpop.f32.mrb[48].mxu1 }
 0x39c   : > { %v7100_v52 = vpop.f32.mrb[49].mxu1 }
 0x39d   : > { %v7101_v17 = vadd.f32 %v7100_v52, %v7099_v7  ;;  %v7102_v6 = vpop.f32.mrb[50].mxu1 }
 0x39e   : > { %v7103_v59 = vpop.f32.mrb[51].mxu1 }
 0x39f   : > { %v5236_v50 = vadd.f32 %v7101_v17, %v7061_v58  ;;  %v7104_v15 = vadd.f32 %v7103_v59, %v7102_v6 }
 0x3a1   : > { %v5239_v10 = vadd.f32 %v7104_v15, %v7064_v14 }
 0x3a4   : > { %v7065_v19 = vpop.f32.mrb[52].mxu0 }
 0x3a5   : > { %v7066_v42 = vpop.f32.mrb[53].mxu0 }
 0x3a6   : > { %v7067_v56 = vadd.f32 %v7066_v42, %v7065_v19  ;;  %v7068_v49 = vpop.f32.mrb[54].mxu0 }
 0x3a7   : > { %v7105_v25 = vpop.f32.mrb[52].mxu1  ;;  %v7069_v39 = vpop.f32.mrb[55].mxu0 }
 0x3a8   : > { %v7106_v3 = vpop.f32.mrb[53].mxu1  ;;  %v7070_v48 = vadd.f32 %v7069_v39, %v7068_v49 }
 0x3a9   : > { %v7107_v28 = vadd.f32 %v7106_v3, %v7105_v25  ;;  %v7108_v2 = vpop.f32.mrb[54].mxu1 }
 0x3aa   : > { %v7109_v37 = vpop.f32.mrb[55].mxu1 }
 0x3ab   : > { %v5244_v12 = vadd.f32 %v7107_v28, %v7067_v56  ;;  %v7110_v41 = vadd.f32 %v7109_v37, %v7108_v2 }
 0x3ad   : > { %v5247_v46 = vadd.f32 %v7110_v41, %v7070_v48 }
 0x3b1   : > { %v7071_v5 = vpop.f32.mrb[56].mxu0 }
 0x3b2   : > { %v7072_v30 = vpop.f32.mrb[57].mxu0 }
 0x3b3   : > { %v7073_v35 = vadd.f32 %v7072_v30, %v7071_v5  ;;  %v7074_v29 = vpop.f32.mrb[58].mxu0 }
 0x3b4   : > { %v7111_v31 = vpop.f32.mrb[56].mxu1  ;;  %v7075_v20 = vpop.f32.mrb[59].mxu0 }
 0x3b5   : > { %v7112_v8 = vpop.f32.mrb[57].mxu1  ;;  %v7076_v0 = vadd.f32 %v7075_v20, %v7074_v29 }
 0x3b6   : > { %v7113_v54 = vadd.f32 %v7112_v8, %v7111_v31  ;;  %v7114_v45 = vpop.f32.mrb[58].mxu1 }
 0x3b7   : > { %v7115_v16 = vpop.f32.mrb[59].mxu1 }
 0x3b8   : > { %v5252_v11 = vadd.f32 %v7113_v54, %v7073_v35  ;;  %v7116_v27 = vadd.f32 %v7115_v16, %v7114_v45 }
 0x3ba   : > { %v5255_v4 = vadd.f32 %v7116_v27, %v7076_v0 }
 0x3be   : > { %v7077_v63 = vpop.f32.mrb[60].mxu0 }
 0x3bf   : > { %v7078_v34 = vpop.f32.mrb[61].mxu0 }
 0x3c0   : > { %v7079_v9 = vadd.f32 %v7078_v34, %v7077_v63  ;;  %v7080_v55 = vpop.f32.mrb[62].mxu0 }
 0x3c1   : > { %v7117_v40 = vpop.f32.mrb[60].mxu1  ;;  %v7081_v21 = vpop.f32.mrb[63].mxu0 }
 0x3c2   : > { %v7118_v32 = vpop.f32.mrb[61].mxu1  ;;  %v7082_v18 = vadd.f32 %v7081_v21, %v7080_v55 }
 0x3c3   : > { %v7119_v62 = vadd.f32 %v7118_v32, %v7117_v40  ;;  %v7120_v22 = vpop.f32.mrb[62].mxu1 }
 0x3c4   : > { %v7121_v1 = vpop.f32.mrb[63].mxu1 }
 0x3c5   : > { %v5260_v24 = vadd.f32 %v7119_v62, %v7079_v9  ;;  %v7122_v44 = vadd.f32 %v7121_v1, %v7120_v22 }
 0x3c6   : > { %v7139_v53 = vpop.f32.mrb[64].mxu0 }
 0x3c7   : > { %v5263_v38 = vadd.f32 %v7122_v44, %v7082_v18  ;;  %v7140_v13 = vpop.f32.mrb[65].mxu0 }
 0x3c8   : > { %v7141_v23 = vadd.f32 %v7140_v13, %v7139_v53  ;;  %v7142_v33 = vpop.f32.mrb[66].mxu0 }
 0x3c9   : > { %v7143_v26 = vpop.f32.mrb[67].mxu0 }
 0x3ca   : > { %v7179_v60 = vpop.f32.mrb[64].mxu1  ;;  %v5301_v61 = vadd.f32 %v7141_v23, %v5236_v50  ;;  %v7144_v58 = vadd.f32 %v7143_v26, %v7142_v33 }
 0x3cb   : > { %v7180_v43 = vpop.f32.mrb[65].mxu1 }
 0x3cc   : > { %v7181_v57 = vadd.f32 %v7180_v43, %v7179_v60  ;;  %v7182_v36 = vpop.f32.mrb[66].mxu1  ;;  %v5304_v14 = vadd.f32 %v7144_v58, %v5239_v10 }
 0x3cd   : > { %v7183_v47 = vpop.f32.mrb[67].mxu1 }
 0x3ce   : > { %v5366_v51 = vadd.f32 %v7181_v57, %v5301_v61  ;;  %v7184_v7 = vadd.f32 %v7183_v47, %v7182_v36  ;;  %v7145_v17 = vpop.f32.mrb[68].mxu0 }
 0x3cf   : > { %v7146_v6 = vpop.f32.mrb[69].mxu0 }
 0x3d0   : > { %v5369_v52 = vadd.f32 %v7184_v7, %v5304_v14  ;;  %v7147_v15 = vadd.f32 %v7146_v6, %v7145_v17  ;;  %v7148_v19 = vpop.f32.mrb[70].mxu0 }
 0x3d1   : > { %v7149_v56 = vpop.f32.mrb[71].mxu0 }
 0x3d2   : > { %v7185_v59 = vpop.f32.mrb[68].mxu1  ;;  %v5309_v49 = vadd.f32 %v7147_v15, %v5244_v12  ;;  %v7150_v3 = vadd.f32 %v7149_v56, %v7148_v19 }
 0x3d3   : > { %v7186_v42 = vpop.f32.mrb[69].mxu1 }
 0x3d4   : > { %v7187_v25 = vadd.f32 %v7186_v42, %v7185_v59  ;;  %v7188_v39 = vpop.f32.mrb[70].mxu1  ;;  %v5312_v28 = vadd.f32 %v7150_v3, %v5247_v46 }
 0x3d5   : > { %v7189_v50 = vpop.f32.mrb[71].mxu1 }
 0x3d6   : > { %v5374_v48 = vadd.f32 %v7187_v25, %v5309_v49  ;;  %v7190_v2 = vadd.f32 %v7189_v50, %v7188_v39  ;;  %v7151_v41 = vpop.f32.mrb[72].mxu0 }
 0x3d7   : > { %v7152_v10 = vpop.f32.mrb[73].mxu0 }
 0x3d8   : > { %v5377_v37 = vadd.f32 %v7190_v2, %v5312_v28  ;;  %v7153_v30 = vadd.f32 %v7152_v10, %v7151_v41  ;;  %v7154_v35 = vpop.f32.mrb[74].mxu0 }
 0x3d9   : > { %v7155_v31 = vpop.f32.mrb[75].mxu0 }
 0x3da   : > { %v7191_v5 = vpop.f32.mrb[72].mxu1  ;;  %v5317_v20 = vadd.f32 %v7153_v30, %v5252_v11  ;;  %v7156_v54 = vadd.f32 %v7155_v31, %v7154_v35 }
 0x3db   : > { %v7192_v29 = vpop.f32.mrb[73].mxu1 }
 0x3dc   : > { %v7193_v8 = vadd.f32 %v7192_v29, %v7191_v5  ;;  %v7194_v0 = vpop.f32.mrb[74].mxu1  ;;  %v5320_v16 = vadd.f32 %v7156_v54, %v5255_v4 }
 0x3dd   : > { %v7195_v12 = vpop.f32.mrb[75].mxu1 }
 0x3de   : > { %v5382_v45 = vadd.f32 %v7193_v8, %v5317_v20  ;;  %v7196_v27 = vadd.f32 %v7195_v12, %v7194_v0  ;;  %v7157_v34 = vpop.f32.mrb[76].mxu0 }
 0x3df   : > { %v7158_v46 = vpop.f32.mrb[77].mxu0 }
 0x3e0   : > { %v5385_v63 = vadd.f32 %v7196_v27, %v5320_v16  ;;  %v7159_v9 = vadd.f32 %v7158_v46, %v7157_v34  ;;  %v7160_v55 = vpop.f32.mrb[78].mxu0 }
 0x3e1   : > { %v7161_v21 = vpop.f32.mrb[79].mxu0 }
 0x3e2   : > { %v7197_v40 = vpop.f32.mrb[76].mxu1  ;;  %v5325_v62 = vadd.f32 %v7159_v9, %v5260_v24  ;;  %v7162_v1 = vadd.f32 %v7161_v21, %v7160_v55 }
 0x3e3   : > { %v7198_v32 = vpop.f32.mrb[77].mxu1 }
 0x3e4   : > { %v7199_v22 = vadd.f32 %v7198_v32, %v7197_v40  ;;  %v7200_v18 = vpop.f32.mrb[78].mxu1  ;;  %v5328_v53 = vadd.f32 %v7162_v1, %v5263_v38 }
 0x3e5   : > { %v7201_v11 = vpop.f32.mrb[79].mxu1 }
 0x3e6   : > { %v5390_v44 = vadd.f32 %v7199_v22, %v5325_v62  ;;  %v7202_v13 = vadd.f32 %v7201_v11, %v7200_v18 }
 0x3e8   : > { %v5393_v60 = vadd.f32 %v7202_v13, %v5328_v53  ;;  %v7219_v23 = vpop.f32.mrb[80].mxu0 }
 0x3e9   : > { %v7220_v4 = vpop.f32.mrb[81].mxu0 }
 0x3ea   : > { %v7259_v33 = vpop.f32.mrb[80].mxu1  ;;  %v7221_v43 = vadd.f32 %v7220_v4, %v7219_v23  ;;  %v7222_v26 = vpop.f32.mrb[82].mxu0 }
 0x3eb   : > { %v7260_v61 = vpop.f32.mrb[81].mxu1  ;;  %v7223_v57 = vpop.f32.mrb[83].mxu0 }
 0x3ec   : > { %v5431_v36 = vadd.f32 %v7221_v43, %v5366_v51  ;;  %v7261_v58 = vadd.f32 %v7260_v61, %v7259_v33  ;;  %v7262_v47 = vpop.f32.mrb[82].mxu1  ;;  %v7224_v14 = vadd.f32 %v7223_v57, %v7222_v26 }
 0x3ed   : > { %v7263_v24 = vpop.f32.mrb[83].mxu1 }
 0x3ee   : > { %v5496_v7 = vadd.f32 %v7261_v58, %v5431_v36  ;;  %v5434_v17 = vadd.f32 %v7224_v14, %v5369_v52  ;;  %v7264_v6 = vadd.f32 %v7263_v24, %v7262_v47 }
 0x3f0   : > { %v5499_v59 = vadd.f32 %v7264_v6, %v5434_v17  ;;  %v7225_v15 = vpop.f32.mrb[84].mxu0 }
 0x3f1   : > { %v7226_v38 = vpop.f32.mrb[85].mxu0 }
 0x3f2   : > { %v7265_v19 = vpop.f32.mrb[84].mxu1  ;;  %v7227_v42 = vadd.f32 %v7226_v38, %v7225_v15  ;;  %v7228_v56 = vpop.f32.mrb[86].mxu0 }
 0x3f3   : > { %v7266_v49 = vpop.f32.mrb[85].mxu1  ;;  %v7229_v25 = vpop.f32.mrb[87].mxu0 }
 0x3f4   : > { %v5439_v39 = vadd.f32 %v7227_v42, %v5374_v48  ;;  %v7267_v3 = vadd.f32 %v7266_v49, %v7265_v19  ;;  %v7268_v50 = vpop.f32.mrb[86].mxu1  ;;  %v7230_v28 = vadd.f32 %v7229_v25, %v7228_v56 }
 0x3f5   : > { %v7269_v51 = vpop.f32.mrb[87].mxu1 }
 0x3f6   : > { %v5504_v2 = vadd.f32 %v7267_v3, %v5439_v39  ;;  %v5442_v41 = vadd.f32 %v7230_v28, %v5377_v37  ;;  %v7270_v10 = vadd.f32 %v7269_v51, %v7268_v50 }
 0x3f8   : > { %v5507_v5 = vadd.f32 %v7270_v10, %v5442_v41  ;;  %v7231_v30 = vpop.f32.mrb[88].mxu0 }
 0x3f9   : > { %v7232_v52 = vpop.f32.mrb[89].mxu0 }
 0x3fa   : > { %v7271_v35 = vpop.f32.mrb[88].mxu1  ;;  %v7233_v29 = vadd.f32 %v7232_v52, %v7231_v30  ;;  %v7234_v31 = vpop.f32.mrb[90].mxu0 }
 0x3fb   : > { %v7272_v20 = vpop.f32.mrb[89].mxu1  ;;  %v7235_v8 = vpop.f32.mrb[91].mxu0 }
 0x3fc   : > { %v5447_v0 = vadd.f32 %v7233_v29, %v5382_v45  ;;  %v7273_v54 = vadd.f32 %v7272_v20, %v7271_v35  ;;  %v7274_v12 = vpop.f32.mrb[90].mxu1  ;;  %v7236_v16 = vadd.f32 %v7235_v8, %v7234_v31 }
 0x3fd   : > { %v7275_v48 = vpop.f32.mrb[91].mxu1 }
 0x3fe   : > { %v5512_v27 = vadd.f32 %v7273_v54, %v5447_v0  ;;  %v5450_v34 = vadd.f32 %v7236_v16, %v5385_v63  ;;  %v7276_v46 = vadd.f32 %v7275_v48, %v7274_v12 }
 0x400   : > { %v5515_v40 = vadd.f32 %v7276_v46, %v5450_v34  ;;  %v7237_v9 = vpop.f32.mrb[92].mxu0 }
 0x401   : > { %v7238_v37 = vpop.f32.mrb[93].mxu0 }
 0x402   : > { %v7277_v55 = vpop.f32.mrb[92].mxu1  ;;  %v7239_v32 = vadd.f32 %v7238_v37, %v7237_v9  ;;  %v7240_v21 = vpop.f32.mrb[94].mxu0 }
 0x403   : > { %v7278_v62 = vpop.f32.mrb[93].mxu1  ;;  %v7241_v22 = vpop.f32.mrb[95].mxu0 }
 0x404   : > { %v5455_v18 = vadd.f32 %v7239_v32, %v5390_v44  ;;  %v7279_v1 = vadd.f32 %v7278_v62, %v7277_v55  ;;  %v7280_v11 = vpop.f32.mrb[94].mxu1  ;;  %v7242_v53 = vadd.f32 %v7241_v22, %v7240_v21 }
 0x405   : > { %v7281_v45 = vpop.f32.mrb[95].mxu1 }
 0x406   : > { %v5520_v13 = vadd.f32 %v7279_v1, %v5455_v18  ;;  %v5458_v23 = vadd.f32 %v7242_v53, %v5393_v60  ;;  %v7282_v4 = vadd.f32 %v7281_v45, %v7280_v11 }
 0x408   : > { %v5523_v33 = vadd.f32 %v7282_v4, %v5458_v23  ;;  %v7299_v43 = vpop.f32.mrb[96].mxu0 }
 0x409   : > { %v7300_v63 = vpop.f32.mrb[97].mxu0 }
 0x40a   : > { %v7339_v26 = vpop.f32.mrb[96].mxu1  ;;  %v7301_v61 = vadd.f32 %v7300_v63, %v7299_v43  ;;  %v7302_v57 = vpop.f32.mrb[98].mxu0 }
 0x40b   : > { %v7340_v36 = vpop.f32.mrb[97].mxu1  ;;  %v7303_v58 = vpop.f32.mrb[99].mxu0 }
 0x40c   : > { %v5561_v47 = vadd.f32 %v7301_v61, %v5496_v7  ;;  %v7341_v14 = vadd.f32 %v7340_v36, %v7339_v26  ;;  %v7342_v24 = vpop.f32.mrb[98].mxu1  ;;  %v7304_v17 = vadd.f32 %v7303_v58, %v7302_v57 }
 0x40d   : > { %v7343_v44 = vpop.f32.mrb[99].mxu1 }
 0x40e   : > { %v5626_v6 = vadd.f32 %v7341_v14, %v5561_v47  ;;  %v5564_v15 = vadd.f32 %v7304_v17, %v5499_v59  ;;  %v7344_v38 = vadd.f32 %v7343_v44, %v7342_v24 }
 0x410   : > { %v5629_v19 = vadd.f32 %v7344_v38, %v5564_v15  ;;  %v7305_v42 = vpop.f32.mrb[100].mxu0 }
 0x411   : > { %v7306_v60 = vpop.f32.mrb[101].mxu0 }
 0x412   : > { %v7345_v56 = vpop.f32.mrb[100].mxu1  ;;  %v7307_v49 = vadd.f32 %v7306_v60, %v7305_v42  ;;  %v7308_v25 = vpop.f32.mrb[102].mxu0 }
 0x413   : > { %v7346_v39 = vpop.f32.mrb[101].mxu1  ;;  %v7309_v3 = vpop.f32.mrb[103].mxu0 }
 0x414   : > { %v5569_v50 = vadd.f32 %v7307_v49, %v5504_v2  ;;  %v7347_v28 = vadd.f32 %v7346_v39, %v7345_v56  ;;  %v7348_v51 = vpop.f32.mrb[102].mxu1  ;;  %v7310_v41 = vadd.f32 %v7309_v3, %v7308_v25 }
 0x415   : > { %v7349_v7 = vpop.f32.mrb[103].mxu1 }
 0x416   : > { %v5634_v10 = vadd.f32 %v7347_v28, %v5569_v50  ;;  %v5572_v30 = vadd.f32 %v7310_v41, %v5507_v5  ;;  %v7350_v52 = vadd.f32 %v7349_v7, %v7348_v51 }
 0x418   : > { %v5637_v35 = vadd.f32 %v7350_v52, %v5572_v30  ;;  %v7311_v29 = vpop.f32.mrb[104].mxu0 }
 0x419   : > { %v7312_v59 = vpop.f32.mrb[105].mxu0 }
 0x41a   : > { %v7351_v31 = vpop.f32.mrb[104].mxu1  ;;  %v7313_v20 = vadd.f32 %v7312_v59, %v7311_v29  ;;  %v7314_v8 = vpop.f32.mrb[106].mxu0 }
 0x41b   : > { %v7352_v0 = vpop.f32.mrb[105].mxu1  ;;  %v7315_v54 = vpop.f32.mrb[107].mxu0 }
 0x41c   : > { %v5577_v12 = vadd.f32 %v7313_v20, %v5512_v27  ;;  %v7353_v16 = vadd.f32 %v7352_v0, %v7351_v31  ;;  %v7354_v48 = vpop.f32.mrb[106].mxu1  ;;  %v7316_v34 = vadd.f32 %v7315_v54, %v7314_v8 }
 0x41d   : > { %v7355_v2 = vpop.f32.mrb[107].mxu1 }
 0x41e   : > { %v5642_v46 = vadd.f32 %v7353_v16, %v5577_v12  ;;  %v5580_v9 = vadd.f32 %v7316_v34, %v5515_v40  ;;  %v7356_v37 = vadd.f32 %v7355_v2, %v7354_v48 }
 0x420   : > { %v5645_v55 = vadd.f32 %v7356_v37, %v5580_v9  ;;  %v7317_v32 = vpop.f32.mrb[108].mxu0 }
 0x421   : > { %v7318_v5 = vpop.f32.mrb[109].mxu0 }
 0x422   : > { %v7357_v21 = vpop.f32.mrb[108].mxu1  ;;  %v7319_v62 = vadd.f32 %v7318_v5, %v7317_v32  ;;  %v7320_v22 = vpop.f32.mrb[110].mxu0 }
 0x423   : > { %v7358_v18 = vpop.f32.mrb[109].mxu1  ;;  %v7321_v1 = vpop.f32.mrb[111].mxu0 }
 0x424   : > { %v5585_v11 = vadd.f32 %v7319_v62, %v5520_v13  ;;  %v7359_v53 = vadd.f32 %v7358_v18, %v7357_v21  ;;  %v7360_v45 = vpop.f32.mrb[110].mxu1  ;;  %v7322_v23 = vadd.f32 %v7321_v1, %v7320_v22 }
 0x425   : > { %v7361_v27 = vpop.f32.mrb[111].mxu1 }
 0x426   : > { %v5650_v4 = vadd.f32 %v7359_v53, %v5585_v11  ;;  %v5588_v43 = vadd.f32 %v7322_v23, %v5523_v33  ;;  %v7362_v63 = vadd.f32 %v7361_v27, %v7360_v45 }
 0x428   : > { %v5653_v26 = vadd.f32 %v7362_v63, %v5588_v43  ;;  %v7379_v61 = vpop.f32.mrb[112].mxu0 }
 0x429   : > { %v7380_v40 = vpop.f32.mrb[113].mxu0 }
 0x42a   : > { %v7419_v57 = vpop.f32.mrb[112].mxu1  ;;  %v7381_v36 = vadd.f32 %v7380_v40, %v7379_v61  ;;  %v7382_v58 = vpop.f32.mrb[114].mxu0 }
 0x42b   : > { %v7420_v47 = vpop.f32.mrb[113].mxu1  ;;  %v7383_v14 = vpop.f32.mrb[115].mxu0 }
 0x42c   : > { %v5691_v24 = vadd.f32 %v7381_v36, %v5626_v6  ;;  %v7421_v17 = vadd.f32 %v7420_v47, %v7419_v57  ;;  %v7422_v44 = vpop.f32.mrb[114].mxu1  ;;  %v7384_v15 = vadd.f32 %v7383_v14, %v7382_v58 }
 0x42d   : > { %v7423_v13 = vpop.f32.mrb[115].mxu1 }
 0x42e   : > { %v5756_v38 = vadd.f32 %v7421_v17, %v5691_v24  ;;  %v5694_v42 = vadd.f32 %v7384_v15, %v5629_v19  ;;  %v7424_v60 = vadd.f32 %v7423_v13, %v7422_v44 }
 0x430   : > { %v5759_v56 = vadd.f32 %v7424_v60, %v5694_v42  ;;  %v7385_v49 = vpop.f32.mrb[116].mxu0 }
 0x431   : > { %v7386_v33 = vpop.f32.mrb[117].mxu0 }
 0x432   : > { %v7425_v25 = vpop.f32.mrb[116].mxu1  ;;  %v7387_v39 = vadd.f32 %v7386_v33, %v7385_v49  ;;  %v7388_v3 = vpop.f32.mrb[118].mxu0 }
 0x433   : > { %v7426_v50 = vpop.f32.mrb[117].mxu1  ;;  %v7389_v28 = vpop.f32.mrb[119].mxu0 }
 0x434   : > { %v5699_v51 = vadd.f32 %v7387_v39, %v5634_v10  ;;  %v7427_v41 = vadd.f32 %v7426_v50, %v7425_v25  ;;  %v7428_v7 = vpop.f32.mrb[118].mxu1  ;;  %v7390_v30 = vadd.f32 %v7389_v28, %v7388_v3 }
 0x435   : > { %v7429_v6 = vpop.f32.mrb[119].mxu1 }
 0x436   : > { %v5764_v52 = vadd.f32 %v7427_v41, %v5699_v51  ;;  %v5702_v29 = vadd.f32 %v7390_v30, %v5637_v35  ;;  %v7430_v59 = vadd.f32 %v7429_v6, %v7428_v7 }
 0x438   : > { %v5767_v31 = vadd.f32 %v7430_v59, %v5702_v29  ;;  %v7391_v20 = vpop.f32.mrb[120].mxu0 }
 0x439   : > { %v7392_v19 = vpop.f32.mrb[121].mxu0 }
 0x43a   : > { %v7431_v8 = vpop.f32.mrb[120].mxu1  ;;  %v7393_v0 = vadd.f32 %v7392_v19, %v7391_v20  ;;  %v7394_v54 = vpop.f32.mrb[122].mxu0 }
 0x43b   : > { %v7432_v12 = vpop.f32.mrb[121].mxu1  ;;  %v7395_v16 = vpop.f32.mrb[123].mxu0 }
 0x43c   : > { %v5707_v48 = vadd.f32 %v7393_v0, %v5642_v46  ;;  %v7433_v34 = vadd.f32 %v7432_v12, %v7431_v8  ;;  %v7434_v2 = vpop.f32.mrb[122].mxu1  ;;  %v7396_v9 = vadd.f32 %v7395_v16, %v7394_v54 }
 0x43d   : > { %v7435_v10 = vpop.f32.mrb[123].mxu1 }
 0x43e   : > { %v5772_v37 = vadd.f32 %v7433_v34, %v5707_v48  ;;  %v5710_v32 = vadd.f32 %v7396_v9, %v5645_v55  ;;  %v7436_v5 = vadd.f32 %v7435_v10, %v7434_v2 }
 0x440   : > { %v5775_v21 = vadd.f32 %v7436_v5, %v5710_v32  ;;  %v7397_v62 = vpop.f32.mrb[124].mxu0 }
 0x441   : > { %v7398_v35 = vpop.f32.mrb[125].mxu0 }
 0x442   : > { %v7437_v22 = vpop.f32.mrb[124].mxu1  ;;  %v7399_v18 = vadd.f32 %v7398_v35, %v7397_v62  ;;  %v7400_v1 = vpop.f32.mrb[126].mxu0 }
 0x443   : > { %v7438_v11 = vpop.f32.mrb[125].mxu1  ;;  %v7401_v53 = vpop.f32.mrb[127].mxu0 }
 0x444   : > { %v5715_v45 = vadd.f32 %v7399_v18, %v5650_v4  ;;  %v7439_v23 = vadd.f32 %v7438_v11, %v7437_v22  ;;  %v7440_v27 = vpop.f32.mrb[126].mxu1  ;;  %v7402_v43 = vadd.f32 %v7401_v53, %v7400_v1 }
 0x445   : > { %v7441_v46 = vpop.f32.mrb[127].mxu1 }
 0x446   : > { %v5780_v63 = vadd.f32 %v7439_v23, %v5715_v45  ;;  %v5718_v61 = vadd.f32 %v7402_v43, %v5653_v26  ;;  %v7442_v40 = vadd.f32 %v7441_v46, %v7440_v27 }
 0x448   : > { %v5783_v57 = vadd.f32 %v7442_v40, %v5718_v61  ;;  %v7459_v36 = vpop.f32.mrb[128].mxu0 }
 0x449   : > { %v7460_v55 = vpop.f32.mrb[129].mxu0 }
 0x44a   : > { %v7499_v58 = vpop.f32.mrb[128].mxu1  ;;  %v7461_v47 = vadd.f32 %v7460_v55, %v7459_v36  ;;  %v7462_v14 = vpop.f32.mrb[130].mxu0 }
 0x44b   : > { %v7500_v24 = vpop.f32.mrb[129].mxu1  ;;  %v7463_v17 = vpop.f32.mrb[131].mxu0 }
 0x44c   : > { %v5821_v44 = vadd.f32 %v7461_v47, %v5756_v38  ;;  %v7501_v15 = vadd.f32 %v7500_v24, %v7499_v58  ;;  %v7502_v13 = vpop.f32.mrb[130].mxu1  ;;  %v7464_v42 = vadd.f32 %v7463_v17, %v7462_v14  ;;  %v7006_v58 = vld [vmem:[#allocation7] ss:$0 sm:$0xff] }
 0x44d   : > { %v7503_v4 = vpop.f32.mrb[131].mxu1 }
 0x44e   : > { %v5824_v60 = vadd.f32 %v7464_v42, %v5759_v56  ;;  %v7504_v49 = vadd.f32 %v7503_v4, %v7502_v13  ;;  %v5886_v33 = vadd.f32 %v7501_v15, %v5821_v44  ;;  %v9469_v13 = vld [vmem:[#allocation12_spill] sm:$0xff] }
 0x44f   : > { %v9266_v42 = vrot.slane %v7006_v58, %v9469_v13 }
 0x450   : > { %v7465_v25 = vpop.f32.mrb[132].mxu0  ;;  %v5889_v39 = vadd.f32 %v7504_v49, %v5824_v60 }
 0x451   : > { %v7466_v26 = vpop.f32.mrb[133].mxu0 }
 0x452   : > { %v7505_v3 = vpop.f32.mrb[132].mxu1  ;;  %v7467_v50 = vadd.f32 %v7466_v26, %v7465_v25  ;;  %v7468_v28 = vpop.f32.mrb[134].mxu0 }
 0x453   : > { %v7506_v51 = vpop.f32.mrb[133].mxu1  ;;  %v7469_v41 = vpop.f32.mrb[135].mxu0 }
 0x454   : > { %v5829_v7 = vadd.f32 %v7467_v50, %v5764_v52  ;;  %v7507_v30 = vadd.f32 %v7506_v51, %v7505_v3  ;;  %v7508_v6 = vpop.f32.mrb[134].mxu1  ;;  %v7470_v29 = vadd.f32 %v7469_v41, %v7468_v28  ;;  %v9270_v51 = vcombine.high %v9266_v42, %v9266_v42 }
 0x455   : > { %v7509_v38 = vpop.f32.mrb[135].mxu1 }
 0x456   : > { %v5832_v59 = vadd.f32 %v7470_v29, %v5767_v31  ;;  %v7510_v20 = vadd.f32 %v7509_v38, %v7508_v6  ;;  %v5894_v19 = vadd.f32 %v7507_v30, %v5829_v7 }
 0x458   : > { %v7471_v8 = vpop.f32.mrb[136].mxu0  ;;  %v5897_v56 = vadd.f32 %v7510_v20, %v5832_v59 }
 0x459   : > { %v7472_v0 = vpop.f32.mrb[137].mxu0 }
 0x45a   : > { %v7511_v54 = vpop.f32.mrb[136].mxu1  ;;  %v7473_v12 = vadd.f32 %v7472_v0, %v7471_v8  ;;  %v7474_v16 = vpop.f32.mrb[138].mxu0  ;;  %v9280_v8 = vrot.slane %v9270_v51, 1 }
 0x45b   : > { %v7512_v48 = vpop.f32.mrb[137].mxu1  ;;  %v7475_v34 = vpop.f32.mrb[139].mxu0 }
 0x45c   : > { %v5837_v2 = vadd.f32 %v7473_v12, %v5772_v37  ;;  %v7513_v9 = vadd.f32 %v7512_v48, %v7511_v54  ;;  %v7514_v10 = vpop.f32.mrb[138].mxu1  ;;  %v7476_v32 = vadd.f32 %v7475_v34, %v7474_v16 }
 0x45d   : > { %v7515_v52 = vpop.f32.mrb[139].mxu1 }
 0x45e   : > { %v5840_v5 = vadd.f32 %v7476_v32, %v5775_v21  ;;  %v7516_v62 = vadd.f32 %v7515_v52, %v7514_v10  ;;  %v5902_v35 = vadd.f32 %v7513_v9, %v5837_v2 }
 0x460   : > { %v7477_v22 = vpop.f32.mrb[140].mxu0  ;;  %v5905_v31 = vadd.f32 %v7516_v62, %v5840_v5 }
 0x461   : > { %v7478_v18 = vpop.f32.mrb[141].mxu0 }
 0x462   : > { %v7517_v1 = vpop.f32.mrb[140].mxu1  ;;  %v7479_v11 = vadd.f32 %v7478_v18, %v7477_v22  ;;  %v7480_v53 = vpop.f32.mrb[142].mxu0 }
 0x463   : > { %v7518_v45 = vpop.f32.mrb[141].mxu1  ;;  %v7481_v23 = vpop.f32.mrb[143].mxu0 }
 0x464   : > { %v5845_v27 = vadd.f32 %v7479_v11, %v5780_v63  ;;  %v7519_v43 = vadd.f32 %v7518_v45, %v7517_v1  ;;  %v7520_v46 = vpop.f32.mrb[142].mxu1  ;;  %v7482_v61 = vadd.f32 %v7481_v23, %v7480_v53 }
 0x465   : > { %v7521_v37 = vpop.f32.mrb[143].mxu1 }
 0x466   : > { %v5848_v40 = vadd.f32 %v7482_v61, %v5783_v57  ;;  %v7522_v36 = vadd.f32 %v7521_v37, %v7520_v46  ;;  %v5910_v55 = vadd.f32 %v7519_v43, %v5845_v27 }
 0x468   : > { %v7553_v21 = vpop.f32.mrb[144].mxu0  ;;  %v5913_v47 = vadd.f32 %v7522_v36, %v5848_v40 }
 0x469   : > { %v5959_v14 = vadd.f32 %v7553_v21, %v5894_v19  ;;  %v5950_v24 = vpop.f32.mrb[145].mxu0  ;;  %v9277_v19 = vrot.slane %v9266_v42, 1 }
 0x46a   : > { %v7557_v17 = vpop.f32.mrb[144].mxu1  ;;  %v5951_v44 = vadd.f32 %v5950_v24, %v5886_v33  ;;  %v7554_v15 = vpop.f32.mrb[146].mxu0 }
 0x46b   : > { %v5975_v4 = vadd.f32 %v7557_v17, %v5910_v55  ;;  %v5966_v63 = vpop.f32.mrb[145].mxu1  ;;  %v5962_v60 = vadd.f32 %v7554_v15, %v5897_v56  ;;  %v5953_v49 = vpop.f32.mrb[147].mxu0 }
 0x46c   : > { %v5967_v25 = vadd.f32 %v5966_v63, %v5902_v35  ;;  %v7558_v26 = vpop.f32.mrb[146].mxu1  ;;  %v5954_v57 = vadd.f32 %v5953_v49, %v5889_v39 }
 0x46d   : > { %v5982_v3 = vmax.f32 %v5959_v14, %v5962_v60  ;;  %v5978_v50 = vadd.f32 %v7558_v26, %v5913_v47  ;;  %v5969_v28 = vpop.f32.mrb[147].mxu1 }
 0x46e   : > { %v5981_v41 = vmax.f32 %v5951_v44, %v5954_v57  ;;  %v5970_v33 = vadd.f32 %v5969_v28, %v5905_v31 }
 0x46f   : > { %v6006_v7 = vcombine.high %v5982_v3, %v5982_v3  ;;  %v6013_v30 = vrot.slane %v5982_v3, %v9469_v13  ;;  %v5984_v6 = vmax.f32 %v5975_v4, %v5978_v50 }
 0x470   : > { %v9273_v29 = vmax.f32 %v5967_v25, %v5970_v33  ;;  %v5989_v9 = vcombine.high %v5981_v41, %v5981_v41  ;;  %v5996_v1 = vrot.slane %v5981_v41, %v9469_v13 }
 0x471   : > { %v6020_v38 = vrot.slane %v6006_v7, %v9469_v13  ;;  %v6021_v59 = vcombine.high %v6013_v30, %v6013_v30  ;;  %v6994_v20 = vrot.slane %v6013_v30, 9  ;;  %v6040_v39 = vcombine.high %v5984_v6, %v5984_v6 }
 0x472   : > { %v6047_v56 = vrot.slane %v5984_v6, %v9469_v13  ;;  %v6003_v43 = vrot.slane %v5989_v9, %v9469_v13  ;;  %v6004_v40 = vcombine.high %v5996_v1, %v5996_v1  ;;  %v6990_v24 = vrot.slane %v5996_v1, 9 }
 0x473   : > { %v6022_v0 = vcombine.high %v6020_v38, %v6020_v38  ;;  %v6995_v54 = vrot.slane %v6021_v59, 9  ;;  %v6996_v12 = vrot.slane %v6020_v38, 9  ;;  %v6125_v16 = vmax.f32 %v6013_v30, %v6994_v20 }
 0x474   : > { %v6054_v48 = vrot.slane %v6040_v39, %v9469_v13  ;;  %v6055_v34 = vcombine.high %v6047_v56, %v6047_v56  ;;  %v7002_v2 = vrot.slane %v6047_v56, 9  ;;  %v6005_v14 = vcombine.high %v6003_v43, %v6003_v43 }
 0x475   : > { %v6997_v10 = vrot.slane %v6022_v0, 9  ;;  %v6126_v32 = vmax.f32 %v6021_v59, %v6995_v54  ;;  %v6127_v52 = vmax.f32 %v6020_v38, %v6996_v12  ;;  %v6161_v5 = vadd.f32 %v9266_v42, %v6125_v16 }
 0x476   : > { %v6056_v62 = vcombine.high %v6054_v48, %v6054_v48  ;;  %v7003_v35 = vrot.slane %v6055_v34, 9  ;;  %v7004_v22 = vrot.slane %v6054_v48, 9  ;;  %v6133_v31 = vmax.f32 %v6047_v56, %v7002_v2 }
 0x477   : > { %v6128_v18 = vmax.f32 %v6022_v0, %v6997_v10  ;;  %v6162_v11 = vadd.f32 %v9277_v19, %v6126_v32  ;;  %v6163_v53 = vadd.f32 %v9270_v51, %v6127_v52  ;;  %v6177_v45 = vmax.f32 %v6161_v5, 0.0 }
 0x478   : > { %v7005_v23 = vrot.slane %v6056_v62, 9  ;;  %v6134_v27 = vmax.f32 %v6055_v34, %v7003_v35  ;;  %v6135_v61 = vmax.f32 %v6054_v48, %v7004_v22  ;;  %v6169_v37 = vadd.f32 %v9266_v42, %v6133_v31 }
 0x479   : > { %v6164_v46 = vadd.f32 %v9280_v8, %v6128_v18  ;;  %v6178_v36 = vmax.f32 %v6162_v11, 0.0  ;;  %v6179_v55 = vmax.f32 %v6163_v53, 0.0  ;;  %v7031_v58 = vpack.c.bf16 %v6177_v45, %v6177_v45 }
 0x47a   : > { %v6136_v21 = vmax.f32 %v6056_v62, %v7005_v23  ;;  %v9292_v47 = vadd.f32 %v9277_v19, %v6134_v27  ;;  %v9295_v44 = vadd.f32 %v9270_v51, %v6135_v61  ;;  %v6185_v15 = vmax.f32 %v6169_v37, 0.0 }
 0x47b   : > { %v6180_v17 = vmax.f32 %v6164_v46, 0.0  ;;  %v6991_v4 = vrot.slane %v6004_v40, 9  ;;  %v9297_v63 = vpack.c.bf16 %v6178_v36, %v6178_v36  ;;  %v9299_v60 = vpack.c.bf16 %v6179_v55, %v6179_v55 }
 0x47c   : > { %v6257_v49 = vunpack.c.l.b16 %v7031_v58  ;;  %v9302_v25 = vadd.f32 %v9280_v8, %v6136_v21  ;;  %v6186_v26 = vmax.f32 %v9292_v47, 0.0  ;;  %v6992_v57 = vrot.slane %v6003_v43, 9 }
 0x47d   : > { %v6993_v3 = vrot.slane %v6005_v14, 9  ;;  %v6121_v50 = vmax.f32 %v5996_v1, %v6990_v24  ;;  %v9305_v28 = vpack.c.bf16 %v6180_v17, %v6180_v17  ;;  %v6187_v41 = vmax.f32 %v9295_v44, 0.0 }
 0x47e   : > { %v9308_v33 = vpack.c.bf16 %v6185_v15, %v6185_v15  ;;  %v6122_v7 = vmax.f32 %v6004_v40, %v6991_v4  ;;  %v6123_v30 = vmax.f32 %v6003_v43, %v6992_v57  ;;  %v6023_v59 = vcombine.high %v9273_v29, %v9273_v29 }
 0x47f   : > { %v6124_v6 = vmax.f32 %v6005_v14, %v6993_v3  ;;  %v6157_v38 = vadd.f32 %v9266_v42, %v6121_v50  ;;  %v6258_v20 = vunpack.c.l.b16 %v9297_v63  ;;  %v6259_v39 = vunpack.c.l.b16 %v9299_v60 }
 0x480   : > { %v6158_v56 = vadd.f32 %v9277_v19, %v6122_v7  ;;  %v6030_v0 = vrot.slane %v9273_v29, %v9469_v13  ;;  %v6159_v54 = vadd.f32 %v9270_v51, %v6123_v30  ;;  %v6037_v48 = vrot.slane %v6023_v59, %v9469_v13 }
 0x481   : > { %v6160_v12 = vadd.f32 %v9280_v8, %v6124_v6  ;;  %v6173_v16 = vmax.f32 %v6157_v38, 0.0  ;;  %v6278_v34 = vrot.slane %v6257_v49, 4  ;;  %v6188_v18 = vmax.f32 %v9302_v25, 0.0 }
 0x482   : > { %v6174_v2 = vmax.f32 %v6158_v56, 0.0  ;;  %v6038_v9 = vcombine.high %v6030_v0, %v6030_v0  ;;  %v6998_v10 = vrot.slane %v6030_v0, 9  ;;  %v6175_v32 = vmax.f32 %v6159_v54, 0.0 }
 0x483   : > { %v6176_v52 = vmax.f32 %v6160_v12, 0.0  ;;  %v7027_v5 = vpack.c.bf16 %v6173_v16, %v6173_v16  ;;  %v6039_v62 = vcombine.high %v6037_v48, %v6037_v48  ;;  %v7000_v22 = vrot.slane %v6037_v48, 9 }
 0x484   : > { %v7028_v35 = vpack.c.bf16 %v6174_v2, %v6174_v2  ;;  %v6999_v29 = vrot.slane %v6038_v9, 9  ;;  %v6129_v31 = vmax.f32 %v6030_v0, %v6998_v10  ;;  %v7029_v1 = vpack.c.bf16 %v6175_v32, %v6175_v32 }
 0x485   : > { %v7030_v11 = vpack.c.bf16 %v6176_v52, %v6176_v52  ;;  %v7001_v13 = vrot.slane %v6039_v62, 9  ;;  %v6131_v23 = vmax.f32 %v6037_v48, %v7000_v22  ;;  %v6253_v43 = vunpack.c.l.b16 %v7027_v5 }
 0x486   : > { %v6254_v53 = vunpack.c.l.b16 %v7028_v35  ;;  %v6130_v45 = vmax.f32 %v6038_v9, %v6999_v29  ;;  %v6165_v27 = vadd.f32 %v9266_v42, %v6129_v31  ;;  %v6255_v46 = vunpack.c.l.b16 %v7029_v1 }
 0x487   : > { %v6256_v61 = vunpack.c.l.b16 %v7030_v11  ;;  %v6132_v37 = vmax.f32 %v6039_v62, %v7001_v13  ;;  %v6167_v55 = vadd.f32 %v9270_v51, %v6131_v23  ;;  %v7040_v21 = vpack.c.bf16 %v6186_v26, %v6186_v26 }
 0x488   : > { %v6269_v40 = vrot.slane %v6254_v53, 7  ;;  %v6166_v36 = vadd.f32 %v9277_v19, %v6130_v45  ;;  %v6181_v58 = vmax.f32 %v6165_v27, 0.0  ;;  %v6272_v47 = vrot.slane %v6255_v46, 6 }
 0x489   : > { %v6275_v14 = vrot.slane %v6256_v61, 5  ;;  %v6168_v24 = vadd.f32 %v9280_v8, %v6132_v37  ;;  %v6260_v17 = vunpack.c.l.b16 %v9305_v28  ;;  %v6183_v15 = vmax.f32 %v6167_v55, 0.0 }
 0x48a   : > { %v6271_v42 = vsel %vm6270_vm5, %v6269_v40, %v6253_v43  ;;  %v6182_v44 = vmax.f32 %v6166_v36, 0.0  ;;  %v6281_v4 = vrot.slane %v6258_v20, 3  ;;  %v7041_v63 = vpack.c.bf16 %v6187_v41, %v6187_v41 }
 0x48b   : > { %v6274_v60 = vsel %vm6273_vm6, %v6272_v47, %v6271_v42  ;;  %v6184_v19 = vmax.f32 %v6168_v24, 0.0  ;;  %v7035_v49 = vpack.c.bf16 %v6181_v58, %v6181_v58  ;;  %v7037_v26 = vpack.c.bf16 %v6183_v15, %v6183_v15 }
 0x48c   : > { %v6277_v51 = vsel %vm6276_vm7, %v6275_v14, %v6274_v60  ;;  %v7036_v25 = vpack.c.bf16 %v6182_v44, %v6182_v44  ;;  %v6284_v57 = vrot.slane %v6259_v39, 2  ;;  %v7042_v3 = vpack.c.bf16 %v6188_v18, %v6188_v18 }
 0x48d   : > { %v6280_v8 = vsel %vm6279_vm8, %v6278_v34, %v6277_v51  ;;  %v7038_v50 = vpack.c.bf16 %v6184_v19, %v6184_v19  ;;  %v6287_v28 = vrot.slane %v6260_v17, 1  ;;  %v6263_v6 = vunpack.c.l.b16 %v7037_v26 }
 0x48e   : > { %v6283_v7 = vsel %vm6282_vm9, %v6281_v4, %v6280_v8  ;;  %v6262_v30 = vunpack.c.l.b16 %v7036_v25  ;;  %v6265_v41 = vunpack.c.l.b16 %v9308_v33  ;;  %v6266_v38 = vunpack.c.l.b16 %v7040_v21 }
 0x48f   : > { %v6286_v59 = vsel %vm6285_vm10, %v6284_v57, %v6283_v7  ;;  %v6264_v20 = vunpack.c.l.b16 %v7038_v50  ;;  %v6261_v56 = vunpack.c.l.b16 %v7035_v49  ;;  %v6292_v54 = vrot.slane %v6263_v6, 6 }
 0x490   : > { %v6289_v39 = vsel %vm6288_vm11, %v6287_v28, %v6286_v59  ;;  %v6290_v0 = vrot.slane %v6262_v30, 7  ;;  %v6267_v12 = vunpack.c.l.b16 %v7041_v63  ;;  %v6268_v34 = vunpack.c.l.b16 %v7042_v3 }
 0x491   : > { %v6304_v16 = vpack.c.b16 %v6289_v39, %v6289_v39  ;;  %v6294_v48 = vrot.slane %v6264_v20, 5  ;;  %v6296_v33 = vrot.slane %v6265_v41, 4  ;;  %v6298_v10 = vrot.slane %v6266_v38, 3 }
 0x492   : > { %v6291_v2 = vsel %vm6270_vm5, %v6290_v0, %v6261_v56  ;;  %v6300_v52 = vrot.slane %v6267_v12, 2  ;;  %v6302_v62 = vrot.slane %v6268_v34, 1 }
 0x493   : > { %6308 = vst [vmem:[%s279_s21] sm:$0xf] %v6304_v16  ;;  %v6293_v9 = vsel %vm6273_vm6, %v6292_v54, %v6291_v2 }
 0x494   : > { %v6295_v32 = vsel %vm6276_vm7, %v6294_v48, %v6293_v9 }
 0x495   : > { %v6297_v5 = vsel %vm6279_vm8, %v6296_v33, %v6295_v32 }
 0x496   : > { %v6299_v35 = vsel %vm6282_vm9, %v6298_v10, %v6297_v5 }
 0x497   : > { %v6301_v29 = vsel %vm6285_vm10, %v6300_v52, %v6299_v35 }
 0x498   : > { %v6303_v22 = vsel %vm6288_vm11, %v6302_v62, %v6301_v29 }
 0x499   : > { %v6305_v31 = vpack.c.b16 %v6303_v22, %v6303_v22 }
 0x49b   : > { %6309 = vst [vmem:[%s279_s21 + $0x4] sm:$0xf] %v6305_v31 }
 0x49c PF: > { %s18_s18 = sadd.s32 1, %s7965_s18  }
 0x49d   : > { %p15_p11 = scmp.ge.s32.totalorder %s18_s18, 4  }
 0x49f   :  { %17 = sbr.rel (!%p15_p11) target bundleno = 3 (0x3), region = 87 }
 0x4a6   :  { %6331 = vsyncpa [#allocation3], 1 }
 0x4a7   :  { %6333 = vsyncpa [#allocation3 + $0x1], 1 }
 0x4a8   :  { %6334 = vsyncpa [#allocation5], 1 }
 0x4a9   :  { %6335 = vsyncpa [#allocation8], 1 }

// kernel: over_lenet5_forward.3
= control target key start
LH: loop header
LB: loop body
LE: loop exit
PB: predicated region body
PF: predicated region fallthrough
CT: control target
= control target key end

     0   :  { %12 = vsyncpa [#allocation3], 0  ;;  %s9666_s0 = inlined_call_operand.vmem [shape: bf16[8,2048], index: 0, kind: input, shape index: {}]   ;;  %s9667_s1 = inlined_call_operand.hbm [shape: bf16[2048,640], index: 1, kind: input, shape index: {}]   ;;  %s9668_s2 = inlined_call_operand.hbm [shape: f32[1,640], index: 2, kind: input, shape index: {}]   ;;  %s9669_s3 = inlined_call_operand.hbm [shape: bf16[640,512], index: 3, kind: input, shape index: {}]   ;;  %s9670_s4 = inlined_call_operand.hbm [shape: f32[1,512], index: 4, kind: input, shape index: {}]   ;;  %s9671_s5 = inlined_call_operand.hbm [shape: bf16[512,128], index: 5, kind: input, shape index: {}]   ;;  %s9672_s6 = inlined_call_operand.hbm [shape: f32[1,128], index: 6, kind: input, shape index: {}]   ;;  %s9673_s7 = inlined_call_operand.vmem [shape: f32[8,128], index: 7, kind: output, shape index: {}]  }
   0x1   :  { %13 = vsyncpa [#allocation5], 0 }
   0x2   :  { %14 = vsyncpa [#allocation8], 0 }
   0x3   :  { %15 = vsyncpa [#allocation11], 0  ;;  %s9350_s24 = smov [#allocation4]   ;;  %s9351_s26 = smov [#allocation7]  }
   0x4   :  { %s36_s25 = sshll.u32 %s9350_s24, 4  ;;  %s58_s27 = sshll.u32 %s9351_s26, 4  ;;  %s37_s25 = int_to_ptr.vmem [resolvable:$true] %s36_s25  ;;  %s59_s27 = int_to_ptr.vmem [resolvable:$true] %s58_s27 }
   0x5   :  { %s9210_s30 = scalar_lea.hbm %s9668_s2, 80 }
   0x6   :  { %p9211_p0 = scmp.ne.s32.totalorder %s9668_s2, %s9210_s30  ;;  %p9214_p1 = scmp.lt.u32.totalorder %s9210_s30, %s9668_s2 }
   0x8   :  { %p9216_p2 = pnand %p9214_p1, %p9211_p0 }
   0xa   :  { %9219 = shalt.err (!%p9216_p2)
}
   0xb   :  { %s9220_s12 = scalar_lea.vmem %s37_s25, 80  ;;  %s9224_s13 = scalar_lea.vmem %s37_s25, 96 }
   0xc   :  { %p9221_p3 = scmp.ne.s32.totalorder %s37_s25, %s9220_s12  ;;  %p9225_p4 = scmp.lt.s32.totalorder %s37_s25, %s37_s25 }
   0xd   :  { %p9226_p5 = scmp.lt.s32.totalorder %s9224_s13, %s9220_s12 }
   0xf   :  { %p9227_p6 = por %p9226_p5, %p9225_p4 }
  0x11   :  { %p9228_p7 = pnand %p9227_p6, %p9221_p3 }
  0x13   :  { %9231 = shalt.err (!%p9228_p7)
}
  0x14   :  { %39 = dma.hbm_to_vmem [thread:$0]  %s9668_s2, 80, %s37_s25, [#allocation5]  }
  0x15   :  { %s9232_s18 = scalar_lea.hbm %s9670_s4, 64 }
  0x16   :  { %p9233_p8 = scmp.ne.s32.totalorder %s9670_s4, %s9232_s18  ;;  %p9236_p9 = scmp.lt.u32.totalorder %s9232_s18, %s9670_s4 }
  0x18   :  { %p9238_p10 = pnand %p9236_p9, %p9233_p8 }
  0x1a   :  { %9241 = shalt.err (!%p9238_p10)
}
  0x1b   :  { %s9242_s23 = scalar_lea.vmem %s59_s27, 64  ;;  %p9247_p12 = scmp.lt.s32.totalorder %s59_s27, %s59_s27 }
  0x1c   :  { %p9243_p11 = scmp.ne.s32.totalorder %s59_s27, %s9242_s23  ;;  %p9248_p13 = scmp.lt.s32.totalorder %s9242_s23, %s9242_s23 }
  0x1e   :  { %p9249_p0 = por %p9248_p13, %p9247_p12 }
  0x20   :  { %p9250_p1 = pnand %p9249_p0, %p9243_p11 }
  0x22   :  { %9253 = shalt.err (!%p9250_p1)
}
  0x23   :  { %61 = dma.hbm_to_vmem [thread:$0]  %s9670_s4, 64, %s59_s27, [#allocation8]  }
  0x24   :  { %s9352_s25 = smov [#allocation2]   ;;  %s9254_s30 = scalar_lea.hbm %s9667_s1, 81920 }
  0x25   :  { %s23_s26 = sshll.u32 %s9352_s25, 4  ;;  %p9255_p2 = scmp.ne.s32.totalorder %s9667_s1, %s9254_s30  ;;  %s24_s26 = int_to_ptr.vmem [resolvable:$true] %s23_s26 }
  0x26   :  { %p9258_p3 = scmp.lt.u32.totalorder %s9254_s30, %s9667_s1 }
  0x28   :  { %p9260_p4 = pnand %p9258_p3, %p9255_p2 }
  0x2a   :  { %9263 = shalt.err (!%p9260_p4)
}
  0x2b   :  { %s9264_s12 = scalar_lea.vmem %s24_s26, 81920  ;;  %p9269_p6 = scmp.lt.s32.totalorder %s24_s26, %s24_s26 }
  0x2c   :  { %p9265_p5 = scmp.ne.s32.totalorder %s24_s26, %s9264_s12  ;;  %p9270_p7 = scmp.lt.s32.totalorder %s9264_s12, %s9264_s12 }
  0x2e   :  { %p9271_p8 = por %p9270_p7, %p9269_p6 }
  0x30   :  { %p9272_p9 = pnand %p9271_p8, %p9265_p5 }
  0x32   :  { %9275 = shalt.err (!%p9272_p9)
}
  0x33   :  { %s9353_s4 = smov 320   ;;  %s9354_s27 = smov 20  }
  0x34   :  { %29 = dma.hbm_to_vmem [thread:$0]  %s9667_s1, 81920, %s24_s26, [#allocation3], %s9353_s4, %s9353_s4, %s9354_s27  }
  0x35   :  { %s9355_s15 = smov [#allocation6]   ;;  %s9276_s19 = scalar_lea.hbm %s9669_s3, 20480 }
  0x36   :  { %s45_s16 = sshll.u32 %s9355_s15, 4  ;;  %p9277_p10 = scmp.ne.s32.totalorder %s9669_s3, %s9276_s19  ;;  %s46_s16 = int_to_ptr.vmem [resolvable:$true] %s45_s16 }
  0x37   :  { %p9280_p11 = scmp.lt.u32.totalorder %s9276_s19, %s9669_s3 }
  0x39   :  { %p9282_p12 = pnand %p9280_p11, %p9277_p10 }
  0x3b   :  { %9285 = shalt.err (!%p9282_p12)
}
  0x3c   :  { %s9286_s2 = scalar_lea.vmem %s46_s16, 20480  ;;  %p9291_p0 = scmp.lt.s32.totalorder %s46_s16, %s46_s16 }
  0x3d   :  { %p9287_p13 = scmp.ne.s32.totalorder %s46_s16, %s9286_s2  ;;  %p9292_p1 = scmp.lt.s32.totalorder %s9286_s2, %s9286_s2 }
  0x3f   :  { %p9293_p2 = por %p9292_p1, %p9291_p0 }
  0x41   :  { %p9294_p3 = pnand %p9293_p2, %p9287_p13 }
  0x43   :  { %9297 = shalt.err (!%p9294_p3)
}
  0x44   :  { %s9356_s1 = smov 256   ;;  %s9357_s24 = smov 16  }
  0x45   :  { %51 = dma.hbm_to_vmem [thread:$0]  %s9669_s3, 20480, %s46_s16, [#allocation5], %s9356_s1, %s9356_s1, %s9357_s24  }
  0x46   :  { %s9358_s28 = smov [#allocation9]   ;;  %s9298_s9 = scalar_lea.hbm %s9671_s5, 4096 }
  0x47   :  { %s67_s29 = sshll.u32 %s9358_s28, 4  ;;  %p9299_p4 = scmp.ne.s32.totalorder %s9671_s5, %s9298_s9  ;;  %s68_s29 = int_to_ptr.vmem [resolvable:$true] %s67_s29 }
  0x48   :  { %p9302_p5 = scmp.lt.u32.totalorder %s9298_s9, %s9671_s5 }
  0x4a   :  { %p9304_p6 = pnand %p9302_p5, %p9299_p4 }
  0x4c   :  { %9307 = shalt.err (!%p9304_p6)
}
  0x4d   :  { %s9308_s27 = scalar_lea.vmem %s68_s29, 4096  ;;  %p9313_p8 = scmp.lt.s32.totalorder %s68_s29, %s68_s29 }
  0x4e   :  { %p9309_p7 = scmp.ne.s32.totalorder %s68_s29, %s9308_s27  ;;  %p9314_p9 = scmp.lt.s32.totalorder %s9308_s27, %s9308_s27 }
  0x50   :  { %p9315_p10 = por %p9314_p9, %p9313_p8 }
  0x52   :  { %p9316_p11 = pnand %p9315_p10, %p9309_p7 }
  0x54   :  { %9319 = shalt.err (!%p9316_p11)
}
  0x55   :  { %s9359_s3 = smov 64   ;;  %s9360_s13 = smov 4  }
  0x56   :  { %73 = dma.hbm_to_vmem [thread:$0]  %s9671_s5, 4096, %s68_s29, [#allocation8], %s9359_s3, %s9359_s3, %s9360_s13  }
  0x57   :  { %s9361_s16 = smov [#allocation10]   ;;  %s9320_s20 = scalar_lea.hbm %s9672_s6, 16 }
  0x58   :  { %s80_s17 = sshll.u32 %s9361_s16, 4  ;;  %p9321_p12 = scmp.ne.s32.totalorder %s9672_s6, %s9320_s20  ;;  %s81_s17 = int_to_ptr.vmem [resolvable:$true] %s80_s17 }
  0x59   :  { %p9324_p13 = scmp.lt.u32.totalorder %s9320_s20, %s9672_s6 }
  0x5b   :  { %p9326_p0 = pnand %p9324_p13, %p9321_p12 }
  0x5d   :  { %9329 = shalt.err (!%p9326_p0)
}
  0x5e   :  { %s9330_s1 = scalar_lea.vmem %s81_s17, 16  ;;  %s9334_s5 = scalar_lea.vmem %s81_s17, 32 }
  0x5f   :  { %p9331_p1 = scmp.ne.s32.totalorder %s81_s17, %s9330_s1  ;;  %p9335_p2 = scmp.lt.s32.totalorder %s81_s17, %s81_s17 }
  0x60   :  { %p9336_p3 = scmp.lt.s32.totalorder %s9334_s5, %s9330_s1 }
  0x62   :  { %p9337_p4 = por %p9336_p3, %p9335_p2 }
  0x64   :  { %p9338_p5 = pnand %p9337_p4, %p9331_p1 }
  0x66   :  { %9341 = shalt.err (!%p9338_p5)
}
  0x67   :  { %83 = dma.hbm_to_vmem [thread:$0]  %s9672_s6, 16, %s81_s17, [#allocation11]  }
  0x68   :  { %9342 = dma.done.wait [#allocation3], 81920  }
  0x69   :  { %9343 = vsyncadd [#allocation3], 4294885376 }
  0x6a   :  { %9344 = dma.done.wait [#allocation5], 20560  }
  0x6b   :  { %9345 = vsyncadd [#allocation5], 4294946736 }
  0x6c   :  { %9346 = dma.done.wait [#allocation8], 4160  }
  0x6d   :  { %9347 = vsyncadd [#allocation8], 4294963136 }
  0x6e   :  { %9348 = dma.done.wait [#allocation11], 16  }
  0x6f   :  { %9349 = vsyncadd [#allocation11], 4294967280  ;;  %v8026_v0 = vld [vmem:[#allocation2 + $0x4] ss:$20 sps:$4 sm:$0xff]   ;;  %v8028_v1 = vld [vmem:[#allocation2 + $0xc] ss:$20 sps:$4 sm:$0xff]  }
  0x70   :  { %4290 = vmatprep.subr.bf16.mxu0 %v8026_v0  ;;  %v8030_v2 = vld [vmem:[#allocation2] ss:$20 sps:$4 sm:$0xff]   ;;  %v8031_v3 = vld [vmem:[#allocation2 + $0x8] ss:$20 sps:$4 sm:$0xff]   ;;  %4618 = vmatprep.subr.bf16.mxu1 %v8028_v1  ;;  %v8037_v7 = vld [vmem:[#allocation2 + $0x30] ss:$20 sps:$4 sm:$0xff]  }
  0x71   :  { %v8032_v4 = vld [vmem:[#allocation2 + $0x2c] ss:$20 sps:$4 sm:$0xff]   ;;  %4291 = vmatpush1.bf16.msra.mxu0 %v8030_v2  ;;  %4619 = vmatpush1.bf16.msra.mxu1 %v8031_v3  ;;  %v8034_v5 = vld [vmem:[#allocation2 + $0x34] ss:$20 sps:$4 sm:$0xff]   ;;  %v8040_v9 = vld [vmem:[#allocation2 + $0x5c] ss:$20 sps:$4 sm:$0xff]  }
  0x72   :  { %v8036_v6 = vld [vmem:[#allocation2 + $0x28] ss:$20 sps:$4 sm:$0xff]   ;;  %4292 = vmatprep.subr.bf16.mxu0 %v8032_v4  ;;  %4620 = vmatprep.subr.bf16.mxu1 %v8034_v5  ;;  %v8042_v10 = vld [vmem:[#allocation2 + $0x50] ss:$20 sps:$4 sm:$0xff]   ;;  %v8043_v11 = vld [vmem:[#allocation2 + $0x58] ss:$20 sps:$4 sm:$0xff]  }
  0x73   :  { %v8038_v8 = vld [vmem:[#allocation2 + $0x54] ss:$20 sps:$4 sm:$0xff]   ;;  %v8044_v12 = vld [vmem:[#allocation2 + $0x7c] ss:$20 sps:$4 sm:$0xff]   ;;  %v8046_v13 = vld [vmem:[#allocation2 + $0x84] ss:$20 sps:$4 sm:$0xff]  }
  0x74   :  { %v8048_v14 = vld [vmem:[#allocation2 + $0x78] ss:$20 sps:$4 sm:$0xff]   ;;  %v8049_v15 = vld [vmem:[#allocation2 + $0x80] ss:$20 sps:$4 sm:$0xff]   ;;  %v8055_v19 = vld [vmem:[#allocation2 + $0xa8] ss:$20 sps:$4 sm:$0xff]  }
  0x75   :  { %4293 = vmatpush1.bf16.msra.mxu0 %v8036_v6  ;;  %4621 = vmatpush1.bf16.msra.mxu1 %v8037_v7  ;;  %v8050_v16 = vld [vmem:[#allocation2 + $0xa4] ss:$20 sps:$4 sm:$0xff]   ;;  %v8052_v17 = vld [vmem:[#allocation2 + $0xac] ss:$20 sps:$4 sm:$0xff]   ;;  %v8058_v21 = vld [vmem:[#allocation2 + $0xd4] ss:$20 sps:$4 sm:$0xff]  }
  0x76   :  { %4294 = vmatprep.subr.bf16.mxu0 %v8038_v8  ;;  %4622 = vmatprep.subr.bf16.mxu1 %v8040_v9  ;;  %v8054_v18 = vld [vmem:[#allocation2 + $0xa0] ss:$20 sps:$4 sm:$0xff]   ;;  %v8060_v22 = vld [vmem:[#allocation2 + $0xc8] ss:$20 sps:$4 sm:$0xff]   ;;  %v8061_v23 = vld [vmem:[#allocation2 + $0xd0] ss:$20 sps:$4 sm:$0xff]  }
  0x77   :  { %v8056_v20 = vld [vmem:[#allocation2 + $0xcc] ss:$20 sps:$4 sm:$0xff]   ;;  %v8062_v24 = vld [vmem:[#allocation2 + $0xf4] ss:$20 sps:$4 sm:$0xff]   ;;  %v8064_v25 = vld [vmem:[#allocation2 + $0xfc] ss:$20 sps:$4 sm:$0xff]  }
  0x78   :  { %v8066_v26 = vld [vmem:[#allocation2 + $0xf0] ss:$20 sps:$4 sm:$0xff]   ;;  %v8067_v27 = vld [vmem:[#allocation2 + $0xf8] ss:$20 sps:$4 sm:$0xff]   ;;  %v8073_v31 = vld [vmem:[#allocation2 + $0x120] ss:$20 sps:$4 sm:$0xff]  }
  0x79   :  { %4295 = vmatpush1.bf16.msra.mxu0 %v8042_v10  ;;  %4623 = vmatpush1.bf16.msra.mxu1 %v8043_v11  ;;  %v8068_v28 = vld [vmem:[#allocation2 + $0x11c] ss:$20 sps:$4 sm:$0xff]   ;;  %v8070_v29 = vld [vmem:[#allocation2 + $0x124] ss:$20 sps:$4 sm:$0xff]   ;;  %v8076_v33 = vld [vmem:[#allocation2 + $0x14c] ss:$20 sps:$4 sm:$0xff]  }
  0x7a   :  { %4296 = vmatprep.subr.bf16.mxu0 %v8044_v12  ;;  %4624 = vmatprep.subr.bf16.mxu1 %v8046_v13  ;;  %v8072_v30 = vld [vmem:[#allocation2 + $0x118] ss:$20 sps:$4 sm:$0xff]   ;;  %v8078_v34 = vld [vmem:[#allocation2 + $0x140] ss:$20 sps:$4 sm:$0xff]   ;;  %v8079_v35 = vld [vmem:[#allocation2 + $0x148] ss:$20 sps:$4 sm:$0xff]  }
  0x7b   :  { %v8074_v32 = vld [vmem:[#allocation2 + $0x144] ss:$20 sps:$4 sm:$0xff]   ;;  %v8080_v36 = vld [vmem:[#allocation2 + $0x16c] ss:$20 sps:$4 sm:$0xff]   ;;  %v8082_v37 = vld [vmem:[#allocation2 + $0x174] ss:$20 sps:$4 sm:$0xff]  }
  0x7c   :  { %v8084_v38 = vld [vmem:[#allocation2 + $0x168] ss:$20 sps:$4 sm:$0xff]   ;;  %v8085_v39 = vld [vmem:[#allocation2 + $0x170] ss:$20 sps:$4 sm:$0xff]   ;;  %v8091_v43 = vld [vmem:[#allocation2 + $0x198] ss:$20 sps:$4 sm:$0xff]  }
  0x7d   :  { %4297 = vmatpush1.bf16.msra.mxu0 %v8048_v14  ;;  %4625 = vmatpush1.bf16.msra.mxu1 %v8049_v15  ;;  %v8086_v40 = vld [vmem:[#allocation2 + $0x194] ss:$20 sps:$4 sm:$0xff]   ;;  %v8088_v41 = vld [vmem:[#allocation2 + $0x19c] ss:$20 sps:$4 sm:$0xff]   ;;  %v8094_v45 = vld [vmem:[#allocation2 + $0x1c4] ss:$20 sps:$4 sm:$0xff]  }
  0x7e   :  { %4298 = vmatprep.subr.bf16.mxu0 %v8050_v16  ;;  %4626 = vmatprep.subr.bf16.mxu1 %v8052_v17  ;;  %v8090_v42 = vld [vmem:[#allocation2 + $0x190] ss:$20 sps:$4 sm:$0xff]   ;;  %v8096_v47 = vld [vmem:[#allocation2 + $0x1b8] ss:$20 sps:$4 sm:$0xff]   ;;  %v8097_v49 = vld [vmem:[#allocation2 + $0x1c0] ss:$20 sps:$4 sm:$0xff]  }
  0x7f   :  { %v8092_v44 = vld [vmem:[#allocation2 + $0x1bc] ss:$20 sps:$4 sm:$0xff]   ;;  %v103_v46 = vld [vmem:[%s9666_s0] sm:$0xff]  ;;  %v8106_v55 = vld [vmem:[#allocation2 + $0x214] ss:$20 sps:$4 sm:$0xff]  }
  0x80   :  { %v9478_v48 = vcombine.high %v103_v46, %v103_v46  ;;  %v8098_v50 = vld [vmem:[#allocation2 + $0x1e4] ss:$20 sps:$4 sm:$0xff]   ;;  %v8100_v51 = vld [vmem:[#allocation2 + $0x1ec] ss:$20 sps:$4 sm:$0xff]   ;;  %v8103_v53 = vld [vmem:[#allocation2 + $0x1e8] ss:$20 sps:$4 sm:$0xff]   ;;  %v9482_v5 = vcombine.low %v103_v46, %v103_v46 }
  0x81   :  { %4299 = vmatpush1.bf16.msra.mxu0 %v8054_v18  ;;  %4627 = vmatpush1.bf16.msra.mxu1 %v8055_v19  ;;  %v8102_v52 = vld [vmem:[#allocation2 + $0x1e0] ss:$20 sps:$4 sm:$0xff]   ;;  %v8108_v56 = vld [vmem:[#allocation2 + $0x208] ss:$20 sps:$4 sm:$0xff]   ;;  %v8109_v57 = vld [vmem:[#allocation2 + $0x210] ss:$20 sps:$4 sm:$0xff]  }
  0x82   :  { %4300 = vmatprep.subr.bf16.mxu0 %v8056_v20  ;;  %4628 = vmatprep.subr.bf16.mxu1 %v8058_v21  ;;  %v8104_v54 = vld [vmem:[#allocation2 + $0x20c] ss:$20 sps:$4 sm:$0xff]   ;;  %v8110_v58 = vld [vmem:[#allocation2 + $0x234] ss:$20 sps:$4 sm:$0xff]   ;;  %v8112_v59 = vld [vmem:[#allocation2 + $0x23c] ss:$20 sps:$4 sm:$0xff]  }
  0x83   :  { %4322 = vmatprep.mubr.bf16.mxu0 %v9478_v48  ;;  %4650 = vmatprep.mubr.bf16.mxu1 %v9478_v48  ;;  %v8114_v60 = vld [vmem:[#allocation2 + $0x230] ss:$20 sps:$4 sm:$0xff]   ;;  %v8115_v61 = vld [vmem:[#allocation2 + $0x238] ss:$20 sps:$4 sm:$0xff]   ;;  %v8121_v1 = vld [vmem:[#allocation2 + $0x260] ss:$20 sps:$4 sm:$0xff]  }
  0x84   :  { %v8116_v62 = vld [vmem:[#allocation2 + $0x25c] ss:$20 sps:$4 sm:$0xff]   ;;  %v8118_v63 = vld [vmem:[#allocation2 + $0x264] ss:$20 sps:$4 sm:$0xff]   ;;  %v8128_v3 = vld [vmem:[#allocation2 + $0x28c] ss:$20 sps:$4 sm:$0xff]  }
  0x85   :  { %4301 = vmatpush1.bf16.msra.mxu0 %v8060_v22  ;;  %4629 = vmatpush1.bf16.msra.mxu1 %v8061_v23  ;;  %v8120_v0 = vld [vmem:[#allocation2 + $0x258] ss:$20 sps:$4 sm:$0xff]   ;;  %v8123_v4 = vld [vmem:[#allocation2 + $0x280] ss:$20 sps:$4 sm:$0xff]   ;;  %v8126_v6 = vld [vmem:[#allocation2 + $0x288] ss:$20 sps:$4 sm:$0xff]  }
  0x86   :  { %4302 = vmatprep.subr.bf16.mxu0 %v8062_v24  ;;  %4630 = vmatprep.subr.bf16.mxu1 %v8064_v25  ;;  %v8125_v2 = vld [vmem:[#allocation2 + $0x284] ss:$20 sps:$4 sm:$0xff]   ;;  %v8132_v7 = vld [vmem:[#allocation2 + $0x2ac] ss:$20 sps:$4 sm:$0xff]   ;;  %v8135_v8 = vld [vmem:[#allocation2 + $0x2b4] ss:$20 sps:$4 sm:$0xff]  }
  0x87   :  { %v8130_v9 = vld [vmem:[#allocation2 + $0x2a8] ss:$20 sps:$4 sm:$0xff]   ;;  %v8133_v10 = vld [vmem:[#allocation2 + $0x2b0] ss:$20 sps:$4 sm:$0xff]   ;;  %v8139_v14 = vld [vmem:[#allocation2 + $0x2d8] ss:$20 sps:$4 sm:$0xff]  }
  0x88   :  { %v8138_v11 = vld [vmem:[#allocation2 + $0x2d4] ss:$20 sps:$4 sm:$0xff]   ;;  %v8141_v12 = vld [vmem:[#allocation2 + $0x2dc] ss:$20 sps:$4 sm:$0xff]   ;;  %v8147_v16 = vld [vmem:[#allocation2 + $0x304] ss:$20 sps:$4 sm:$0xff]  }
  0x89   :  { %4303 = vmatpush1.bf16.msra.mxu0 %v8066_v26  ;;  %4631 = vmatpush1.bf16.msra.mxu1 %v8067_v27  ;;  %v8136_v13 = vld [vmem:[#allocation2 + $0x2d0] ss:$20 sps:$4 sm:$0xff]   ;;  %v8142_v17 = vld [vmem:[#allocation2 + $0x2f8] ss:$20 sps:$4 sm:$0xff]   ;;  %v8145_v18 = vld [vmem:[#allocation2 + $0x300] ss:$20 sps:$4 sm:$0xff]  }
  0x8a   :  { %4304 = vmatprep.subr.bf16.mxu0 %v8068_v28  ;;  %4632 = vmatprep.subr.bf16.mxu1 %v8070_v29  ;;  %v8144_v15 = vld [vmem:[#allocation2 + $0x2fc] ss:$20 sps:$4 sm:$0xff]   ;;  %v8150_v19 = vld [vmem:[#allocation2 + $0x324] ss:$20 sps:$4 sm:$0xff]   ;;  %v8153_v20 = vld [vmem:[#allocation2 + $0x32c] ss:$20 sps:$4 sm:$0xff]  }
  0x8b   :  { %v8148_v21 = vld [vmem:[#allocation2 + $0x320] ss:$20 sps:$4 sm:$0xff]   ;;  %v8151_v22 = vld [vmem:[#allocation2 + $0x328] ss:$20 sps:$4 sm:$0xff]   ;;  %v8157_v26 = vld [vmem:[#allocation2 + $0x350] ss:$20 sps:$4 sm:$0xff]  }
  0x8c   :  { %v8156_v23 = vld [vmem:[#allocation2 + $0x34c] ss:$20 sps:$4 sm:$0xff]   ;;  %v8159_v24 = vld [vmem:[#allocation2 + $0x354] ss:$20 sps:$4 sm:$0xff]   ;;  %v8165_v28 = vld [vmem:[#allocation2 + $0x37c] ss:$20 sps:$4 sm:$0xff]  }
  0x8d   :  { %4305 = vmatpush1.bf16.msra.mxu0 %v8072_v30  ;;  %4633 = vmatpush1.bf16.msra.mxu1 %v8073_v31  ;;  %v8154_v25 = vld [vmem:[#allocation2 + $0x348] ss:$20 sps:$4 sm:$0xff]   ;;  %v8160_v31 = vld [vmem:[#allocation2 + $0x370] ss:$20 sps:$4 sm:$0xff]  }
  0x8e   :  { %4306 = vmatprep.subr.bf16.mxu0 %v8074_v32  ;;  %4634 = vmatprep.subr.bf16.mxu1 %v8076_v33  ;;  %v8162_v27 = vld [vmem:[#allocation2 + $0x374] ss:$20 sps:$4 sm:$0xff]   ;;  %v8163_v32 = vld [vmem:[#allocation2 + $0x378] ss:$20 sps:$4 sm:$0xff]   ;;  %v8168_v33 = vld [vmem:[#allocation2 + $0x39c] ss:$20 sps:$4 sm:$0xff]  }
  0x8f   :  { %v9489_v29 = vld [vmem:[%s9666_s0 + $0x8] sm:$0xff]  ;;  %v8189_v46 = vld [vmem:[#allocation2 + $0x41c] ss:$20 sps:$4 sm:$0xff]  }
  0x90   :  { %v9493_v30 = vcombine.high %v9489_v29, %v9489_v29 }
  0x91   :  { %4307 = vmatpush1.bf16.msra.mxu0 %v8078_v34  ;;  %4635 = vmatpush1.bf16.msra.mxu1 %v8079_v35  ;;  %v8171_v34 = vld [vmem:[#allocation2 + $0x3a4] ss:$20 sps:$4 sm:$0xff]  }
  0x92   :  { %4308 = vmatprep.subr.bf16.mxu0 %v8080_v36  ;;  %4636 = vmatprep.subr.bf16.mxu1 %v8082_v37  ;;  %v8166_v35 = vld [vmem:[#allocation2 + $0x398] ss:$20 sps:$4 sm:$0xff]   ;;  %v8169_v36 = vld [vmem:[#allocation2 + $0x3a0] ss:$20 sps:$4 sm:$0xff]  }
  0x93   :  { %v8174_v37 = vld [vmem:[#allocation2 + $0x3c4] ss:$20 sps:$4 sm:$0xff]  }
  0x95   :  { %4309 = vmatpush1.bf16.msra.mxu0 %v8084_v38  ;;  %4637 = vmatpush1.bf16.msra.mxu1 %v8085_v39  ;;  %v8177_v38 = vld [vmem:[#allocation2 + $0x3cc] ss:$20 sps:$4 sm:$0xff]  }
  0x96   :  { %4310 = vmatprep.subr.bf16.mxu0 %v8086_v40  ;;  %4638 = vmatprep.subr.bf16.mxu1 %v8088_v41  ;;  %v8172_v39 = vld [vmem:[#allocation2 + $0x3c0] ss:$20 sps:$4 sm:$0xff]   ;;  %v8175_v40 = vld [vmem:[#allocation2 + $0x3c8] ss:$20 sps:$4 sm:$0xff]  }
  0x97   :  { %v8180_v41 = vld [vmem:[#allocation2 + $0x3ec] ss:$20 sps:$4 sm:$0xff]  }
  0x99   :  { %4311 = vmatpush1.bf16.msra.mxu0 %v8090_v42  ;;  %4639 = vmatpush1.bf16.msra.mxu1 %v8091_v43  ;;  %v8183_v42 = vld [vmem:[#allocation2 + $0x3f4] ss:$20 sps:$4 sm:$0xff]  }
  0x9a   :  { %4312 = vmatprep.subr.bf16.mxu0 %v8092_v44  ;;  %4640 = vmatprep.subr.bf16.mxu1 %v8094_v45  ;;  %v8178_v43 = vld [vmem:[#allocation2 + $0x3e8] ss:$20 sps:$4 sm:$0xff]   ;;  %v8181_v44 = vld [vmem:[#allocation2 + $0x3f0] ss:$20 sps:$4 sm:$0xff]  }
  0x9b   :  { %v8186_v45 = vld [vmem:[#allocation2 + $0x414] ss:$20 sps:$4 sm:$0xff]  }
  0x9d   :  { %4313 = vmatpush1.bf16.msra.mxu0 %v8096_v47  ;;  %4641 = vmatpush1.bf16.msra.mxu1 %v8097_v49  ;;  %v8184_v47 = vld [vmem:[#allocation2 + $0x410] ss:$20 sps:$4 sm:$0xff]   ;;  %v8187_v49 = vld [vmem:[#allocation2 + $0x418] ss:$20 sps:$4 sm:$0xff]  }
  0x9e   :  { %4314 = vmatprep.subr.bf16.mxu0 %v8098_v50  ;;  %4642 = vmatprep.subr.bf16.mxu1 %v8100_v51  ;;  %v8192_v50 = vld [vmem:[#allocation2 + $0x43c] ss:$20 sps:$4 sm:$0xff]   ;;  %v8195_v51 = vld [vmem:[#allocation2 + $0x444] ss:$20 sps:$4 sm:$0xff]  }
  0xa1   :  { %4315 = vmatpush1.bf16.msra.mxu0 %v8102_v52  ;;  %4643 = vmatpush1.bf16.msra.mxu1 %v8103_v53  ;;  %v8190_v52 = vld [vmem:[#allocation2 + $0x438] ss:$20 sps:$4 sm:$0xff]   ;;  %v8193_v53 = vld [vmem:[#allocation2 + $0x440] ss:$20 sps:$4 sm:$0xff]  }
  0xa2   :  { %4316 = vmatprep.subr.bf16.mxu0 %v8104_v54  ;;  %4644 = vmatprep.subr.bf16.mxu1 %v8106_v55  ;;  %v8198_v54 = vld [vmem:[#allocation2 + $0x464] ss:$20 sps:$4 sm:$0xff]   ;;  %v8201_v55 = vld [vmem:[#allocation2 + $0x46c] ss:$20 sps:$4 sm:$0xff]  }
  0xa5   :  { %4317 = vmatpush1.bf16.msra.mxu0 %v8108_v56  ;;  %4645 = vmatpush1.bf16.msra.mxu1 %v8109_v57  ;;  %v8196_v56 = vld [vmem:[#allocation2 + $0x460] ss:$20 sps:$4 sm:$0xff]   ;;  %v8199_v57 = vld [vmem:[#allocation2 + $0x468] ss:$20 sps:$4 sm:$0xff]  }
  0xa6   :  { %4318 = vmatprep.subr.bf16.mxu0 %v8110_v58  ;;  %4646 = vmatprep.subr.bf16.mxu1 %v8112_v59  ;;  %v8204_v58 = vld [vmem:[#allocation2 + $0x48c] ss:$20 sps:$4 sm:$0xff]   ;;  %v8207_v59 = vld [vmem:[#allocation2 + $0x494] ss:$20 sps:$4 sm:$0xff]  }
  0xa9   :  { %4319 = vmatpush1.bf16.msra.mxu0 %v8114_v60  ;;  %4647 = vmatpush1.bf16.msra.mxu1 %v8115_v61  ;;  %v8202_v60 = vld [vmem:[#allocation2 + $0x488] ss:$20 sps:$4 sm:$0xff]   ;;  %v8205_v61 = vld [vmem:[#allocation2 + $0x490] ss:$20 sps:$4 sm:$0xff]  }
  0xaa   :  { %4320 = vmatprep.subr.bf16.mxu0 %v8116_v62  ;;  %4648 = vmatprep.subr.bf16.mxu1 %v8118_v63  ;;  %v8210_v62 = vld [vmem:[#allocation2 + $0x4b4] ss:$20 sps:$4 sm:$0xff]   ;;  %v8213_v63 = vld [vmem:[#allocation2 + $0x4bc] ss:$20 sps:$4 sm:$0xff]  }
  0xad   :  { %4321 = vmatpush1.bf16.msra.mxu0 %v8120_v0  ;;  %4649 = vmatpush1.bf16.msra.mxu1 %v8121_v1  ;;  %v8208_v0 = vld [vmem:[#allocation2 + $0x4b0] ss:$20 sps:$4 sm:$0xff]   ;;  %v8211_v1 = vld [vmem:[#allocation2 + $0x4b8] ss:$20 sps:$4 sm:$0xff]  }
  0xae   :  { %4331 = vmatprep.subr.bf16.mxu0 %v8125_v2  ;;  %4659 = vmatprep.subr.bf16.mxu1 %v8128_v3  ;;  %v8216_v2 = vld [vmem:[#allocation2 + $0x4dc] ss:$20 sps:$4 sm:$0xff]   ;;  %v8219_v3 = vld [vmem:[#allocation2 + $0x4e4] ss:$20 sps:$4 sm:$0xff]  }
  0xb0   :  { %4323 = vmatmul.mubr.bf16.vlgmr.msra.gmra.mrb[0].mxu0 %v9482_v5  ;;  %4651 = vmatmul.mubr.bf16.vlgmr.msra.gmra.mrb[0].mxu1 %v9482_v5 }
  0xb1   :  { %4332 = vmatpush1.bf16.msra.mxu0 %v8123_v4  ;;  %4660 = vmatpush1.bf16.msra.mxu1 %v8126_v6  ;;  %v8214_v4 = vld [vmem:[#allocation2 + $0x4d8] ss:$20 sps:$4 sm:$0xff]   ;;  %v8217_v6 = vld [vmem:[#allocation2 + $0x4e0] ss:$20 sps:$4 sm:$0xff]  }
  0xb2   :  { %4333 = vmatprep.subr.bf16.mxu0 %v8132_v7  ;;  %4661 = vmatprep.subr.bf16.mxu1 %v8135_v8  ;;  %v8224_v7 = vld [vmem:[#allocation2 + $0x504] ss:$20 sps:$4 sm:$0xff]   ;;  %v8227_v8 = vld [vmem:[#allocation2 + $0x50c] ss:$20 sps:$4 sm:$0xff]  }
  0xb3   :  { %4363 = vmatprep.mubr.bf16.mxu0 %v9493_v30  ;;  %4691 = vmatprep.mubr.bf16.mxu1 %v9493_v30 }
  0xb5   :  { %4334 = vmatpush1.bf16.msra.mxu0 %v8130_v9  ;;  %4662 = vmatpush1.bf16.msra.mxu1 %v8133_v10  ;;  %v9499_v9 = vcombine.low %v9489_v29, %v9489_v29  ;;  %v8222_v10 = vld [vmem:[#allocation2 + $0x500] ss:$20 sps:$4 sm:$0xff]   ;;  %v8249_v29 = vld [vmem:[#allocation2 + $0x5a8] ss:$20 sps:$4 sm:$0xff]  }
  0xb6   :  { %4335 = vmatprep.subr.bf16.mxu0 %v8138_v11  ;;  %4663 = vmatprep.subr.bf16.mxu1 %v8141_v12  ;;  %v8225_v11 = vld [vmem:[#allocation2 + $0x508] ss:$20 sps:$4 sm:$0xff]   ;;  %v8230_v12 = vld [vmem:[#allocation2 + $0x52c] ss:$20 sps:$4 sm:$0xff]  }
  0xb9   :  { %4336 = vmatpush1.bf16.msra.mxu0 %v8136_v13  ;;  %4664 = vmatpush1.bf16.msra.mxu1 %v8139_v14  ;;  %v9504_v13 = vld [vmem:[%s9666_s0 + $0x10] sm:$0xff] }
  0xba   :  { %4337 = vmatprep.subr.bf16.mxu0 %v8144_v15  ;;  %4665 = vmatprep.subr.bf16.mxu1 %v8147_v16  ;;  %v8233_v14 = vld [vmem:[#allocation2 + $0x534] ss:$20 sps:$4 sm:$0xff]   ;;  %v9508_v15 = vcombine.high %v9504_v13, %v9504_v13 }
  0xbb   :  { %v8228_v16 = vld [vmem:[#allocation2 + $0x528] ss:$20 sps:$4 sm:$0xff]  }
  0xbd   :  { %4338 = vmatpush1.bf16.msra.mxu0 %v8142_v17  ;;  %4666 = vmatpush1.bf16.msra.mxu1 %v8145_v18  ;;  %v8231_v17 = vld [vmem:[#allocation2 + $0x530] ss:$20 sps:$4 sm:$0xff]   ;;  %v8236_v18 = vld [vmem:[#allocation2 + $0x554] ss:$20 sps:$4 sm:$0xff]  }
  0xbe   :  { %4339 = vmatprep.subr.bf16.mxu0 %v8150_v19  ;;  %4667 = vmatprep.subr.bf16.mxu1 %v8153_v20  ;;  %v8239_v19 = vld [vmem:[#allocation2 + $0x55c] ss:$20 sps:$4 sm:$0xff]  }
  0xbf   :  { %v8234_v20 = vld [vmem:[#allocation2 + $0x550] ss:$20 sps:$4 sm:$0xff]  }
  0xc1   :  { %4340 = vmatpush1.bf16.msra.mxu0 %v8148_v21  ;;  %4668 = vmatpush1.bf16.msra.mxu1 %v8151_v22  ;;  %v8237_v21 = vld [vmem:[#allocation2 + $0x558] ss:$20 sps:$4 sm:$0xff]   ;;  %v8242_v22 = vld [vmem:[#allocation2 + $0x57c] ss:$20 sps:$4 sm:$0xff]  }
  0xc2   :  { %4341 = vmatprep.subr.bf16.mxu0 %v8156_v23  ;;  %4669 = vmatprep.subr.bf16.mxu1 %v8159_v24  ;;  %v8245_v23 = vld [vmem:[#allocation2 + $0x584] ss:$20 sps:$4 sm:$0xff]  }
  0xc3   :  { %v8240_v24 = vld [vmem:[#allocation2 + $0x578] ss:$20 sps:$4 sm:$0xff]  }
  0xc5   :  { %4342 = vmatpush1.bf16.msra.mxu0 %v8154_v25  ;;  %4670 = vmatpush1.bf16.msra.mxu1 %v8157_v26  ;;  %v8243_v25 = vld [vmem:[#allocation2 + $0x580] ss:$20 sps:$4 sm:$0xff]   ;;  %v8248_v26 = vld [vmem:[#allocation2 + $0x5a4] ss:$20 sps:$4 sm:$0xff]  }
  0xc6   :  { %4343 = vmatprep.subr.bf16.mxu0 %v8162_v27  ;;  %4671 = vmatprep.subr.bf16.mxu1 %v8165_v28  ;;  %v8251_v27 = vld [vmem:[#allocation2 + $0x5ac] ss:$20 sps:$4 sm:$0xff]  }
  0xc7   :  { %v8246_v28 = vld [vmem:[#allocation2 + $0x5a0] ss:$20 sps:$4 sm:$0xff]  }
  0xc9   :  { %4344 = vmatpush1.bf16.msra.mxu0 %v8160_v31  ;;  %4672 = vmatpush1.bf16.msra.mxu1 %v8163_v32  ;;  %v8254_v31 = vld [vmem:[#allocation2 + $0x5cc] ss:$20 sps:$4 sm:$0xff]   ;;  %v8257_v32 = vld [vmem:[#allocation2 + $0x5d4] ss:$20 sps:$4 sm:$0xff]  }
  0xca   :  { %4345 = vmatprep.subr.bf16.mxu0 %v8168_v33  ;;  %4673 = vmatprep.subr.bf16.mxu1 %v8171_v34  ;;  %v8252_v33 = vld [vmem:[#allocation2 + $0x5c8] ss:$20 sps:$4 sm:$0xff]   ;;  %v8255_v34 = vld [vmem:[#allocation2 + $0x5d0] ss:$20 sps:$4 sm:$0xff]  }
  0xcd   :  { %4346 = vmatpush1.bf16.msra.mxu0 %v8166_v35  ;;  %4674 = vmatpush1.bf16.msra.mxu1 %v8169_v36  ;;  %v8260_v35 = vld [vmem:[#allocation2 + $0x5f4] ss:$20 sps:$4 sm:$0xff]   ;;  %v8263_v36 = vld [vmem:[#allocation2 + $0x5fc] ss:$20 sps:$4 sm:$0xff]  }
  0xce   :  { %4347 = vmatprep.subr.bf16.mxu0 %v8174_v37  ;;  %4675 = vmatprep.subr.bf16.mxu1 %v8177_v38  ;;  %v8258_v37 = vld [vmem:[#allocation2 + $0x5f0] ss:$20 sps:$4 sm:$0xff]   ;;  %v8261_v38 = vld [vmem:[#allocation2 + $0x5f8] ss:$20 sps:$4 sm:$0xff]  }
  0xd1   :  { %4348 = vmatpush1.bf16.msra.mxu0 %v8172_v39  ;;  %4676 = vmatpush1.bf16.msra.mxu1 %v8175_v40  ;;  %v8266_v39 = vld [vmem:[#allocation2 + $0x61c] ss:$20 sps:$4 sm:$0xff]   ;;  %v8269_v40 = vld [vmem:[#allocation2 + $0x624] ss:$20 sps:$4 sm:$0xff]  }
  0xd2   :  { %4349 = vmatprep.subr.bf16.mxu0 %v8180_v41  ;;  %4677 = vmatprep.subr.bf16.mxu1 %v8183_v42  ;;  %v8264_v41 = vld [vmem:[#allocation2 + $0x618] ss:$20 sps:$4 sm:$0xff]   ;;  %v8267_v42 = vld [vmem:[#allocation2 + $0x620] ss:$20 sps:$4 sm:$0xff]  }
  0xd5   :  { %4350 = vmatpush1.bf16.msra.mxu0 %v8178_v43  ;;  %4678 = vmatpush1.bf16.msra.mxu1 %v8181_v44  ;;  %v8272_v43 = vld [vmem:[#allocation2 + $0x644] ss:$20 sps:$4 sm:$0xff]   ;;  %v8275_v44 = vld [vmem:[#allocation2 + $0x64c] ss:$20 sps:$4 sm:$0xff]  }
  0xd6   :  { %4351 = vmatprep.subr.bf16.mxu0 %v8186_v45  ;;  %4679 = vmatprep.subr.bf16.mxu1 %v8189_v46  ;;  %v8270_v45 = vld [vmem:[#allocation2 + $0x640] ss:$20 sps:$4 sm:$0xff]   ;;  %v8273_v46 = vld [vmem:[#allocation2 + $0x648] ss:$20 sps:$4 sm:$0xff]  }
  0xd9   :  { %4352 = vmatpush1.bf16.msra.mxu0 %v8184_v47  ;;  %4680 = vmatpush1.bf16.msra.mxu1 %v8187_v49  ;;  %v8278_v47 = vld [vmem:[#allocation2 + $0x66c] ss:$20 sps:$4 sm:$0xff]   ;;  %v8281_v49 = vld [vmem:[#allocation2 + $0x674] ss:$20 sps:$4 sm:$0xff]  }
  0xda   :  { %4353 = vmatprep.subr.bf16.mxu0 %v8192_v50  ;;  %4681 = vmatprep.subr.bf16.mxu1 %v8195_v51  ;;  %v8276_v50 = vld [vmem:[#allocation2 + $0x668] ss:$20 sps:$4 sm:$0xff]   ;;  %v8279_v51 = vld [vmem:[#allocation2 + $0x670] ss:$20 sps:$4 sm:$0xff]  }
  0xdd   :  { %4354 = vmatpush1.bf16.msra.mxu0 %v8190_v52  ;;  %4682 = vmatpush1.bf16.msra.mxu1 %v8193_v53  ;;  %v8284_v52 = vld [vmem:[#allocation2 + $0x694] ss:$20 sps:$4 sm:$0xff]   ;;  %v8287_v53 = vld [vmem:[#allocation2 + $0x69c] ss:$20 sps:$4 sm:$0xff]  }
  0xde   :  { %4355 = vmatprep.subr.bf16.mxu0 %v8198_v54  ;;  %4683 = vmatprep.subr.bf16.mxu1 %v8201_v55  ;;  %v8282_v54 = vld [vmem:[#allocation2 + $0x690] ss:$20 sps:$4 sm:$0xff]   ;;  %v8285_v55 = vld [vmem:[#allocation2 + $0x698] ss:$20 sps:$4 sm:$0xff]  }
  0xe1   :  { %4356 = vmatpush1.bf16.msra.mxu0 %v8196_v56  ;;  %4684 = vmatpush1.bf16.msra.mxu1 %v8199_v57  ;;  %v8290_v56 = vld [vmem:[#allocation2 + $0x6bc] ss:$20 sps:$4 sm:$0xff]   ;;  %v8293_v57 = vld [vmem:[#allocation2 + $0x6c4] ss:$20 sps:$4 sm:$0xff]  }
  0xe2   :  { %4357 = vmatprep.subr.bf16.mxu0 %v8204_v58  ;;  %4685 = vmatprep.subr.bf16.mxu1 %v8207_v59  ;;  %v8288_v58 = vld [vmem:[#allocation2 + $0x6b8] ss:$20 sps:$4 sm:$0xff]   ;;  %v8291_v59 = vld [vmem:[#allocation2 + $0x6c0] ss:$20 sps:$4 sm:$0xff]  }
  0xe5   :  { %4358 = vmatpush1.bf16.msra.mxu0 %v8202_v60  ;;  %4686 = vmatpush1.bf16.msra.mxu1 %v8205_v61  ;;  %v8296_v60 = vld [vmem:[#allocation2 + $0x6e4] ss:$20 sps:$4 sm:$0xff]   ;;  %v8299_v61 = vld [vmem:[#allocation2 + $0x6ec] ss:$20 sps:$4 sm:$0xff]  }
  0xe6   :  { %4359 = vmatprep.subr.bf16.mxu0 %v8210_v62  ;;  %4687 = vmatprep.subr.bf16.mxu1 %v8213_v63  ;;  %v8294_v62 = vld [vmem:[#allocation2 + $0x6e0] ss:$20 sps:$4 sm:$0xff]   ;;  %v8297_v63 = vld [vmem:[#allocation2 + $0x6e8] ss:$20 sps:$4 sm:$0xff]  }
  0xe9   :  { %4360 = vmatpush1.bf16.msra.mxu0 %v8208_v0  ;;  %4688 = vmatpush1.bf16.msra.mxu1 %v8211_v1  ;;  %v8302_v0 = vld [vmem:[#allocation2 + $0x70c] ss:$20 sps:$4 sm:$0xff]   ;;  %v8305_v1 = vld [vmem:[#allocation2 + $0x714] ss:$20 sps:$4 sm:$0xff]  }
  0xea   :  { %4361 = vmatprep.subr.bf16.mxu0 %v8216_v2  ;;  %4689 = vmatprep.subr.bf16.mxu1 %v8219_v3  ;;  %v8300_v2 = vld [vmem:[#allocation2 + $0x708] ss:$20 sps:$4 sm:$0xff]   ;;  %v8303_v3 = vld [vmem:[#allocation2 + $0x710] ss:$20 sps:$4 sm:$0xff]  }
  0xed   :  { %4362 = vmatpush1.bf16.msra.mxu0 %v8214_v4  ;;  %4690 = vmatpush1.bf16.msra.mxu1 %v8217_v6  ;;  %v8308_v4 = vld [vmem:[#allocation2 + $0x734] ss:$20 sps:$4 sm:$0xff]   ;;  %v8311_v6 = vld [vmem:[#allocation2 + $0x73c] ss:$20 sps:$4 sm:$0xff]  }
  0xee   :  { %4372 = vmatprep.subr.bf16.mxu0 %v8224_v7  ;;  %4700 = vmatprep.subr.bf16.mxu1 %v8227_v8  ;;  %v8306_v7 = vld [vmem:[#allocation2 + $0x730] ss:$20 sps:$4 sm:$0xff]   ;;  %v8309_v8 = vld [vmem:[#allocation2 + $0x738] ss:$20 sps:$4 sm:$0xff]  }
  0xf0   :  { %4364 = vmatmul.mubr.bf16.vlgmr.msra.gmra.mrb[0].mxu0 %v9499_v9  ;;  %4692 = vmatmul.mubr.bf16.vlgmr.msra.gmra.mrb[0].mxu1 %v9499_v9 }
  0xf1   :  { %4373 = vmatpush1.bf16.msra.mxu0 %v8222_v10  ;;  %4701 = vmatpush1.bf16.msra.mxu1 %v8225_v11  ;;  %v8314_v10 = vld [vmem:[#allocation2 + $0x75c] ss:$20 sps:$4 sm:$0xff]   ;;  %v8317_v11 = vld [vmem:[#allocation2 + $0x764] ss:$20 sps:$4 sm:$0xff]  }
  0xf2   :  { %4374 = vmatprep.subr.bf16.mxu0 %v8230_v12  ;;  %4702 = vmatprep.subr.bf16.mxu1 %v8233_v14  ;;  %v8312_v12 = vld [vmem:[#allocation2 + $0x758] ss:$20 sps:$4 sm:$0xff]   ;;  %v8315_v14 = vld [vmem:[#allocation2 + $0x760] ss:$20 sps:$4 sm:$0xff]  }
  0xf3   :  { %4404 = vmatprep.mubr.bf16.mxu0 %v9508_v15  ;;  %4732 = vmatprep.mubr.bf16.mxu1 %v9508_v15 }
  0xf5   :  { %4375 = vmatpush1.bf16.msra.mxu0 %v8228_v16  ;;  %4703 = vmatpush1.bf16.msra.mxu1 %v8231_v17  ;;  %v8322_v16 = vld [vmem:[#allocation2 + $0x784] ss:$20 sps:$4 sm:$0xff]   ;;  %v8325_v17 = vld [vmem:[#allocation2 + $0x78c] ss:$20 sps:$4 sm:$0xff]  }
  0xf6   :  { %4376 = vmatprep.subr.bf16.mxu0 %v8236_v18  ;;  %4704 = vmatprep.subr.bf16.mxu1 %v8239_v19  ;;  %v8320_v18 = vld [vmem:[#allocation2 + $0x780] ss:$20 sps:$4 sm:$0xff]   ;;  %v9516_v19 = vcombine.low %v9504_v13, %v9504_v13  ;;  %v8326_v13 = vld [vmem:[#allocation2 + $0x7a8] ss:$20 sps:$4 sm:$0xff]  }
  0xf9   :  { %4377 = vmatpush1.bf16.msra.mxu0 %v8234_v20  ;;  %4705 = vmatpush1.bf16.msra.mxu1 %v8237_v21  ;;  %v8323_v20 = vld [vmem:[#allocation2 + $0x788] ss:$20 sps:$4 sm:$0xff]  }
  0xfa   :  { %4378 = vmatprep.subr.bf16.mxu0 %v8242_v22  ;;  %4706 = vmatprep.subr.bf16.mxu1 %v8245_v23  ;;  %v9521_v21 = vld [vmem:[%s9666_s0 + $0x18] sm:$0xff]  ;;  %v8328_v22 = vld [vmem:[#allocation2 + $0x7ac] ss:$20 sps:$4 sm:$0xff]   ;;  %v8331_v23 = vld [vmem:[#allocation2 + $0x7b4] ss:$20 sps:$4 sm:$0xff]  }
  0xfd   :  { %4379 = vmatpush1.bf16.msra.mxu0 %v8240_v24  ;;  %4707 = vmatpush1.bf16.msra.mxu1 %v8243_v25  ;;  %v9525_v24 = vcombine.high %v9521_v21, %v9521_v21  ;;  %v8329_v25 = vld [vmem:[#allocation2 + $0x7b0] ss:$20 sps:$4 sm:$0xff]  }
  0xfe   :  { %4380 = vmatprep.subr.bf16.mxu0 %v8248_v26  ;;  %4708 = vmatprep.subr.bf16.mxu1 %v8251_v27  ;;  %v8334_v26 = vld [vmem:[#allocation2 + $0x7d4] ss:$20 sps:$4 sm:$0xff]   ;;  %v8337_v27 = vld [vmem:[#allocation2 + $0x7dc] ss:$20 sps:$4 sm:$0xff]  }
 0x101   :  { %4381 = vmatpush1.bf16.msra.mxu0 %v8246_v28  ;;  %4709 = vmatpush1.bf16.msra.mxu1 %v8249_v29  ;;  %v8332_v28 = vld [vmem:[#allocation2 + $0x7d0] ss:$20 sps:$4 sm:$0xff]   ;;  %v8335_v29 = vld [vmem:[#allocation2 + $0x7d8] ss:$20 sps:$4 sm:$0xff]  }
 0x102   :  { %4382 = vmatprep.subr.bf16.mxu0 %v8254_v31  ;;  %4710 = vmatprep.subr.bf16.mxu1 %v8257_v32  ;;  %v8340_v31 = vld [vmem:[#allocation2 + $0x7fc] ss:$20 sps:$4 sm:$0xff]   ;;  %v8343_v32 = vld [vmem:[#allocation2 + $0x804] ss:$20 sps:$4 sm:$0xff]  }
 0x105   :  { %4383 = vmatpush1.bf16.msra.mxu0 %v8252_v33  ;;  %4711 = vmatpush1.bf16.msra.mxu1 %v8255_v34  ;;  %v8338_v33 = vld [vmem:[#allocation2 + $0x7f8] ss:$20 sps:$4 sm:$0xff]   ;;  %v8341_v34 = vld [vmem:[#allocation2 + $0x800] ss:$20 sps:$4 sm:$0xff]  }
 0x106   :  { %4384 = vmatprep.subr.bf16.mxu0 %v8260_v35  ;;  %4712 = vmatprep.subr.bf16.mxu1 %v8263_v36  ;;  %v8346_v35 = vld [vmem:[#allocation2 + $0x824] ss:$20 sps:$4 sm:$0xff]   ;;  %v8349_v36 = vld [vmem:[#allocation2 + $0x82c] ss:$20 sps:$4 sm:$0xff]  }
 0x109   :  { %4385 = vmatpush1.bf16.msra.mxu0 %v8258_v37  ;;  %4713 = vmatpush1.bf16.msra.mxu1 %v8261_v38  ;;  %v8344_v37 = vld [vmem:[#allocation2 + $0x820] ss:$20 sps:$4 sm:$0xff]   ;;  %v8347_v38 = vld [vmem:[#allocation2 + $0x828] ss:$20 sps:$4 sm:$0xff]  }
 0x10a   :  { %4386 = vmatprep.subr.bf16.mxu0 %v8266_v39  ;;  %4714 = vmatprep.subr.bf16.mxu1 %v8269_v40  ;;  %v8352_v39 = vld [vmem:[#allocation2 + $0x84c] ss:$20 sps:$4 sm:$0xff]   ;;  %v8355_v40 = vld [vmem:[#allocation2 + $0x854] ss:$20 sps:$4 sm:$0xff]  }
 0x10d   :  { %4387 = vmatpush1.bf16.msra.mxu0 %v8264_v41  ;;  %4715 = vmatpush1.bf16.msra.mxu1 %v8267_v42  ;;  %v8350_v41 = vld [vmem:[#allocation2 + $0x848] ss:$20 sps:$4 sm:$0xff]   ;;  %v8353_v42 = vld [vmem:[#allocation2 + $0x850] ss:$20 sps:$4 sm:$0xff]  }
 0x10e   :  { %4388 = vmatprep.subr.bf16.mxu0 %v8272_v43  ;;  %4716 = vmatprep.subr.bf16.mxu1 %v8275_v44  ;;  %v8358_v43 = vld [vmem:[#allocation2 + $0x874] ss:$20 sps:$4 sm:$0xff]   ;;  %v8361_v44 = vld [vmem:[#allocation2 + $0x87c] ss:$20 sps:$4 sm:$0xff]  }
 0x111   :  { %4389 = vmatpush1.bf16.msra.mxu0 %v8270_v45  ;;  %4717 = vmatpush1.bf16.msra.mxu1 %v8273_v46  ;;  %v8356_v45 = vld [vmem:[#allocation2 + $0x870] ss:$20 sps:$4 sm:$0xff]   ;;  %v8359_v46 = vld [vmem:[#allocation2 + $0x878] ss:$20 sps:$4 sm:$0xff]  }
 0x112   :  { %4390 = vmatprep.subr.bf16.mxu0 %v8278_v47  ;;  %4718 = vmatprep.subr.bf16.mxu1 %v8281_v49  ;;  %v8364_v47 = vld [vmem:[#allocation2 + $0x89c] ss:$20 sps:$4 sm:$0xff]   ;;  %v8367_v49 = vld [vmem:[#allocation2 + $0x8a4] ss:$20 sps:$4 sm:$0xff]  }
 0x115   :  { %4391 = vmatpush1.bf16.msra.mxu0 %v8276_v50  ;;  %4719 = vmatpush1.bf16.msra.mxu1 %v8279_v51  ;;  %v8362_v50 = vld [vmem:[#allocation2 + $0x898] ss:$20 sps:$4 sm:$0xff]   ;;  %v8365_v51 = vld [vmem:[#allocation2 + $0x8a0] ss:$20 sps:$4 sm:$0xff]  }
 0x116   :  { %4392 = vmatprep.subr.bf16.mxu0 %v8284_v52  ;;  %4720 = vmatprep.subr.bf16.mxu1 %v8287_v53  ;;  %v8370_v52 = vld [vmem:[#allocation2 + $0x8c4] ss:$20 sps:$4 sm:$0xff]   ;;  %v8373_v53 = vld [vmem:[#allocation2 + $0x8cc] ss:$20 sps:$4 sm:$0xff]  }
 0x119   :  { %4393 = vmatpush1.bf16.msra.mxu0 %v8282_v54  ;;  %4721 = vmatpush1.bf16.msra.mxu1 %v8285_v55  ;;  %v8368_v54 = vld [vmem:[#allocation2 + $0x8c0] ss:$20 sps:$4 sm:$0xff]   ;;  %v8371_v55 = vld [vmem:[#allocation2 + $0x8c8] ss:$20 sps:$4 sm:$0xff]  }
 0x11a   :  { %4394 = vmatprep.subr.bf16.mxu0 %v8290_v56  ;;  %4722 = vmatprep.subr.bf16.mxu1 %v8293_v57  ;;  %v8376_v56 = vld [vmem:[#allocation2 + $0x8ec] ss:$20 sps:$4 sm:$0xff]   ;;  %v8379_v57 = vld [vmem:[#allocation2 + $0x8f4] ss:$20 sps:$4 sm:$0xff]  }
 0x11d   :  { %4395 = vmatpush1.bf16.msra.mxu0 %v8288_v58  ;;  %4723 = vmatpush1.bf16.msra.mxu1 %v8291_v59  ;;  %v8374_v58 = vld [vmem:[#allocation2 + $0x8e8] ss:$20 sps:$4 sm:$0xff]   ;;  %v8377_v59 = vld [vmem:[#allocation2 + $0x8f0] ss:$20 sps:$4 sm:$0xff]  }
 0x11e   :  { %4396 = vmatprep.subr.bf16.mxu0 %v8296_v60  ;;  %4724 = vmatprep.subr.bf16.mxu1 %v8299_v61  ;;  %v8382_v60 = vld [vmem:[#allocation2 + $0x914] ss:$20 sps:$4 sm:$0xff]   ;;  %v8385_v61 = vld [vmem:[#allocation2 + $0x91c] ss:$20 sps:$4 sm:$0xff]  }
 0x121   :  { %4397 = vmatpush1.bf16.msra.mxu0 %v8294_v62  ;;  %4725 = vmatpush1.bf16.msra.mxu1 %v8297_v63  ;;  %v8380_v62 = vld [vmem:[#allocation2 + $0x910] ss:$20 sps:$4 sm:$0xff]   ;;  %v8383_v63 = vld [vmem:[#allocation2 + $0x918] ss:$20 sps:$4 sm:$0xff]  }
 0x122   :  { %4398 = vmatprep.subr.bf16.mxu0 %v8302_v0  ;;  %4726 = vmatprep.subr.bf16.mxu1 %v8305_v1  ;;  %v8388_v0 = vld [vmem:[#allocation2 + $0x93c] ss:$20 sps:$4 sm:$0xff]   ;;  %v8391_v1 = vld [vmem:[#allocation2 + $0x944] ss:$20 sps:$4 sm:$0xff]  }
 0x125   :  { %4399 = vmatpush1.bf16.msra.mxu0 %v8300_v2  ;;  %4727 = vmatpush1.bf16.msra.mxu1 %v8303_v3  ;;  %v8386_v2 = vld [vmem:[#allocation2 + $0x938] ss:$20 sps:$4 sm:$0xff]   ;;  %v8389_v3 = vld [vmem:[#allocation2 + $0x940] ss:$20 sps:$4 sm:$0xff]  }
 0x126   :  { %4400 = vmatprep.subr.bf16.mxu0 %v8308_v4  ;;  %4728 = vmatprep.subr.bf16.mxu1 %v8311_v6  ;;  %v8394_v4 = vld [vmem:[#allocation2 + $0x964] ss:$20 sps:$4 sm:$0xff]   ;;  %v8397_v6 = vld [vmem:[#allocation2 + $0x96c] ss:$20 sps:$4 sm:$0xff]  }
 0x129   :  { %4401 = vmatpush1.bf16.msra.mxu0 %v8306_v7  ;;  %4729 = vmatpush1.bf16.msra.mxu1 %v8309_v8  ;;  %v8392_v7 = vld [vmem:[#allocation2 + $0x960] ss:$20 sps:$4 sm:$0xff]   ;;  %v8395_v8 = vld [vmem:[#allocation2 + $0x968] ss:$20 sps:$4 sm:$0xff]  }
 0x12a   :  { %4402 = vmatprep.subr.bf16.mxu0 %v8314_v10  ;;  %4730 = vmatprep.subr.bf16.mxu1 %v8317_v11  ;;  %v8400_v10 = vld [vmem:[#allocation2 + $0x98c] ss:$20 sps:$4 sm:$0xff]   ;;  %v8403_v11 = vld [vmem:[#allocation2 + $0x994] ss:$20 sps:$4 sm:$0xff]  }
 0x12d   :  { %4403 = vmatpush1.bf16.msra.mxu0 %v8312_v12  ;;  %4731 = vmatpush1.bf16.msra.mxu1 %v8315_v14  ;;  %v8398_v12 = vld [vmem:[#allocation2 + $0x988] ss:$20 sps:$4 sm:$0xff]   ;;  %v8401_v14 = vld [vmem:[#allocation2 + $0x990] ss:$20 sps:$4 sm:$0xff]  }
 0x12e   :  { %4413 = vmatprep.subr.bf16.mxu0 %v8322_v16  ;;  %4741 = vmatprep.subr.bf16.mxu1 %v8325_v17  ;;  %v8406_v16 = vld [vmem:[#allocation2 + $0x9b4] ss:$20 sps:$4 sm:$0xff]   ;;  %v8409_v17 = vld [vmem:[#allocation2 + $0x9bc] ss:$20 sps:$4 sm:$0xff]  }
 0x130   :  { %4405 = vmatmul.mubr.bf16.vlgmr.msra.gmra.mrb[0].mxu0 %v9516_v19  ;;  %4733 = vmatmul.mubr.bf16.vlgmr.msra.gmra.mrb[0].mxu1 %v9516_v19 }
 0x131   :  { %4414 = vmatpush1.bf16.msra.mxu0 %v8320_v18  ;;  %4742 = vmatpush1.bf16.msra.mxu1 %v8323_v20  ;;  %v8404_v18 = vld [vmem:[#allocation2 + $0x9b0] ss:$20 sps:$4 sm:$0xff]   ;;  %v8407_v20 = vld [vmem:[#allocation2 + $0x9b8] ss:$20 sps:$4 sm:$0xff]  }
 0x132   :  { %4415 = vmatprep.subr.bf16.mxu0 %v8328_v22  ;;  %4743 = vmatprep.subr.bf16.mxu1 %v8331_v23  ;;  %v8412_v22 = vld [vmem:[#allocation2 + $0x9dc] ss:$20 sps:$4 sm:$0xff]   ;;  %v8415_v23 = vld [vmem:[#allocation2 + $0x9e4] ss:$20 sps:$4 sm:$0xff]  }
 0x133   :  { %4445 = vmatprep.mubr.bf16.mxu0 %v9525_v24  ;;  %4773 = vmatprep.mubr.bf16.mxu1 %v9525_v24 }
 0x135   :  { %4416 = vmatpush1.bf16.msra.mxu0 %v8326_v13  ;;  %4744 = vmatpush1.bf16.msra.mxu1 %v8329_v25  ;;  %v8410_v13 = vld [vmem:[#allocation2 + $0x9d8] ss:$20 sps:$4 sm:$0xff]   ;;  %v8413_v25 = vld [vmem:[#allocation2 + $0x9e0] ss:$20 sps:$4 sm:$0xff]  }
 0x136   :  { %4417 = vmatprep.subr.bf16.mxu0 %v8334_v26  ;;  %4745 = vmatprep.subr.bf16.mxu1 %v8337_v27  ;;  %v8420_v26 = vld [vmem:[#allocation2 + $0xa04] ss:$20 sps:$4 sm:$0xff]   ;;  %v8423_v27 = vld [vmem:[#allocation2 + $0xa0c] ss:$20 sps:$4 sm:$0xff]  }
 0x139   :  { %4418 = vmatpush1.bf16.msra.mxu0 %v8332_v28  ;;  %4746 = vmatpush1.bf16.msra.mxu1 %v8335_v29  ;;  %v8418_v28 = vld [vmem:[#allocation2 + $0xa00] ss:$20 sps:$4 sm:$0xff]   ;;  %v9533_v29 = vcombine.low %v9521_v21, %v9521_v21  ;;  %v8424_v21 = vld [vmem:[#allocation2 + $0xa28] ss:$20 sps:$4 sm:$0xff]  }
 0x13a   :  { %4419 = vmatprep.subr.bf16.mxu0 %v8340_v31  ;;  %4747 = vmatprep.subr.bf16.mxu1 %v8343_v32  ;;  %v9538_v31 = vld [vmem:[%s9666_s0 + $0x20] sm:$0xff]  ;;  %v8421_v32 = vld [vmem:[#allocation2 + $0xa08] ss:$20 sps:$4 sm:$0xff]  }
 0x13d   :  { %4420 = vmatpush1.bf16.msra.mxu0 %v8338_v33  ;;  %4748 = vmatpush1.bf16.msra.mxu1 %v8341_v34  ;;  %v8426_v33 = vld [vmem:[#allocation2 + $0xa2c] ss:$20 sps:$4 sm:$0xff]   ;;  %v8429_v34 = vld [vmem:[#allocation2 + $0xa34] ss:$20 sps:$4 sm:$0xff]  }
 0x13e   :  { %4421 = vmatprep.subr.bf16.mxu0 %v8346_v35  ;;  %4749 = vmatprep.subr.bf16.mxu1 %v8349_v36  ;;  %v9542_v35 = vcombine.high %v9538_v31, %v9538_v31  ;;  %v8427_v36 = vld [vmem:[#allocation2 + $0xa30] ss:$20 sps:$4 sm:$0xff]  }
 0x141   :  { %4422 = vmatpush1.bf16.msra.mxu0 %v8344_v37  ;;  %4750 = vmatpush1.bf16.msra.mxu1 %v8347_v38  ;;  %v8432_v37 = vld [vmem:[#allocation2 + $0xa54] ss:$20 sps:$4 sm:$0xff]   ;;  %v8435_v38 = vld [vmem:[#allocation2 + $0xa5c] ss:$20 sps:$4 sm:$0xff]  }
 0x142   :  { %4423 = vmatprep.subr.bf16.mxu0 %v8352_v39  ;;  %4751 = vmatprep.subr.bf16.mxu1 %v8355_v40  ;;  %v8430_v39 = vld [vmem:[#allocation2 + $0xa50] ss:$20 sps:$4 sm:$0xff]   ;;  %v8433_v40 = vld [vmem:[#allocation2 + $0xa58] ss:$20 sps:$4 sm:$0xff]  }
 0x145   :  { %4424 = vmatpush1.bf16.msra.mxu0 %v8350_v41  ;;  %4752 = vmatpush1.bf16.msra.mxu1 %v8353_v42  ;;  %v8438_v41 = vld [vmem:[#allocation2 + $0xa7c] ss:$20 sps:$4 sm:$0xff]   ;;  %v8441_v42 = vld [vmem:[#allocation2 + $0xa84] ss:$20 sps:$4 sm:$0xff]  }
 0x146   :  { %4425 = vmatprep.subr.bf16.mxu0 %v8358_v43  ;;  %4753 = vmatprep.subr.bf16.mxu1 %v8361_v44  ;;  %v8436_v43 = vld [vmem:[#allocation2 + $0xa78] ss:$20 sps:$4 sm:$0xff]   ;;  %v8439_v44 = vld [vmem:[#allocation2 + $0xa80] ss:$20 sps:$4 sm:$0xff]  }
 0x149   :  { %4426 = vmatpush1.bf16.msra.mxu0 %v8356_v45  ;;  %4754 = vmatpush1.bf16.msra.mxu1 %v8359_v46  ;;  %v8444_v45 = vld [vmem:[#allocation2 + $0xaa4] ss:$20 sps:$4 sm:$0xff]   ;;  %v8447_v46 = vld [vmem:[#allocation2 + $0xaac] ss:$20 sps:$4 sm:$0xff]  }
 0x14a   :  { %4427 = vmatprep.subr.bf16.mxu0 %v8364_v47  ;;  %4755 = vmatprep.subr.bf16.mxu1 %v8367_v49  ;;  %v8442_v47 = vld [vmem:[#allocation2 + $0xaa0] ss:$20 sps:$4 sm:$0xff]   ;;  %v8445_v49 = vld [vmem:[#allocation2 + $0xaa8] ss:$20 sps:$4 sm:$0xff]  }
 0x14d   :  { %4428 = vmatpush1.bf16.msra.mxu0 %v8362_v50  ;;  %4756 = vmatpush1.bf16.msra.mxu1 %v8365_v51  ;;  %v8450_v50 = vld [vmem:[#allocation2 + $0xacc] ss:$20 sps:$4 sm:$0xff]   ;;  %v8453_v51 = vld [vmem:[#allocation2 + $0xad4] ss:$20 sps:$4 sm:$0xff]  }
 0x14e   :  { %4429 = vmatprep.subr.bf16.mxu0 %v8370_v52  ;;  %4757 = vmatprep.subr.bf16.mxu1 %v8373_v53  ;;  %v8448_v52 = vld [vmem:[#allocation2 + $0xac8] ss:$20 sps:$4 sm:$0xff]   ;;  %v8451_v53 = vld [vmem:[#allocation2 + $0xad0] ss:$20 sps:$4 sm:$0xff]  }
 0x151   :  { %4430 = vmatpush1.bf16.msra.mxu0 %v8368_v54  ;;  %4758 = vmatpush1.bf16.msra.mxu1 %v8371_v55  ;;  %v8456_v54 = vld [vmem:[#allocation2 + $0xaf4] ss:$20 sps:$4 sm:$0xff]   ;;  %v8459_v55 = vld [vmem:[#allocation2 + $0xafc] ss:$20 sps:$4 sm:$0xff]  }
 0x152   :  { %4431 = vmatprep.subr.bf16.mxu0 %v8376_v56  ;;  %4759 = vmatprep.subr.bf16.mxu1 %v8379_v57  ;;  %v8454_v56 = vld [vmem:[#allocation2 + $0xaf0] ss:$20 sps:$4 sm:$0xff]   ;;  %v8457_v57 = vld [vmem:[#allocation2 + $0xaf8] ss:$20 sps:$4 sm:$0xff]  }
 0x155   :  { %4432 = vmatpush1.bf16.msra.mxu0 %v8374_v58  ;;  %4760 = vmatpush1.bf16.msra.mxu1 %v8377_v59  ;;  %v8462_v58 = vld [vmem:[#allocation2 + $0xb1c] ss:$20 sps:$4 sm:$0xff]   ;;  %v8465_v59 = vld [vmem:[#allocation2 + $0xb24] ss:$20 sps:$4 sm:$0xff]  }
 0x156   :  { %4433 = vmatprep.subr.bf16.mxu0 %v8382_v60  ;;  %4761 = vmatprep.subr.bf16.mxu1 %v8385_v61  ;;  %v8460_v60 = vld [vmem:[#allocation2 + $0xb18] ss:$20 sps:$4 sm:$0xff]   ;;  %v8463_v61 = vld [vmem:[#allocation2 + $0xb20] ss:$20 sps:$4 sm:$0xff]  }
 0x159   :  { %4434 = vmatpush1.bf16.msra.mxu0 %v8380_v62  ;;  %4762 = vmatpush1.bf16.msra.mxu1 %v8383_v63  ;;  %v8468_v62 = vld [vmem:[#allocation2 + $0xb44] ss:$20 sps:$4 sm:$0xff]   ;;  %v8471_v63 = vld [vmem:[#allocation2 + $0xb4c] ss:$20 sps:$4 sm:$0xff]  }
 0x15a   :  { %4435 = vmatprep.subr.bf16.mxu0 %v8388_v0  ;;  %4763 = vmatprep.subr.bf16.mxu1 %v8391_v1  ;;  %v8466_v0 = vld [vmem:[#allocation2 + $0xb40] ss:$20 sps:$4 sm:$0xff]   ;;  %v8469_v1 = vld [vmem:[#allocation2 + $0xb48] ss:$20 sps:$4 sm:$0xff]  }
 0x15d   :  { %4436 = vmatpush1.bf16.msra.mxu0 %v8386_v2  ;;  %4764 = vmatpush1.bf16.msra.mxu1 %v8389_v3  ;;  %v8474_v2 = vld [vmem:[#allocation2 + $0xb6c] ss:$20 sps:$4 sm:$0xff]   ;;  %v8477_v3 = vld [vmem:[#allocation2 + $0xb74] ss:$20 sps:$4 sm:$0xff]  }
 0x15e   :  { %4437 = vmatprep.subr.bf16.mxu0 %v8394_v4  ;;  %4765 = vmatprep.subr.bf16.mxu1 %v8397_v6  ;;  %v8472_v4 = vld [vmem:[#allocation2 + $0xb68] ss:$20 sps:$4 sm:$0xff]   ;;  %v8475_v6 = vld [vmem:[#allocation2 + $0xb70] ss:$20 sps:$4 sm:$0xff]  }
 0x161   :  { %4438 = vmatpush1.bf16.msra.mxu0 %v8392_v7  ;;  %4766 = vmatpush1.bf16.msra.mxu1 %v8395_v8  ;;  %v8480_v7 = vld [vmem:[#allocation2 + $0xb94] ss:$20 sps:$4 sm:$0xff]   ;;  %v8483_v8 = vld [vmem:[#allocation2 + $0xb9c] ss:$20 sps:$4 sm:$0xff]  }
 0x162   :  { %4439 = vmatprep.subr.bf16.mxu0 %v8400_v10  ;;  %4767 = vmatprep.subr.bf16.mxu1 %v8403_v11  ;;  %v8478_v10 = vld [vmem:[#allocation2 + $0xb90] ss:$20 sps:$4 sm:$0xff]   ;;  %v8481_v11 = vld [vmem:[#allocation2 + $0xb98] ss:$20 sps:$4 sm:$0xff]  }
 0x165   :  { %4440 = vmatpush1.bf16.msra.mxu0 %v8398_v12  ;;  %4768 = vmatpush1.bf16.msra.mxu1 %v8401_v14  ;;  %v8486_v12 = vld [vmem:[#allocation2 + $0xbbc] ss:$20 sps:$4 sm:$0xff]   ;;  %v8489_v14 = vld [vmem:[#allocation2 + $0xbc4] ss:$20 sps:$4 sm:$0xff]  }
 0x166   :  { %4441 = vmatprep.subr.bf16.mxu0 %v8406_v16  ;;  %4769 = vmatprep.subr.bf16.mxu1 %v8409_v17  ;;  %v8484_v16 = vld [vmem:[#allocation2 + $0xbb8] ss:$20 sps:$4 sm:$0xff]   ;;  %v8487_v17 = vld [vmem:[#allocation2 + $0xbc0] ss:$20 sps:$4 sm:$0xff]  }
 0x169   :  { %4442 = vmatpush1.bf16.msra.mxu0 %v8404_v18  ;;  %4770 = vmatpush1.bf16.msra.mxu1 %v8407_v20  ;;  %v8492_v18 = vld [vmem:[#allocation2 + $0xbe4] ss:$20 sps:$4 sm:$0xff]   ;;  %v8495_v20 = vld [vmem:[#allocation2 + $0xbec] ss:$20 sps:$4 sm:$0xff]  }
 0x16a   :  { %4443 = vmatprep.subr.bf16.mxu0 %v8412_v22  ;;  %4771 = vmatprep.subr.bf16.mxu1 %v8415_v23  ;;  %v8490_v22 = vld [vmem:[#allocation2 + $0xbe0] ss:$20 sps:$4 sm:$0xff]   ;;  %v8493_v23 = vld [vmem:[#allocation2 + $0xbe8] ss:$20 sps:$4 sm:$0xff]  }
 0x16d   :  { %4444 = vmatpush1.bf16.msra.mxu0 %v8410_v13  ;;  %4772 = vmatpush1.bf16.msra.mxu1 %v8413_v25  ;;  %v8498_v13 = vld [vmem:[#allocation2 + $0xc0c] ss:$20 sps:$4 sm:$0xff]   ;;  %v8501_v25 = vld [vmem:[#allocation2 + $0xc14] ss:$20 sps:$4 sm:$0xff]  }
 0x16e   :  { %4454 = vmatprep.subr.bf16.mxu0 %v8420_v26  ;;  %4782 = vmatprep.subr.bf16.mxu1 %v8423_v27  ;;  %v8496_v26 = vld [vmem:[#allocation2 + $0xc08] ss:$20 sps:$4 sm:$0xff]   ;;  %v8499_v27 = vld [vmem:[#allocation2 + $0xc10] ss:$20 sps:$4 sm:$0xff]  }
 0x170   :  { %4446 = vmatmul.mubr.bf16.vlgmr.msra.gmra.mrb[0].mxu0 %v9533_v29  ;;  %4774 = vmatmul.mubr.bf16.vlgmr.msra.gmra.mrb[0].mxu1 %v9533_v29 }
 0x171   :  { %4455 = vmatpush1.bf16.msra.mxu0 %v8418_v28  ;;  %4783 = vmatpush1.bf16.msra.mxu1 %v8421_v32  ;;  %v8504_v28 = vld [vmem:[#allocation2 + $0xc34] ss:$20 sps:$4 sm:$0xff]   ;;  %v8507_v32 = vld [vmem:[#allocation2 + $0xc3c] ss:$20 sps:$4 sm:$0xff]  }
 0x172   :  { %4456 = vmatprep.subr.bf16.mxu0 %v8426_v33  ;;  %4784 = vmatprep.subr.bf16.mxu1 %v8429_v34  ;;  %v8502_v33 = vld [vmem:[#allocation2 + $0xc30] ss:$20 sps:$4 sm:$0xff]   ;;  %v8505_v34 = vld [vmem:[#allocation2 + $0xc38] ss:$20 sps:$4 sm:$0xff]  }
 0x173   :  { %4486 = vmatprep.mubr.bf16.mxu0 %v9542_v35  ;;  %4814 = vmatprep.mubr.bf16.mxu1 %v9542_v35 }
 0x175   :  { %4457 = vmatpush1.bf16.msra.mxu0 %v8424_v21  ;;  %4785 = vmatpush1.bf16.msra.mxu1 %v8427_v36  ;;  %v8510_v21 = vld [vmem:[#allocation2 + $0xc5c] ss:$20 sps:$4 sm:$0xff]   ;;  %v8513_v36 = vld [vmem:[#allocation2 + $0xc64] ss:$20 sps:$4 sm:$0xff]  }
 0x176   :  { %4458 = vmatprep.subr.bf16.mxu0 %v8432_v37  ;;  %4786 = vmatprep.subr.bf16.mxu1 %v8435_v38  ;;  %v8508_v37 = vld [vmem:[#allocation2 + $0xc58] ss:$20 sps:$4 sm:$0xff]   ;;  %v8511_v38 = vld [vmem:[#allocation2 + $0xc60] ss:$20 sps:$4 sm:$0xff]  }
 0x179   :  { %4459 = vmatpush1.bf16.msra.mxu0 %v8430_v39  ;;  %4787 = vmatpush1.bf16.msra.mxu1 %v8433_v40  ;;  %v8518_v39 = vld [vmem:[#allocation2 + $0xc84] ss:$20 sps:$4 sm:$0xff]   ;;  %v8521_v40 = vld [vmem:[#allocation2 + $0xc8c] ss:$20 sps:$4 sm:$0xff]  }
 0x17a   :  { %4460 = vmatprep.subr.bf16.mxu0 %v8438_v41  ;;  %4788 = vmatprep.subr.bf16.mxu1 %v8441_v42  ;;  %v9551_v41 = vld [vmem:[%s9666_s0 + $0x28] sm:$0xff]  ;;  %v9555_v42 = vcombine.low %v9538_v31, %v9538_v31 }
 0x17b   :  { %v8522_v31 = vld [vmem:[#allocation2 + $0xca8] ss:$20 sps:$4 sm:$0xff]  }
 0x17d   :  { %4461 = vmatpush1.bf16.msra.mxu0 %v8436_v43  ;;  %4789 = vmatpush1.bf16.msra.mxu1 %v8439_v44  ;;  %v8516_v43 = vld [vmem:[#allocation2 + $0xc80] ss:$20 sps:$4 sm:$0xff]   ;;  %v8519_v44 = vld [vmem:[#allocation2 + $0xc88] ss:$20 sps:$4 sm:$0xff]  }
 0x17e   :  { %4462 = vmatprep.subr.bf16.mxu0 %v8444_v45  ;;  %4790 = vmatprep.subr.bf16.mxu1 %v8447_v46  ;;  %v8524_v45 = vld [vmem:[#allocation2 + $0xcac] ss:$20 sps:$4 sm:$0xff]   ;;  %v8527_v46 = vld [vmem:[#allocation2 + $0xcb4] ss:$20 sps:$4 sm:$0xff]  }
 0x181   :  { %4463 = vmatpush1.bf16.msra.mxu0 %v8442_v47  ;;  %4791 = vmatpush1.bf16.msra.mxu1 %v8445_v49  ;;  %v9559_v47 = vcombine.high %v9551_v41, %v9551_v41  ;;  %v8525_v49 = vld [vmem:[#allocation2 + $0xcb0] ss:$20 sps:$4 sm:$0xff]  }
 0x182   :  { %4464 = vmatprep.subr.bf16.mxu0 %v8450_v50  ;;  %4792 = vmatprep.subr.bf16.mxu1 %v8453_v51  ;;  %v8530_v50 = vld [vmem:[#allocation2 + $0xcd4] ss:$20 sps:$4 sm:$0xff]   ;;  %v8533_v51 = vld [vmem:[#allocation2 + $0xcdc] ss:$20 sps:$4 sm:$0xff]  }
 0x185   :  { %4465 = vmatpush1.bf16.msra.mxu0 %v8448_v52  ;;  %4793 = vmatpush1.bf16.msra.mxu1 %v8451_v53  ;;  %v8528_v52 = vld [vmem:[#allocation2 + $0xcd0] ss:$20 sps:$4 sm:$0xff]   ;;  %v8531_v53 = vld [vmem:[#allocation2 + $0xcd8] ss:$20 sps:$4 sm:$0xff]  }
 0x186   :  { %4466 = vmatprep.subr.bf16.mxu0 %v8456_v54  ;;  %4794 = vmatprep.subr.bf16.mxu1 %v8459_v55  ;;  %v8536_v54 = vld [vmem:[#allocation2 + $0xcfc] ss:$20 sps:$4 sm:$0xff]   ;;  %v8539_v55 = vld [vmem:[#allocation2 + $0xd04] ss:$20 sps:$4 sm:$0xff]  }
 0x189   :  { %4467 = vmatpush1.bf16.msra.mxu0 %v8454_v56  ;;  %4795 = vmatpush1.bf16.msra.mxu1 %v8457_v57  ;;  %v8534_v56 = vld [vmem:[#allocation2 + $0xcf8] ss:$20 sps:$4 sm:$0xff]   ;;  %v8537_v57 = vld [vmem:[#allocation2 + $0xd00] ss:$20 sps:$4 sm:$0xff]  }
 0x18a   :  { %4468 = vmatprep.subr.bf16.mxu0 %v8462_v58  ;;  %4796 = vmatprep.subr.bf16.mxu1 %v8465_v59  ;;  %v8542_v58 = vld [vmem:[#allocation2 + $0xd24] ss:$20 sps:$4 sm:$0xff]   ;;  %v8545_v59 = vld [vmem:[#allocation2 + $0xd2c] ss:$20 sps:$4 sm:$0xff]  }
 0x18d   :  { %4469 = vmatpush1.bf16.msra.mxu0 %v8460_v60  ;;  %4797 = vmatpush1.bf16.msra.mxu1 %v8463_v61  ;;  %v8540_v60 = vld [vmem:[#allocation2 + $0xd20] ss:$20 sps:$4 sm:$0xff]   ;;  %v8543_v61 = vld [vmem:[#allocation2 + $0xd28] ss:$20 sps:$4 sm:$0xff]  }
 0x18e   :  { %4470 = vmatprep.subr.bf16.mxu0 %v8468_v62  ;;  %4798 = vmatprep.subr.bf16.mxu1 %v8471_v63  ;;  %v8548_v62 = vld [vmem:[#allocation2 + $0xd4c] ss:$20 sps:$4 sm:$0xff]   ;;  %v8551_v63 = vld [vmem:[#allocation2 + $0xd54] ss:$20 sps:$4 sm:$0xff]  }
 0x191   :  { %4471 = vmatpush1.bf16.msra.mxu0 %v8466_v0  ;;  %4799 = vmatpush1.bf16.msra.mxu1 %v8469_v1  ;;  %v8546_v0 = vld [vmem:[#allocation2 + $0xd48] ss:$20 sps:$4 sm:$0xff]   ;;  %v8549_v1 = vld [vmem:[#allocation2 + $0xd50] ss:$20 sps:$4 sm:$0xff]  }
 0x192   :  { %4472 = vmatprep.subr.bf16.mxu0 %v8474_v2  ;;  %4800 = vmatprep.subr.bf16.mxu1 %v8477_v3  ;;  %v8554_v2 = vld [vmem:[#allocation2 + $0xd74] ss:$20 sps:$4 sm:$0xff]   ;;  %v8557_v3 = vld [vmem:[#allocation2 + $0xd7c] ss:$20 sps:$4 sm:$0xff]  }
 0x195   :  { %4473 = vmatpush1.bf16.msra.mxu0 %v8472_v4  ;;  %4801 = vmatpush1.bf16.msra.mxu1 %v8475_v6  ;;  %v8552_v4 = vld [vmem:[#allocation2 + $0xd70] ss:$20 sps:$4 sm:$0xff]   ;;  %v8555_v6 = vld [vmem:[#allocation2 + $0xd78] ss:$20 sps:$4 sm:$0xff]  }
 0x196   :  { %4474 = vmatprep.subr.bf16.mxu0 %v8480_v7  ;;  %4802 = vmatprep.subr.bf16.mxu1 %v8483_v8  ;;  %v8560_v7 = vld [vmem:[#allocation2 + $0xd9c] ss:$20 sps:$4 sm:$0xff]   ;;  %v8563_v8 = vld [vmem:[#allocation2 + $0xda4] ss:$20 sps:$4 sm:$0xff]  }
 0x199   :  { %4475 = vmatpush1.bf16.msra.mxu0 %v8478_v10  ;;  %4803 = vmatpush1.bf16.msra.mxu1 %v8481_v11  ;;  %v8558_v10 = vld [vmem:[#allocation2 + $0xd98] ss:$20 sps:$4 sm:$0xff]   ;;  %v8561_v11 = vld [vmem:[#allocation2 + $0xda0] ss:$20 sps:$4 sm:$0xff]  }
 0x19a   :  { %4476 = vmatprep.subr.bf16.mxu0 %v8486_v12  ;;  %4804 = vmatprep.subr.bf16.mxu1 %v8489_v14  ;;  %v8566_v12 = vld [vmem:[#allocation2 + $0xdc4] ss:$20 sps:$4 sm:$0xff]   ;;  %v8569_v14 = vld [vmem:[#allocation2 + $0xdcc] ss:$20 sps:$4 sm:$0xff]  }
 0x19d   :  { %4477 = vmatpush1.bf16.msra.mxu0 %v8484_v16  ;;  %4805 = vmatpush1.bf16.msra.mxu1 %v8487_v17  ;;  %v8564_v16 = vld [vmem:[#allocation2 + $0xdc0] ss:$20 sps:$4 sm:$0xff]   ;;  %v8567_v17 = vld [vmem:[#allocation2 + $0xdc8] ss:$20 sps:$4 sm:$0xff]  }
 0x19e   :  { %4478 = vmatprep.subr.bf16.mxu0 %v8492_v18  ;;  %4806 = vmatprep.subr.bf16.mxu1 %v8495_v20  ;;  %v8572_v18 = vld [vmem:[#allocation2 + $0xdec] ss:$20 sps:$4 sm:$0xff]   ;;  %v8575_v20 = vld [vmem:[#allocation2 + $0xdf4] ss:$20 sps:$4 sm:$0xff]  }
 0x1a1   :  { %4479 = vmatpush1.bf16.msra.mxu0 %v8490_v22  ;;  %4807 = vmatpush1.bf16.msra.mxu1 %v8493_v23  ;;  %v8570_v22 = vld [vmem:[#allocation2 + $0xde8] ss:$20 sps:$4 sm:$0xff]   ;;  %v8573_v23 = vld [vmem:[#allocation2 + $0xdf0] ss:$20 sps:$4 sm:$0xff]  }
 0x1a2   :  { %4480 = vmatprep.subr.bf16.mxu0 %v8498_v13  ;;  %4808 = vmatprep.subr.bf16.mxu1 %v8501_v25  ;;  %v8578_v13 = vld [vmem:[#allocation2 + $0xe14] ss:$20 sps:$4 sm:$0xff]   ;;  %v8581_v25 = vld [vmem:[#allocation2 + $0xe1c] ss:$20 sps:$4 sm:$0xff]  }
 0x1a5   :  { %4481 = vmatpush1.bf16.msra.mxu0 %v8496_v26  ;;  %4809 = vmatpush1.bf16.msra.mxu1 %v8499_v27  ;;  %v8576_v26 = vld [vmem:[#allocation2 + $0xe10] ss:$20 sps:$4 sm:$0xff]   ;;  %v8579_v27 = vld [vmem:[#allocation2 + $0xe18] ss:$20 sps:$4 sm:$0xff]  }
 0x1a6   :  { %4482 = vmatprep.subr.bf16.mxu0 %v8504_v28  ;;  %4810 = vmatprep.subr.bf16.mxu1 %v8507_v32  ;;  %v8584_v28 = vld [vmem:[#allocation2 + $0xe3c] ss:$20 sps:$4 sm:$0xff]   ;;  %v8587_v32 = vld [vmem:[#allocation2 + $0xe44] ss:$20 sps:$4 sm:$0xff]  }
 0x1a9   :  { %4483 = vmatpush1.bf16.msra.mxu0 %v8502_v33  ;;  %4811 = vmatpush1.bf16.msra.mxu1 %v8505_v34  ;;  %v8582_v33 = vld [vmem:[#allocation2 + $0xe38] ss:$20 sps:$4 sm:$0xff]   ;;  %v8585_v34 = vld [vmem:[#allocation2 + $0xe40] ss:$20 sps:$4 sm:$0xff]  }
 0x1aa   :  { %4484 = vmatprep.subr.bf16.mxu0 %v8510_v21  ;;  %4812 = vmatprep.subr.bf16.mxu1 %v8513_v36  ;;  %v8590_v21 = vld [vmem:[#allocation2 + $0xe64] ss:$20 sps:$4 sm:$0xff]   ;;  %v8593_v36 = vld [vmem:[#allocation2 + $0xe6c] ss:$20 sps:$4 sm:$0xff]  }
 0x1ad   :  { %4485 = vmatpush1.bf16.msra.mxu0 %v8508_v37  ;;  %4813 = vmatpush1.bf16.msra.mxu1 %v8511_v38  ;;  %v8588_v37 = vld [vmem:[#allocation2 + $0xe60] ss:$20 sps:$4 sm:$0xff]   ;;  %v8591_v38 = vld [vmem:[#allocation2 + $0xe68] ss:$20 sps:$4 sm:$0xff]  }
 0x1ae   :  { %4495 = vmatprep.subr.bf16.mxu0 %v8518_v39  ;;  %4823 = vmatprep.subr.bf16.mxu1 %v8521_v40  ;;  %v8596_v39 = vld [vmem:[#allocation2 + $0xe8c] ss:$20 sps:$4 sm:$0xff]   ;;  %v8599_v40 = vld [vmem:[#allocation2 + $0xe94] ss:$20 sps:$4 sm:$0xff]  }
 0x1b0   :  { %4487 = vmatmul.mubr.bf16.vlgmr.msra.gmra.mrb[0].mxu0 %v9555_v42  ;;  %4815 = vmatmul.mubr.bf16.vlgmr.msra.gmra.mrb[0].mxu1 %v9555_v42 }
 0x1b1   :  { %4496 = vmatpush1.bf16.msra.mxu0 %v8516_v43  ;;  %4824 = vmatpush1.bf16.msra.mxu1 %v8519_v44  ;;  %v8594_v43 = vld [vmem:[#allocation2 + $0xe88] ss:$20 sps:$4 sm:$0xff]   ;;  %v8597_v44 = vld [vmem:[#allocation2 + $0xe90] ss:$20 sps:$4 sm:$0xff]  }
 0x1b2   :  { %4497 = vmatprep.subr.bf16.mxu0 %v8524_v45  ;;  %4825 = vmatprep.subr.bf16.mxu1 %v8527_v46  ;;  %v8602_v45 = vld [vmem:[#allocation2 + $0xeb4] ss:$20 sps:$4 sm:$0xff]   ;;  %v8605_v46 = vld [vmem:[#allocation2 + $0xebc] ss:$20 sps:$4 sm:$0xff]  }
 0x1b3   :  { %4527 = vmatprep.mubr.bf16.mxu0 %v9559_v47  ;;  %4855 = vmatprep.mubr.bf16.mxu1 %v9559_v47 }
 0x1b5   :  { %4498 = vmatpush1.bf16.msra.mxu0 %v8522_v31  ;;  %4826 = vmatpush1.bf16.msra.mxu1 %v8525_v49  ;;  %v8600_v31 = vld [vmem:[#allocation2 + $0xeb0] ss:$20 sps:$4 sm:$0xff]   ;;  %v8603_v49 = vld [vmem:[#allocation2 + $0xeb8] ss:$20 sps:$4 sm:$0xff]  }
 0x1b6   :  { %4499 = vmatprep.subr.bf16.mxu0 %v8530_v50  ;;  %4827 = vmatprep.subr.bf16.mxu1 %v8533_v51  ;;  %v8608_v50 = vld [vmem:[#allocation2 + $0xedc] ss:$20 sps:$4 sm:$0xff]   ;;  %v8611_v51 = vld [vmem:[#allocation2 + $0xee4] ss:$20 sps:$4 sm:$0xff]  }
 0x1b9   :  { %4500 = vmatpush1.bf16.msra.mxu0 %v8528_v52  ;;  %4828 = vmatpush1.bf16.msra.mxu1 %v8531_v53  ;;  %v8606_v52 = vld [vmem:[#allocation2 + $0xed8] ss:$20 sps:$4 sm:$0xff]   ;;  %v8609_v53 = vld [vmem:[#allocation2 + $0xee0] ss:$20 sps:$4 sm:$0xff]  }
 0x1ba   :  { %4501 = vmatprep.subr.bf16.mxu0 %v8536_v54  ;;  %4829 = vmatprep.subr.bf16.mxu1 %v8539_v55  ;;  %v8616_v54 = vld [vmem:[#allocation2 + $0xf04] ss:$20 sps:$4 sm:$0xff]   ;;  %v8619_v55 = vld [vmem:[#allocation2 + $0xf0c] ss:$20 sps:$4 sm:$0xff]  }
 0x1bd   :  { %4502 = vmatpush1.bf16.msra.mxu0 %v8534_v56  ;;  %4830 = vmatpush1.bf16.msra.mxu1 %v8537_v57  ;;  %v8614_v56 = vld [vmem:[#allocation2 + $0xf00] ss:$20 sps:$4 sm:$0xff]   ;;  %v8617_v57 = vld [vmem:[#allocation2 + $0xf08] ss:$20 sps:$4 sm:$0xff]  }
 0x1be   :  { %4503 = vmatprep.subr.bf16.mxu0 %v8542_v58  ;;  %4831 = vmatprep.subr.bf16.mxu1 %v8545_v59  ;;  %v9567_v58 = vcombine.low %v9551_v41, %v9551_v41  ;;  %v9572_v59 = vld [vmem:[%s9666_s0 + $0x30] sm:$0xff] }
 0x1bf   :  { %v8623_v41 = vld [vmem:[#allocation2 + $0xf30] ss:$20 sps:$4 sm:$0xff]  }
 0x1c1   :  { %4504 = vmatpush1.bf16.msra.mxu0 %v8540_v60  ;;  %4832 = vmatpush1.bf16.msra.mxu1 %v8543_v61  ;;  %v8622_v60 = vld [vmem:[#allocation2 + $0xf2c] ss:$20 sps:$4 sm:$0xff]   ;;  %v8625_v61 = vld [vmem:[#allocation2 + $0xf34] ss:$20 sps:$4 sm:$0xff]  }
 0x1c2   :  { %4505 = vmatprep.subr.bf16.mxu0 %v8548_v62  ;;  %4833 = vmatprep.subr.bf16.mxu1 %v8551_v63  ;;  %v8620_v62 = vld [vmem:[#allocation2 + $0xf28] ss:$20 sps:$4 sm:$0xff]   ;;  %v9576_v63 = vcombine.high %v9572_v59, %v9572_v59 }
 0x1c5   :  { %4506 = vmatpush1.bf16.msra.mxu0 %v8546_v0  ;;  %4834 = vmatpush1.bf16.msra.mxu1 %v8549_v1  ;;  %v8628_v0 = vld [vmem:[#allocation2 + $0xf54] ss:$20 sps:$4 sm:$0xff]   ;;  %v8631_v1 = vld [vmem:[#allocation2 + $0xf5c] ss:$20 sps:$4 sm:$0xff]  }
 0x1c6   :  { %4507 = vmatprep.subr.bf16.mxu0 %v8554_v2  ;;  %4835 = vmatprep.subr.bf16.mxu1 %v8557_v3  ;;  %v8626_v2 = vld [vmem:[#allocation2 + $0xf50] ss:$20 sps:$4 sm:$0xff]   ;;  %v8629_v3 = vld [vmem:[#allocation2 + $0xf58] ss:$20 sps:$4 sm:$0xff]  }
 0x1c9   :  { %4508 = vmatpush1.bf16.msra.mxu0 %v8552_v4  ;;  %4836 = vmatpush1.bf16.msra.mxu1 %v8555_v6  ;;  %v8634_v4 = vld [vmem:[#allocation2 + $0xf7c] ss:$20 sps:$4 sm:$0xff]   ;;  %v8637_v6 = vld [vmem:[#allocation2 + $0xf84] ss:$20 sps:$4 sm:$0xff]  }
 0x1ca   :  { %4509 = vmatprep.subr.bf16.mxu0 %v8560_v7  ;;  %4837 = vmatprep.subr.bf16.mxu1 %v8563_v8  ;;  %v8632_v7 = vld [vmem:[#allocation2 + $0xf78] ss:$20 sps:$4 sm:$0xff]   ;;  %v8635_v8 = vld [vmem:[#allocation2 + $0xf80] ss:$20 sps:$4 sm:$0xff]  }
 0x1cd   :  { %4510 = vmatpush1.bf16.msra.mxu0 %v8558_v10  ;;  %4838 = vmatpush1.bf16.msra.mxu1 %v8561_v11  ;;  %v8640_v10 = vld [vmem:[#allocation2 + $0xfa4] ss:$20 sps:$4 sm:$0xff]   ;;  %v8643_v11 = vld [vmem:[#allocation2 + $0xfac] ss:$20 sps:$4 sm:$0xff]  }
 0x1ce   :  { %4511 = vmatprep.subr.bf16.mxu0 %v8566_v12  ;;  %4839 = vmatprep.subr.bf16.mxu1 %v8569_v14  ;;  %v8638_v12 = vld [vmem:[#allocation2 + $0xfa0] ss:$20 sps:$4 sm:$0xff]   ;;  %v8641_v14 = vld [vmem:[#allocation2 + $0xfa8] ss:$20 sps:$4 sm:$0xff]  }
 0x1d1   :  { %4512 = vmatpush1.bf16.msra.mxu0 %v8564_v16  ;;  %4840 = vmatpush1.bf16.msra.mxu1 %v8567_v17  ;;  %v8646_v16 = vld [vmem:[#allocation2 + $0xfcc] ss:$20 sps:$4 sm:$0xff]   ;;  %v8649_v17 = vld [vmem:[#allocation2 + $0xfd4] ss:$20 sps:$4 sm:$0xff]  }
 0x1d2   :  { %4513 = vmatprep.subr.bf16.mxu0 %v8572_v18  ;;  %4841 = vmatprep.subr.bf16.mxu1 %v8575_v20  ;;  %v8644_v18 = vld [vmem:[#allocation2 + $0xfc8] ss:$20 sps:$4 sm:$0xff]   ;;  %v8647_v20 = vld [vmem:[#allocation2 + $0xfd0] ss:$20 sps:$4 sm:$0xff]  }
 0x1d5   :  { %4514 = vmatpush1.bf16.msra.mxu0 %v8570_v22  ;;  %4842 = vmatpush1.bf16.msra.mxu1 %v8573_v23  ;;  %v8652_v22 = vld [vmem:[#allocation2 + $0xff4] ss:$20 sps:$4 sm:$0xff]   ;;  %v8655_v23 = vld [vmem:[#allocation2 + $0xffc] ss:$20 sps:$4 sm:$0xff]  }
 0x1d6   :  { %4515 = vmatprep.subr.bf16.mxu0 %v8578_v13  ;;  %4843 = vmatprep.subr.bf16.mxu1 %v8581_v25  ;;  %v8650_v13 = vld [vmem:[#allocation2 + $0xff0] ss:$20 sps:$4 sm:$0xff]   ;;  %v8653_v25 = vld [vmem:[#allocation2 + $0xff8] ss:$20 sps:$4 sm:$0xff]  }
 0x1d9   :  { %4516 = vmatpush1.bf16.msra.mxu0 %v8576_v26  ;;  %4844 = vmatpush1.bf16.msra.mxu1 %v8579_v27  ;;  %v8658_v26 = vld [vmem:[#allocation2 + $0x101c] ss:$20 sps:$4 sm:$0xff]   ;;  %v8661_v27 = vld [vmem:[#allocation2 + $0x1024] ss:$20 sps:$4 sm:$0xff]  }
 0x1da   :  { %4517 = vmatprep.subr.bf16.mxu0 %v8584_v28  ;;  %4845 = vmatprep.subr.bf16.mxu1 %v8587_v32  ;;  %v8656_v28 = vld [vmem:[#allocation2 + $0x1018] ss:$20 sps:$4 sm:$0xff]   ;;  %v8659_v32 = vld [vmem:[#allocation2 + $0x1020] ss:$20 sps:$4 sm:$0xff]  }
 0x1dd   :  { %4518 = vmatpush1.bf16.msra.mxu0 %v8582_v33  ;;  %4846 = vmatpush1.bf16.msra.mxu1 %v8585_v34  ;;  %v8664_v33 = vld [vmem:[#allocation2 + $0x1044] ss:$20 sps:$4 sm:$0xff]   ;;  %v8667_v34 = vld [vmem:[#allocation2 + $0x104c] ss:$20 sps:$4 sm:$0xff]  }
 0x1de   :  { %4519 = vmatprep.subr.bf16.mxu0 %v8590_v21  ;;  %4847 = vmatprep.subr.bf16.mxu1 %v8593_v36  ;;  %v8662_v21 = vld [vmem:[#allocation2 + $0x1040] ss:$20 sps:$4 sm:$0xff]   ;;  %v8665_v36 = vld [vmem:[#allocation2 + $0x1048] ss:$20 sps:$4 sm:$0xff]  }
 0x1e1   :  { %4520 = vmatpush1.bf16.msra.mxu0 %v8588_v37  ;;  %4848 = vmatpush1.bf16.msra.mxu1 %v8591_v38  ;;  %v8670_v37 = vld [vmem:[#allocation2 + $0x106c] ss:$20 sps:$4 sm:$0xff]   ;;  %v8673_v38 = vld [vmem:[#allocation2 + $0x1074] ss:$20 sps:$4 sm:$0xff]  }
 0x1e2   :  { %4521 = vmatprep.subr.bf16.mxu0 %v8596_v39  ;;  %4849 = vmatprep.subr.bf16.mxu1 %v8599_v40  ;;  %v8668_v39 = vld [vmem:[#allocation2 + $0x1068] ss:$20 sps:$4 sm:$0xff]   ;;  %v8671_v40 = vld [vmem:[#allocation2 + $0x1070] ss:$20 sps:$4 sm:$0xff]  }
 0x1e5   :  { %4522 = vmatpush1.bf16.msra.mxu0 %v8594_v43  ;;  %4850 = vmatpush1.bf16.msra.mxu1 %v8597_v44  ;;  %v8676_v43 = vld [vmem:[#allocation2 + $0x1094] ss:$20 sps:$4 sm:$0xff]   ;;  %v8679_v44 = vld [vmem:[#allocation2 + $0x109c] ss:$20 sps:$4 sm:$0xff]  }
 0x1e6   :  { %4523 = vmatprep.subr.bf16.mxu0 %v8602_v45  ;;  %4851 = vmatprep.subr.bf16.mxu1 %v8605_v46  ;;  %v8674_v45 = vld [vmem:[#allocation2 + $0x1090] ss:$20 sps:$4 sm:$0xff]   ;;  %v8677_v46 = vld [vmem:[#allocation2 + $0x1098] ss:$20 sps:$4 sm:$0xff]  }
 0x1e9   :  { %4524 = vmatpush1.bf16.msra.mxu0 %v8600_v31  ;;  %4852 = vmatpush1.bf16.msra.mxu1 %v8603_v49  ;;  %v8682_v31 = vld [vmem:[#allocation2 + $0x10bc] ss:$20 sps:$4 sm:$0xff]   ;;  %v8685_v49 = vld [vmem:[#allocation2 + $0x10c4] ss:$20 sps:$4 sm:$0xff]  }
 0x1ea   :  { %4525 = vmatprep.subr.bf16.mxu0 %v8608_v50  ;;  %4853 = vmatprep.subr.bf16.mxu1 %v8611_v51  ;;  %v8680_v50 = vld [vmem:[#allocation2 + $0x10b8] ss:$20 sps:$4 sm:$0xff]   ;;  %v8683_v51 = vld [vmem:[#allocation2 + $0x10c0] ss:$20 sps:$4 sm:$0xff]  }
 0x1ed   :  { %4526 = vmatpush1.bf16.msra.mxu0 %v8606_v52  ;;  %4854 = vmatpush1.bf16.msra.mxu1 %v8609_v53  ;;  %v8688_v52 = vld [vmem:[#allocation2 + $0x10e4] ss:$20 sps:$4 sm:$0xff]   ;;  %v8691_v53 = vld [vmem:[#allocation2 + $0x10ec] ss:$20 sps:$4 sm:$0xff]  }
 0x1ee   :  { %4536 = vmatprep.subr.bf16.mxu0 %v8616_v54  ;;  %4864 = vmatprep.subr.bf16.mxu1 %v8619_v55  ;;  %v8686_v54 = vld [vmem:[#allocation2 + $0x10e0] ss:$20 sps:$4 sm:$0xff]   ;;  %v8689_v55 = vld [vmem:[#allocation2 + $0x10e8] ss:$20 sps:$4 sm:$0xff]  }
 0x1f0   :  { %4528 = vmatmul.mubr.bf16.vlgmr.msra.gmra.mrb[0].mxu0 %v9567_v58  ;;  %4856 = vmatmul.mubr.bf16.vlgmr.msra.gmra.mrb[0].mxu1 %v9567_v58 }
 0x1f1   :  { %4537 = vmatpush1.bf16.msra.mxu0 %v8614_v56  ;;  %4865 = vmatpush1.bf16.msra.mxu1 %v8617_v57  ;;  %v8694_v56 = vld [vmem:[#allocation2 + $0x110c] ss:$20 sps:$4 sm:$0xff]   ;;  %v8697_v57 = vld [vmem:[#allocation2 + $0x1114] ss:$20 sps:$4 sm:$0xff]  }
 0x1f2   :  { %4538 = vmatprep.subr.bf16.mxu0 %v8622_v60  ;;  %4866 = vmatprep.subr.bf16.mxu1 %v8625_v61  ;;  %v8692_v60 = vld [vmem:[#allocation2 + $0x1108] ss:$20 sps:$4 sm:$0xff]   ;;  %v8695_v61 = vld [vmem:[#allocation2 + $0x1110] ss:$20 sps:$4 sm:$0xff]  }
 0x1f3   :  { %4568 = vmatprep.mubr.bf16.mxu0 %v9576_v63  ;;  %4896 = vmatprep.mubr.bf16.mxu1 %v9576_v63 }
 0x1f5   :  { %4539 = vmatpush1.bf16.msra.mxu0 %v8620_v62  ;;  %4867 = vmatpush1.bf16.msra.mxu1 %v8623_v41  ;;  %v8700_v62 = vld [vmem:[#allocation2 + $0x1134] ss:$20 sps:$4 sm:$0xff]   ;;  %v8703_v41 = vld [vmem:[#allocation2 + $0x113c] ss:$20 sps:$4 sm:$0xff]  }
 0x1f6   :  { %4540 = vmatprep.subr.bf16.mxu0 %v8628_v0  ;;  %4868 = vmatprep.subr.bf16.mxu1 %v8631_v1  ;;  %v8698_v0 = vld [vmem:[#allocation2 + $0x1130] ss:$20 sps:$4 sm:$0xff]   ;;  %v8701_v1 = vld [vmem:[#allocation2 + $0x1138] ss:$20 sps:$4 sm:$0xff]  }
 0x1f9   :  { %4541 = vmatpush1.bf16.msra.mxu0 %v8626_v2  ;;  %4869 = vmatpush1.bf16.msra.mxu1 %v8629_v3  ;;  %v8706_v2 = vld [vmem:[#allocation2 + $0x115c] ss:$20 sps:$4 sm:$0xff]   ;;  %v8709_v3 = vld [vmem:[#allocation2 + $0x1164] ss:$20 sps:$4 sm:$0xff]  }
 0x1fa   :  { %4542 = vmatprep.subr.bf16.mxu0 %v8634_v4  ;;  %4870 = vmatprep.subr.bf16.mxu1 %v8637_v6  ;;  %v8704_v4 = vld [vmem:[#allocation2 + $0x1158] ss:$20 sps:$4 sm:$0xff]   ;;  %v8707_v6 = vld [vmem:[#allocation2 + $0x1160] ss:$20 sps:$4 sm:$0xff]  }
 0x1fd   :  { %4543 = vmatpush1.bf16.msra.mxu0 %v8632_v7  ;;  %4871 = vmatpush1.bf16.msra.mxu1 %v8635_v8  ;;  %v8714_v7 = vld [vmem:[#allocation2 + $0x1184] ss:$20 sps:$4 sm:$0xff]   ;;  %v8717_v8 = vld [vmem:[#allocation2 + $0x118c] ss:$20 sps:$4 sm:$0xff]  }
 0x1fe   :  { %4544 = vmatprep.subr.bf16.mxu0 %v8640_v10  ;;  %4872 = vmatprep.subr.bf16.mxu1 %v8643_v11  ;;  %v8712_v10 = vld [vmem:[#allocation2 + $0x1180] ss:$20 sps:$4 sm:$0xff]   ;;  %v8715_v11 = vld [vmem:[#allocation2 + $0x1188] ss:$20 sps:$4 sm:$0xff]  }
 0x201   :  { %4545 = vmatpush1.bf16.msra.mxu0 %v8638_v12  ;;  %4873 = vmatpush1.bf16.msra.mxu1 %v8641_v14  ;;  %v9585_v12 = vld [vmem:[%s9666_s0 + $0x38] sm:$0xff]  ;;  %v9589_v14 = vcombine.low %v9572_v59, %v9572_v59  ;;  %v8726_v59 = vld [vmem:[#allocation2 + $0x11d4] ss:$20 sps:$4 sm:$0xff]  }
 0x202   :  { %4546 = vmatprep.subr.bf16.mxu0 %v8646_v16  ;;  %4874 = vmatprep.subr.bf16.mxu1 %v8649_v17  ;;  %v8720_v16 = vld [vmem:[#allocation2 + $0x11ac] ss:$20 sps:$4 sm:$0xff]   ;;  %v8723_v17 = vld [vmem:[#allocation2 + $0x11b4] ss:$20 sps:$4 sm:$0xff]  }
 0x205   :  { %4547 = vmatpush1.bf16.msra.mxu0 %v8644_v18  ;;  %4875 = vmatpush1.bf16.msra.mxu1 %v8647_v20  ;;  %v8718_v18 = vld [vmem:[#allocation2 + $0x11a8] ss:$20 sps:$4 sm:$0xff]   ;;  %v9593_v20 = vcombine.high %v9585_v12, %v9585_v12 }
 0x206   :  { %4548 = vmatprep.subr.bf16.mxu0 %v8652_v22  ;;  %4876 = vmatprep.subr.bf16.mxu1 %v8655_v23  ;;  %v8721_v22 = vld [vmem:[#allocation2 + $0x11b0] ss:$20 sps:$4 sm:$0xff]  }
 0x207   :  { %v8729_v23 = vld [vmem:[#allocation2 + $0x11dc] ss:$20 sps:$4 sm:$0xff]  }
 0x209   :  { %4549 = vmatpush1.bf16.msra.mxu0 %v8650_v13  ;;  %4877 = vmatpush1.bf16.msra.mxu1 %v8653_v25  ;;  %v8724_v13 = vld [vmem:[#allocation2 + $0x11d0] ss:$20 sps:$4 sm:$0xff]   ;;  %v8727_v25 = vld [vmem:[#allocation2 + $0x11d8] ss:$20 sps:$4 sm:$0xff]  }
 0x20a   :  { %4550 = vmatprep.subr.bf16.mxu0 %v8658_v26  ;;  %4878 = vmatprep.subr.bf16.mxu1 %v8661_v27  ;;  %v8732_v26 = vld [vmem:[#allocation2 + $0x11fc] ss:$20 sps:$4 sm:$0xff]   ;;  %v8735_v27 = vld [vmem:[#allocation2 + $0x1204] ss:$20 sps:$4 sm:$0xff]  }
 0x20d   :  { %4551 = vmatpush1.bf16.msra.mxu0 %v8656_v28  ;;  %4879 = vmatpush1.bf16.msra.mxu1 %v8659_v32  ;;  %v8730_v28 = vld [vmem:[#allocation2 + $0x11f8] ss:$20 sps:$4 sm:$0xff]   ;;  %v8733_v32 = vld [vmem:[#allocation2 + $0x1200] ss:$20 sps:$4 sm:$0xff]  }
 0x20e   :  { %4552 = vmatprep.subr.bf16.mxu0 %v8664_v33  ;;  %4880 = vmatprep.subr.bf16.mxu1 %v8667_v34  ;;  %v8738_v33 = vld [vmem:[#allocation2 + $0x1224] ss:$20 sps:$4 sm:$0xff]   ;;  %v8741_v34 = vld [vmem:[#allocation2 + $0x122c] ss:$20 sps:$4 sm:$0xff]  }
 0x211   :  { %4553 = vmatpush1.bf16.msra.mxu0 %v8662_v21  ;;  %4881 = vmatpush1.bf16.msra.mxu1 %v8665_v36  ;;  %v8736_v21 = vld [vmem:[#allocation2 + $0x1220] ss:$20 sps:$4 sm:$0xff]   ;;  %v8739_v36 = vld [vmem:[#allocation2 + $0x1228] ss:$20 sps:$4 sm:$0xff]  }
 0x212   :  { %4554 = vmatprep.subr.bf16.mxu0 %v8670_v37  ;;  %4882 = vmatprep.subr.bf16.mxu1 %v8673_v38  ;;  %v8744_v37 = vld [vmem:[#allocation2 + $0x124c] ss:$20 sps:$4 sm:$0xff]   ;;  %v8747_v38 = vld [vmem:[#allocation2 + $0x1254] ss:$20 sps:$4 sm:$0xff]  }
 0x215   :  { %4555 = vmatpush1.bf16.msra.mxu0 %v8668_v39  ;;  %4883 = vmatpush1.bf16.msra.mxu1 %v8671_v40  ;;  %v8742_v39 = vld [vmem:[#allocation2 + $0x1248] ss:$20 sps:$4 sm:$0xff]   ;;  %v8745_v40 = vld [vmem:[#allocation2 + $0x1250] ss:$20 sps:$4 sm:$0xff]  }
 0x216   :  { %4556 = vmatprep.subr.bf16.mxu0 %v8676_v43  ;;  %4884 = vmatprep.subr.bf16.mxu1 %v8679_v44  ;;  %v8750_v43 = vld [vmem:[#allocation2 + $0x1274] ss:$20 sps:$4 sm:$0xff]   ;;  %v8753_v44 = vld [vmem:[#allocation2 + $0x127c] ss:$20 sps:$4 sm:$0xff]  }
 0x219   :  { %4557 = vmatpush1.bf16.msra.mxu0 %v8674_v45  ;;  %4885 = vmatpush1.bf16.msra.mxu1 %v8677_v46  ;;  %v8748_v45 = vld [vmem:[#allocation2 + $0x1270] ss:$20 sps:$4 sm:$0xff]   ;;  %v8751_v46 = vld [vmem:[#allocation2 + $0x1278] ss:$20 sps:$4 sm:$0xff]  }
 0x21a   :  { %4558 = vmatprep.subr.bf16.mxu0 %v8682_v31  ;;  %4886 = vmatprep.subr.bf16.mxu1 %v8685_v49  ;;  %v8756_v31 = vld [vmem:[#allocation2 + $0x129c] ss:$20 sps:$4 sm:$0xff]   ;;  %v8759_v49 = vld [vmem:[#allocation2 + $0x12a4] ss:$20 sps:$4 sm:$0xff]  }
 0x21d   :  { %4559 = vmatpush1.bf16.msra.mxu0 %v8680_v50  ;;  %4887 = vmatpush1.bf16.msra.mxu1 %v8683_v51  ;;  %v8754_v50 = vld [vmem:[#allocation2 + $0x1298] ss:$20 sps:$4 sm:$0xff]   ;;  %v8757_v51 = vld [vmem:[#allocation2 + $0x12a0] ss:$20 sps:$4 sm:$0xff]  }
 0x21e   :  { %4560 = vmatprep.subr.bf16.mxu0 %v8688_v52  ;;  %4888 = vmatprep.subr.bf16.mxu1 %v8691_v53  ;;  %v8762_v52 = vld [vmem:[#allocation2 + $0x12c4] ss:$20 sps:$4 sm:$0xff]   ;;  %v8765_v53 = vld [vmem:[#allocation2 + $0x12cc] ss:$20 sps:$4 sm:$0xff]  }
 0x221   :  { %4561 = vmatpush1.bf16.msra.mxu0 %v8686_v54  ;;  %4889 = vmatpush1.bf16.msra.mxu1 %v8689_v55  ;;  %v8760_v54 = vld [vmem:[#allocation2 + $0x12c0] ss:$20 sps:$4 sm:$0xff]   ;;  %v8763_v55 = vld [vmem:[#allocation2 + $0x12c8] ss:$20 sps:$4 sm:$0xff]  }
 0x222   :  { %4562 = vmatprep.subr.bf16.mxu0 %v8694_v56  ;;  %4890 = vmatprep.subr.bf16.mxu1 %v8697_v57  ;;  %v8768_v56 = vld [vmem:[#allocation2 + $0x12ec] ss:$20 sps:$4 sm:$0xff]   ;;  %v8771_v57 = vld [vmem:[#allocation2 + $0x12f4] ss:$20 sps:$4 sm:$0xff]  }
 0x225   :  { %4563 = vmatpush1.bf16.msra.mxu0 %v8692_v60  ;;  %4891 = vmatpush1.bf16.msra.mxu1 %v8695_v61  ;;  %v8766_v60 = vld [vmem:[#allocation2 + $0x12e8] ss:$20 sps:$4 sm:$0xff]   ;;  %v8769_v61 = vld [vmem:[#allocation2 + $0x12f0] ss:$20 sps:$4 sm:$0xff]  }
 0x226   :  { %4564 = vmatprep.subr.bf16.mxu0 %v8700_v62  ;;  %4892 = vmatprep.subr.bf16.mxu1 %v8703_v41  ;;  %v8774_v62 = vld [vmem:[#allocation2 + $0x1314] ss:$20 sps:$4 sm:$0xff]   ;;  %v8777_v41 = vld [vmem:[#allocation2 + $0x131c] ss:$20 sps:$4 sm:$0xff]  }
 0x229   :  { %4565 = vmatpush1.bf16.msra.mxu0 %v8698_v0  ;;  %4893 = vmatpush1.bf16.msra.mxu1 %v8701_v1  ;;  %v8772_v0 = vld [vmem:[#allocation2 + $0x1310] ss:$20 sps:$4 sm:$0xff]   ;;  %v8775_v1 = vld [vmem:[#allocation2 + $0x1318] ss:$20 sps:$4 sm:$0xff]  }
 0x22a   :  { %4566 = vmatprep.subr.bf16.mxu0 %v8706_v2  ;;  %4894 = vmatprep.subr.bf16.mxu1 %v8709_v3  ;;  %v8780_v2 = vld [vmem:[#allocation2 + $0x133c] ss:$20 sps:$4 sm:$0xff]   ;;  %v8783_v3 = vld [vmem:[#allocation2 + $0x1344] ss:$20 sps:$4 sm:$0xff]  }
 0x22d   :  { %4567 = vmatpush1.bf16.msra.mxu0 %v8704_v4  ;;  %4895 = vmatpush1.bf16.msra.mxu1 %v8707_v6  ;;  %v8778_v4 = vld [vmem:[#allocation2 + $0x1338] ss:$20 sps:$4 sm:$0xff]   ;;  %v8781_v6 = vld [vmem:[#allocation2 + $0x1340] ss:$20 sps:$4 sm:$0xff]  }
 0x22e   :  { %4577 = vmatprep.subr.bf16.mxu0 %v8714_v7  ;;  %4905 = vmatprep.subr.bf16.mxu1 %v8717_v8  ;;  %v8786_v7 = vld [vmem:[#allocation2 + $0x1364] ss:$20 sps:$4 sm:$0xff]   ;;  %v8789_v8 = vld [vmem:[#allocation2 + $0x136c] ss:$20 sps:$4 sm:$0xff]  }
 0x230   :  { %4569 = vmatmul.mubr.bf16.vlgmr.msra.gmra.mrb[0].mxu0 %v9589_v14  ;;  %4897 = vmatmul.mubr.bf16.vlgmr.msra.gmra.mrb[0].mxu1 %v9589_v14 }
 0x231   :  { %4578 = vmatpush1.bf16.msra.mxu0 %v8712_v10  ;;  %4906 = vmatpush1.bf16.msra.mxu1 %v8715_v11  ;;  %v8784_v10 = vld [vmem:[#allocation2 + $0x1360] ss:$20 sps:$4 sm:$0xff]   ;;  %v8787_v11 = vld [vmem:[#allocation2 + $0x1368] ss:$20 sps:$4 sm:$0xff]  }
 0x232   :  { %4579 = vmatprep.subr.bf16.mxu0 %v8720_v16  ;;  %4907 = vmatprep.subr.bf16.mxu1 %v8723_v17  ;;  %v8792_v16 = vld [vmem:[#allocation2 + $0x138c] ss:$20 sps:$4 sm:$0xff]   ;;  %v8795_v17 = vld [vmem:[#allocation2 + $0x1394] ss:$20 sps:$4 sm:$0xff]  }
 0x233   :  { %4609 = vmatprep.mubr.bf16.mxu0 %v9593_v20  ;;  %4937 = vmatprep.mubr.bf16.mxu1 %v9593_v20 }
 0x235   :  { %4580 = vmatpush1.bf16.msra.mxu0 %v8718_v18  ;;  %4908 = vmatpush1.bf16.msra.mxu1 %v8721_v22  ;;  %v8790_v18 = vld [vmem:[#allocation2 + $0x1388] ss:$20 sps:$4 sm:$0xff]   ;;  %v8793_v22 = vld [vmem:[#allocation2 + $0x1390] ss:$20 sps:$4 sm:$0xff]  }
 0x236   :  { %4581 = vmatprep.subr.bf16.mxu0 %v8726_v59  ;;  %4909 = vmatprep.subr.bf16.mxu1 %v8729_v23  ;;  %v8798_v59 = vld [vmem:[#allocation2 + $0x13b4] ss:$20 sps:$4 sm:$0xff]   ;;  %v8801_v23 = vld [vmem:[#allocation2 + $0x13bc] ss:$20 sps:$4 sm:$0xff]  }
 0x239   :  { %4582 = vmatpush1.bf16.msra.mxu0 %v8724_v13  ;;  %4910 = vmatpush1.bf16.msra.mxu1 %v8727_v25  ;;  %v8796_v13 = vld [vmem:[#allocation2 + $0x13b0] ss:$20 sps:$4 sm:$0xff]   ;;  %v8799_v25 = vld [vmem:[#allocation2 + $0x13b8] ss:$20 sps:$4 sm:$0xff]  }
 0x23a   :  { %4583 = vmatprep.subr.bf16.mxu0 %v8732_v26  ;;  %4911 = vmatprep.subr.bf16.mxu1 %v8735_v27  ;;  %v8804_v26 = vld [vmem:[#allocation2 + $0x13dc] ss:$20 sps:$4 sm:$0xff]   ;;  %v8807_v27 = vld [vmem:[#allocation2 + $0x13e4] ss:$20 sps:$4 sm:$0xff]  }
 0x23d   :  { %4584 = vmatpush1.bf16.msra.mxu0 %v8730_v28  ;;  %4912 = vmatpush1.bf16.msra.mxu1 %v8733_v32  ;;  %v8802_v28 = vld [vmem:[#allocation2 + $0x13d8] ss:$20 sps:$4 sm:$0xff]   ;;  %v8805_v32 = vld [vmem:[#allocation2 + $0x13e0] ss:$20 sps:$4 sm:$0xff]  }
 0x23e   :  { %4585 = vmatprep.subr.bf16.mxu0 %v8738_v33  ;;  %4913 = vmatprep.subr.bf16.mxu1 %v8741_v34  ;;  %v8810_v33 = vld [vmem:[#allocation2 + $0x150] ss:$20 sps:$4 sm:$0xff]  }
 0x23f   :  { %v8811_v34 = vld [vmem:[#allocation2 + $0x3d0] ss:$20 sps:$4 sm:$0xff]  }
 0x241   :  { %4586 = vmatpush1.bf16.msra.mxu0 %v8736_v21  ;;  %4914 = vmatpush1.bf16.msra.mxu1 %v8739_v36  ;;  %v8812_v21 = vld [vmem:[#allocation2 + $0x10] ss:$20 sps:$4 sm:$0xff]  }
 0x242   :  { %4587 = vmatprep.subr.bf16.mxu0 %v8744_v37  ;;  %4915 = vmatprep.subr.bf16.mxu1 %v8747_v38  ;;  %v8813_v36 = vld [vmem:[#allocation2 + $0x290] ss:$20 sps:$4 sm:$0xff]   ;;  %v9601_v37 = vcombine.low %v9585_v12, %v9585_v12  ;;  %v8814_v38 = vld [vmem:[#allocation2 + $0x178] ss:$20 sps:$4 sm:$0xff]   ;;  %v8820_v12 = vld [vmem:[#allocation2 + $0x60] ss:$20 sps:$4 sm:$0xff]  }
 0x245   :  { %4588 = vmatpush1.bf16.msra.mxu0 %v8742_v39  ;;  %4916 = vmatpush1.bf16.msra.mxu1 %v8745_v40  ;;  %v8815_v39 = vld [vmem:[#allocation2 + $0x3f8] ss:$20 sps:$4 sm:$0xff]  }
 0x246   :  { %4589 = vmatprep.subr.bf16.mxu0 %v8750_v43  ;;  %4917 = vmatprep.subr.bf16.mxu1 %v8753_v44  ;;  %v8816_v40 = vld [vmem:[#allocation2 + $0x38] ss:$20 sps:$4 sm:$0xff]   ;;  %v8818_v44 = vld [vmem:[#allocation2 + $0x1a0] ss:$20 sps:$4 sm:$0xff]  }
 0x247   :  { %v8817_v43 = vld [vmem:[#allocation2 + $0x2b8] ss:$20 sps:$4 sm:$0xff]  }
 0x249   :  { %4590 = vmatpush1.bf16.msra.mxu0 %v8748_v45  ;;  %4918 = vmatpush1.bf16.msra.mxu1 %v8751_v46  ;;  %v8819_v45 = vld [vmem:[#allocation2 + $0x420] ss:$20 sps:$4 sm:$0xff]  }
 0x24a   :  { %4591 = vmatprep.subr.bf16.mxu0 %v8756_v31  ;;  %4919 = vmatprep.subr.bf16.mxu1 %v8759_v49  ;;  %v8821_v46 = vld [vmem:[#allocation2 + $0x2e0] ss:$20 sps:$4 sm:$0xff]   ;;  %v8822_v31 = vld [vmem:[#allocation2 + $0x1c8] ss:$20 sps:$4 sm:$0xff]  }
 0x24b   :  { %v8823_v49 = vld [vmem:[#allocation2 + $0x448] ss:$20 sps:$4 sm:$0xff]  }
 0x24d   :  { %4592 = vmatpush1.bf16.msra.mxu0 %v8754_v50  ;;  %4920 = vmatpush1.bf16.msra.mxu1 %v8757_v51  ;;  %v8824_v50 = vld [vmem:[#allocation2 + $0x88] ss:$20 sps:$4 sm:$0xff]  }
 0x24e   :  { %4593 = vmatprep.subr.bf16.mxu0 %v8762_v52  ;;  %4921 = vmatprep.subr.bf16.mxu1 %v8765_v53  ;;  %v8825_v51 = vld [vmem:[#allocation2 + $0x308] ss:$20 sps:$4 sm:$0xff]   ;;  %v8826_v52 = vld [vmem:[#allocation2 + $0x1f0] ss:$20 sps:$4 sm:$0xff]  }
 0x24f   :  { %v8827_v53 = vld [vmem:[#allocation2 + $0x470] ss:$20 sps:$4 sm:$0xff]  }
 0x251   :  { %4594 = vmatpush1.bf16.msra.mxu0 %v8760_v54  ;;  %4922 = vmatpush1.bf16.msra.mxu1 %v8763_v55  ;;  %v8830_v54 = vld [vmem:[#allocation2 + $0x218] ss:$20 sps:$4 sm:$0xff]  }
 0x252   :  { %4595 = vmatprep.subr.bf16.mxu0 %v8768_v56  ;;  %4923 = vmatprep.subr.bf16.mxu1 %v8771_v57  ;;  %v8831_v55 = vld [vmem:[#allocation2 + $0x498] ss:$20 sps:$4 sm:$0xff]  }
 0x253   :  { %v8832_v56 = vld [vmem:[#allocation2 + $0xd8] ss:$20 sps:$4 sm:$0xff]  }
 0x254   :  { %v8833_v57 = vld [vmem:[#allocation2 + $0x358] ss:$20 sps:$4 sm:$0xff]  }
 0x255   :  { %4596 = vmatpush1.bf16.msra.mxu0 %v8766_v60  ;;  %4924 = vmatpush1.bf16.msra.mxu1 %v8769_v61  ;;  %v8834_v60 = vld [vmem:[#allocation2 + $0x240] ss:$20 sps:$4 sm:$0xff]  }
 0x256   :  { %4597 = vmatprep.subr.bf16.mxu0 %v8774_v62  ;;  %4925 = vmatprep.subr.bf16.mxu1 %v8777_v41  ;;  %v8835_v61 = vld [vmem:[#allocation2 + $0x4c0] ss:$20 sps:$4 sm:$0xff]  }
 0x257   :  { %v8836_v62 = vld [vmem:[#allocation2 + $0x100] ss:$20 sps:$4 sm:$0xff]  }
 0x258   :  { %v8837_v41 = vld [vmem:[#allocation2 + $0x380] ss:$20 sps:$4 sm:$0xff]  }
 0x259   :  { %4598 = vmatpush1.bf16.msra.mxu0 %v8772_v0  ;;  %4926 = vmatpush1.bf16.msra.mxu1 %v8775_v1  ;;  %v8838_v0 = vld [vmem:[#allocation2 + $0x268] ss:$20 sps:$4 sm:$0xff]  }
 0x25a   :  { %4599 = vmatprep.subr.bf16.mxu0 %v8780_v2  ;;  %4927 = vmatprep.subr.bf16.mxu1 %v8783_v3  ;;  %v8839_v1 = vld [vmem:[#allocation2 + $0x4e8] ss:$20 sps:$4 sm:$0xff]  }
 0x25b   :  { %v8840_v2 = vld [vmem:[#allocation2 + $0x128] ss:$20 sps:$4 sm:$0xff]  }
 0x25c   :  { %v8841_v3 = vld [vmem:[#allocation2 + $0x3a8] ss:$20 sps:$4 sm:$0xff]  }
 0x25d   :  { %4600 = vmatpush1.bf16.msra.mxu0 %v8778_v4  ;;  %4928 = vmatpush1.bf16.msra.mxu1 %v8781_v6  ;;  %v8842_v4 = vld [vmem:[#allocation2 + $0x650] ss:$20 sps:$4 sm:$0xff]  }
 0x25e   :  { %4601 = vmatprep.subr.bf16.mxu0 %v8786_v7  ;;  %4929 = vmatprep.subr.bf16.mxu1 %v8789_v8  ;;  %v8843_v6 = vld [vmem:[#allocation2 + $0x8d0] ss:$20 sps:$4 sm:$0xff]  }
 0x25f   :  { %v8844_v7 = vld [vmem:[#allocation2 + $0x510] ss:$20 sps:$4 sm:$0xff]  }
 0x260   :  { %v8845_v8 = vld [vmem:[#allocation2 + $0x790] ss:$20 sps:$4 sm:$0xff]  }
 0x261   :  { %4602 = vmatpush1.bf16.msra.mxu0 %v8784_v10  ;;  %4930 = vmatpush1.bf16.msra.mxu1 %v8787_v11  ;;  %v8846_v10 = vld [vmem:[#allocation2 + $0x678] ss:$20 sps:$4 sm:$0xff]  }
 0x262   :  { %4603 = vmatprep.subr.bf16.mxu0 %v8792_v16  ;;  %4931 = vmatprep.subr.bf16.mxu1 %v8795_v17  ;;  %v8847_v11 = vld [vmem:[#allocation2 + $0x8f8] ss:$20 sps:$4 sm:$0xff]  }
 0x263   :  { %v8848_v16 = vld [vmem:[#allocation2 + $0x538] ss:$20 sps:$4 sm:$0xff]  }
 0x264   :  { %v8849_v17 = vld [vmem:[#allocation2 + $0x7b8] ss:$20 sps:$4 sm:$0xff]  }
 0x265   :  { %4604 = vmatpush1.bf16.msra.mxu0 %v8790_v18  ;;  %4932 = vmatpush1.bf16.msra.mxu1 %v8793_v22  ;;  %v8850_v18 = vld [vmem:[#allocation2 + $0x6a0] ss:$20 sps:$4 sm:$0xff]  }
 0x266   :  { %4605 = vmatprep.subr.bf16.mxu0 %v8798_v59  ;;  %4933 = vmatprep.subr.bf16.mxu1 %v8801_v23  ;;  %v8851_v22 = vld [vmem:[#allocation2 + $0x920] ss:$20 sps:$4 sm:$0xff]  }
 0x267   :  { %v8852_v59 = vld [vmem:[#allocation2 + $0x560] ss:$20 sps:$4 sm:$0xff]  }
 0x268   :  { %v8853_v23 = vld [vmem:[#allocation2 + $0x7e0] ss:$20 sps:$4 sm:$0xff]  }
 0x269   :  { %4606 = vmatpush1.bf16.msra.mxu0 %v8796_v13  ;;  %4934 = vmatpush1.bf16.msra.mxu1 %v8799_v25  ;;  %v8856_v13 = vld [vmem:[#allocation2 + $0x588] ss:$20 sps:$4 sm:$0xff]  }
 0x26a   :  { %4607 = vmatprep.subr.bf16.mxu0 %v8804_v26  ;;  %4935 = vmatprep.subr.bf16.mxu1 %v8807_v27  ;;  %v8857_v25 = vld [vmem:[#allocation2 + $0x808] ss:$20 sps:$4 sm:$0xff]   ;;  %v8858_v26 = vld [vmem:[#allocation2 + $0x6f0] ss:$20 sps:$4 sm:$0xff]  }
 0x26b   :  { %v8859_v27 = vld [vmem:[#allocation2 + $0x970] ss:$20 sps:$4 sm:$0xff]  }
 0x26d   :  { %4608 = vmatpush1.bf16.msra.mxu0 %v8802_v28  ;;  %4936 = vmatpush1.bf16.msra.mxu1 %v8805_v32  ;;  %v8862_v28 = vld [vmem:[#allocation2 + $0x718] ss:$20 sps:$4 sm:$0xff]  }
 0x26e   :  { %7713 = vmatprep.subr.bf16.mxu0 %v8810_v33  ;;  %7735 = vmatprep.subr.bf16.mxu1 %v8811_v34  ;;  %v8863_v32 = vld [vmem:[#allocation2 + $0x998] ss:$20 sps:$4 sm:$0xff]  }
 0x26f   :  { %v8864_v33 = vld [vmem:[#allocation2 + $0x5d8] ss:$20 sps:$4 sm:$0xff]  }
 0x270   :  { %4610 = vmatmul.mubr.bf16.vlgmr.msra.gmra.mrb[0].mxu0 %v9601_v37  ;;  %4938 = vmatmul.mubr.bf16.vlgmr.msra.gmra.mrb[0].mxu1 %v9601_v37  ;;  %v8865_v34 = vld [vmem:[#allocation2 + $0x858] ss:$20 sps:$4 sm:$0xff]  }
 0x271   :  { %7714 = vmatpush3.bf16.msra.mxu0 %v8812_v21  ;;  %7736 = vmatpush3.bf16.msra.mxu1 %v8813_v36  ;;  %v8866_v21 = vld [vmem:[#allocation2 + $0x740] ss:$20 sps:$4 sm:$0xff]  }
 0x272   :  { %7715 = vmatprep.subr.bf16.mxu0 %v8814_v38  ;;  %7737 = vmatprep.subr.bf16.mxu1 %v8815_v39  ;;  %v8867_v36 = vld [vmem:[#allocation2 + $0x9c0] ss:$20 sps:$4 sm:$0xff]  }
 0x273   :  { %4978 = vmatprep.mubr.bf16.mxu0 %v9478_v48  ;;  %5018 = vmatprep.mubr.bf16.mxu1 %v9493_v30  ;;  %v8828_v48 = vld [vmem:[#allocation2 + $0xb0] ss:$20 sps:$4 sm:$0xff]   ;;  %v8868_v38 = vld [vmem:[#allocation2 + $0x600] ss:$20 sps:$4 sm:$0xff]  }
 0x274   :  { %v8829_v30 = vld [vmem:[#allocation2 + $0x330] ss:$20 sps:$4 sm:$0xff]   ;;  %v8869_v39 = vld [vmem:[#allocation2 + $0x880] ss:$20 sps:$4 sm:$0xff]  }
 0x275   :  { %7716 = vmatpush3.bf16.msra.mxu0 %v8816_v40  ;;  %7738 = vmatpush3.bf16.msra.mxu1 %v8817_v43  ;;  %v8870_v40 = vld [vmem:[#allocation2 + $0x768] ss:$20 sps:$4 sm:$0xff]  }
 0x276   :  { %7717 = vmatprep.subr.bf16.mxu0 %v8818_v44  ;;  %7739 = vmatprep.subr.bf16.mxu1 %v8819_v45  ;;  %v8871_v43 = vld [vmem:[#allocation2 + $0x9e8] ss:$20 sps:$4 sm:$0xff]  }
 0x277   :  { %v8872_v44 = vld [vmem:[#allocation2 + $0x628] ss:$20 sps:$4 sm:$0xff]  }
 0x278   :  { %v8873_v45 = vld [vmem:[#allocation2 + $0x8a8] ss:$20 sps:$4 sm:$0xff]  }
 0x279   :  { %7718 = vmatpush3.bf16.msra.mxu0 %v8820_v12  ;;  %7740 = vmatpush3.bf16.msra.mxu1 %v8821_v46  ;;  %v8874_v12 = vld [vmem:[#allocation2 + $0xb50] ss:$20 sps:$4 sm:$0xff]  }
 0x27a   :  { %7719 = vmatprep.subr.bf16.mxu0 %v8822_v31  ;;  %7741 = vmatprep.subr.bf16.mxu1 %v8823_v49  ;;  %v8875_v46 = vld [vmem:[#allocation2 + $0xdd0] ss:$20 sps:$4 sm:$0xff]  }
 0x27b   :  { %v8876_v31 = vld [vmem:[#allocation2 + $0xa10] ss:$20 sps:$4 sm:$0xff]  }
 0x27c   :  { %v8877_v49 = vld [vmem:[#allocation2 + $0xc90] ss:$20 sps:$4 sm:$0xff]  }
 0x27d   :  { %7720 = vmatpush3.bf16.msra.mxu0 %v8824_v50  ;;  %7742 = vmatpush3.bf16.msra.mxu1 %v8825_v51  ;;  %v8878_v50 = vld [vmem:[#allocation2 + $0xb78] ss:$20 sps:$4 sm:$0xff]  }
 0x27e   :  { %7721 = vmatprep.subr.bf16.mxu0 %v8826_v52  ;;  %7743 = vmatprep.subr.bf16.mxu1 %v8827_v53  ;;  %v8879_v51 = vld [vmem:[#allocation2 + $0xdf8] ss:$20 sps:$4 sm:$0xff]  }
 0x27f   :  { %v8880_v52 = vld [vmem:[#allocation2 + $0xa38] ss:$20 sps:$4 sm:$0xff]  }
 0x280   :  { %v8881_v53 = vld [vmem:[#allocation2 + $0xcb8] ss:$20 sps:$4 sm:$0xff]  }
 0x281   :  { %7722 = vmatpush3.bf16.msra.mxu0 %v8828_v48  ;;  %7744 = vmatpush3.bf16.msra.mxu1 %v8829_v30  ;;  %v8882_v48 = vld [vmem:[#allocation2 + $0xba0] ss:$20 sps:$4 sm:$0xff]  }
 0x282   :  { %7723 = vmatprep.subr.bf16.mxu0 %v8830_v54  ;;  %7745 = vmatprep.subr.bf16.mxu1 %v8831_v55  ;;  %v8883_v30 = vld [vmem:[#allocation2 + $0xe20] ss:$20 sps:$4 sm:$0xff]  }
 0x283   :  { %v8884_v54 = vld [vmem:[#allocation2 + $0xa60] ss:$20 sps:$4 sm:$0xff]  }
 0x284   :  { %v8885_v55 = vld [vmem:[#allocation2 + $0xce0] ss:$20 sps:$4 sm:$0xff]  }
 0x285   :  { %7724 = vmatpush3.bf16.msra.mxu0 %v8832_v56  ;;  %7746 = vmatpush3.bf16.msra.mxu1 %v8833_v57  ;;  %v8888_v56 = vld [vmem:[#allocation2 + $0xa88] ss:$20 sps:$4 sm:$0xff]  }
 0x286   :  { %7725 = vmatprep.subr.bf16.mxu0 %v8834_v60  ;;  %7747 = vmatprep.subr.bf16.mxu1 %v8835_v61  ;;  %v8889_v57 = vld [vmem:[#allocation2 + $0xd08] ss:$20 sps:$4 sm:$0xff]   ;;  %v8890_v60 = vld [vmem:[#allocation2 + $0xbf0] ss:$20 sps:$4 sm:$0xff]  }
 0x287   :  { %v8891_v61 = vld [vmem:[#allocation2 + $0xe70] ss:$20 sps:$4 sm:$0xff]  }
 0x289   :  { %7726 = vmatpush3.bf16.msra.mxu0 %v8836_v62  ;;  %7748 = vmatpush3.bf16.msra.mxu1 %v8837_v41  ;;  %v8894_v62 = vld [vmem:[#allocation2 + $0xc18] ss:$20 sps:$4 sm:$0xff]  }
 0x28a   :  { %7727 = vmatprep.subr.bf16.mxu0 %v8838_v0  ;;  %7749 = vmatprep.subr.bf16.mxu1 %v8839_v1  ;;  %v8895_v41 = vld [vmem:[#allocation2 + $0xe98] ss:$20 sps:$4 sm:$0xff]  }
 0x28b   :  { %v8896_v0 = vld [vmem:[#allocation2 + $0xad8] ss:$20 sps:$4 sm:$0xff]  }
 0x28c   :  { %v8897_v1 = vld [vmem:[#allocation2 + $0xd58] ss:$20 sps:$4 sm:$0xff]  }
 0x28d   :  { %7728 = vmatpush3.bf16.msra.mxu0 %v8840_v2  ;;  %7750 = vmatpush3.bf16.msra.mxu1 %v8841_v3  ;;  %v8898_v2 = vld [vmem:[#allocation2 + $0xc40] ss:$20 sps:$4 sm:$0xff]  }
 0x28e   :  { %7757 = vmatprep.subr.bf16.mxu0 %v8842_v4  ;;  %7779 = vmatprep.subr.bf16.mxu1 %v8843_v6  ;;  %v8899_v3 = vld [vmem:[#allocation2 + $0xec0] ss:$20 sps:$4 sm:$0xff]  }
 0x28f   :  { %v8900_v4 = vld [vmem:[#allocation2 + $0xb00] ss:$20 sps:$4 sm:$0xff]  }
 0x290   :  { %4979 = vmatmul.mubr.bf16.vlgmr.msra.gmra.mrb[4].mxu0 %v9482_v5  ;;  %5019 = vmatmul.mubr.bf16.vlgmr.msra.gmra.mrb[4].mxu1 %v9499_v9  ;;  %v8854_v5 = vld [vmem:[#allocation2 + $0x6c8] ss:$20 sps:$4 sm:$0xff]   ;;  %v8901_v6 = vld [vmem:[#allocation2 + $0xd80] ss:$20 sps:$4 sm:$0xff]  }
 0x291   :  { %7758 = vmatpush3.bf16.msra.mxu0 %v8844_v7  ;;  %7780 = vmatpush3.bf16.msra.mxu1 %v8845_v8  ;;  %v8855_v9 = vld [vmem:[#allocation2 + $0x948] ss:$20 sps:$4 sm:$0xff]  }
 0x292   :  { %7759 = vmatprep.subr.bf16.mxu0 %v8846_v10  ;;  %7781 = vmatprep.subr.bf16.mxu1 %v8847_v11  ;;  %v8902_v7 = vld [vmem:[#allocation2 + $0xc68] ss:$20 sps:$4 sm:$0xff]  }
 0x293   :  { %5058 = vmatprep.mubr.bf16.mxu0 %v9508_v15  ;;  %5098 = vmatprep.mubr.bf16.mxu1 %v9525_v24  ;;  %v8860_v15 = vld [vmem:[#allocation2 + $0x5b0] ss:$20 sps:$4 sm:$0xff]   ;;  %v8903_v8 = vld [vmem:[#allocation2 + $0xee8] ss:$20 sps:$4 sm:$0xff]  }
 0x294   :  { %v8861_v24 = vld [vmem:[#allocation2 + $0x830] ss:$20 sps:$4 sm:$0xff]   ;;  %v8904_v10 = vld [vmem:[#allocation2 + $0xb28] ss:$20 sps:$4 sm:$0xff]  }
 0x295   :  { %7760 = vmatpush3.bf16.msra.mxu0 %v8848_v16  ;;  %7782 = vmatpush3.bf16.msra.mxu1 %v8849_v17  ;;  %v8905_v11 = vld [vmem:[#allocation2 + $0xda8] ss:$20 sps:$4 sm:$0xff]   ;;  %v8906_v16 = vld [vmem:[#allocation2 + $0x1050] ss:$20 sps:$4 sm:$0xff]  }
 0x296   :  { %7761 = vmatprep.subr.bf16.mxu0 %v8850_v18  ;;  %7783 = vmatprep.subr.bf16.mxu1 %v8851_v22  ;;  %v8907_v17 = vld [vmem:[#allocation2 + $0x12d0] ss:$20 sps:$4 sm:$0xff]  }
 0x297   :  { %v8908_v18 = vld [vmem:[#allocation2 + $0xf10] ss:$20 sps:$4 sm:$0xff]  }
 0x298   :  { %v8909_v22 = vld [vmem:[#allocation2 + $0x1190] ss:$20 sps:$4 sm:$0xff]  }
 0x299   :  { %7762 = vmatpush3.bf16.msra.mxu0 %v8852_v59  ;;  %7784 = vmatpush3.bf16.msra.mxu1 %v8853_v23  ;;  %v8910_v59 = vld [vmem:[#allocation2 + $0x1078] ss:$20 sps:$4 sm:$0xff]  }
 0x29a   :  { %7763 = vmatprep.subr.bf16.mxu0 %v8854_v5  ;;  %7785 = vmatprep.subr.bf16.mxu1 %v8855_v9  ;;  %v8911_v23 = vld [vmem:[#allocation2 + $0x12f8] ss:$20 sps:$4 sm:$0xff]  }
 0x29b   :  { %v8912_v5 = vld [vmem:[#allocation2 + $0xf38] ss:$20 sps:$4 sm:$0xff]  }
 0x29c   :  { %v8913_v9 = vld [vmem:[#allocation2 + $0x11b8] ss:$20 sps:$4 sm:$0xff]  }
 0x29d   :  { %7764 = vmatpush3.bf16.msra.mxu0 %v8856_v13  ;;  %7786 = vmatpush3.bf16.msra.mxu1 %v8857_v25  ;;  %v8914_v13 = vld [vmem:[#allocation2 + $0x10a0] ss:$20 sps:$4 sm:$0xff]  }
 0x29e   :  { %7765 = vmatprep.subr.bf16.mxu0 %v8858_v26  ;;  %7787 = vmatprep.subr.bf16.mxu1 %v8859_v27  ;;  %v8915_v25 = vld [vmem:[#allocation2 + $0x1320] ss:$20 sps:$4 sm:$0xff]  }
 0x29f   :  { %v8916_v26 = vld [vmem:[#allocation2 + $0xf60] ss:$20 sps:$4 sm:$0xff]  }
 0x2a0   :  { %v8917_v27 = vld [vmem:[#allocation2 + $0x11e0] ss:$20 sps:$4 sm:$0xff]  }
 0x2a1   :  { %7766 = vmatpush3.bf16.msra.mxu0 %v8860_v15  ;;  %7788 = vmatpush3.bf16.msra.mxu1 %v8861_v24  ;;  %v8920_v15 = vld [vmem:[#allocation2 + $0xf88] ss:$20 sps:$4 sm:$0xff]  }
 0x2a2   :  { %7767 = vmatprep.subr.bf16.mxu0 %v8862_v28  ;;  %7789 = vmatprep.subr.bf16.mxu1 %v8863_v32  ;;  %v8921_v24 = vld [vmem:[#allocation2 + $0x1208] ss:$20 sps:$4 sm:$0xff]   ;;  %v8922_v28 = vld [vmem:[#allocation2 + $0x10f0] ss:$20 sps:$4 sm:$0xff]  }
 0x2a3   :  { %v8923_v32 = vld [vmem:[#allocation2 + $0x1370] ss:$20 sps:$4 sm:$0xff]  }
 0x2a5   :  { %7768 = vmatpush3.bf16.msra.mxu0 %v8864_v33  ;;  %7790 = vmatpush3.bf16.msra.mxu1 %v8865_v34  ;;  %v881_v33 = vlaneseq  ;;  %v8926_v34 = vld [vmem:[#allocation2 + $0x1118] ss:$20 sps:$4 sm:$0xff]  }
 0x2a6   :  { %7769 = vmatprep.subr.bf16.mxu0 %v8866_v21  ;;  %7791 = vmatprep.subr.bf16.mxu1 %v8867_v36  ;;  %v8927_v21 = vld [vmem:[#allocation2 + $0x1398] ss:$20 sps:$4 sm:$0xff]  }
 0x2a7   :  { %v8928_v36 = vld [vmem:[#allocation2 + $0xfd8] ss:$20 sps:$4 sm:$0xff]  }
 0x2a9   :  { %7770 = vmatpush3.bf16.msra.mxu0 %v8868_v38  ;;  %7792 = vmatpush3.bf16.msra.mxu1 %v8869_v39  ;;  %v8929_v38 = vld [vmem:[#allocation2 + $0x1258] ss:$20 sps:$4 sm:$0xff]   ;;  %v9619_v39 = vshrl.u32 %v881_v33, 7 }
 0x2aa   :  { %7771 = vmatprep.subr.bf16.mxu0 %v8870_v40  ;;  %7793 = vmatprep.subr.bf16.mxu1 %v8871_v43  ;;  %v8930_v40 = vld [vmem:[#allocation2 + $0x1140] ss:$20 sps:$4 sm:$0xff]  }
 0x2ab   :  { %v8931_v43 = vld [vmem:[#allocation2 + $0x13c0] ss:$20 sps:$4 sm:$0xff]  }
 0x2ac   :  { %v9007_v33 = vld [vmem:[#allocation6 + $0x168] ss:$16 sps:$4 sm:$0xff]  }
 0x2ad   :  { %7772 = vmatpush3.bf16.msra.mxu0 %v8872_v44  ;;  %7794 = vmatpush3.bf16.msra.mxu1 %v8873_v45  ;;  %v899_v44 = vsub.s32 4, %v9619_v39  ;;  %v9622_v45 = vld [vmem:[#allocation4] sm:$0x1f] }
 0x2ae   :  { %7801 = vmatprep.subr.bf16.mxu0 %v8874_v12  ;;  %7823 = vmatprep.subr.bf16.mxu1 %v8875_v46  ;;  %v8932_v12 = vld [vmem:[#allocation2 + $0x1000] ss:$20 sps:$4 sm:$0xff]  }
 0x2af   :  { %v8933_v46 = vld [vmem:[#allocation2 + $0x1280] ss:$20 sps:$4 sm:$0xff]  }
 0x2b0   :  { %5059 = vmatmul.mubr.bf16.vlgmr.msra.gmra.mrb[8].mxu0 %v9516_v19  ;;  %5099 = vmatmul.mubr.bf16.vlgmr.msra.gmra.mrb[8].mxu1 %v9533_v29  ;;  %v8886_v19 = vld [vmem:[#allocation2 + $0xbc8] ss:$20 sps:$4 sm:$0xff]  }
 0x2b1   :  { %7802 = vmatpush3.bf16.msra.mxu0 %v8876_v31  ;;  %7824 = vmatpush3.bf16.msra.mxu1 %v8877_v49  ;;  %v8887_v29 = vld [vmem:[#allocation2 + $0xe48] ss:$20 sps:$4 sm:$0xff]   ;;  %v9625_v31 = vrot.slane %v9622_v45, %v899_v44 }
 0x2b2   :  { %7803 = vmatprep.subr.bf16.mxu0 %v8878_v50  ;;  %7825 = vmatprep.subr.bf16.mxu1 %v8879_v51  ;;  %v8934_v49 = vld [vmem:[#allocation2 + $0x1168] ss:$20 sps:$4 sm:$0xff]  }
 0x2b3   :  { %5138 = vmatprep.mubr.bf16.mxu0 %v9542_v35  ;;  %5178 = vmatprep.mubr.bf16.mxu1 %v9559_v47  ;;  %v8892_v35 = vld [vmem:[#allocation2 + $0xab0] ss:$20 sps:$4 sm:$0xff]   ;;  %v8935_v50 = vld [vmem:[#allocation2 + $0x13e8] ss:$20 sps:$4 sm:$0xff]  }
 0x2b4   :  { %v8893_v47 = vld [vmem:[#allocation2 + $0xd30] ss:$20 sps:$4 sm:$0xff]   ;;  %v8936_v51 = vld [vmem:[#allocation2 + $0x1028] ss:$20 sps:$4 sm:$0xff]  }
 0x2b5   :  { %7804 = vmatpush3.bf16.msra.mxu0 %v8880_v52  ;;  %7826 = vmatpush3.bf16.msra.mxu1 %v8881_v53  ;;  %v8937_v52 = vld [vmem:[#allocation2 + $0x12a8] ss:$20 sps:$4 sm:$0xff]  }
 0x2b6   :  { %7805 = vmatprep.subr.bf16.mxu0 %v8882_v48  ;;  %7827 = vmatprep.subr.bf16.mxu1 %v8883_v30  ;;  %v8940_v53 = vld [vmem:[#allocation6 + $0x4] ss:$16 sps:$4 sm:$0xff]   ;;  %v8943_v48 = vld [vmem:[#allocation6 + $0xc] ss:$16 sps:$4 sm:$0xff]   ;;  %v8938_v30 = vld [vmem:[#allocation6] ss:$16 sps:$4 sm:$0xff]  }
 0x2b7   :  { %v9016_v44 = vld [vmem:[#allocation6 + $0x1a0] ss:$16 sps:$4 sm:$0xff]  }
 0x2b9   :  { %7806 = vmatpush3.bf16.msra.mxu0 %v8884_v54  ;;  %7828 = vmatpush3.bf16.msra.mxu1 %v8885_v55  ;;  %v8941_v54 = vld [vmem:[#allocation6 + $0x8] ss:$16 sps:$4 sm:$0xff]   ;;  %v8946_v55 = vld [vmem:[#allocation6 + $0x24] ss:$16 sps:$4 sm:$0xff]  }
 0x2ba   :  { %7807 = vmatprep.subr.bf16.mxu0 %v8886_v19  ;;  %7829 = vmatprep.subr.bf16.mxu1 %v8887_v29  ;;  %v8949_v19 = vld [vmem:[#allocation6 + $0x2c] ss:$16 sps:$4 sm:$0xff]   ;;  %v8944_v29 = vld [vmem:[#allocation6 + $0x20] ss:$16 sps:$4 sm:$0xff]  }
 0x2bd   :  { %7808 = vmatpush3.bf16.msra.mxu0 %v8888_v56  ;;  %7830 = vmatpush3.bf16.msra.mxu1 %v8889_v57  ;;  %v8947_v56 = vld [vmem:[#allocation6 + $0x28] ss:$16 sps:$4 sm:$0xff]   ;;  %v8952_v57 = vld [vmem:[#allocation6 + $0x44] ss:$16 sps:$4 sm:$0xff]  }
 0x2be   :  { %7809 = vmatprep.subr.bf16.mxu0 %v8890_v60  ;;  %7831 = vmatprep.subr.bf16.mxu1 %v8891_v61  ;;  %v8955_v60 = vld [vmem:[#allocation6 + $0x4c] ss:$16 sps:$4 sm:$0xff]   ;;  %v8950_v61 = vld [vmem:[#allocation6 + $0x40] ss:$16 sps:$4 sm:$0xff]  }
 0x2c1   :  { %7810 = vmatpush3.bf16.msra.mxu0 %v8892_v35  ;;  %7832 = vmatpush3.bf16.msra.mxu1 %v8893_v47  ;;  %v8953_v35 = vld [vmem:[#allocation6 + $0x48] ss:$16 sps:$4 sm:$0xff]   ;;  %v8958_v47 = vld [vmem:[#allocation6 + $0x64] ss:$16 sps:$4 sm:$0xff]  }
 0x2c2   :  { %7811 = vmatprep.subr.bf16.mxu0 %v8894_v62  ;;  %7833 = vmatprep.subr.bf16.mxu1 %v8895_v41  ;;  %v8961_v62 = vld [vmem:[#allocation6 + $0x6c] ss:$16 sps:$4 sm:$0xff]   ;;  %v8964_v41 = vld [vmem:[#allocation6 + $0x84] ss:$16 sps:$4 sm:$0xff]  }
 0x2c5   :  { %7812 = vmatpush3.bf16.msra.mxu0 %v8896_v0  ;;  %7834 = vmatpush3.bf16.msra.mxu1 %v8897_v1  ;;  %v8967_v0 = vld [vmem:[#allocation6 + $0x8c] ss:$16 sps:$4 sm:$0xff]   ;;  %v8962_v1 = vld [vmem:[#allocation6 + $0x80] ss:$16 sps:$4 sm:$0xff]  }
 0x2c6   :  { %7813 = vmatprep.subr.bf16.mxu0 %v8898_v2  ;;  %7835 = vmatprep.subr.bf16.mxu1 %v8899_v3  ;;  %v8965_v2 = vld [vmem:[#allocation6 + $0x88] ss:$16 sps:$4 sm:$0xff]   ;;  %v8970_v3 = vld [vmem:[#allocation6 + $0xa4] ss:$16 sps:$4 sm:$0xff]  }
 0x2c9   :  { %7814 = vmatpush3.bf16.msra.mxu0 %v8900_v4  ;;  %7836 = vmatpush3.bf16.msra.mxu1 %v8901_v6  ;;  %v8973_v4 = vld [vmem:[#allocation6 + $0xac] ss:$16 sps:$4 sm:$0xff]   ;;  %v8968_v6 = vld [vmem:[#allocation6 + $0xa0] ss:$16 sps:$4 sm:$0xff]  }
 0x2ca   :  { %7815 = vmatprep.subr.bf16.mxu0 %v8902_v7  ;;  %7837 = vmatprep.subr.bf16.mxu1 %v8903_v8  ;;  %v8971_v7 = vld [vmem:[#allocation6 + $0xa8] ss:$16 sps:$4 sm:$0xff]   ;;  %v8976_v8 = vld [vmem:[#allocation6 + $0xc4] ss:$16 sps:$4 sm:$0xff]  }
 0x2cd   :  { %7816 = vmatpush3.bf16.msra.mxu0 %v8904_v10  ;;  %7838 = vmatpush3.bf16.msra.mxu1 %v8905_v11  ;;  %v8979_v10 = vld [vmem:[#allocation6 + $0xcc] ss:$16 sps:$4 sm:$0xff]   ;;  %v8974_v11 = vld [vmem:[#allocation6 + $0xc0] ss:$16 sps:$4 sm:$0xff]  }
 0x2ce   :  { %7845 = vmatprep.subr.bf16.mxu0 %v8906_v16  ;;  %7867 = vmatprep.subr.bf16.mxu1 %v8907_v17  ;;  %v8977_v16 = vld [vmem:[#allocation6 + $0xc8] ss:$16 sps:$4 sm:$0xff]   ;;  %v8982_v17 = vld [vmem:[#allocation6 + $0xe4] ss:$16 sps:$4 sm:$0xff]  }
 0x2d0   :  { %5139 = vmatmul.mubr.bf16.vlgmr.msra.gmra.mrb[12].mxu0 %v9555_v42  ;;  %5179 = vmatmul.mubr.bf16.vlgmr.msra.gmra.mrb[12].mxu1 %v9567_v58  ;;  %v8918_v42 = vld [vmem:[#allocation2 + $0x10c8] ss:$20 sps:$4 sm:$0xff]  }
 0x2d1   :  { %7846 = vmatpush3.bf16.msra.mxu0 %v8908_v18  ;;  %7868 = vmatpush3.bf16.msra.mxu1 %v8909_v22  ;;  %v8919_v58 = vld [vmem:[#allocation2 + $0x1348] ss:$20 sps:$4 sm:$0xff]   ;;  %v8985_v18 = vld [vmem:[#allocation6 + $0xec] ss:$16 sps:$4 sm:$0xff]  }
 0x2d2   :  { %7847 = vmatprep.subr.bf16.mxu0 %v8910_v59  ;;  %7869 = vmatprep.subr.bf16.mxu1 %v8911_v23  ;;  %v8980_v22 = vld [vmem:[#allocation6 + $0xe0] ss:$16 sps:$4 sm:$0xff]   ;;  %v8983_v59 = vld [vmem:[#allocation6 + $0xe8] ss:$16 sps:$4 sm:$0xff]   ;;  %v8988_v23 = vld [vmem:[#allocation6 + $0x104] ss:$16 sps:$4 sm:$0xff]  }
 0x2d3   :  { %5218 = vmatprep.mubr.bf16.mxu0 %v9576_v63  ;;  %5258 = vmatprep.mubr.bf16.mxu1 %v9593_v20  ;;  %v8924_v63 = vld [vmem:[#allocation2 + $0xfb0] ss:$20 sps:$4 sm:$0xff]  }
 0x2d4   :  { %v8925_v20 = vld [vmem:[#allocation2 + $0x1230] ss:$20 sps:$4 sm:$0xff]  }
 0x2d5   :  { %7848 = vmatpush3.bf16.msra.mxu0 %v8912_v5  ;;  %7870 = vmatpush3.bf16.msra.mxu1 %v8913_v9  ;;  %v8991_v5 = vld [vmem:[#allocation6 + $0x10c] ss:$16 sps:$4 sm:$0xff]   ;;  %v8986_v9 = vld [vmem:[#allocation6 + $0x100] ss:$16 sps:$4 sm:$0xff]  }
 0x2d6   :  { %7849 = vmatprep.subr.bf16.mxu0 %v8914_v13  ;;  %7871 = vmatprep.subr.bf16.mxu1 %v8915_v25  ;;  %v8989_v13 = vld [vmem:[#allocation6 + $0x108] ss:$16 sps:$4 sm:$0xff]   ;;  %v8994_v25 = vld [vmem:[#allocation6 + $0x124] ss:$16 sps:$4 sm:$0xff]  }
 0x2d9   :  { %7850 = vmatpush3.bf16.msra.mxu0 %v8916_v26  ;;  %7872 = vmatpush3.bf16.msra.mxu1 %v8917_v27  ;;  %v8997_v26 = vld [vmem:[#allocation6 + $0x12c] ss:$16 sps:$4 sm:$0xff]   ;;  %v8992_v27 = vld [vmem:[#allocation6 + $0x120] ss:$16 sps:$4 sm:$0xff]  }
 0x2da   :  { %7851 = vmatprep.subr.bf16.mxu0 %v8918_v42  ;;  %7873 = vmatprep.subr.bf16.mxu1 %v8919_v58  ;;  %v8995_v42 = vld [vmem:[#allocation6 + $0x128] ss:$16 sps:$4 sm:$0xff]   ;;  %v9000_v58 = vld [vmem:[#allocation6 + $0x144] ss:$16 sps:$4 sm:$0xff]  }
 0x2dd   :  { %7852 = vmatpush3.bf16.msra.mxu0 %v8920_v15  ;;  %7874 = vmatpush3.bf16.msra.mxu1 %v8921_v24  ;;  %v9003_v15 = vld [vmem:[#allocation6 + $0x14c] ss:$16 sps:$4 sm:$0xff]   ;;  %v8998_v24 = vld [vmem:[#allocation6 + $0x140] ss:$16 sps:$4 sm:$0xff]  }
 0x2de   :  { %7853 = vmatprep.subr.bf16.mxu0 %v8922_v28  ;;  %7875 = vmatprep.subr.bf16.mxu1 %v8923_v32  ;;  %v9001_v28 = vld [vmem:[#allocation6 + $0x148] ss:$16 sps:$4 sm:$0xff]   ;;  %v9006_v32 = vld [vmem:[#allocation6 + $0x164] ss:$16 sps:$4 sm:$0xff]  }
 0x2e1   :  { %7854 = vmatpush3.bf16.msra.mxu0 %v8924_v63  ;;  %7876 = vmatpush3.bf16.msra.mxu1 %v8925_v20  ;;  %v9009_v63 = vld [vmem:[#allocation6 + $0x16c] ss:$16 sps:$4 sm:$0xff]   ;;  %v9004_v20 = vld [vmem:[#allocation6 + $0x160] ss:$16 sps:$4 sm:$0xff]  }
 0x2e2   :  { %7855 = vmatprep.subr.bf16.mxu0 %v8926_v34  ;;  %7877 = vmatprep.subr.bf16.mxu1 %v8927_v21  ;;  %v9012_v34 = vld [vmem:[#allocation6 + $0x184] ss:$16 sps:$4 sm:$0xff]   ;;  %v9015_v21 = vld [vmem:[#allocation6 + $0x18c] ss:$16 sps:$4 sm:$0xff]  }
 0x2e5   :  { %7856 = vmatpush3.bf16.msra.mxu0 %v8928_v36  ;;  %7878 = vmatpush3.bf16.msra.mxu1 %v8929_v38  ;;  %v9010_v36 = vld [vmem:[#allocation6 + $0x180] ss:$16 sps:$4 sm:$0xff]   ;;  %v9013_v38 = vld [vmem:[#allocation6 + $0x188] ss:$16 sps:$4 sm:$0xff]  }
 0x2e6   :  { %7857 = vmatprep.subr.bf16.mxu0 %v8930_v40  ;;  %7879 = vmatprep.subr.bf16.mxu1 %v8931_v43  ;;  %v9018_v40 = vld [vmem:[#allocation6 + $0x1a4] ss:$16 sps:$4 sm:$0xff]   ;;  %v9021_v43 = vld [vmem:[#allocation6 + $0x1ac] ss:$16 sps:$4 sm:$0xff]  }
 0x2e9   :  { %7858 = vmatpush3.bf16.msra.mxu0 %v8932_v12  ;;  %7880 = vmatpush3.bf16.msra.mxu1 %v8933_v46  ;;  %v9019_v12 = vld [vmem:[#allocation6 + $0x1a8] ss:$16 sps:$4 sm:$0xff]   ;;  %v9024_v46 = vld [vmem:[#allocation6 + $0x1c4] ss:$16 sps:$4 sm:$0xff]  }
 0x2ea   :  { %7859 = vmatprep.subr.bf16.mxu0 %v8934_v49  ;;  %7881 = vmatprep.subr.bf16.mxu1 %v8935_v50  ;;  %v9027_v49 = vld [vmem:[#allocation6 + $0x1cc] ss:$16 sps:$4 sm:$0xff]   ;;  %v9022_v50 = vld [vmem:[#allocation6 + $0x1c0] ss:$16 sps:$4 sm:$0xff]  }
 0x2ed   :  { %7860 = vmatpush3.bf16.msra.mxu0 %v8936_v51  ;;  %7882 = vmatpush3.bf16.msra.mxu1 %v8937_v52  ;;  %v9025_v51 = vld [vmem:[#allocation6 + $0x1c8] ss:$16 sps:$4 sm:$0xff]   ;;  %v9030_v52 = vld [vmem:[#allocation6 + $0x1e4] ss:$16 sps:$4 sm:$0xff]  }
 0x2ee   :  { %6258 = vmatprep.subr.bf16.mxu0 %v8940_v53  ;;  %6381 = vmatprep.subr.bf16.mxu1 %v8943_v48  ;;  %v9033_v53 = vld [vmem:[#allocation6 + $0x1ec] ss:$16 sps:$4 sm:$0xff]   ;;  %v9028_v48 = vld [vmem:[#allocation6 + $0x1e0] ss:$16 sps:$4 sm:$0xff]  }
 0x2f0   :  { %5219 = vmatmul.mubr.bf16.vlgmr.msra.gmra.mrb[16].mxu0 %v9589_v14  ;;  %5259 = vmatmul.mubr.bf16.vlgmr.msra.gmra.mrb[16].mxu1 %v9601_v37  ;;  %v8956_v14 = vld [vmem:[#allocation6 + $0x60] ss:$16 sps:$4 sm:$0xff]   ;;  %v8959_v37 = vld [vmem:[#allocation6 + $0x68] ss:$16 sps:$4 sm:$0xff]  }
 0x2f1   :  { %6259 = vmatpush1.bf16.msra.mxu0 %v8938_v30  ;;  %6382 = vmatpush1.bf16.msra.mxu1 %v8941_v54  ;;  %v9031_v30 = vld [vmem:[#allocation6 + $0x1e8] ss:$16 sps:$4 sm:$0xff]   ;;  %v9036_v54 = vld [vmem:[#allocation6 + $0x204] ss:$16 sps:$4 sm:$0xff]  }
 0x2f2   :  { %6260 = vmatprep.subr.bf16.mxu0 %v8946_v55  ;;  %6383 = vmatprep.subr.bf16.mxu1 %v8949_v19  ;;  %v9039_v55 = vld [vmem:[#allocation6 + $0x20c] ss:$16 sps:$4 sm:$0xff]   ;;  %v883_v19 = vsub.s32 0, %v9619_v39 }
 0x2f5   :  { %6261 = vmatpush1.bf16.msra.mxu0 %v8944_v29  ;;  %6384 = vmatpush1.bf16.msra.mxu1 %v8947_v56  ;;  %v891_v29 = vsub.s32 2, %v9619_v39  ;;  %v887_v56 = vsub.s32 1, %v9619_v39 }
 0x2f6   :  { %6262 = vmatprep.subr.bf16.mxu0 %v8952_v57  ;;  %6385 = vmatprep.subr.bf16.mxu1 %v8955_v60  ;;  %v895_v57 = vsub.s32 3, %v9619_v39  ;;  %v884_v60 = vrot.slane %v9622_v45, %v883_v19 }
 0x2f9   :  { %6263 = vmatpush1.bf16.msra.mxu0 %v8950_v61  ;;  %6386 = vmatpush1.bf16.msra.mxu1 %v8953_v35  ;;  %v892_v61 = vrot.slane %v9622_v45, %v891_v29  ;;  %v888_v35 = vrot.slane %v9622_v45, %v887_v56 }
 0x2fa   :  { %6264 = vmatprep.subr.bf16.mxu0 %v8958_v47  ;;  %6387 = vmatprep.subr.bf16.mxu1 %v8961_v62  ;;  %v896_v47 = vrot.slane %v9622_v45, %v895_v57 }
 0x2fd   :  { %6265 = vmatpush1.bf16.msra.mxu0 %v8956_v14  ;;  %6388 = vmatpush1.bf16.msra.mxu1 %v8959_v37 }
 0x2fe   :  { %6266 = vmatprep.subr.bf16.mxu0 %v8964_v41  ;;  %6389 = vmatprep.subr.bf16.mxu1 %v8967_v0 }
 0x301   :  { %6267 = vmatpush1.bf16.msra.mxu0 %v8962_v1  ;;  %6390 = vmatpush1.bf16.msra.mxu1 %v8965_v2 }
 0x302   :  { %6268 = vmatprep.subr.bf16.mxu0 %v8970_v3  ;;  %6391 = vmatprep.subr.bf16.mxu1 %v8973_v4 }
 0x305   :  { %6269 = vmatpush1.bf16.msra.mxu0 %v8968_v6  ;;  %6392 = vmatpush1.bf16.msra.mxu1 %v8971_v7 }
 0x306   :  { %6270 = vmatprep.subr.bf16.mxu0 %v8976_v8  ;;  %6393 = vmatprep.subr.bf16.mxu1 %v8979_v10 }
 0x309   :  { %6271 = vmatpush1.bf16.msra.mxu0 %v8974_v11  ;;  %6394 = vmatpush1.bf16.msra.mxu1 %v8977_v16 }
 0x30a   :  { %6272 = vmatprep.subr.bf16.mxu0 %v8982_v17  ;;  %6395 = vmatprep.subr.bf16.mxu1 %v8985_v18  ;;  %v9034_v18 = vld [vmem:[#allocation6 + $0x200] ss:$16 sps:$4 sm:$0xff]  }
 0x30d   :  { %6273 = vmatpush1.bf16.msra.mxu0 %v8980_v22  ;;  %6396 = vmatpush1.bf16.msra.mxu1 %v8983_v59  ;;  %v9037_v22 = vld [vmem:[#allocation6 + $0x208] ss:$16 sps:$4 sm:$0xff]   ;;  %v9042_v59 = vld [vmem:[#allocation6 + $0x224] ss:$16 sps:$4 sm:$0xff]  }
 0x30e   :  { %6274 = vmatprep.subr.bf16.mxu0 %v8988_v23  ;;  %6397 = vmatprep.subr.bf16.mxu1 %v8991_v5  ;;  %v9045_v23 = vld [vmem:[#allocation6 + $0x22c] ss:$16 sps:$4 sm:$0xff]  }
 0x311   :  { %6275 = vmatpush1.bf16.msra.mxu0 %v8986_v9  ;;  %6398 = vmatpush1.bf16.msra.mxu1 %v8989_v13  ;;  %v9040_v9 = vld [vmem:[#allocation6 + $0x220] ss:$16 sps:$4 sm:$0xff]   ;;  %v9043_v13 = vld [vmem:[#allocation6 + $0x228] ss:$16 sps:$4 sm:$0xff]  }
 0x312   :  { %6276 = vmatprep.subr.bf16.mxu0 %v8994_v25  ;;  %6399 = vmatprep.subr.bf16.mxu1 %v8997_v26  ;;  %v9048_v25 = vld [vmem:[#allocation6 + $0x244] ss:$16 sps:$4 sm:$0xff]   ;;  %v9051_v26 = vld [vmem:[#allocation6 + $0x24c] ss:$16 sps:$4 sm:$0xff]  }
 0x315   :  { %6277 = vmatpush1.bf16.msra.mxu0 %v8992_v27  ;;  %6400 = vmatpush1.bf16.msra.mxu1 %v8995_v42  ;;  %v9046_v27 = vld [vmem:[#allocation6 + $0x240] ss:$16 sps:$4 sm:$0xff]   ;;  %v9049_v42 = vld [vmem:[#allocation6 + $0x248] ss:$16 sps:$4 sm:$0xff]  }
 0x316   :  { %6278 = vmatprep.subr.bf16.mxu0 %v9000_v58  ;;  %6401 = vmatprep.subr.bf16.mxu1 %v9003_v15  ;;  %v9054_v58 = vld [vmem:[#allocation6 + $0x264] ss:$16 sps:$4 sm:$0xff]   ;;  %v9057_v15 = vld [vmem:[#allocation6 + $0x26c] ss:$16 sps:$4 sm:$0xff]  }
 0x319   :  { %6279 = vmatpush1.bf16.msra.mxu0 %v8998_v24  ;;  %6402 = vmatpush1.bf16.msra.mxu1 %v9001_v28  ;;  %v9052_v24 = vld [vmem:[#allocation6 + $0x260] ss:$16 sps:$4 sm:$0xff]   ;;  %v9055_v28 = vld [vmem:[#allocation6 + $0x268] ss:$16 sps:$4 sm:$0xff]  }
 0x31a   :  { %6280 = vmatprep.subr.bf16.mxu0 %v9006_v32  ;;  %6403 = vmatprep.subr.bf16.mxu1 %v9009_v63  ;;  %v9060_v32 = vld [vmem:[#allocation6 + $0x284] ss:$16 sps:$4 sm:$0xff]   ;;  %v9063_v63 = vld [vmem:[#allocation6 + $0x28c] ss:$16 sps:$4 sm:$0xff]  }
 0x31d   :  { %6281 = vmatpush1.bf16.msra.mxu0 %v9004_v20  ;;  %6404 = vmatpush1.bf16.msra.mxu1 %v9007_v33  ;;  %v9058_v20 = vld [vmem:[#allocation6 + $0x280] ss:$16 sps:$4 sm:$0xff]   ;;  %v9061_v33 = vld [vmem:[#allocation6 + $0x288] ss:$16 sps:$4 sm:$0xff]  }
 0x31e   :  { %6282 = vmatprep.subr.bf16.mxu0 %v9012_v34  ;;  %6405 = vmatprep.subr.bf16.mxu1 %v9015_v21  ;;  %v9066_v34 = vld [vmem:[#allocation6 + $0x2a4] ss:$16 sps:$4 sm:$0xff]   ;;  %v9069_v21 = vld [vmem:[#allocation6 + $0x2ac] ss:$16 sps:$4 sm:$0xff]  }
 0x321   :  { %6283 = vmatpush1.bf16.msra.mxu0 %v9010_v36  ;;  %6406 = vmatpush1.bf16.msra.mxu1 %v9013_v38  ;;  %v9064_v36 = vld [vmem:[#allocation6 + $0x2a0] ss:$16 sps:$4 sm:$0xff]   ;;  %v9067_v38 = vld [vmem:[#allocation6 + $0x2a8] ss:$16 sps:$4 sm:$0xff]  }
 0x322   :  { %6284 = vmatprep.subr.bf16.mxu0 %v9018_v40  ;;  %6407 = vmatprep.subr.bf16.mxu1 %v9021_v43  ;;  %v9072_v40 = vld [vmem:[#allocation6 + $0x2c4] ss:$16 sps:$4 sm:$0xff]   ;;  %v9075_v43 = vld [vmem:[#allocation6 + $0x2cc] ss:$16 sps:$4 sm:$0xff]  }
 0x325   :  { %6285 = vmatpush1.bf16.msra.mxu0 %v9016_v44  ;;  %6408 = vmatpush1.bf16.msra.mxu1 %v9019_v12  ;;  %v9070_v44 = vld [vmem:[#allocation6 + $0x2c0] ss:$16 sps:$4 sm:$0xff]   ;;  %v9073_v12 = vld [vmem:[#allocation6 + $0x2c8] ss:$16 sps:$4 sm:$0xff]  }
 0x326   :  { %6286 = vmatprep.subr.bf16.mxu0 %v9024_v46  ;;  %6409 = vmatprep.subr.bf16.mxu1 %v9027_v49  ;;  %v9078_v46 = vld [vmem:[#allocation6 + $0x2e4] ss:$16 sps:$4 sm:$0xff]   ;;  %v9081_v49 = vld [vmem:[#allocation6 + $0x2ec] ss:$16 sps:$4 sm:$0xff]  }
 0x329   :  { %6287 = vmatpush1.bf16.msra.mxu0 %v9022_v50  ;;  %6410 = vmatpush1.bf16.msra.mxu1 %v9025_v51 }
 0x32a   :  { %6288 = vmatprep.subr.bf16.mxu0 %v9030_v52  ;;  %6411 = vmatprep.subr.bf16.mxu1 %v9033_v53 }
 0x32d   :  { %6289 = vmatpush1.bf16.msra.mxu0 %v9028_v48  ;;  %6412 = vmatpush1.bf16.msra.mxu1 %v9031_v30 }
 0x32e   :  { %6299 = vmatprep.subr.bf16.mxu0 %v9036_v54  ;;  %6422 = vmatprep.subr.bf16.mxu1 %v9039_v55 }
 0x343   :  { %v4611_v62 = vpop.f32.mrb[0].mxu0  ;;  %v4939_v14 = vpop.f32.mrb[0].mxu1 }
 0x344   :  { %v7933_v37 = vadd.f32 %v4611_v62, %v884_v60  ;;  %v9645_v41 = vadd.f32 %v4939_v14, %v892_v61  ;;  %v4613_v0 = vpop.f32.mrb[1].mxu0  ;;  %v4941_v1 = vpop.f32.mrb[1].mxu1  ;;  %v9076_v60 = vld [vmem:[#allocation6 + $0x2e0] ss:$16 sps:$4 sm:$0xff]   ;;  %v9079_v61 = vld [vmem:[#allocation6 + $0x2e8] ss:$16 sps:$4 sm:$0xff]  }
 0x345   :  { %v7934_v2 = vadd.f32 %v4613_v0, %v888_v35  ;;  %v7936_v3 = vadd.f32 %v4941_v1, %v896_v47  ;;  %v4615_v4 = vpop.f32.mrb[2].mxu0  ;;  %v4943_v6 = vpop.f32.mrb[2].mxu1  ;;  %v9084_v62 = vld [vmem:[#allocation6 + $0x304] ss:$16 sps:$4 sm:$0xff]   ;;  %v9087_v14 = vld [vmem:[#allocation6 + $0x30c] ss:$16 sps:$4 sm:$0xff]  }
 0x346   :  { %v5266_v7 = vmax.f32 %v7933_v37, 0.0  ;;  %v4616_v8 = vpop.f32.mrb[3].mxu0  ;;  %v4944_v10 = vpop.f32.mrb[3].mxu1  ;;  %v9082_v1 = vld [vmem:[#allocation6 + $0x300] ss:$16 sps:$4 sm:$0xff]  }
 0x347   :  { %v5267_v11 = vmax.f32 %v7934_v2, 0.0  ;;  %v5269_v16 = vmax.f32 %v7936_v3, 0.0  ;;  %v9085_v2 = vld [vmem:[#allocation6 + $0x308] ss:$16 sps:$4 sm:$0xff]   ;;  %v9090_v3 = vld [vmem:[#allocation6 + $0x324] ss:$16 sps:$4 sm:$0xff]  }
 0x348   :  { %v5271_v45 = vpack.c.bf16 %v5266_v7, %v5266_v7  ;;  %v9093_v4 = vld [vmem:[#allocation6 + $0x32c] ss:$16 sps:$4 sm:$0xff]   ;;  %v9088_v6 = vld [vmem:[#allocation6 + $0x320] ss:$16 sps:$4 sm:$0xff]   ;;  %v9091_v7 = vld [vmem:[#allocation6 + $0x328] ss:$16 sps:$4 sm:$0xff]  }
 0x349   :  { %v5272_v17 = vpack.c.bf16 %v5267_v11, %v5267_v11  ;;  %v5274_v5 = vpack.c.bf16 %v5269_v16, %v5269_v16  ;;  %v9096_v8 = vld [vmem:[#allocation6 + $0x344] ss:$16 sps:$4 sm:$0xff]   ;;  %v9099_v10 = vld [vmem:[#allocation6 + $0x34c] ss:$16 sps:$4 sm:$0xff]   ;;  %v9097_v11 = vld [vmem:[#allocation6 + $0x348] ss:$16 sps:$4 sm:$0xff]  }
 0x34a   :  { %v9102_v16 = vld [vmem:[#allocation6 + $0x364] ss:$16 sps:$4 sm:$0xff]  }
 0x34b   :  { %6290 = vmatprep.mubr.bf16.mxu0 %v5272_v17  ;;  %6413 = vmatprep.mubr.bf16.mxu1 %v5272_v17  ;;  %v9105_v17 = vld [vmem:[#allocation6 + $0x36c] ss:$16 sps:$4 sm:$0xff]  }
 0x34c   :  { %6291 = vmatmul.mubr.bf16.vlgmr.msra.gmra.mrb[20].mxu0 %v5271_v45  ;;  %6414 = vmatmul.mubr.bf16.vlgmr.msra.gmra.mrb[20].mxu1 %v5271_v45  ;;  %v9108_v45 = vld [vmem:[#allocation6 + $0x384] ss:$16 sps:$4 sm:$0xff]  }
 0x34d   :  { %6300 = vmatpush1.bf16.msra.mxu0 %v9034_v18  ;;  %6423 = vmatpush1.bf16.msra.mxu1 %v9037_v22  ;;  %v9100_v18 = vld [vmem:[#allocation6 + $0x360] ss:$16 sps:$4 sm:$0xff]   ;;  %v9103_v22 = vld [vmem:[#allocation6 + $0x368] ss:$16 sps:$4 sm:$0xff]  }
 0x34e   :  { %6331 = vmatprep.mubr.bf16.mxu0 %v5274_v5  ;;  %6454 = vmatprep.mubr.bf16.mxu1 %v5274_v5  ;;  %v9109_v5 = vld [vmem:[#allocation6 + $0x388] ss:$16 sps:$4 sm:$0xff]  }
 0x34f   :  { %6301 = vmatprep.subr.bf16.mxu0 %v9042_v59  ;;  %6424 = vmatprep.subr.bf16.mxu1 %v9045_v23  ;;  %v9111_v59 = vld [vmem:[#allocation6 + $0x38c] ss:$16 sps:$4 sm:$0xff]   ;;  %v9106_v23 = vld [vmem:[#allocation6 + $0x380] ss:$16 sps:$4 sm:$0xff]  }
 0x351   :  { %6302 = vmatpush1.bf16.msra.mxu0 %v9040_v9  ;;  %6425 = vmatpush1.bf16.msra.mxu1 %v9043_v13  ;;  %v9114_v9 = vld [vmem:[#allocation6 + $0x3a4] ss:$16 sps:$4 sm:$0xff]   ;;  %v9117_v13 = vld [vmem:[#allocation6 + $0x3ac] ss:$16 sps:$4 sm:$0xff]  }
 0x352   :  { %6303 = vmatprep.subr.bf16.mxu0 %v9048_v25  ;;  %6426 = vmatprep.subr.bf16.mxu1 %v9051_v26  ;;  %v9112_v25 = vld [vmem:[#allocation6 + $0x3a0] ss:$16 sps:$4 sm:$0xff]   ;;  %v9115_v26 = vld [vmem:[#allocation6 + $0x3a8] ss:$16 sps:$4 sm:$0xff]  }
 0x355   :  { %6304 = vmatpush1.bf16.msra.mxu0 %v9046_v27  ;;  %6427 = vmatpush1.bf16.msra.mxu1 %v9049_v42  ;;  %v9120_v27 = vld [vmem:[#allocation6 + $0x3c4] ss:$16 sps:$4 sm:$0xff]   ;;  %v9123_v42 = vld [vmem:[#allocation6 + $0x3cc] ss:$16 sps:$4 sm:$0xff]  }
 0x356   :  { %6305 = vmatprep.subr.bf16.mxu0 %v9054_v58  ;;  %6428 = vmatprep.subr.bf16.mxu1 %v9057_v15  ;;  %v9118_v58 = vld [vmem:[#allocation6 + $0x3c0] ss:$16 sps:$4 sm:$0xff]   ;;  %v9121_v15 = vld [vmem:[#allocation6 + $0x3c8] ss:$16 sps:$4 sm:$0xff]  }
 0x359   :  { %6306 = vmatpush1.bf16.msra.mxu0 %v9052_v24  ;;  %6429 = vmatpush1.bf16.msra.mxu1 %v9055_v28  ;;  %v9126_v24 = vld [vmem:[#allocation6 + $0x3e4] ss:$16 sps:$4 sm:$0xff]   ;;  %v9129_v28 = vld [vmem:[#allocation6 + $0x3ec] ss:$16 sps:$4 sm:$0xff]  }
 0x35a   :  { %6307 = vmatprep.subr.bf16.mxu0 %v9060_v32  ;;  %6430 = vmatprep.subr.bf16.mxu1 %v9063_v63 }
 0x35d   :  { %6308 = vmatpush1.bf16.msra.mxu0 %v9058_v20  ;;  %6431 = vmatpush1.bf16.msra.mxu1 %v9061_v33 }
 0x35e   :  { %6309 = vmatprep.subr.bf16.mxu0 %v9066_v34  ;;  %6432 = vmatprep.subr.bf16.mxu1 %v9069_v21  ;;  %v9124_v34 = vld [vmem:[#allocation6 + $0x3e0] ss:$16 sps:$4 sm:$0xff]  }
 0x361   :  { %6310 = vmatpush1.bf16.msra.mxu0 %v9064_v36  ;;  %6433 = vmatpush1.bf16.msra.mxu1 %v9067_v38 }
 0x362   :  { %6311 = vmatprep.subr.bf16.mxu0 %v9072_v40  ;;  %6434 = vmatprep.subr.bf16.mxu1 %v9075_v43  ;;  %v9127_v43 = vld [vmem:[#allocation6 + $0x3e8] ss:$16 sps:$4 sm:$0xff]  }
 0x363   :  { %v7729_v50 = vpop.f32.mrb[4].mxu0  ;;  %v7751_v51 = vpop.f32.mrb[4].mxu1 }
 0x364   :  { %v7730_v52 = vpop.f32.mrb[5].mxu0  ;;  %v7752_v53 = vpop.f32.mrb[5].mxu1 }
 0x365   :  { %v7731_v48 = vadd.f32 %v7730_v52, %v7729_v50  ;;  %v7753_v30 = vadd.f32 %v7752_v53, %v7751_v51  ;;  %6312 = vmatpush1.bf16.msra.mxu0 %v9070_v44  ;;  %6435 = vmatpush1.bf16.msra.mxu1 %v9073_v12  ;;  %v7732_v54 = vpop.f32.mrb[6].mxu0  ;;  %v7754_v55 = vpop.f32.mrb[6].mxu1  ;;  %v9132_v44 = vld [vmem:[#allocation6 + $0x404] ss:$16 sps:$4 sm:$0xff]   ;;  %v5268_v12 = vmax.f32 %v9645_v41, 0.0 }
 0x366   :  { %v7733_v35 = vpop.f32.mrb[7].mxu0  ;;  %v7755_v47 = vpop.f32.mrb[7].mxu1  ;;  %6313 = vmatprep.subr.bf16.mxu0 %v9078_v46  ;;  %6436 = vmatprep.subr.bf16.mxu1 %v9081_v49  ;;  %v9135_v50 = vld [vmem:[#allocation6 + $0x40c] ss:$16 sps:$4 sm:$0xff]   ;;  %v9130_v53 = vld [vmem:[#allocation6 + $0x400] ss:$16 sps:$4 sm:$0xff]  }
 0x367   :  { %v4981_v37 = vadd.f32 %v7731_v48, %v9625_v31  ;;  %v9094_v31 = vld [vmem:[#allocation6 + $0x340] ss:$16 sps:$4 sm:$0xff]   ;;  %v9133_v48 = vld [vmem:[#allocation6 + $0x408] ss:$16 sps:$4 sm:$0xff]   ;;  %v9138_v54 = vld [vmem:[#allocation6 + $0x424] ss:$16 sps:$4 sm:$0xff]  }
 0x368   :  { %v9141_v55 = vld [vmem:[#allocation6 + $0x42c] ss:$16 sps:$4 sm:$0xff]   ;;  %v9136_v41 = vld [vmem:[#allocation6 + $0x420] ss:$16 sps:$4 sm:$0xff]   ;;  %v9362_v47 = vmov 0  }
 0x369   :  { %v9648_v0 = vadd.f32 %v7753_v30, %v4981_v37  ;;  %6314 = vmatpush1.bf16.msra.mxu0 %v9076_v60  ;;  %6437 = vmatpush1.bf16.msra.mxu1 %v9079_v61  ;;  %v5273_v30 = vpack.c.bf16 %v5268_v12, %v5268_v12  ;;  %v9139_v60 = vld [vmem:[#allocation6 + $0x428] ss:$16 sps:$4 sm:$0xff]   ;;  %v9144_v61 = vld [vmem:[#allocation6 + $0x444] ss:$16 sps:$4 sm:$0xff]   ;;  %v9147_v35 = vld [vmem:[#allocation6 + $0x44c] ss:$16 sps:$4 sm:$0xff]  }
 0x36a   :  { %6315 = vmatprep.subr.bf16.mxu0 %v9084_v62  ;;  %6438 = vmatprep.subr.bf16.mxu1 %v9087_v14  ;;  %v9142_v62 = vld [vmem:[#allocation6 + $0x440] ss:$16 sps:$4 sm:$0xff]   ;;  %v9145_v14 = vld [vmem:[#allocation6 + $0x448] ss:$16 sps:$4 sm:$0xff]   ;;  %v9150_v37 = vld [vmem:[#allocation6 + $0x464] ss:$16 sps:$4 sm:$0xff]  }
 0x36d   :  { %6316 = vmatpush1.bf16.msra.mxu0 %v9082_v1  ;;  %6439 = vmatpush1.bf16.msra.mxu1 %v9085_v2  ;;  %v9148_v1 = vld [vmem:[#allocation6 + $0x460] ss:$16 sps:$4 sm:$0xff]   ;;  %v9151_v2 = vld [vmem:[#allocation6 + $0x468] ss:$16 sps:$4 sm:$0xff]  }
 0x36e   :  { %6317 = vmatprep.subr.bf16.mxu0 %v9090_v3  ;;  %6440 = vmatprep.subr.bf16.mxu1 %v9093_v4  ;;  %v9156_v3 = vld [vmem:[#allocation6 + $0x484] ss:$16 sps:$4 sm:$0xff]   ;;  %v9159_v4 = vld [vmem:[#allocation6 + $0x48c] ss:$16 sps:$4 sm:$0xff]  }
 0x371   :  { %6318 = vmatpush1.bf16.msra.mxu0 %v9088_v6  ;;  %6441 = vmatpush1.bf16.msra.mxu1 %v9091_v7  ;;  %v9154_v6 = vld [vmem:[#allocation6 + $0x480] ss:$16 sps:$4 sm:$0xff]   ;;  %v9157_v7 = vld [vmem:[#allocation6 + $0x488] ss:$16 sps:$4 sm:$0xff]  }
 0x372   :  { %6319 = vmatprep.subr.bf16.mxu0 %v9096_v8  ;;  %6442 = vmatprep.subr.bf16.mxu1 %v9099_v10  ;;  %v9162_v8 = vld [vmem:[#allocation6 + $0x4a4] ss:$16 sps:$4 sm:$0xff]   ;;  %v9165_v10 = vld [vmem:[#allocation6 + $0x4ac] ss:$16 sps:$4 sm:$0xff]  }
 0x375   :  { %6320 = vmatpush1.bf16.msra.mxu0 %v9094_v31  ;;  %6443 = vmatpush1.bf16.msra.mxu1 %v9097_v11  ;;  %v9160_v31 = vld [vmem:[#allocation6 + $0x4a0] ss:$16 sps:$4 sm:$0xff]   ;;  %v9163_v11 = vld [vmem:[#allocation6 + $0x4a8] ss:$16 sps:$4 sm:$0xff]  }
 0x376   :  { %6321 = vmatprep.subr.bf16.mxu0 %v9102_v16  ;;  %6444 = vmatprep.subr.bf16.mxu1 %v9105_v17  ;;  %v9168_v16 = vld [vmem:[#allocation6 + $0x4c4] ss:$16 sps:$4 sm:$0xff]   ;;  %v9171_v17 = vld [vmem:[#allocation6 + $0x4cc] ss:$16 sps:$4 sm:$0xff]  }
 0x379   :  { %6322 = vmatpush1.bf16.msra.mxu0 %v9100_v18  ;;  %6445 = vmatpush1.bf16.msra.mxu1 %v9103_v22  ;;  %v9166_v18 = vld [vmem:[#allocation6 + $0x4c0] ss:$16 sps:$4 sm:$0xff]   ;;  %v9169_v22 = vld [vmem:[#allocation6 + $0x4c8] ss:$16 sps:$4 sm:$0xff]  }
 0x37a   :  { %6323 = vmatprep.subr.bf16.mxu0 %v9108_v45  ;;  %6446 = vmatprep.subr.bf16.mxu1 %v9111_v59  ;;  %v9174_v45 = vld [vmem:[#allocation6 + $0x4e4] ss:$16 sps:$4 sm:$0xff]   ;;  %v9177_v59 = vld [vmem:[#allocation6 + $0x4ec] ss:$16 sps:$4 sm:$0xff]  }
 0x37d   :  { %6324 = vmatpush1.bf16.msra.mxu0 %v9106_v23  ;;  %6447 = vmatpush1.bf16.msra.mxu1 %v9109_v5 }
 0x37e   :  { %6325 = vmatprep.subr.bf16.mxu0 %v9114_v9  ;;  %6448 = vmatprep.subr.bf16.mxu1 %v9117_v13 }
 0x381   :  { %6326 = vmatpush1.bf16.msra.mxu0 %v9112_v25  ;;  %6449 = vmatpush1.bf16.msra.mxu1 %v9115_v26 }
 0x382   :  { %6327 = vmatprep.subr.bf16.mxu0 %v9120_v27  ;;  %6450 = vmatprep.subr.bf16.mxu1 %v9123_v42 }
 0x383   :  { %v7773_v32 = vpop.f32.mrb[8].mxu0  ;;  %v7795_v63 = vpop.f32.mrb[8].mxu1 }
 0x384   :  { %v7774_v20 = vpop.f32.mrb[9].mxu0  ;;  %v7796_v33 = vpop.f32.mrb[9].mxu1 }
 0x385   :  { %v7775_v21 = vadd.f32 %v7774_v20, %v7773_v32  ;;  %v7797_v36 = vadd.f32 %v7796_v33, %v7795_v63  ;;  %6328 = vmatpush1.bf16.msra.mxu0 %v9118_v58  ;;  %6451 = vmatpush1.bf16.msra.mxu1 %v9121_v15  ;;  %v7776_v38 = vpop.f32.mrb[10].mxu0  ;;  %v7798_v40 = vpop.f32.mrb[10].mxu1  ;;  %v9172_v58 = vld [vmem:[#allocation6 + $0x4e0] ss:$16 sps:$4 sm:$0xff]   ;;  %v9175_v15 = vld [vmem:[#allocation6 + $0x4e8] ss:$16 sps:$4 sm:$0xff]  }
 0x386   :  { %v7777_v46 = vpop.f32.mrb[11].mxu0  ;;  %v7799_v49 = vpop.f32.mrb[11].mxu1  ;;  %6329 = vmatprep.subr.bf16.mxu0 %v9126_v24  ;;  %6452 = vmatprep.subr.bf16.mxu1 %v9129_v28  ;;  %v9178_v32 = vld [vmem:[#allocation9 + $0x40] sm:$0xff]  }
 0x387   :  { %v5061_v51 = vadd.f32 %v7775_v21, %v9648_v0  ;;  %v9153_v0 = vld [vmem:[#allocation6 + $0x46c] ss:$16 sps:$4 sm:$0xff]   ;;  %v9179_v63 = vld [vmem:[#allocation9 + $0xc0] sm:$0xff]  }
 0x389   :  { %v9652_v52 = vadd.f32 %v7797_v36, %v5061_v51  ;;  %6330 = vmatpush1.bf16.msra.mxu0 %v9124_v34  ;;  %6453 = vmatpush1.bf16.msra.mxu1 %v9127_v43 }
 0x38a   :  { %6340 = vmatprep.subr.bf16.mxu0 %v9132_v44  ;;  %6463 = vmatprep.subr.bf16.mxu1 %v9135_v50 }
 0x38c   :  { %6332 = vmatmul.mubr.bf16.vlgmr.msra.gmra.mrb[20].mxu0 %v5273_v30  ;;  %6455 = vmatmul.mubr.bf16.vlgmr.msra.gmra.mrb[20].mxu1 %v5273_v30 }
 0x38d   :  { %6341 = vmatpush1.bf16.msra.mxu0 %v9130_v53  ;;  %6464 = vmatpush1.bf16.msra.mxu1 %v9133_v48  ;;  %v9180_v48 = vld [vmem:[#allocation9] sm:$0xff]  }
 0x38e   :  { %6342 = vmatprep.subr.bf16.mxu0 %v9138_v54  ;;  %6465 = vmatprep.subr.bf16.mxu1 %v9141_v55  ;;  %v9182_v54 = vld [vmem:[#allocation9 + $0x48] sm:$0xff]  }
 0x38f   :  { %6372 = vmatprep.mubr.bf16.mxu0 %v9362_v47  ;;  %6495 = vmatprep.mubr.bf16.mxu1 %v9362_v47  ;;  %v9183_v55 = vld [vmem:[#allocation9 + $0xc8] sm:$0xff]   ;;  %v9188_v47 = vld [vmem:[#allocation9 + $0x10] sm:$0xff]  }
 0x391   :  { %6343 = vmatpush1.bf16.msra.mxu0 %v9136_v41  ;;  %6466 = vmatpush1.bf16.msra.mxu1 %v9139_v60  ;;  %v9184_v41 = vld [vmem:[#allocation9 + $0x8] sm:$0xff]  }
 0x392   :  { %6344 = vmatprep.subr.bf16.mxu0 %v9144_v61  ;;  %6467 = vmatprep.subr.bf16.mxu1 %v9147_v35  ;;  %v9185_v60 = vld [vmem:[#allocation9 + $0x88] sm:$0xff]   ;;  %v9186_v61 = vld [vmem:[#allocation9 + $0x50] sm:$0xff]  }
 0x393   :  { %v9187_v35 = vld [vmem:[#allocation9 + $0xd0] sm:$0xff]  }
 0x395   :  { %6345 = vmatpush1.bf16.msra.mxu0 %v9142_v62  ;;  %6468 = vmatpush1.bf16.msra.mxu1 %v9145_v14  ;;  %v9189_v62 = vld [vmem:[#allocation9 + $0x90] sm:$0xff]   ;;  %v9190_v14 = vld [vmem:[#allocation9 + $0x58] sm:$0xff]  }
 0x396   :  { %6346 = vmatprep.subr.bf16.mxu0 %v9150_v37  ;;  %6469 = vmatprep.subr.bf16.mxu1 %v9153_v0  ;;  %v9191_v37 = vld [vmem:[#allocation9 + $0xd8] sm:$0xff]  }
 0x397   :  { %v9192_v0 = vld [vmem:[#allocation9 + $0x18] sm:$0xff]  }
 0x399   :  { %6347 = vmatpush1.bf16.msra.mxu0 %v9148_v1  ;;  %6470 = vmatpush1.bf16.msra.mxu1 %v9151_v2  ;;  %v9193_v1 = vld [vmem:[#allocation9 + $0x98] sm:$0xff]   ;;  %v9194_v2 = vld [vmem:[#allocation9 + $0x60] sm:$0xff]  }
 0x39a   :  { %6348 = vmatprep.subr.bf16.mxu0 %v9156_v3  ;;  %6471 = vmatprep.subr.bf16.mxu1 %v9159_v4  ;;  %v9195_v3 = vld [vmem:[#allocation9 + $0xe0] sm:$0xff]  }
 0x39b   :  { %v9196_v4 = vld [vmem:[#allocation9 + $0x20] sm:$0xff]  }
 0x39d   :  { %6349 = vmatpush1.bf16.msra.mxu0 %v9154_v6  ;;  %6472 = vmatpush1.bf16.msra.mxu1 %v9157_v7  ;;  %v9197_v6 = vld [vmem:[#allocation9 + $0xa0] sm:$0xff]   ;;  %v9198_v7 = vld [vmem:[#allocation9 + $0x68] sm:$0xff]  }
 0x39e   :  { %6350 = vmatprep.subr.bf16.mxu0 %v9162_v8  ;;  %6473 = vmatprep.subr.bf16.mxu1 %v9165_v10  ;;  %v9199_v8 = vld [vmem:[#allocation9 + $0xe8] sm:$0xff]  }
 0x39f   :  { %v9200_v10 = vld [vmem:[#allocation9 + $0x28] sm:$0xff]  }
 0x3a1   :  { %6351 = vmatpush1.bf16.msra.mxu0 %v9160_v31  ;;  %6474 = vmatpush1.bf16.msra.mxu1 %v9163_v11  ;;  %v9201_v31 = vld [vmem:[#allocation9 + $0xa8] sm:$0xff]   ;;  %v9202_v11 = vld [vmem:[#allocation9 + $0x70] sm:$0xff]  }
 0x3a2   :  { %6352 = vmatprep.subr.bf16.mxu0 %v9168_v16  ;;  %6475 = vmatprep.subr.bf16.mxu1 %v9171_v17  ;;  %v9203_v16 = vld [vmem:[#allocation9 + $0xf0] sm:$0xff]  }
 0x3a3   :  { %v7817_v23 = vpop.f32.mrb[12].mxu0  ;;  %v7839_v5 = vpop.f32.mrb[12].mxu1  ;;  %v9204_v17 = vld [vmem:[#allocation9 + $0x30] sm:$0xff]  }
 0x3a4   :  { %v7818_v9 = vpop.f32.mrb[13].mxu0  ;;  %v7840_v13 = vpop.f32.mrb[13].mxu1 }
 0x3a5   :  { %v7819_v25 = vadd.f32 %v7818_v9, %v7817_v23  ;;  %v7841_v26 = vadd.f32 %v7840_v13, %v7839_v5  ;;  %v7820_v27 = vpop.f32.mrb[14].mxu0  ;;  %v7842_v42 = vpop.f32.mrb[14].mxu1  ;;  %6353 = vmatpush1.bf16.msra.mxu0 %v9166_v18  ;;  %6476 = vmatpush1.bf16.msra.mxu1 %v9169_v22  ;;  %v9205_v18 = vld [vmem:[#allocation9 + $0xb0] sm:$0xff]   ;;  %v9206_v22 = vld [vmem:[#allocation9 + $0x78] sm:$0xff]  }
 0x3a6   :  { %v7821_v24 = vpop.f32.mrb[15].mxu0  ;;  %v7843_v28 = vpop.f32.mrb[15].mxu1  ;;  %6354 = vmatprep.subr.bf16.mxu0 %v9174_v45  ;;  %6477 = vmatprep.subr.bf16.mxu1 %v9177_v59  ;;  %v9207_v45 = vld [vmem:[#allocation9 + $0xf8] sm:$0xff]  }
 0x3a7   :  { %v5141_v20 = vadd.f32 %v7819_v25, %v9652_v52  ;;  %v9181_v52 = vld [vmem:[#allocation9 + $0x80] sm:$0xff]   ;;  %v9208_v59 = vld [vmem:[#allocation9 + $0x38] sm:$0xff]  }
 0x3a8   :  { %v9209_v23 = vld [vmem:[#allocation9 + $0xb8] sm:$0xff]  }
 0x3a9   :  { %v5181_v33 = vadd.f32 %v7841_v26, %v5141_v20  ;;  %6355 = vmatpush1.bf16.msra.mxu0 %v9172_v58  ;;  %6478 = vmatpush1.bf16.msra.mxu1 %v9175_v15  ;;  %v5436_v5 = vld [vmem:[#allocation7] sm:$0xf] }
 0x3aa   :  { %7889 = vmatprep.subr.bf16.mxu0 %v9178_v32  ;;  %7911 = vmatprep.subr.bf16.mxu1 %v9179_v63  ;;  %v5441_v9 = vrot.slane %v5436_v5, %v883_v19  ;;  %v5449_v13 = vrot.slane %v5436_v5, %v891_v29  ;;  %v5445_v25 = vrot.slane %v5436_v5, %v887_v56 }
 0x3ab   :  { %v5453_v26 = vrot.slane %v5436_v5, %v895_v57 }
 0x3c3   :  { %v7861_v34 = vpop.f32.mrb[16].mxu0  ;;  %v7883_v21 = vpop.f32.mrb[16].mxu1 }
 0x3c4   :  { %v7862_v36 = vpop.f32.mrb[17].mxu0  ;;  %v7884_v38 = vpop.f32.mrb[17].mxu1 }
 0x3c5   :  { %v7863_v40 = vadd.f32 %v7862_v36, %v7861_v34  ;;  %v7885_v43 = vadd.f32 %v7884_v38, %v7883_v21  ;;  %v7864_v44 = vpop.f32.mrb[18].mxu0  ;;  %v7886_v12 = vpop.f32.mrb[18].mxu1 }
 0x3c6   :  { %v7865_v46 = vpop.f32.mrb[19].mxu0  ;;  %v7887_v49 = vpop.f32.mrb[19].mxu1  ;;  %v7680_v12 = vld [vmem:[#allocation10] ss:$0 sm:$0xff] }
 0x3c7   :  { %v5221_v50 = vadd.f32 %v7863_v40, %v5181_v33 }
 0x3c9   :  { %v5261_v51 = vadd.f32 %v7885_v43, %v5221_v50 }
 0x3cb   :  { %v5270_v53 = vmax.f32 %v5261_v51, 0.0 }
 0x3cd   :  { %v5275_v30 = vpack.c.bf16 %v5270_v53, %v5270_v53 }
 0x3cf   :  { %6373 = vmatmul.mubr.bf16.vlgmr.msra.gmra.mrb[20].mxu0 %v5275_v30  ;;  %6496 = vmatmul.mubr.bf16.vlgmr.msra.gmra.mrb[20].mxu1 %v5275_v30 }
 0x3d0   :  { %7890 = vmatpush3.bf16.msra.mxu0 %v9180_v48  ;;  %7912 = vmatpush3.bf16.msra.mxu1 %v9181_v52 }
 0x3d1   :  { %7891 = vmatprep.subr.bf16.mxu0 %v9182_v54  ;;  %7913 = vmatprep.subr.bf16.mxu1 %v9183_v55 }
 0x3d4   :  { %7892 = vmatpush3.bf16.msra.mxu0 %v9184_v41  ;;  %7914 = vmatpush3.bf16.msra.mxu1 %v9185_v60 }
 0x3d5   :  { %7893 = vmatprep.subr.bf16.mxu0 %v9186_v61  ;;  %7915 = vmatprep.subr.bf16.mxu1 %v9187_v35 }
 0x3d8   :  { %7894 = vmatpush3.bf16.msra.mxu0 %v9188_v47  ;;  %7916 = vmatpush3.bf16.msra.mxu1 %v9189_v62 }
 0x3d9   :  { %7895 = vmatprep.subr.bf16.mxu0 %v9190_v14  ;;  %7917 = vmatprep.subr.bf16.mxu1 %v9191_v37 }
 0x3dc   :  { %7896 = vmatpush3.bf16.msra.mxu0 %v9192_v0  ;;  %7918 = vmatpush3.bf16.msra.mxu1 %v9193_v1 }
 0x3dd   :  { %7897 = vmatprep.subr.bf16.mxu0 %v9194_v2  ;;  %7919 = vmatprep.subr.bf16.mxu1 %v9195_v3 }
 0x3e0   :  { %7898 = vmatpush3.bf16.msra.mxu0 %v9196_v4  ;;  %7920 = vmatpush3.bf16.msra.mxu1 %v9197_v6 }
 0x3e1   :  { %7899 = vmatprep.subr.bf16.mxu0 %v9198_v7  ;;  %7921 = vmatprep.subr.bf16.mxu1 %v9199_v8 }
 0x3e4   :  { %7900 = vmatpush3.bf16.msra.mxu0 %v9200_v10  ;;  %7922 = vmatpush3.bf16.msra.mxu1 %v9201_v31 }
 0x3e5   :  { %7901 = vmatprep.subr.bf16.mxu0 %v9202_v11  ;;  %7923 = vmatprep.subr.bf16.mxu1 %v9203_v16 }
 0x3e8   :  { %7902 = vmatpush3.bf16.msra.mxu0 %v9204_v17  ;;  %7924 = vmatpush3.bf16.msra.mxu1 %v9205_v18 }
 0x3e9   :  { %7903 = vmatprep.subr.bf16.mxu0 %v9206_v22  ;;  %7925 = vmatprep.subr.bf16.mxu1 %v9207_v45 }
 0x3ec   :  { %7904 = vmatpush3.bf16.msra.mxu0 %v9208_v59  ;;  %7926 = vmatpush3.bf16.msra.mxu1 %v9209_v23 }
 0x4a2   :  { %v6374_v27 = vpop.f32.mrb[20].mxu0  ;;  %v6497_v42 = vpop.f32.mrb[20].mxu1 }
 0x4a3   :  { %v7937_v58 = vadd.f32 %v6374_v27, %v5441_v9  ;;  %v7939_v15 = vadd.f32 %v6497_v42, %v5449_v13  ;;  %v6376_v24 = vpop.f32.mrb[21].mxu0  ;;  %v6499_v28 = vpop.f32.mrb[21].mxu1 }
 0x4a4   :  { %v7938_v32 = vadd.f32 %v6376_v24, %v5445_v25  ;;  %v7940_v63 = vadd.f32 %v6499_v28, %v5453_v26  ;;  %v6378_v20 = vpop.f32.mrb[22].mxu0  ;;  %v6501_v33 = vpop.f32.mrb[22].mxu1 }
 0x4a5   :  { %v6504_v19 = vmax.f32 %v7937_v58, 0.0  ;;  %v6506_v34 = vmax.f32 %v7939_v15, 0.0  ;;  %v6379_v21 = vpop.f32.mrb[23].mxu0  ;;  %v6502_v29 = vpop.f32.mrb[23].mxu1 }
 0x4a6   :  { %v6505_v36 = vmax.f32 %v7938_v32, 0.0  ;;  %v6507_v38 = vmax.f32 %v7940_v63, 0.0 }
 0x4a7   :  { %v6508_v39 = vpack.c.bf16 %v6504_v19, %v6504_v19  ;;  %v6510_v57 = vpack.c.bf16 %v6506_v34, %v6506_v34 }
 0x4a8   :  { %v6509_v56 = vpack.c.bf16 %v6505_v36, %v6505_v36  ;;  %v6511_v40 = vpack.c.bf16 %v6507_v38, %v6507_v38 }
 0x4aa   :  { %6807 = vmatprep.mubr.bf16.mxu0 %v6509_v56  ;;  %6847 = vmatprep.mubr.bf16.mxu1 %v6511_v40 }
 0x4ab   :  { %6808 = vmatmul.mubr.bf16.vlgmr.msra.gmra.mrb[24].mxu0 %v6508_v39  ;;  %6848 = vmatmul.mubr.bf16.vlgmr.msra.gmra.mrb[24].mxu1 %v6510_v57 }
 0x57e   :  { %v7905_v43 = vpop.f32.mrb[24].mxu0  ;;  %v7927_v44 = vpop.f32.mrb[24].mxu1 }
 0x57f   :  { %v7906_v46 = vpop.f32.mrb[25].mxu0  ;;  %v7928_v49 = vpop.f32.mrb[25].mxu1 }
 0x580   :  { %v7907_v50 = vadd.f32 %v7906_v46, %v7905_v43  ;;  %v7929_v51 = vadd.f32 %v7928_v49, %v7927_v44  ;;  %v7908_v53 = vpop.f32.mrb[26].mxu0  ;;  %v7930_v48 = vpop.f32.mrb[26].mxu1 }
 0x581   :  { %v7909_v52 = vpop.f32.mrb[27].mxu0  ;;  %v7931_v30 = vpop.f32.mrb[27].mxu1 }
 0x582   :  { %v6810_v54 = vadd.f32 %v7907_v50, %v7680_v12 }
 0x584   :  { %v6850_v55 = vadd.f32 %v7929_v51, %v6810_v54 }
 0x586   :  { %6855 = vst [vmem:[%s9673_s7] sm:$0xff] %v6850_v55 }
 0x587   :  { %6860 = vsyncpa [#allocation3], 1 }
 0x588   :  { %6861 = vsyncpa [#allocation5], 1 }
 0x589   :  { %6862 = vsyncpa [#allocation8], 1 }
 0x58a   :  { %6863 = vsyncpa [#allocation11], 1 }

</bundles_post_ra>
